<compile_context>
chip_gen: v7x
topology: tpu7x:2x2x1
jax: 0.10.0
libtpu: 0.0.40
codegen_flags: <defaults>
</compile_context>

<pallas_src>
import functools

import jax
import jax.numpy as jnp
from jax.experimental import pallas as pl
from jax.experimental.pallas import tpu as pltpu


def _block_kernel(n_heads, head_dim,
                  x_ref,
                  g1_ref, be1_ref,
                  wqkv_ref, bqkv_ref,
                  wproj_ref, bproj_ref,
                  g2_ref, be2_ref,
                  w1_ref, b1_ref,
                  w2_ref, b2_ref,
                  o_ref,
                  qh_ref, kh_ref, vh_ref):
    eps = 1e-6
    dim = n_heads * head_dim

    x = x_ref[0].astype(jnp.float32)                              # (T, D) f32

    # ---- LayerNorm 1: fused single-pass moments (biased var, eps in rsqrt) ----
    mu = jnp.mean(x, axis=-1, keepdims=True)
    var = jnp.maximum(jnp.mean(x * x, axis=-1, keepdims=True) - mu * mu, 0.0)
    xn = (x - mu) * jax.lax.rsqrt(var + eps)
    xn = xn * g1_ref[0] + be1_ref[0]

    # ---- fused QKV projection (softmax scale already folded into Q weights) ----
    qkv = jnp.dot(xn.astype(jnp.bfloat16), wqkv_ref[...],
                  preferred_element_type=jnp.float32) + bqkv_ref[0]   # (T, 3D)
    qkv_b = qkv.astype(jnp.bfloat16)        # single whole-tensor bf16 cast

    # ---- stage heads into (H, T, hd) scratch: pure bf16 slice copies ----
    for h in range(n_heads):
        lo = h * head_dim
        hi = lo + head_dim
        qh_ref[h] = qkv_b[:, lo:hi]
        kh_ref[h] = qkv_b[:, dim + lo:dim + hi]
        vh_ref[h] = qkv_b[:, 2 * dim + lo:2 * dim + hi]

    # ---- batched attention: one MXU dot for Q@K^T, one for P@V ----
    s = jnp.einsum('hqd,hkd->hqk', qh_ref[...], kh_ref[...],
                   preferred_element_type=jnp.float32)                # (H, T, T)
    s = s - jnp.max(s, axis=-1, keepdims=True)
    p = jnp.exp(s)
    row_sum = jnp.sum(p, axis=-1, keepdims=True)                      # (H, T, 1)
    wav = jnp.einsum('hqk,hkd->hqd', p.astype(jnp.bfloat16), vh_ref[...],
                     preferred_element_type=jnp.float32)              # (H, T, hd)
    # deferred softmax normalization: O(H*T*hd) multiplies instead of O(H*T^2)
    wav = wav * pl.reciprocal(row_sum, approx=True)
    wav_b = wav.astype(jnp.bfloat16)

    # ---- merge heads + output projection without the (T, D) scratch roundtrip:
    # wproj is (H, hd, D); H per-head MXU matmuls accumulate in f32.
    proj = jnp.dot(wav_b[0], wproj_ref[0], preferred_element_type=jnp.float32)
    for h in range(1, n_heads):
        proj = proj + jnp.dot(wav_b[h], wproj_ref[h],
                              preferred_element_type=jnp.float32)
    x1 = x + proj + bproj_ref[0]                                      # (T, D)

    # ---- LayerNorm 2: fused single-pass moments ----
    mu2 = jnp.mean(x1, axis=-1, keepdims=True)
    var2 = jnp.maximum(jnp.mean(x1 * x1, axis=-1, keepdims=True) - mu2 * mu2, 0.0)
    x2 = (x1 - mu2) * jax.lax.rsqrt(var2 + eps)
    x2 = x2 * g2_ref[0] + be2_ref[0]

    # ---- MLP: FC1 -> exact GELU (erf, f32, matches nn.GELU) -> FC2 + residual ----
    h1 = jnp.dot(x2.astype(jnp.bfloat16), w1_ref[...],
                 preferred_element_type=jnp.float32) + b1_ref[0]
    # TODO(synk): on v6e/v7x (bf16 VPU/EUP) a bf16 or tanh-approx GELU would move
    # this off the f32 VPU erf polynomial; kept exact erf for nn.GELU parity.
    h1 = 0.5 * h1 * (1.0 + jax.lax.erf(h1 * 0.7071067811865476))
    h2 = jnp.dot(h1.astype(jnp.bfloat16), w2_ref[...],
                 preferred_element_type=jnp.float32) + b2_ref[0]

    o_ref[0] = (x1 + h2).astype(o_ref.dtype)


def prepare_block_params(params, n_heads):
    """One-time weight preparation (call once, reuse across invocations):
      * fold the softmax scale (head_dim**-0.5) into the Q columns of wqkv/bqkv,
      * reshape wproj to (H, head_dim, D) for per-head accumulation,
      * cast the four matmul weights to bf16 exactly once (biases/LN stay f32).
    """
    D = params["wproj"].shape[0]
    head_dim = D // n_heads
    scale = float(head_dim) ** -0.5

    wqkv = params["wqkv"].at[:, :D].multiply(scale)
    bqkv = params["bqkv"].at[:, :D].multiply(scale)
    prep = {
        "g1": params["g1"], "be1": params["be1"],
        "wqkv": wqkv.astype(jnp.bfloat16), "bqkv": bqkv,
        "wproj": params["wproj"].reshape(n_heads, head_dim, D).astype(jnp.bfloat16),
        "bproj": params["bproj"],
        "g2": params["g2"], "be2": params["be2"],
        "w1": params["w1"].astype(jnp.bfloat16), "b1": params["b1"],
        "w2": params["w2"].astype(jnp.bfloat16), "b2": params["b2"],
    }
    return jax.tree_util.tree_map(jax.block_until_ready, prep)


def vit_block(x, prep, n_heads):
    """x: (B, T, D) float32; prep: output of prepare_block_params. Returns (B, T, D)."""
    B, T, D = x.shape
    Hmlp = prep["w1"].shape[1]
    head_dim = D // n_heads

    args = (x,
            prep["g1"], prep["be1"],
            prep["wqkv"], prep["bqkv"],
            prep["wproj"], prep["bproj"],
            prep["g2"], prep["be2"],
            prep["w1"], prep["b1"],
            prep["w2"], prep["b2"])

    # VMEM budget: single-buffered resident params + double-buffered x/out
    # tiles + q/k/v scratch + f32 in-kernel intermediates + headroom, capped
    # at 85% of the actual chip's physical VMEM (generation-aware).
    param_bytes = sum(int(a.size) * a.dtype.itemsize for a in args[1:])
    tile_bytes = T * D * 4
    scratch_bytes = 2 * 3 * n_heads * T * head_dim
    work_bytes = 4 * (3 * T * D + 3 * n_heads * T * T + 2 * T * Hmlp + 6 * T * D)
    needed = param_bytes + 2 * 2 * tile_bytes + scratch_bytes + work_bytes + (8 << 20)
    try:
        vmem_cap = int(pltpu.get_tpu_info().vmem_capacity_bytes)
    except Exception:
        vmem_cap = 64 << 20
    vmem_limit = int(min(max(needed, 32 << 20), int(vmem_cap * 0.85)))

    kernel = functools.partial(_block_kernel, n_heads, head_dim)

    def run(weights_single_buffered):
        def const(shape):
            kwargs = {}
            if weights_single_buffered:
                # constant index_map -> never re-fetched; 1 buffer is enough
                kwargs["pipeline_mode"] = pl.Buffered(1)
            return pl.BlockSpec(shape, lambda b: (0,) * len(shape), **kwargs)

        out = pl.pallas_call(
            kernel,
            out_shape=jax.ShapeDtypeStruct((B, T, D), x.dtype),
            grid_spec=pltpu.PrefetchScalarGridSpec(
                num_scalar_prefetch=0,
                grid=(B,),
                in_specs=[
                    pl.BlockSpec((1, T, D), lambda b: (b, 0, 0)),     # x
                    const((1, D)), const((1, D)),                     # ln1 gamma/beta
                    const((D, 3 * D)), const((1, 3 * D)),             # qkv W, b
                    const((n_heads, head_dim, D)), const((1, D)),     # proj W, b
                    const((1, D)), const((1, D)),                     # ln2 gamma/beta
                    const((D, Hmlp)), const((1, Hmlp)),               # fc1 W, b
                    const((Hmlp, D)), const((1, D)),                  # fc2 W, b
                ],
                out_specs=pl.BlockSpec((1, T, D), lambda b: (b, 0, 0)),
                scratch_shapes=[
                    pltpu.VMEM((n_heads, T, head_dim), jnp.bfloat16),  # q heads
                    pltpu.VMEM((n_heads, T, head_dim), jnp.bfloat16),  # k heads
                    pltpu.VMEM((n_heads, T, head_dim), jnp.bfloat16),  # v heads
                ],
            ),
            compiler_params=pltpu.CompilerParams(
                dimension_semantics=("parallel",),
                vmem_limit_bytes=vmem_limit),
        )(*args)
        return jax.block_until_ready(out)

    # TODO(synk): on single-TC v5e/v6e, block several batch elements per grid
    # step (flatten Bt*T into the matmul M-dim, batch attention over Bt*H heads)
    # to raise MXU occupancy; on v7x keep >= 2 grid steps so ("parallel",)
    # shards across both TensorCores.
    try:
        return run(weights_single_buffered=True)
    except Exception:
        # pipeline_mode=pl.Buffered(1) not supported on this jax build; fall
        # back to default (double-buffered) specs -- correct, just more VMEM.
        return run(weights_single_buffered=False)


def vit_block_ref(x, params, n_heads):
    """Pure-JAX f32 reference mirroring the PyTorch Block forward."""
    B, T, D = x.shape
    hd = D // n_heads
    scale = hd ** -0.5

    def ln(v, g, b):
        mu = jnp.mean(v, axis=-1, keepdims=True)
        var = jnp.mean((v - mu) ** 2, axis=-1, keepdims=True)
        return (v - mu) / jnp.sqrt(var + 1e-6) * g + b

    xn = ln(x, params["g1"][0], params["be1"][0])
    qkv = xn @ params["wqkv"] + params["bqkv"][0]                 # (B,T,3D)
    qkv = qkv.reshape(B, T, 3, n_heads, hd).transpose(2, 0, 3, 1, 4)
    q, k, v = qkv[0], qkv[1], qkv[2]                              # (B,nh,T,hd)
    dp = jnp.einsum("bhqd,bhkd->bhqk", q, k) * scale
    attn = jax.nn.softmax(dp, axis=-1)
    wav = jnp.einsum("bhqk,bhkd->bhqd", attn, v)
    wav = wav.transpose(0, 2, 1, 3).reshape(B, T, D)
    x1 = x + wav @ params["wproj"] + params["bproj"][0]

    x2 = ln(x1, params["g2"][0], params["be2"][0])
    h1 = x2 @ params["w1"] + params["b1"][0]
    h1 = 0.5 * h1 * (1.0 + jax.lax.erf(h1 / jnp.sqrt(2.0)))
    h2 = h1 @ params["w2"] + params["b2"][0]
    return x1 + h2


if __name__ == "__main__":
    # Small, hardware-aligned ViT-block config:
    #   batch=2 (-> 2 grid steps, shards across v7x's 2 TCs), tokens=16
    #   (multiple of 8 sublanes), dim=256 (multiple of 128 lanes), heads=2 ->
    #   head_dim=128 (full MXU lane width), mlp hidden=1024.
    B, T, D = 2, 16, 256
    N_HEADS = 2
    HID = int(D * 4.0)

    key = jax.random.PRNGKey(0)
    ks = jax.random.split(key, 12)

    params = {
        "g1":    1.0 + 0.1 * jax.random.normal(ks[9], (1, D), jnp.float32),
        "be1":   0.05 * jax.random.normal(ks[10], (1, D), jnp.float32),
        # Linear weights stored as (in, out) = W^T of the PyTorch (out, in) weight.
        "wqkv":  jax.random.normal(ks[0], (D, 3 * D), jnp.float32) * 0.03,
        "bqkv":  jax.random.normal(ks[1], (1, 3 * D), jnp.float32) * 0.02,
        "wproj": jax.random.normal(ks[2], (D, D), jnp.float32) * 0.03,
        "bproj": jax.random.normal(ks[3], (1, D), jnp.float32) * 0.02,
        "g2":    1.0 + 0.1 * jax.random.normal(ks[11], (1, D), jnp.float32),
        "be2":   0.05 * jax.random.normal(ks[5], (1, D), jnp.float32),
        "w1":    jax.random.normal(ks[4], (D, HID), jnp.float32) * 0.03,
        "b1":    jax.random.normal(ks[6], (1, HID), jnp.float32) * 0.02,
        "w2":    jax.random.normal(ks[7], (HID, D), jnp.float32) * 0.03,
        "b2":    jax.random.normal(ks[8], (1, D), jnp.float32) * 0.02,
    }

    x = jax.random.normal(jax.random.PRNGKey(42), (B, T, D), jnp.float32)

    prep = prepare_block_params(params, N_HEADS)      # one-time: fold/reshape/bf16
    out = jax.block_until_ready(vit_block(x, prep, N_HEADS))
    ref = vit_block_ref(x, params, N_HEADS)

    assert out.shape == (B, T, D)
    err = float(jnp.max(jnp.abs(out - ref)))
    # bf16 MXU inputs + approx softmax reciprocal -> loosened tolerance vs f32 ref.
    assert jnp.allclose(out, ref, atol=3e-2, rtol=3e-2), f"max abs err = {err}"
    print("KERNEL_OK")
</pallas_src>

<mosaic_0001>
module attributes {stable_mosaic.version = 11 : i64} {
  func.func @_block_kernel(%arg0: i32, %arg1: memref<1x16x256xf32, #tpu.memory_space<vmem>>, %arg2: memref<1x256xf32, #tpu.memory_space<vmem>>, %arg3: memref<1x256xf32, #tpu.memory_space<vmem>>, %arg4: memref<256x768xbf16, #tpu.memory_space<vmem>>, %arg5: memref<1x768xf32, #tpu.memory_space<vmem>>, %arg6: memref<2x128x256xbf16, #tpu.memory_space<vmem>>, %arg7: memref<1x256xf32, #tpu.memory_space<vmem>>, %arg8: memref<1x256xf32, #tpu.memory_space<vmem>>, %arg9: memref<1x256xf32, #tpu.memory_space<vmem>>, %arg10: memref<256x1024xbf16, #tpu.memory_space<vmem>>, %arg11: memref<1x1024xf32, #tpu.memory_space<vmem>>, %arg12: memref<1024x256xbf16, #tpu.memory_space<vmem>>, %arg13: memref<1x256xf32, #tpu.memory_space<vmem>>, %arg14: memref<1x16x256xf32, #tpu.memory_space<vmem>>, %arg15: memref<2x16x128xbf16, #tpu.memory_space<vmem>>, %arg16: memref<2x16x128xbf16, #tpu.memory_space<vmem>>, %arg17: memref<2x16x128xbf16, #tpu.memory_space<vmem>>) attributes {dimension_semantics = [#tpu.dimension_semantics<parallel>], iteration_bounds = array<i64: 2>, scalar_prefetch = 0 : i64, scratch_operands = 3 : i64, tpu.core_type = #tpu.core_type<tc>, window_params = [{transform_indices = @transform_0, window_bounds = array<i64: 1, 16, 256>}, {pipeline_mode = #tpu.pipeline_mode<synchronous>, transform_indices = @transform_1, window_bounds = array<i64: 1, 256>}, {pipeline_mode = #tpu.pipeline_mode<synchronous>, transform_indices = @transform_2, window_bounds = array<i64: 1, 256>}, {pipeline_mode = #tpu.pipeline_mode<synchronous>, transform_indices = @transform_3, window_bounds = array<i64: 256, 768>}, {pipeline_mode = #tpu.pipeline_mode<synchronous>, transform_indices = @transform_4, window_bounds = array<i64: 1, 768>}, {pipeline_mode = #tpu.pipeline_mode<synchronous>, transform_indices = @transform_5, window_bounds = array<i64: 2, 128, 256>}, {pipeline_mode = #tpu.pipeline_mode<synchronous>, transform_indices = @transform_6, window_bounds = array<i64: 1, 256>}, {pipeline_mode = #tpu.pipeline_mode<synchronous>, transform_indices = @transform_7, window_bounds = array<i64: 1, 256>}, {pipeline_mode = #tpu.pipeline_mode<synchronous>, transform_indices = @transform_8, window_bounds = array<i64: 1, 256>}, {pipeline_mode = #tpu.pipeline_mode<synchronous>, transform_indices = @transform_9, window_bounds = array<i64: 256, 1024>}, {pipeline_mode = #tpu.pipeline_mode<synchronous>, transform_indices = @transform_10, window_bounds = array<i64: 1, 1024>}, {pipeline_mode = #tpu.pipeline_mode<synchronous>, transform_indices = @transform_11, window_bounds = array<i64: 1024, 256>}, {pipeline_mode = #tpu.pipeline_mode<synchronous>, transform_indices = @transform_12, window_bounds = array<i64: 1, 256>}, {transform_indices = @transform_13, window_bounds = array<i64: 1, 16, 256>}]} {
    %c0 = arith.constant 0 : index
    %c0_0 = arith.constant 0 : index
    %c0_1 = arith.constant 0 : index
    %0 = vector.load %arg1[%c0, %c0_0, %c0_1] : memref<1x16x256xf32, #tpu.memory_space<vmem>>, vector<1x16x256xf32>
    %1 = vector.shape_cast %0 : vector<1x16x256xf32> to vector<16x256xf32>
    %cst = arith.constant dense<0.000000e+00> : vector<16xf32>
    %2 = vector.multi_reduction <add>, %1, %cst [1] : vector<16x256xf32> to vector<16xf32>
    %3 = vector.shape_cast %2 : vector<16xf32> to vector<16x1xf32>
    %cst_2 = arith.constant 2.560000e+02 : f32
    %4 = vector.broadcast %cst_2 : f32 to vector<16x1xf32>
    %5 = arith.divf %3, %4 : vector<16x1xf32>
    %6 = arith.mulf %1, %1 : vector<16x256xf32>
    %cst_3 = arith.constant dense<0.000000e+00> : vector<16xf32>
    %7 = vector.multi_reduction <add>, %6, %cst_3 [1] : vector<16x256xf32> to vector<16xf32>
    %8 = vector.shape_cast %7 : vector<16xf32> to vector<16x1xf32>
    %cst_4 = arith.constant 2.560000e+02 : f32
    %9 = vector.broadcast %cst_4 : f32 to vector<16x1xf32>
    %10 = arith.divf %8, %9 : vector<16x1xf32>
    %11 = arith.mulf %5, %5 : vector<16x1xf32>
    %12 = arith.subf %10, %11 : vector<16x1xf32>
    %cst_5 = arith.constant 0.000000e+00 : f32
    %13 = vector.broadcast %cst_5 : f32 to vector<16x1xf32>
    %14 = arith.maximumf %12, %13 : vector<16x1xf32>
    %15 = vector.broadcast %5 : vector<16x1xf32> to vector<16x256xf32>
    %16 = arith.subf %1, %15 : vector<16x256xf32>
    %cst_6 = arith.constant 9.99999997E-7 : f32
    %17 = vector.broadcast %cst_6 : f32 to vector<16x1xf32>
    %18 = arith.addf %14, %17 : vector<16x1xf32>
    %19 = math.rsqrt %18 : vector<16x1xf32>
    %20 = vector.broadcast %19 : vector<16x1xf32> to vector<16x256xf32>
    %21 = arith.mulf %16, %20 : vector<16x256xf32>
    %c0_7 = arith.constant 0 : index
    %c0_8 = arith.constant 0 : index
    %22 = vector.load %arg2[%c0_7, %c0_8] : memref<1x256xf32, #tpu.memory_space<vmem>>, vector<1x256xf32>
    %23 = vector.shape_cast %22 : vector<1x256xf32> to vector<256xf32>
    %24 = vector.shape_cast %23 : vector<256xf32> to vector<1x256xf32>
    %25 = vector.broadcast %24 : vector<1x256xf32> to vector<16x256xf32>
    %26 = arith.mulf %21, %25 : vector<16x256xf32>
    %c0_9 = arith.constant 0 : index
    %c0_10 = arith.constant 0 : index
    %27 = vector.load %arg3[%c0_9, %c0_10] : memref<1x256xf32, #tpu.memory_space<vmem>>, vector<1x256xf32>
    %28 = vector.shape_cast %27 : vector<1x256xf32> to vector<256xf32>
    %29 = vector.shape_cast %28 : vector<256xf32> to vector<1x256xf32>
    %30 = vector.broadcast %29 : vector<1x256xf32> to vector<16x256xf32>
    %31 = arith.addf %26, %30 : vector<16x256xf32>
    %32 = arith.truncf %31 : vector<16x256xf32> to vector<16x256xbf16>
    %c0_11 = arith.constant 0 : index
    %c0_12 = arith.constant 0 : index
    %33 = vector.load %arg4[%c0_11, %c0_12] : memref<256x768xbf16, #tpu.memory_space<vmem>>, vector<256x768xbf16>
    %cst_13 = arith.constant dense<0.000000e+00> : vector<16x768xf32>
    %34 = tpu.matmul %32, %33, %cst_13 {dimension_numbers = #tpu.dot_dimension_numbers<[1], [0], [0], [1], [0, 0, 1, 1], [], []>} : vector<16x256xbf16>, vector<256x768xbf16>, vector<16x768xf32> -> vector<16x768xf32>
    %c0_14 = arith.constant 0 : index
    %c0_15 = arith.constant 0 : index
    %35 = vector.load %arg5[%c0_14, %c0_15] : memref<1x768xf32, #tpu.memory_space<vmem>>, vector<1x768xf32>
    %36 = vector.shape_cast %35 : vector<1x768xf32> to vector<768xf32>
    %37 = vector.shape_cast %36 : vector<768xf32> to vector<1x768xf32>
    %38 = vector.broadcast %37 : vector<1x768xf32> to vector<16x768xf32>
    %39 = arith.addf %34, %38 : vector<16x768xf32>
    %40 = arith.truncf %39 : vector<16x768xf32> to vector<16x768xbf16>
    %41 = vector.extract_strided_slice %40 {offsets = [0, 0], sizes = [16, 128], strides = [1, 1]} : vector<16x768xbf16> to vector<16x128xbf16>
    %c0_16 = arith.constant 0 : index
    %c0_17 = arith.constant 0 : index
    %c0_18 = arith.constant 0 : index
    %42 = vector.load %arg15[%c0_16, %c0_17, %c0_18] : memref<2x16x128xbf16, #tpu.memory_space<vmem>>, vector<1x16x128xbf16>
    %43 = vector.shape_cast %42 : vector<1x16x128xbf16> to vector<16x128xbf16>
    %44 = vector.shape_cast %41 : vector<16x128xbf16> to vector<1x16x128xbf16>
    tpu.vector_store %arg15[%c0_16, %c0_17, %c0_18], %44 {strides = array<i32>} : memref<2x16x128xbf16, #tpu.memory_space<vmem>>, vector<1x16x128xbf16>,
    %45 = vector.extract_strided_slice %40 {offsets = [0, 256], sizes = [16, 128], strides = [1, 1]} : vector<16x768xbf16> to vector<16x128xbf16>
    %c0_19 = arith.constant 0 : index
    %c0_20 = arith.constant 0 : index
    %c0_21 = arith.constant 0 : index
    %46 = vector.load %arg16[%c0_19, %c0_20, %c0_21] : memref<2x16x128xbf16, #tpu.memory_space<vmem>>, vector<1x16x128xbf16>
    %47 = vector.shape_cast %46 : vector<1x16x128xbf16> to vector<16x128xbf16>
    %48 = vector.shape_cast %45 : vector<16x128xbf16> to vector<1x16x128xbf16>
    tpu.vector_store %arg16[%c0_19, %c0_20, %c0_21], %48 {strides = array<i32>} : memref<2x16x128xbf16, #tpu.memory_space<vmem>>, vector<1x16x128xbf16>,
    %49 = vector.extract_strided_slice %40 {offsets = [0, 512], sizes = [16, 128], strides = [1, 1]} : vector<16x768xbf16> to vector<16x128xbf16>
    %c0_22 = arith.constant 0 : index
    %c0_23 = arith.constant 0 : index
    %c0_24 = arith.constant 0 : index
    %50 = vector.load %arg17[%c0_22, %c0_23, %c0_24] : memref<2x16x128xbf16, #tpu.memory_space<vmem>>, vector<1x16x128xbf16>
    %51 = vector.shape_cast %50 : vector<1x16x128xbf16> to vector<16x128xbf16>
    %52 = vector.shape_cast %49 : vector<16x128xbf16> to vector<1x16x128xbf16>
    tpu.vector_store %arg17[%c0_22, %c0_23, %c0_24], %52 {strides = array<i32>} : memref<2x16x128xbf16, #tpu.memory_space<vmem>>, vector<1x16x128xbf16>,
    %53 = vector.extract_strided_slice %40 {offsets = [0, 128], sizes = [16, 128], strides = [1, 1]} : vector<16x768xbf16> to vector<16x128xbf16>
    %c1 = arith.constant 1 : index
    %c0_25 = arith.constant 0 : index
    %c0_26 = arith.constant 0 : index
    %54 = vector.load %arg15[%c1, %c0_25, %c0_26] : memref<2x16x128xbf16, #tpu.memory_space<vmem>>, vector<1x16x128xbf16>
    %55 = vector.shape_cast %54 : vector<1x16x128xbf16> to vector<16x128xbf16>
    %56 = vector.shape_cast %53 : vector<16x128xbf16> to vector<1x16x128xbf16>
    tpu.vector_store %arg15[%c1, %c0_25, %c0_26], %56 {strides = array<i32>} : memref<2x16x128xbf16, #tpu.memory_space<vmem>>, vector<1x16x128xbf16>,
    %57 = vector.extract_strided_slice %40 {offsets = [0, 384], sizes = [16, 128], strides = [1, 1]} : vector<16x768xbf16> to vector<16x128xbf16>
    %c1_27 = arith.constant 1 : index
    %c0_28 = arith.constant 0 : index
    %c0_29 = arith.constant 0 : index
    %58 = vector.load %arg16[%c1_27, %c0_28, %c0_29] : memref<2x16x128xbf16, #tpu.memory_space<vmem>>, vector<1x16x128xbf16>
    %59 = vector.shape_cast %58 : vector<1x16x128xbf16> to vector<16x128xbf16>
    %60 = vector.shape_cast %57 : vector<16x128xbf16> to vector<1x16x128xbf16>
    tpu.vector_store %arg16[%c1_27, %c0_28, %c0_29], %60 {strides = array<i32>} : memref<2x16x128xbf16, #tpu.memory_space<vmem>>, vector<1x16x128xbf16>,
    %61 = vector.extract_strided_slice %40 {offsets = [0, 640], sizes = [16, 128], strides = [1, 1]} : vector<16x768xbf16> to vector<16x128xbf16>
    %c1_30 = arith.constant 1 : index
    %c0_31 = arith.constant 0 : index
    %c0_32 = arith.constant 0 : index
    %62 = vector.load %arg17[%c1_30, %c0_31, %c0_32] : memref<2x16x128xbf16, #tpu.memory_space<vmem>>, vector<1x16x128xbf16>
    %63 = vector.shape_cast %62 : vector<1x16x128xbf16> to vector<16x128xbf16>
    %64 = vector.shape_cast %61 : vector<16x128xbf16> to vector<1x16x128xbf16>
    tpu.vector_store %arg17[%c1_30, %c0_31, %c0_32], %64 {strides = array<i32>} : memref<2x16x128xbf16, #tpu.memory_space<vmem>>, vector<1x16x128xbf16>,
    %c0_33 = arith.constant 0 : index
    %c0_34 = arith.constant 0 : index
    %c0_35 = arith.constant 0 : index
    %65 = vector.load %arg15[%c0_33, %c0_34, %c0_35] : memref<2x16x128xbf16, #tpu.memory_space<vmem>>, vector<2x16x128xbf16>
    %c0_36 = arith.constant 0 : index
    %c0_37 = arith.constant 0 : index
    %c0_38 = arith.constant 0 : index
    %66 = vector.load %arg16[%c0_36, %c0_37, %c0_38] : memref<2x16x128xbf16, #tpu.memory_space<vmem>>, vector<2x16x128xbf16>
    "tpu.trace_start"() <{level = 10 : i32, message = "hqd,hkd->hqk"}> : () -> ()
    %cst_39 = arith.constant dense<0.000000e+00> : vector<2x16x16xf32>
    %67 = tpu.matmul %65, %66, %cst_39 {dimension_numbers = #tpu.dot_dimension_numbers<[2], [2], [1], [1], [0, 0, 0, 1, 1, 1], [0], [0]>} : vector<2x16x128xbf16>, vector<2x16x128xbf16>, vector<2x16x16xf32> -> vector<2x16x16xf32>
    "tpu.trace_stop"() : () -> ()
    %cst_40 = arith.constant dense<0xFF800000> : vector<2x16xf32>
    %68 = vector.multi_reduction <maximumf>, %67, %cst_40 [2] : vector<2x16x16xf32> to vector<2x16xf32>
    %69 = vector.shape_cast %68 : vector<2x16xf32> to vector<2x16x1xf32>
    %70 = vector.broadcast %69 : vector<2x16x1xf32> to vector<2x16x16xf32>
    %71 = arith.subf %67, %70 : vector<2x16x16xf32>
    %72 = math.exp %71 : vector<2x16x16xf32>
    %cst_41 = arith.constant dense<0.000000e+00> : vector<2x16xf32>
    %73 = vector.multi_reduction <add>, %72, %cst_41 [2] : vector<2x16x16xf32> to vector<2x16xf32>
    %74 = vector.shape_cast %73 : vector<2x16xf32> to vector<2x16x1xf32>
    %75 = arith.truncf %72 : vector<2x16x16xf32> to vector<2x16x16xbf16>
    %c0_42 = arith.constant 0 : index
    %c0_43 = arith.constant 0 : index
    %c0_44 = arith.constant 0 : index
    %76 = vector.load %arg17[%c0_42, %c0_43, %c0_44] : memref<2x16x128xbf16, #tpu.memory_space<vmem>>, vector<2x16x128xbf16>
    "tpu.trace_start"() <{level = 10 : i32, message = "hqk,hkd->hqd"}> : () -> ()
    %cst_45 = arith.constant dense<0.000000e+00> : vector<2x16x128xf32>
    %77 = tpu.matmul %75, %76, %cst_45 {dimension_numbers = #tpu.dot_dimension_numbers<[2], [1], [1], [2], [0, 0, 0, 1, 1, 2], [0], [0]>} : vector<2x16x16xbf16>, vector<2x16x128xbf16>, vector<2x16x128xf32> -> vector<2x16x128xf32>
    "tpu.trace_stop"() : () -> ()
    %78 = tpu.reciprocal %74 {approx = true} : vector<2x16x1xf32> -> vector<2x16x1xf32>
    %79 = vector.broadcast %78 : vector<2x16x1xf32> to vector<2x16x128xf32>
    %80 = arith.mulf %77, %79 : vector<2x16x128xf32>
    %81 = arith.truncf %80 : vector<2x16x128xf32> to vector<2x16x128xbf16>
    %82 = vector.extract_strided_slice %81 {offsets = [0, 0, 0], sizes = [1, 16, 128], strides = [1, 1, 1]} : vector<2x16x128xbf16> to vector<1x16x128xbf16>
    %83 = vector.shape_cast %82 : vector<1x16x128xbf16> to vector<16x128xbf16>
    %c0_46 = arith.constant 0 : index
    %c0_47 = arith.constant 0 : index
    %c0_48 = arith.constant 0 : index
    %84 = vector.load %arg6[%c0_46, %c0_47, %c0_48] : memref<2x128x256xbf16, #tpu.memory_space<vmem>>, vector<1x128x256xbf16>
    %85 = vector.shape_cast %84 : vector<1x128x256xbf16> to vector<128x256xbf16>
    %cst_49 = arith.constant dense<0.000000e+00> : vector<16x256xf32>
    %86 = tpu.matmul %83, %85, %cst_49 {dimension_numbers = #tpu.dot_dimension_numbers<[1], [0], [0], [1], [0, 0, 1, 1], [], []>} : vector<16x128xbf16>, vector<128x256xbf16>, vector<16x256xf32> -> vector<16x256xf32>
    %87 = vector.extract_strided_slice %81 {offsets = [1, 0, 0], sizes = [1, 16, 128], strides = [1, 1, 1]} : vector<2x16x128xbf16> to vector<1x16x128xbf16>
    %88 = vector.shape_cast %87 : vector<1x16x128xbf16> to vector<16x128xbf16>
    %c1_50 = arith.constant 1 : index
    %c0_51 = arith.constant 0 : index
    %c0_52 = arith.constant 0 : index
    %89 = vector.load %arg6[%c1_50, %c0_51, %c0_52] : memref<2x128x256xbf16, #tpu.memory_space<vmem>>, vector<1x128x256xbf16>
    %90 = vector.shape_cast %89 : vector<1x128x256xbf16> to vector<128x256xbf16>
    %cst_53 = arith.constant dense<0.000000e+00> : vector<16x256xf32>
    %91 = tpu.matmul %88, %90, %cst_53 {dimension_numbers = #tpu.dot_dimension_numbers<[1], [0], [0], [1], [0, 0, 1, 1], [], []>} : vector<16x128xbf16>, vector<128x256xbf16>, vector<16x256xf32> -> vector<16x256xf32>
    %92 = arith.addf %86, %91 : vector<16x256xf32>
    %93 = arith.addf %1, %92 : vector<16x256xf32>
    %c0_54 = arith.constant 0 : index
    %c0_55 = arith.constant 0 : index
    %94 = vector.load %arg7[%c0_54, %c0_55] : memref<1x256xf32, #tpu.memory_space<vmem>>, vector<1x256xf32>
    %95 = vector.shape_cast %94 : vector<1x256xf32> to vector<256xf32>
    %96 = vector.shape_cast %95 : vector<256xf32> to vector<1x256xf32>
    %97 = vector.broadcast %96 : vector<1x256xf32> to vector<16x256xf32>
    %98 = arith.addf %93, %97 : vector<16x256xf32>
    %cst_56 = arith.constant dense<0.000000e+00> : vector<16xf32>
    %99 = vector.multi_reduction <add>, %98, %cst_56 [1] : vector<16x256xf32> to vector<16xf32>
    %100 = vector.shape_cast %99 : vector<16xf32> to vector<16x1xf32>
    %cst_57 = arith.constant 2.560000e+02 : f32
    %101 = vector.broadcast %cst_57 : f32 to vector<16x1xf32>
    %102 = arith.divf %100, %101 : vector<16x1xf32>
    %103 = arith.mulf %98, %98 : vector<16x256xf32>
    %cst_58 = arith.constant dense<0.000000e+00> : vector<16xf32>
    %104 = vector.multi_reduction <add>, %103, %cst_58 [1] : vector<16x256xf32> to vector<16xf32>
    %105 = vector.shape_cast %104 : vector<16xf32> to vector<16x1xf32>
    %cst_59 = arith.constant 2.560000e+02 : f32
    %106 = vector.broadcast %cst_59 : f32 to vector<16x1xf32>
    %107 = arith.divf %105, %106 : vector<16x1xf32>
    %108 = arith.mulf %102, %102 : vector<16x1xf32>
    %109 = arith.subf %107, %108 : vector<16x1xf32>
    %cst_60 = arith.constant 0.000000e+00 : f32
    %110 = vector.broadcast %cst_60 : f32 to vector<16x1xf32>
    %111 = arith.maximumf %109, %110 : vector<16x1xf32>
    %112 = vector.broadcast %102 : vector<16x1xf32> to vector<16x256xf32>
    %113 = arith.subf %98, %112 : vector<16x256xf32>
    %cst_61 = arith.constant 9.99999997E-7 : f32
    %114 = vector.broadcast %cst_61 : f32 to vector<16x1xf32>
    %115 = arith.addf %111, %114 : vector<16x1xf32>
    %116 = math.rsqrt %115 : vector<16x1xf32>
    %117 = vector.broadcast %116 : vector<16x1xf32> to vector<16x256xf32>
    %118 = arith.mulf %113, %117 : vector<16x256xf32>
    %c0_62 = arith.constant 0 : index
    %c0_63 = arith.constant 0 : index
    %119 = vector.load %arg8[%c0_62, %c0_63] : memref<1x256xf32, #tpu.memory_space<vmem>>, vector<1x256xf32>
    %120 = vector.shape_cast %119 : vector<1x256xf32> to vector<256xf32>
    %121 = vector.shape_cast %120 : vector<256xf32> to vector<1x256xf32>
    %122 = vector.broadcast %121 : vector<1x256xf32> to vector<16x256xf32>
    %123 = arith.mulf %118, %122 : vector<16x256xf32>
    %c0_64 = arith.constant 0 : index
    %c0_65 = arith.constant 0 : index
    %124 = vector.load %arg9[%c0_64, %c0_65] : memref<1x256xf32, #tpu.memory_space<vmem>>, vector<1x256xf32>
    %125 = vector.shape_cast %124 : vector<1x256xf32> to vector<256xf32>
    %126 = vector.shape_cast %125 : vector<256xf32> to vector<1x256xf32>
    %127 = vector.broadcast %126 : vector<1x256xf32> to vector<16x256xf32>
    %128 = arith.addf %123, %127 : vector<16x256xf32>
    %129 = arith.truncf %128 : vector<16x256xf32> to vector<16x256xbf16>
    %c0_66 = arith.constant 0 : index
    %c0_67 = arith.constant 0 : index
    %130 = vector.load %arg10[%c0_66, %c0_67] : memref<256x1024xbf16, #tpu.memory_space<vmem>>, vector<256x1024xbf16>
    %cst_68 = arith.constant dense<0.000000e+00> : vector<16x1024xf32>
    %131 = tpu.matmul %129, %130, %cst_68 {dimension_numbers = #tpu.dot_dimension_numbers<[1], [0], [0], [1], [0, 0, 1, 1], [], []>} : vector<16x256xbf16>, vector<256x1024xbf16>, vector<16x1024xf32> -> vector<16x1024xf32>
    %c0_69 = arith.constant 0 : index
    %c0_70 = arith.constant 0 : index
    %132 = vector.load %arg11[%c0_69, %c0_70] : memref<1x1024xf32, #tpu.memory_space<vmem>>, vector<1x1024xf32>
    %133 = vector.shape_cast %132 : vector<1x1024xf32> to vector<1024xf32>
    %134 = vector.shape_cast %133 : vector<1024xf32> to vector<1x1024xf32>
    %135 = vector.broadcast %134 : vector<1x1024xf32> to vector<16x1024xf32>
    %136 = arith.addf %131, %135 : vector<16x1024xf32>
    %cst_71 = arith.constant 5.000000e-01 : f32
    %137 = vector.broadcast %cst_71 : f32 to vector<16x1024xf32>
    %138 = arith.mulf %137, %136 : vector<16x1024xf32>
    %cst_72 = arith.constant 0.707106769 : f32
    %139 = vector.broadcast %cst_72 : f32 to vector<16x1024xf32>
    %140 = arith.mulf %136, %139 : vector<16x1024xf32>
    %141 = math.erf %140 : vector<16x1024xf32>
    %cst_73 = arith.constant 1.000000e+00 : f32
    %142 = vector.broadcast %cst_73 : f32 to vector<16x1024xf32>
    %143 = arith.addf %142, %141 : vector<16x1024xf32>
    %144 = arith.mulf %138, %143 : vector<16x1024xf32>
    %145 = arith.truncf %144 : vector<16x1024xf32> to vector<16x1024xbf16>
    %c0_74 = arith.constant 0 : index
    %c0_75 = arith.constant 0 : index
    %146 = vector.load %arg12[%c0_74, %c0_75] : memref<1024x256xbf16, #tpu.memory_space<vmem>>, vector<1024x256xbf16>
    %cst_76 = arith.constant dense<0.000000e+00> : vector<16x256xf32>
    %147 = tpu.matmul %145, %146, %cst_76 {dimension_numbers = #tpu.dot_dimension_numbers<[1], [0], [0], [1], [0, 0, 1, 1], [], []>} : vector<16x1024xbf16>, vector<1024x256xbf16>, vector<16x256xf32> -> vector<16x256xf32>
    %c0_77 = arith.constant 0 : index
    %c0_78 = arith.constant 0 : index
    %148 = vector.load %arg13[%c0_77, %c0_78] : memref<1x256xf32, #tpu.memory_space<vmem>>, vector<1x256xf32>
    %149 = vector.shape_cast %148 : vector<1x256xf32> to vector<256xf32>
    %150 = vector.shape_cast %149 : vector<256xf32> to vector<1x256xf32>
    %151 = vector.broadcast %150 : vector<1x256xf32> to vector<16x256xf32>
    %152 = arith.addf %147, %151 : vector<16x256xf32>
    %153 = arith.addf %98, %152 : vector<16x256xf32>
    %c0_79 = arith.constant 0 : index
    %c0_80 = arith.constant 0 : index
    %c0_81 = arith.constant 0 : index
    %154 = vector.load %arg14[%c0_79, %c0_80, %c0_81] : memref<1x16x256xf32, #tpu.memory_space<vmem>>, vector<1x16x256xf32>
    %155 = vector.shape_cast %154 : vector<1x16x256xf32> to vector<16x256xf32>
    %156 = vector.shape_cast %153 : vector<16x256xf32> to vector<1x16x256xf32>
    tpu.vector_store %arg14[%c0_79, %c0_80, %c0_81], %156 {strides = array<i32>} : memref<1x16x256xf32, #tpu.memory_space<vmem>>, vector<1x16x256xf32>,
    return
  }
  func.func @transform_0(%arg0: i32) -> (i32, i32, i32) {
    %c0_i32 = arith.constant 0 : i32
    %c0_i32_0 = arith.constant 0 : i32
    %c0_i32_1 = arith.constant 0 : i32
    return %arg0, %c0_i32, %c0_i32_0 : i32, i32, i32
  }
  func.func @transform_1(%arg0: i32) -> (i32, i32) {
    %c0_i32 = arith.constant 0 : i32
    %c0_i32_0 = arith.constant 0 : i32
    %c0_i32_1 = arith.constant 0 : i32
    return %c0_i32, %c0_i32_0 : i32, i32
  }
  func.func @transform_2(%arg0: i32) -> (i32, i32) {
    %c0_i32 = arith.constant 0 : i32
    %c0_i32_0 = arith.constant 0 : i32
    %c0_i32_1 = arith.constant 0 : i32
    return %c0_i32, %c0_i32_0 : i32, i32
  }
  func.func @transform_3(%arg0: i32) -> (i32, i32) {
    %c0_i32 = arith.constant 0 : i32
    %c0_i32_0 = arith.constant 0 : i32
    %c0_i32_1 = arith.constant 0 : i32
    return %c0_i32, %c0_i32_0 : i32, i32
  }
  func.func @transform_4(%arg0: i32) -> (i32, i32) {
    %c0_i32 = arith.constant 0 : i32
    %c0_i32_0 = arith.constant 0 : i32
    %c0_i32_1 = arith.constant 0 : i32
    return %c0_i32, %c0_i32_0 : i32, i32
  }
  func.func @transform_5(%arg0: i32) -> (i32, i32, i32) {
    %c0_i32 = arith.constant 0 : i32
    %c0_i32_0 = arith.constant 0 : i32
    %c0_i32_1 = arith.constant 0 : i32
    %c0_i32_2 = arith.constant 0 : i32
    return %c0_i32, %c0_i32_0, %c0_i32_1 : i32, i32, i32
  }
  func.func @transform_6(%arg0: i32) -> (i32, i32) {
    %c0_i32 = arith.constant 0 : i32
    %c0_i32_0 = arith.constant 0 : i32
    %c0_i32_1 = arith.constant 0 : i32
    return %c0_i32, %c0_i32_0 : i32, i32
  }
  func.func @transform_7(%arg0: i32) -> (i32, i32) {
    %c0_i32 = arith.constant 0 : i32
    %c0_i32_0 = arith.constant 0 : i32
    %c0_i32_1 = arith.constant 0 : i32
    return %c0_i32, %c0_i32_0 : i32, i32
  }
  func.func @transform_8(%arg0: i32) -> (i32, i32) {
    %c0_i32 = arith.constant 0 : i32
    %c0_i32_0 = arith.constant 0 : i32
    %c0_i32_1 = arith.constant 0 : i32
    return %c0_i32, %c0_i32_0 : i32, i32
  }
  func.func @transform_9(%arg0: i32) -> (i32, i32) {
    %c0_i32 = arith.constant 0 : i32
    %c0_i32_0 = arith.constant 0 : i32
    %c0_i32_1 = arith.constant 0 : i32
    return %c0_i32, %c0_i32_0 : i32, i32
  }
  func.func @transform_10(%arg0: i32) -> (i32, i32) {
    %c0_i32 = arith.constant 0 : i32
    %c0_i32_0 = arith.constant 0 : i32
    %c0_i32_1 = arith.constant 0 : i32
    return %c0_i32, %c0_i32_0 : i32, i32
  }
  func.func @transform_11(%arg0: i32) -> (i32, i32) {
    %c0_i32 = arith.constant 0 : i32
    %c0_i32_0 = arith.constant 0 : i32
    %c0_i32_1 = arith.constant 0 : i32
    return %c0_i32, %c0_i32_0 : i32, i32
  }
  func.func @transform_12(%arg0: i32) -> (i32, i32) {
    %c0_i32 = arith.constant 0 : i32
    %c0_i32_0 = arith.constant 0 : i32
    %c0_i32_1 = arith.constant 0 : i32
    return %c0_i32, %c0_i32_0 : i32, i32
  }
  func.func @transform_13(%arg0: i32) -> (i32, i32, i32) {
    %c0_i32 = arith.constant 0 : i32
    %c0_i32_0 = arith.constant 0 : i32
    %c0_i32_1 = arith.constant 0 : i32
    return %arg0, %c0_i32, %c0_i32_0 : i32, i32, i32
  }
}

module attributes {stable_mosaic.version = 11 : i64} {
  func.func @_block_kernel(%arg0: i32, %arg1: memref<1x16x256xf32, #tpu.memory_space<vmem>>, %arg2: memref<1x256xf32, #tpu.memory_space<vmem>>, %arg3: memref<1x256xf32, #tpu.memory_space<vmem>>, %arg4: memref<256x768xbf16, #tpu.memory_space<vmem>>, %arg5: memref<1x768xf32, #tpu.memory_space<vmem>>, %arg6: memref<2x128x256xbf16, #tpu.memory_space<vmem>>, %arg7: memref<1x256xf32, #tpu.memory_space<vmem>>, %arg8: memref<1x256xf32, #tpu.memory_space<vmem>>, %arg9: memref<1x256xf32, #tpu.memory_space<vmem>>, %arg10: memref<256x1024xbf16, #tpu.memory_space<vmem>>, %arg11: memref<1x1024xf32, #tpu.memory_space<vmem>>, %arg12: memref<1024x256xbf16, #tpu.memory_space<vmem>>, %arg13: memref<1x256xf32, #tpu.memory_space<vmem>>, %arg14: memref<1x16x256xf32, #tpu.memory_space<vmem>>, %arg15: memref<2x16x128xbf16, #tpu.memory_space<vmem>>, %arg16: memref<2x16x128xbf16, #tpu.memory_space<vmem>>, %arg17: memref<2x16x128xbf16, #tpu.memory_space<vmem>>) attributes {dimension_semantics = [#tpu.dimension_semantics<parallel>], iteration_bounds = array<i64: 2>, scalar_prefetch = 0 : i64, scratch_operands = 3 : i64, tpu.core_type = #tpu.core_type<tc>, window_params = [{transform_indices = @transform_0, window_bounds = array<i64: 1, 16, 256>}, {pipeline_mode = #tpu.pipeline_mode<synchronous>, transform_indices = @transform_1, window_bounds = array<i64: 1, 256>}, {pipeline_mode = #tpu.pipeline_mode<synchronous>, transform_indices = @transform_2, window_bounds = array<i64: 1, 256>}, {pipeline_mode = #tpu.pipeline_mode<synchronous>, transform_indices = @transform_3, window_bounds = array<i64: 256, 768>}, {pipeline_mode = #tpu.pipeline_mode<synchronous>, transform_indices = @transform_4, window_bounds = array<i64: 1, 768>}, {pipeline_mode = #tpu.pipeline_mode<synchronous>, transform_indices = @transform_5, window_bounds = array<i64: 2, 128, 256>}, {pipeline_mode = #tpu.pipeline_mode<synchronous>, transform_indices = @transform_6, window_bounds = array<i64: 1, 256>}, {pipeline_mode = #tpu.pipeline_mode<synchronous>, transform_indices = @transform_7, window_bounds = array<i64: 1, 256>}, {pipeline_mode = #tpu.pipeline_mode<synchronous>, transform_indices = @transform_8, window_bounds = array<i64: 1, 256>}, {pipeline_mode = #tpu.pipeline_mode<synchronous>, transform_indices = @transform_9, window_bounds = array<i64: 256, 1024>}, {pipeline_mode = #tpu.pipeline_mode<synchronous>, transform_indices = @transform_10, window_bounds = array<i64: 1, 1024>}, {pipeline_mode = #tpu.pipeline_mode<synchronous>, transform_indices = @transform_11, window_bounds = array<i64: 1024, 256>}, {pipeline_mode = #tpu.pipeline_mode<synchronous>, transform_indices = @transform_12, window_bounds = array<i64: 1, 256>}, {transform_indices = @transform_13, window_bounds = array<i64: 1, 16, 256>}]} {
    %c0 = arith.constant 0 : index
    %c0_0 = arith.constant 0 : index
    %c0_1 = arith.constant 0 : index
    %0 = vector.load %arg1[%c0, %c0_0, %c0_1] : memref<1x16x256xf32, #tpu.memory_space<vmem>>, vector<1x16x256xf32>
    %1 = vector.shape_cast %0 : vector<1x16x256xf32> to vector<16x256xf32>
    %cst = arith.constant dense<0.000000e+00> : vector<16xf32>
    %2 = vector.multi_reduction <add>, %1, %cst [1] : vector<16x256xf32> to vector<16xf32>
    %3 = vector.shape_cast %2 : vector<16xf32> to vector<16x1xf32>
    %cst_2 = arith.constant 2.560000e+02 : f32
    %4 = vector.broadcast %cst_2 : f32 to vector<16x1xf32>
    %5 = arith.divf %3, %4 : vector<16x1xf32>
    %6 = arith.mulf %1, %1 : vector<16x256xf32>
    %cst_3 = arith.constant dense<0.000000e+00> : vector<16xf32>
    %7 = vector.multi_reduction <add>, %6, %cst_3 [1] : vector<16x256xf32> to vector<16xf32>
    %8 = vector.shape_cast %7 : vector<16xf32> to vector<16x1xf32>
    %cst_4 = arith.constant 2.560000e+02 : f32
    %9 = vector.broadcast %cst_4 : f32 to vector<16x1xf32>
    %10 = arith.divf %8, %9 : vector<16x1xf32>
    %11 = arith.mulf %5, %5 : vector<16x1xf32>
    %12 = arith.subf %10, %11 : vector<16x1xf32>
    %cst_5 = arith.constant 0.000000e+00 : f32
    %13 = vector.broadcast %cst_5 : f32 to vector<16x1xf32>
    %14 = arith.maximumf %12, %13 : vector<16x1xf32>
    %15 = vector.broadcast %5 : vector<16x1xf32> to vector<16x256xf32>
    %16 = arith.subf %1, %15 : vector<16x256xf32>
    %cst_6 = arith.constant 9.99999997E-7 : f32
    %17 = vector.broadcast %cst_6 : f32 to vector<16x1xf32>
    %18 = arith.addf %14, %17 : vector<16x1xf32>
    %19 = math.rsqrt %18 : vector<16x1xf32>
    %20 = vector.broadcast %19 : vector<16x1xf32> to vector<16x256xf32>
    %21 = arith.mulf %16, %20 : vector<16x256xf32>
    %c0_7 = arith.constant 0 : index
    %c0_8 = arith.constant 0 : index
    %22 = vector.load %arg2[%c0_7, %c0_8] : memref<1x256xf32, #tpu.memory_space<vmem>>, vector<1x256xf32>
    %23 = vector.shape_cast %22 : vector<1x256xf32> to vector<256xf32>
    %24 = vector.shape_cast %23 : vector<256xf32> to vector<1x256xf32>
    %25 = vector.broadcast %24 : vector<1x256xf32> to vector<16x256xf32>
    %26 = arith.mulf %21, %25 : vector<16x256xf32>
    %c0_9 = arith.constant 0 : index
    %c0_10 = arith.constant 0 : index
    %27 = vector.load %arg3[%c0_9, %c0_10] : memref<1x256xf32, #tpu.memory_space<vmem>>, vector<1x256xf32>
    %28 = vector.shape_cast %27 : vector<1x256xf32> to vector<256xf32>
    %29 = vector.shape_cast %28 : vector<256xf32> to vector<1x256xf32>
    %30 = vector.broadcast %29 : vector<1x256xf32> to vector<16x256xf32>
    %31 = arith.addf %26, %30 : vector<16x256xf32>
    %32 = arith.truncf %31 : vector<16x256xf32> to vector<16x256xbf16>
    %c0_11 = arith.constant 0 : index
    %c0_12 = arith.constant 0 : index
    %33 = vector.load %arg4[%c0_11, %c0_12] : memref<256x768xbf16, #tpu.memory_space<vmem>>, vector<256x768xbf16>
    %cst_13 = arith.constant dense<0.000000e+00> : vector<16x768xf32>
    %34 = tpu.matmul %32, %33, %cst_13 {dimension_numbers = #tpu.dot_dimension_numbers<[1], [0], [0], [1], [0, 0, 1, 1], [], []>} : vector<16x256xbf16>, vector<256x768xbf16>, vector<16x768xf32> -> vector<16x768xf32>
    %c0_14 = arith.constant 0 : index
    %c0_15 = arith.constant 0 : index
    %35 = vector.load %arg5[%c0_14, %c0_15] : memref<1x768xf32, #tpu.memory_space<vmem>>, vector<1x768xf32>
    %36 = vector.shape_cast %35 : vector<1x768xf32> to vector<768xf32>
    %37 = vector.shape_cast %36 : vector<768xf32> to vector<1x768xf32>
    %38 = vector.broadcast %37 : vector<1x768xf32> to vector<16x768xf32>
    %39 = arith.addf %34, %38 : vector<16x768xf32>
    %40 = arith.truncf %39 : vector<16x768xf32> to vector<16x768xbf16>
    %41 = vector.extract_strided_slice %40 {offsets = [0, 0], sizes = [16, 128], strides = [1, 1]} : vector<16x768xbf16> to vector<16x128xbf16>
    %c0_16 = arith.constant 0 : index
    %c0_17 = arith.constant 0 : index
    %c0_18 = arith.constant 0 : index
    %42 = vector.load %arg15[%c0_16, %c0_17, %c0_18] : memref<2x16x128xbf16, #tpu.memory_space<vmem>>, vector<1x16x128xbf16>
    %43 = vector.shape_cast %42 : vector<1x16x128xbf16> to vector<16x128xbf16>
    %44 = vector.shape_cast %41 : vector<16x128xbf16> to vector<1x16x128xbf16>
    tpu.vector_store %arg15[%c0_16, %c0_17, %c0_18], %44 {strides = array<i32>} : memref<2x16x128xbf16, #tpu.memory_space<vmem>>, vector<1x16x128xbf16>,
    %45 = vector.extract_strided_slice %40 {offsets = [0, 256], sizes = [16, 128], strides = [1, 1]} : vector<16x768xbf16> to vector<16x128xbf16>
    %c0_19 = arith.constant 0 : index
    %c0_20 = arith.constant 0 : index
    %c0_21 = arith.constant 0 : index
    %46 = vector.load %arg16[%c0_19, %c0_20, %c0_21] : memref<2x16x128xbf16, #tpu.memory_space<vmem>>, vector<1x16x128xbf16>
    %47 = vector.shape_cast %46 : vector<1x16x128xbf16> to vector<16x128xbf16>
    %48 = vector.shape_cast %45 : vector<16x128xbf16> to vector<1x16x128xbf16>
    tpu.vector_store %arg16[%c0_19, %c0_20, %c0_21], %48 {strides = array<i32>} : memref<2x16x128xbf16, #tpu.memory_space<vmem>>, vector<1x16x128xbf16>,
    %49 = vector.extract_strided_slice %40 {offsets = [0, 512], sizes = [16, 128], strides = [1, 1]} : vector<16x768xbf16> to vector<16x128xbf16>
    %c0_22 = arith.constant 0 : index
    %c0_23 = arith.constant 0 : index
    %c0_24 = arith.constant 0 : index
    %50 = vector.load %arg17[%c0_22, %c0_23, %c0_24] : memref<2x16x128xbf16, #tpu.memory_space<vmem>>, vector<1x16x128xbf16>
    %51 = vector.shape_cast %50 : vector<1x16x128xbf16> to vector<16x128xbf16>
    %52 = vector.shape_cast %49 : vector<16x128xbf16> to vector<1x16x128xbf16>
    tpu.vector_store %arg17[%c0_22, %c0_23, %c0_24], %52 {strides = array<i32>} : memref<2x16x128xbf16, #tpu.memory_space<vmem>>, vector<1x16x128xbf16>,
    %53 = vector.extract_strided_slice %40 {offsets = [0, 128], sizes = [16, 128], strides = [1, 1]} : vector<16x768xbf16> to vector<16x128xbf16>
    %c1 = arith.constant 1 : index
    %c0_25 = arith.constant 0 : index
    %c0_26 = arith.constant 0 : index
    %54 = vector.load %arg15[%c1, %c0_25, %c0_26] : memref<2x16x128xbf16, #tpu.memory_space<vmem>>, vector<1x16x128xbf16>
    %55 = vector.shape_cast %54 : vector<1x16x128xbf16> to vector<16x128xbf16>
    %56 = vector.shape_cast %53 : vector<16x128xbf16> to vector<1x16x128xbf16>
    tpu.vector_store %arg15[%c1, %c0_25, %c0_26], %56 {strides = array<i32>} : memref<2x16x128xbf16, #tpu.memory_space<vmem>>, vector<1x16x128xbf16>,
    %57 = vector.extract_strided_slice %40 {offsets = [0, 384], sizes = [16, 128], strides = [1, 1]} : vector<16x768xbf16> to vector<16x128xbf16>
    %c1_27 = arith.constant 1 : index
    %c0_28 = arith.constant 0 : index
    %c0_29 = arith.constant 0 : index
    %58 = vector.load %arg16[%c1_27, %c0_28, %c0_29] : memref<2x16x128xbf16, #tpu.memory_space<vmem>>, vector<1x16x128xbf16>
    %59 = vector.shape_cast %58 : vector<1x16x128xbf16> to vector<16x128xbf16>
    %60 = vector.shape_cast %57 : vector<16x128xbf16> to vector<1x16x128xbf16>
    tpu.vector_store %arg16[%c1_27, %c0_28, %c0_29], %60 {strides = array<i32>} : memref<2x16x128xbf16, #tpu.memory_space<vmem>>, vector<1x16x128xbf16>,
    %61 = vector.extract_strided_slice %40 {offsets = [0, 640], sizes = [16, 128], strides = [1, 1]} : vector<16x768xbf16> to vector<16x128xbf16>
    %c1_30 = arith.constant 1 : index
    %c0_31 = arith.constant 0 : index
    %c0_32 = arith.constant 0 : index
    %62 = vector.load %arg17[%c1_30, %c0_31, %c0_32] : memref<2x16x128xbf16, #tpu.memory_space<vmem>>, vector<1x16x128xbf16>
    %63 = vector.shape_cast %62 : vector<1x16x128xbf16> to vector<16x128xbf16>
    %64 = vector.shape_cast %61 : vector<16x128xbf16> to vector<1x16x128xbf16>
    tpu.vector_store %arg17[%c1_30, %c0_31, %c0_32], %64 {strides = array<i32>} : memref<2x16x128xbf16, #tpu.memory_space<vmem>>, vector<1x16x128xbf16>,
    %c0_33 = arith.constant 0 : index
    %c0_34 = arith.constant 0 : index
    %c0_35 = arith.constant 0 : index
    %65 = vector.load %arg15[%c0_33, %c0_34, %c0_35] : memref<2x16x128xbf16, #tpu.memory_space<vmem>>, vector<2x16x128xbf16>
    %c0_36 = arith.constant 0 : index
    %c0_37 = arith.constant 0 : index
    %c0_38 = arith.constant 0 : index
    %66 = vector.load %arg16[%c0_36, %c0_37, %c0_38] : memref<2x16x128xbf16, #tpu.memory_space<vmem>>, vector<2x16x128xbf16>
    "tpu.trace_start"() <{level = 10 : i32, message = "hqd,hkd->hqk"}> : () -> ()
    %cst_39 = arith.constant dense<0.000000e+00> : vector<2x16x16xf32>
    %67 = tpu.matmul %65, %66, %cst_39 {dimension_numbers = #tpu.dot_dimension_numbers<[2], [2], [1], [1], [0, 0, 0, 1, 1, 1], [0], [0]>} : vector<2x16x128xbf16>, vector<2x16x128xbf16>, vector<2x16x16xf32> -> vector<2x16x16xf32>
    "tpu.trace_stop"() : () -> ()
    %cst_40 = arith.constant dense<0xFF800000> : vector<2x16xf32>
    %68 = vector.multi_reduction <maximumf>, %67, %cst_40 [2] : vector<2x16x16xf32> to vector<2x16xf32>
    %69 = vector.shape_cast %68 : vector<2x16xf32> to vector<2x16x1xf32>
    %70 = vector.broadcast %69 : vector<2x16x1xf32> to vector<2x16x16xf32>
    %71 = arith.subf %67, %70 : vector<2x16x16xf32>
    %72 = math.exp %71 : vector<2x16x16xf32>
    %cst_41 = arith.constant dense<0.000000e+00> : vector<2x16xf32>
    %73 = vector.multi_reduction <add>, %72, %cst_41 [2] : vector<2x16x16xf32> to vector<2x16xf32>
    %74 = vector.shape_cast %73 : vector<2x16xf32> to vector<2x16x1xf32>
    %75 = arith.truncf %72 : vector<2x16x16xf32> to vector<2x16x16xbf16>
    %c0_42 = arith.constant 0 : index
    %c0_43 = arith.constant 0 : index
    %c0_44 = arith.constant 0 : index
    %76 = vector.load %arg17[%c0_42, %c0_43, %c0_44] : memref<2x16x128xbf16, #tpu.memory_space<vmem>>, vector<2x16x128xbf16>
    "tpu.trace_start"() <{level = 10 : i32, message = "hqk,hkd->hqd"}> : () -> ()
    %cst_45 = arith.constant dense<0.000000e+00> : vector<2x16x128xf32>
    %77 = tpu.matmul %75, %76, %cst_45 {dimension_numbers = #tpu.dot_dimension_numbers<[2], [1], [1], [2], [0, 0, 0, 1, 1, 2], [0], [0]>} : vector<2x16x16xbf16>, vector<2x16x128xbf16>, vector<2x16x128xf32> -> vector<2x16x128xf32>
    "tpu.trace_stop"() : () -> ()
    %78 = tpu.reciprocal %74 {approx = true} : vector<2x16x1xf32> -> vector<2x16x1xf32>
    %79 = vector.broadcast %78 : vector<2x16x1xf32> to vector<2x16x128xf32>
    %80 = arith.mulf %77, %79 : vector<2x16x128xf32>
    %81 = arith.truncf %80 : vector<2x16x128xf32> to vector<2x16x128xbf16>
    %82 = vector.extract_strided_slice %81 {offsets = [0, 0, 0], sizes = [1, 16, 128], strides = [1, 1, 1]} : vector<2x16x128xbf16> to vector<1x16x128xbf16>
    %83 = vector.shape_cast %82 : vector<1x16x128xbf16> to vector<16x128xbf16>
    %c0_46 = arith.constant 0 : index
    %c0_47 = arith.constant 0 : index
    %c0_48 = arith.constant 0 : index
    %84 = vector.load %arg6[%c0_46, %c0_47, %c0_48] : memref<2x128x256xbf16, #tpu.memory_space<vmem>>, vector<1x128x256xbf16>
    %85 = vector.shape_cast %84 : vector<1x128x256xbf16> to vector<128x256xbf16>
    %cst_49 = arith.constant dense<0.000000e+00> : vector<16x256xf32>
    %86 = tpu.matmul %83, %85, %cst_49 {dimension_numbers = #tpu.dot_dimension_numbers<[1], [0], [0], [1], [0, 0, 1, 1], [], []>} : vector<16x128xbf16>, vector<128x256xbf16>, vector<16x256xf32> -> vector<16x256xf32>
    %87 = vector.extract_strided_slice %81 {offsets = [1, 0, 0], sizes = [1, 16, 128], strides = [1, 1, 1]} : vector<2x16x128xbf16> to vector<1x16x128xbf16>
    %88 = vector.shape_cast %87 : vector<1x16x128xbf16> to vector<16x128xbf16>
    %c1_50 = arith.constant 1 : index
    %c0_51 = arith.constant 0 : index
    %c0_52 = arith.constant 0 : index
    %89 = vector.load %arg6[%c1_50, %c0_51, %c0_52] : memref<2x128x256xbf16, #tpu.memory_space<vmem>>, vector<1x128x256xbf16>
    %90 = vector.shape_cast %89 : vector<1x128x256xbf16> to vector<128x256xbf16>
    %cst_53 = arith.constant dense<0.000000e+00> : vector<16x256xf32>
    %91 = tpu.matmul %88, %90, %cst_53 {dimension_numbers = #tpu.dot_dimension_numbers<[1], [0], [0], [1], [0, 0, 1, 1], [], []>} : vector<16x128xbf16>, vector<128x256xbf16>, vector<16x256xf32> -> vector<16x256xf32>
    %92 = arith.addf %86, %91 : vector<16x256xf32>
    %93 = arith.addf %1, %92 : vector<16x256xf32>
    %c0_54 = arith.constant 0 : index
    %c0_55 = arith.constant 0 : index
    %94 = vector.load %arg7[%c0_54, %c0_55] : memref<1x256xf32, #tpu.memory_space<vmem>>, vector<1x256xf32>
    %95 = vector.shape_cast %94 : vector<1x256xf32> to vector<256xf32>
    %96 = vector.shape_cast %95 : vector<256xf32> to vector<1x256xf32>
    %97 = vector.broadcast %96 : vector<1x256xf32> to vector<16x256xf32>
    %98 = arith.addf %93, %97 : vector<16x256xf32>
    %cst_56 = arith.constant dense<0.000000e+00> : vector<16xf32>
    %99 = vector.multi_reduction <add>, %98, %cst_56 [1] : vector<16x256xf32> to vector<16xf32>
    %100 = vector.shape_cast %99 : vector<16xf32> to vector<16x1xf32>
    %cst_57 = arith.constant 2.560000e+02 : f32
    %101 = vector.broadcast %cst_57 : f32 to vector<16x1xf32>
    %102 = arith.divf %100, %101 : vector<16x1xf32>
    %103 = arith.mulf %98, %98 : vector<16x256xf32>
    %cst_58 = arith.constant dense<0.000000e+00> : vector<16xf32>
    %104 = vector.multi_reduction <add>, %103, %cst_58 [1] : vector<16x256xf32> to vector<16xf32>
    %105 = vector.shape_cast %104 : vector<16xf32> to vector<16x1xf32>
    %cst_59 = arith.constant 2.560000e+02 : f32
    %106 = vector.broadcast %cst_59 : f32 to vector<16x1xf32>
    %107 = arith.divf %105, %106 : vector<16x1xf32>
    %108 = arith.mulf %102, %102 : vector<16x1xf32>
    %109 = arith.subf %107, %108 : vector<16x1xf32>
    %cst_60 = arith.constant 0.000000e+00 : f32
    %110 = vector.broadcast %cst_60 : f32 to vector<16x1xf32>
    %111 = arith.maximumf %109, %110 : vector<16x1xf32>
    %112 = vector.broadcast %102 : vector<16x1xf32> to vector<16x256xf32>
    %113 = arith.subf %98, %112 : vector<16x256xf32>
    %cst_61 = arith.constant 9.99999997E-7 : f32
    %114 = vector.broadcast %cst_61 : f32 to vector<16x1xf32>
    %115 = arith.addf %111, %114 : vector<16x1xf32>
    %116 = math.rsqrt %115 : vector<16x1xf32>
    %117 = vector.broadcast %116 : vector<16x1xf32> to vector<16x256xf32>
    %118 = arith.mulf %113, %117 : vector<16x256xf32>
    %c0_62 = arith.constant 0 : index
    %c0_63 = arith.constant 0 : index
    %119 = vector.load %arg8[%c0_62, %c0_63] : memref<1x256xf32, #tpu.memory_space<vmem>>, vector<1x256xf32>
    %120 = vector.shape_cast %119 : vector<1x256xf32> to vector<256xf32>
    %121 = vector.shape_cast %120 : vector<256xf32> to vector<1x256xf32>
    %122 = vector.broadcast %121 : vector<1x256xf32> to vector<16x256xf32>
    %123 = arith.mulf %118, %122 : vector<16x256xf32>
    %c0_64 = arith.constant 0 : index
    %c0_65 = arith.constant 0 : index
    %124 = vector.load %arg9[%c0_64, %c0_65] : memref<1x256xf32, #tpu.memory_space<vmem>>, vector<1x256xf32>
    %125 = vector.shape_cast %124 : vector<1x256xf32> to vector<256xf32>
    %126 = vector.shape_cast %125 : vector<256xf32> to vector<1x256xf32>
    %127 = vector.broadcast %126 : vector<1x256xf32> to vector<16x256xf32>
    %128 = arith.addf %123, %127 : vector<16x256xf32>
    %129 = arith.truncf %128 : vector<16x256xf32> to vector<16x256xbf16>
    %c0_66 = arith.constant 0 : index
    %c0_67 = arith.constant 0 : index
    %130 = vector.load %arg10[%c0_66, %c0_67] : memref<256x1024xbf16, #tpu.memory_space<vmem>>, vector<256x1024xbf16>
    %cst_68 = arith.constant dense<0.000000e+00> : vector<16x1024xf32>
    %131 = tpu.matmul %129, %130, %cst_68 {dimension_numbers = #tpu.dot_dimension_numbers<[1], [0], [0], [1], [0, 0, 1, 1], [], []>} : vector<16x256xbf16>, vector<256x1024xbf16>, vector<16x1024xf32> -> vector<16x1024xf32>
    %c0_69 = arith.constant 0 : index
    %c0_70 = arith.constant 0 : index
    %132 = vector.load %arg11[%c0_69, %c0_70] : memref<1x1024xf32, #tpu.memory_space<vmem>>, vector<1x1024xf32>
    %133 = vector.shape_cast %132 : vector<1x1024xf32> to vector<1024xf32>
    %134 = vector.shape_cast %133 : vector<1024xf32> to vector<1x1024xf32>
    %135 = vector.broadcast %134 : vector<1x1024xf32> to vector<16x1024xf32>
    %136 = arith.addf %131, %135 : vector<16x1024xf32>
    %cst_71 = arith.constant 5.000000e-01 : f32
    %137 = vector.broadcast %cst_71 : f32 to vector<16x1024xf32>
    %138 = arith.mulf %137, %136 : vector<16x1024xf32>
    %cst_72 = arith.constant 0.707106769 : f32
    %139 = vector.broadcast %cst_72 : f32 to vector<16x1024xf32>
    %140 = arith.mulf %136, %139 : vector<16x1024xf32>
    %141 = math.erf %140 : vector<16x1024xf32>
    %cst_73 = arith.constant 1.000000e+00 : f32
    %142 = vector.broadcast %cst_73 : f32 to vector<16x1024xf32>
    %143 = arith.addf %142, %141 : vector<16x1024xf32>
    %144 = arith.mulf %138, %143 : vector<16x1024xf32>
    %145 = arith.truncf %144 : vector<16x1024xf32> to vector<16x1024xbf16>
    %c0_74 = arith.constant 0 : index
    %c0_75 = arith.constant 0 : index
    %146 = vector.load %arg12[%c0_74, %c0_75] : memref<1024x256xbf16, #tpu.memory_space<vmem>>, vector<1024x256xbf16>
    %cst_76 = arith.constant dense<0.000000e+00> : vector<16x256xf32>
    %147 = tpu.matmul %145, %146, %cst_76 {dimension_numbers = #tpu.dot_dimension_numbers<[1], [0], [0], [1], [0, 0, 1, 1], [], []>} : vector<16x1024xbf16>, vector<1024x256xbf16>, vector<16x256xf32> -> vector<16x256xf32>
    %c0_77 = arith.constant 0 : index
    %c0_78 = arith.constant 0 : index
    %148 = vector.load %arg13[%c0_77, %c0_78] : memref<1x256xf32, #tpu.memory_space<vmem>>, vector<1x256xf32>
    %149 = vector.shape_cast %148 : vector<1x256xf32> to vector<256xf32>
    %150 = vector.shape_cast %149 : vector<256xf32> to vector<1x256xf32>
    %151 = vector.broadcast %150 : vector<1x256xf32> to vector<16x256xf32>
    %152 = arith.addf %147, %151 : vector<16x256xf32>
    %153 = arith.addf %98, %152 : vector<16x256xf32>
    %c0_79 = arith.constant 0 : index
    %c0_80 = arith.constant 0 : index
    %c0_81 = arith.constant 0 : index
    %154 = vector.load %arg14[%c0_79, %c0_80, %c0_81] : memref<1x16x256xf32, #tpu.memory_space<vmem>>, vector<1x16x256xf32>
    %155 = vector.shape_cast %154 : vector<1x16x256xf32> to vector<16x256xf32>
    %156 = vector.shape_cast %153 : vector<16x256xf32> to vector<1x16x256xf32>
    tpu.vector_store %arg14[%c0_79, %c0_80, %c0_81], %156 {strides = array<i32>} : memref<1x16x256xf32, #tpu.memory_space<vmem>>, vector<1x16x256xf32>,
    return
  }
  func.func @transform_0(%arg0: i32) -> (i32, i32, i32) {
    %c0_i32 = arith.constant 0 : i32
    %c0_i32_0 = arith.constant 0 : i32
    %c0_i32_1 = arith.constant 0 : i32
    return %arg0, %c0_i32, %c0_i32_0 : i32, i32, i32
  }
  func.func @transform_1(%arg0: i32) -> (i32, i32) {
    %c0_i32 = arith.constant 0 : i32
    %c0_i32_0 = arith.constant 0 : i32
    %c0_i32_1 = arith.constant 0 : i32
    return %c0_i32, %c0_i32_0 : i32, i32
  }
  func.func @transform_2(%arg0: i32) -> (i32, i32) {
    %c0_i32 = arith.constant 0 : i32
    %c0_i32_0 = arith.constant 0 : i32
    %c0_i32_1 = arith.constant 0 : i32
    return %c0_i32, %c0_i32_0 : i32, i32
  }
  func.func @transform_3(%arg0: i32) -> (i32, i32) {
    %c0_i32 = arith.constant 0 : i32
    %c0_i32_0 = arith.constant 0 : i32
    %c0_i32_1 = arith.constant 0 : i32
    return %c0_i32, %c0_i32_0 : i32, i32
  }
  func.func @transform_4(%arg0: i32) -> (i32, i32) {
    %c0_i32 = arith.constant 0 : i32
    %c0_i32_0 = arith.constant 0 : i32
    %c0_i32_1 = arith.constant 0 : i32
    return %c0_i32, %c0_i32_0 : i32, i32
  }
  func.func @transform_5(%arg0: i32) -> (i32, i32, i32) {
    %c0_i32 = arith.constant 0 : i32
    %c0_i32_0 = arith.constant 0 : i32
    %c0_i32_1 = arith.constant 0 : i32
    %c0_i32_2 = arith.constant 0 : i32
    return %c0_i32, %c0_i32_0, %c0_i32_1 : i32, i32, i32
  }
  func.func @transform_6(%arg0: i32) -> (i32, i32) {
    %c0_i32 = arith.constant 0 : i32
    %c0_i32_0 = arith.constant 0 : i32
    %c0_i32_1 = arith.constant 0 : i32
    return %c0_i32, %c0_i32_0 : i32, i32
  }
  func.func @transform_7(%arg0: i32) -> (i32, i32) {
    %c0_i32 = arith.constant 0 : i32
    %c0_i32_0 = arith.constant 0 : i32
    %c0_i32_1 = arith.constant 0 : i32
    return %c0_i32, %c0_i32_0 : i32, i32
  }
  func.func @transform_8(%arg0: i32) -> (i32, i32) {
    %c0_i32 = arith.constant 0 : i32
    %c0_i32_0 = arith.constant 0 : i32
    %c0_i32_1 = arith.constant 0 : i32
    return %c0_i32, %c0_i32_0 : i32, i32
  }
  func.func @transform_9(%arg0: i32) -> (i32, i32) {
    %c0_i32 = arith.constant 0 : i32
    %c0_i32_0 = arith.constant 0 : i32
    %c0_i32_1 = arith.constant 0 : i32
    return %c0_i32, %c0_i32_0 : i32, i32
  }
  func.func @transform_10(%arg0: i32) -> (i32, i32) {
    %c0_i32 = arith.constant 0 : i32
    %c0_i32_0 = arith.constant 0 : i32
    %c0_i32_1 = arith.constant 0 : i32
    return %c0_i32, %c0_i32_0 : i32, i32
  }
  func.func @transform_11(%arg0: i32) -> (i32, i32) {
    %c0_i32 = arith.constant 0 : i32
    %c0_i32_0 = arith.constant 0 : i32
    %c0_i32_1 = arith.constant 0 : i32
    return %c0_i32, %c0_i32_0 : i32, i32
  }
  func.func @transform_12(%arg0: i32) -> (i32, i32) {
    %c0_i32 = arith.constant 0 : i32
    %c0_i32_0 = arith.constant 0 : i32
    %c0_i32_1 = arith.constant 0 : i32
    return %c0_i32, %c0_i32_0 : i32, i32
  }
  func.func @transform_13(%arg0: i32) -> (i32, i32, i32) {
    %c0_i32 = arith.constant 0 : i32
    %c0_i32_0 = arith.constant 0 : i32
    %c0_i32_1 = arith.constant 0 : i32
    return %arg0, %c0_i32, %c0_i32_0 : i32, i32, i32
  }
}

</mosaic_0001>

<bundles_post_ra>
// kernel: tpu_custom_call.1
= control target key start
LH: loop header
LB: loop body
LE: loop exit
PB: predicated region body
PF: predicated region fallthrough
CT: control target
= control target key end

     0   :  { %s6089_s0 = inlined_call_operand.hbm [shape: f32[2,16,256], index: 0, kind: input, shape index: {}]   ;;  %s6090_s1 = inlined_call_operand.hbm [shape: f32[1,256], index: 1, kind: input, shape index: {}]   ;;  %s6091_s2 = inlined_call_operand.hbm [shape: f32[1,256], index: 2, kind: input, shape index: {}]   ;;  %s6092_s3 = inlined_call_operand.hbm [shape: bf16[256,768], index: 3, kind: input, shape index: {}]   ;;  %s6093_s4 = inlined_call_operand.vmem [shape: f32[1,768], index: 4, kind: input, shape index: {}]   ;;  %s6094_s5 = inlined_call_operand.hbm [shape: bf16[2,128,256], index: 5, kind: input, shape index: {}]   ;;  %s6095_s6 = inlined_call_operand.vmem [shape: f32[1,256], index: 6, kind: input, shape index: {}]   ;;  %s6096_s7 = inlined_call_operand.vmem [shape: f32[1,256], index: 7, kind: input, shape index: {}]   ;;  %s6097_s8 = inlined_call_operand.vmem [shape: f32[1,256], index: 8, kind: input, shape index: {}]   ;;  %s6098_s9 = inlined_call_operand.hbm [shape: bf16[256,1024], index: 9, kind: input, shape index: {}]   ;;  %s6099_s10 = inlined_call_operand.vmem [shape: f32[1,1024], index: 10, kind: input, shape index: {}]   ;;  %s6100_s11 = inlined_call_operand.hbm [shape: bf16[1024,256], index: 11, kind: input, shape index: {}]   ;;  %s6101_s12 = inlined_call_operand.vmem [shape: f32[1,256], index: 12, kind: input, shape index: {}]   ;;  %s6102_s13 = inlined_call_operand.hbm [shape: f32[2,16,256], index: 13, kind: output, shape index: {}]  }
   0x1   :  { %6107 = sst [smem:[#allocation23_spill]] %s6090_s1 }
   0x2   :  { %6108 = sst [smem:[#allocation24_spill]] %s6092_s3 }
   0x3   :  { %6109 = sst [smem:[#allocation25_spill]] %s6096_s7 }
   0x4   :  { %6110 = sst [smem:[#allocation26_spill]] %s6097_s8 }
   0x5   :  { %6111 = sst [smem:[#allocation27_spill]] %s6099_s10 }
   0x6   :  { %6112 = sst [smem:[#allocation28_spill]] %s6101_s12 }
   0x7   :  { %6113 = sst [smem:[#allocation29_spill]] %s6102_s13 }
   0x8   :  { %18 = vsyncpa [#allocation6], 0 }
   0x9   :  { %20 = vsyncpa [#allocation6 + $0x1], 0 }
   0xa   :  { %21 = vsyncpa [#allocation9], 0 }
   0xb   :  { %22 = vsyncpa [#allocation12], 0 }
   0xc   :  { %23 = vsyncpa [#allocation15], 0 }
   0xd   :  { %24 = vsyncpa [#allocation7], 0 }
   0xe   :  { %26 = vsyncpa [#allocation7 + $0x1], 0  ;;  %s5541_s25 = smov 0   ;;  %s5543_s26 = smov 0  }
   0xf   :  { %s5545_s27 = smov 0   ;;  %s5547_s28 = smov 0  }
  0x10 LB: > { %s5450_s29 = smov [#allocation8]   ;;  %s5562_s14 = sadd.s32 4294967295, %s5448_s28   ;;  %s5448_s28 = sphi %s5547_s28, %s6143_s28   ;;  %s5444_s27 = sphi %s5545_s27, %s6142_s27   ;;  %s5440_s26 = sphi %s5543_s26, %s6141_s26   ;;  %s5436_s25 = sphi %s5541_s25, %s6140_s25  }
  0x11   : > { %s354_s30 = sshll.u32 %s5450_s29, 4  ;;  %p4143_p0 = scmp.ge.s32.totalorder %s5448_s28, 1  ;;  %s355_s30 = int_to_ptr.vmem [resolvable:$true] %s354_s30 }
  0x12   : > { %p6104_p1 = scmp.eq.s32.totalorder %s5562_s14, 0  ;;  %p341_p2 = scmp.lt.s32.totalorder %s5448_s28, 3 }
  0x13   : > { %s5451_s16 = smov [#allocation11]   ;;  %s5452_s19 = smov [#allocation14]  }
  0x14   : > { %p5567_p3 = pnand %p4143_p0, %p341_p2  ;;  %s375_s17 = sshll.u32 %s5451_s16, 4  ;;  %s5574_s17 = int_to_ptr.vmem [resolvable:$true] %s375_s17 }
  0x15   : > { %s413_s20 = sshll.u32 %s5452_s19, 4  ;;  %s6116_s1 = sld [smem:[#allocation23_spill]]  ;;  %s5582_s20 = int_to_ptr.vmem [resolvable:$true] %s413_s20 }
  0x16   : > { %s6114_s15 = scalar_select %p5567_p3, 1, 0 }
  0x17   : > { %p4636_p5 = pneg %p5567_p3 }
  0x19   : > { %p5578_p6 = pnand %p4636_p5, %p6104_p1 }
  0x1b   : > { %s5172_s23 = scalar_lea.hbm %s6116_s1, 32  ;;  %p5592_p8 = pneg %p5578_p6 }
  0x1c   : > { %p5173_p7 = scmp.ne.s32.totalorder %s6116_s1, %s5172_s23  ;;  %p5179_p11 = scmp.lt.u32.totalorder %s5172_s23, %s6116_s1 }
  0x1e   : > { %p5175_p9 = pnand %p5592_p8, %p5173_p7 }
  0x20   : > { %p5176_p10 = pneg %p5175_p9 }
  0x22   : > { %p5181_p12 = pnand %p5179_p11, %p5176_p10 }
  0x24   : > { %5184 = shalt.err (!%p5181_p12)
}
  0x25   : > { %s5185_s21 = scalar_lea.vmem %s355_s30, 32  ;;  %p5193_p5 = scmp.lt.s32.totalorder %s355_s30, %s355_s30 }
  0x26   : > { %p5186_p13 = scmp.ne.s32.totalorder %s355_s30, %s5185_s21  ;;  %p5194_p4 = scmp.lt.s32.totalorder %s5185_s21, %s5185_s21 }
  0x28   : > { %p5188_p0 = pnand %p5186_p13, %p5592_p8  ;;  %p5195_p1 = por %p5194_p4, %p5193_p5 }
  0x2a   : > { %p5189_p2 = pneg %p5188_p0 }
  0x2c   : > { %p5196_p3 = pnand %p5195_p1, %p5189_p2 }
  0x2e   : > { %5199 = shalt.err (!%p5196_p3)
}
  0x2f   : > { %4639 = dma.hbm_to_vmem [thread:$0]  (!%p5578_p6), %s6116_s1, 32, %s355_s30, [#allocation9]  }
  0x30   : > { %s6118_s3 = sld [smem:[#allocation24_spill]] }
  0x36   : > { %s5200_s29 = scalar_lea.hbm %s6118_s3, 12288 }
  0x37   : > { %p5201_p7 = scmp.ne.s32.totalorder %s6118_s3, %s5200_s29  ;;  %p5207_p1 = scmp.lt.u32.totalorder %s5200_s29, %s6118_s3 }
  0x39   : > { %p5203_p9 = pnand %p5201_p7, %p5592_p8 }
  0x3b   : > { %p5204_p4 = pneg %p5203_p9 }
  0x3d   : > { %p5209_p3 = pnand %p5207_p1, %p5204_p4 }
  0x3f   : > { %5212 = shalt.err (!%p5209_p3)
}
  0x40   : > { %s5213_s30 = scalar_lea.vmem %s5574_s17, 12288  ;;  %p5221_p13 = scmp.lt.s32.totalorder %s5574_s17, %s5574_s17 }
  0x41   : > { %p5214_p10 = scmp.ne.s32.totalorder %s5574_s17, %s5213_s30  ;;  %p5222_p0 = scmp.lt.s32.totalorder %s5213_s30, %s5213_s30 }
  0x43   : > { %p5216_p11 = pnand %p5214_p10, %p5592_p8  ;;  %p5223_p2 = por %p5222_p0, %p5221_p13 }
  0x45   : > { %p5217_p12 = pneg %p5216_p11 }
  0x47   : > { %p5224_p5 = pnand %p5223_p2, %p5217_p12 }
  0x49   : > { %5227 = shalt.err (!%p5224_p5)
}
  0x4a   : > { %s5453_s12 = smov 384   ;;  %s5454_s10 = smov 24  }
  0x4b   : > { %4645 = dma.hbm_to_vmem [thread:$0]  (!%p5578_p6), %s6118_s3, 12288, %s5574_s17, [#allocation12], %s5453_s12, %s5453_s12, %s5454_s10  }
  0x4c   : > { %s5228_s29 = scalar_lea.hbm %s6098_s9, 16384 }
  0x4d   : > { %p5229_p7 = scmp.ne.s32.totalorder %s6098_s9, %s5228_s29  ;;  %p5235_p1 = scmp.lt.u32.totalorder %s5228_s29, %s6098_s9 }
  0x4f   : > { %p5231_p9 = pnand %p5229_p7, %p5592_p8 }
  0x51   : > { %p5232_p4 = pneg %p5231_p9 }
  0x53   : > { %p5237_p3 = pnand %p5235_p1, %p5232_p4 }
  0x55   : > { %5240 = shalt.err (!%p5237_p3)
}
  0x56   : > { %s5241_s17 = scalar_lea.vmem %s5582_s20, 16384  ;;  %p5249_p13 = scmp.lt.s32.totalorder %s5582_s20, %s5582_s20 }
  0x57   : > { %p5242_p10 = scmp.ne.s32.totalorder %s5582_s20, %s5241_s17  ;;  %p5250_p0 = scmp.lt.s32.totalorder %s5241_s17, %s5241_s17 }
  0x59   : > { %p5244_p11 = pnand %p5242_p10, %p5592_p8  ;;  %p5251_p2 = por %p5250_p0, %p5249_p13 }
  0x5b   : > { %p5245_p12 = pneg %p5244_p11 }
  0x5d   : > { %p5252_p5 = pnand %p5251_p2, %p5245_p12 }
  0x5f   : > { %5255 = shalt.err (!%p5252_p5)
}
  0x60   : > { %s5455_s12 = smov 512   ;;  %s5456_s1 = smov 32  }
  0x61   : > { %4651 = dma.hbm_to_vmem [thread:$0]  (!%p5578_p6), %s6098_s9, 16384, %s5582_s20, [#allocation15], %s5455_s12, %s5455_s12, %s5456_s1  }
  0x62   : > { %s5457_s24 = smov [#allocation10]   ;;  %s5458_s23 = smov [#allocation13]  }
  0x63   : > { %s365_s13 = sshll.u32 %s5457_s24, 4  ;;  %s391_s29 = sshll.u32 %s5458_s23, 4  ;;  %s366_s13 = int_to_ptr.vmem [resolvable:$true] %s365_s13  ;;  %s392_s29 = int_to_ptr.vmem [resolvable:$true] %s391_s29 }
  0x64   : > { %s5256_s30 = scalar_lea.hbm %s6091_s2, 32 }
  0x65   : > { %p5257_p7 = scmp.ne.s32.totalorder %s6091_s2, %s5256_s30  ;;  %p5263_p1 = scmp.lt.u32.totalorder %s5256_s30, %s6091_s2 }
  0x67   : > { %p5259_p9 = pnand %p5257_p7, %p5592_p8 }
  0x69   : > { %p5260_p4 = pneg %p5259_p9 }
  0x6b   : > { %p5265_p3 = pnand %p5263_p1, %p5260_p4 }
  0x6d   : > { %5268 = shalt.err (!%p5265_p3)
}
  0x6e   : > { %s5269_s20 = scalar_lea.vmem %s366_s13, 32  ;;  %p5277_p13 = scmp.lt.s32.totalorder %s366_s13, %s366_s13 }
  0x6f   : > { %p5270_p10 = scmp.ne.s32.totalorder %s366_s13, %s5269_s20  ;;  %p5278_p0 = scmp.lt.s32.totalorder %s5269_s20, %s5269_s20 }
  0x71   : > { %p5272_p11 = pnand %p5270_p10, %p5592_p8  ;;  %p5279_p2 = por %p5278_p0, %p5277_p13 }
  0x73   : > { %p5273_p12 = pneg %p5272_p11 }
  0x75   : > { %p5280_p5 = pnand %p5279_p2, %p5273_p12 }
  0x77   : > { %5283 = shalt.err (!%p5280_p5)
}
  0x78   : > { %4642 = dma.hbm_to_vmem [thread:$0]  (!%p5578_p6), %s6091_s2, 32, %s366_s13, [#allocation9]  }
  0x79   : > { %s5284_s1 = scalar_lea.hbm %s6094_s5, 4096 }
  0x7a   : > { %p5285_p7 = scmp.ne.s32.totalorder %s6094_s5, %s5284_s1  ;;  %p5291_p1 = scmp.lt.u32.totalorder %s5284_s1, %s6094_s5 }
  0x7c   : > { %p5287_p9 = pnand %p5285_p7, %p5592_p8 }
  0x7e   : > { %p5288_p4 = pneg %p5287_p9 }
  0x80   : > { %p5293_p3 = pnand %p5291_p1, %p5288_p4 }
  0x82   : > { %5296 = shalt.err (!%p5293_p3)
}
  0x83   : > { %s5297_s19 = scalar_lea.vmem %s392_s29, 4096  ;;  %p5305_p13 = scmp.lt.s32.totalorder %s392_s29, %s392_s29 }
  0x84   : > { %p5298_p10 = scmp.ne.s32.totalorder %s392_s29, %s5297_s19  ;;  %p5306_p0 = scmp.lt.s32.totalorder %s5297_s19, %s5297_s19 }
  0x86   : > { %p5300_p11 = pnand %p5298_p10, %p5592_p8  ;;  %p5307_p2 = por %p5306_p0, %p5305_p13 }
  0x88   : > { %p5301_p12 = pneg %p5300_p11 }
  0x8a   : > { %p5308_p5 = pnand %p5307_p2, %p5301_p12 }
  0x8c   : > { %5311 = shalt.err (!%p5308_p5)
}
  0x8d   : > { %s5459_s13 = smov 128   ;;  %s5460_s21 = smov 8  }
  0x8e   : > { %4648 = dma.hbm_to_vmem [thread:$0]  (!%p5578_p6), %s6094_s5, 4096, %s392_s29, [#allocation12], %s5459_s13, %s5459_s13, %s5460_s21  }
  0x8f   : > { %s5461_s20 = smov [#allocation16]   ;;  %s5312_s8 = scalar_lea.hbm %s6100_s11, 16384 }
  0x90   : > { %s429_s3 = sshll.u32 %s5461_s20, 4  ;;  %p5313_p7 = scmp.ne.s32.totalorder %s6100_s11, %s5312_s8  ;;  %s430_s3 = int_to_ptr.vmem [resolvable:$true] %s429_s3 }
  0x91   : > { %p5319_p1 = scmp.lt.u32.totalorder %s5312_s8, %s6100_s11 }
  0x92   : > { %p5315_p9 = pnand %p5313_p7, %p5592_p8 }
  0x94   : > { %p5316_p4 = pneg %p5315_p9 }
  0x96   : > { %p5321_p3 = pnand %p5319_p1, %p5316_p4 }
  0x98   : > { %5324 = shalt.err (!%p5321_p3)
}
  0x99   : > { %s5325_s29 = scalar_lea.vmem %s430_s3, 16384  ;;  %p5333_p13 = scmp.lt.s32.totalorder %s430_s3, %s430_s3 }
  0x9a   : > { %p5326_p10 = scmp.ne.s32.totalorder %s430_s3, %s5325_s29  ;;  %p5334_p0 = scmp.lt.s32.totalorder %s5325_s29, %s5325_s29 }
  0x9c   : > { %p5328_p11 = pnand %p5326_p10, %p5592_p8  ;;  %p5335_p2 = por %p5334_p0, %p5333_p13 }
  0x9e   : > { %p5329_p12 = pneg %p5328_p11 }
  0xa0   : > { %p5336_p5 = pnand %p5335_p2, %p5329_p12 }
  0xa2   : > { %5339 = shalt.err (!%p5336_p5)
}
  0xa3   : > { %4654 = dma.hbm_to_vmem [thread:$0]  (!%p5578_p6), %s6100_s11, 16384, %s430_s3, [#allocation15], %s5459_s13, %s5459_s13, %s5460_s21  }
  0xa4   : > { %s4142_s16 = sadd.s32 4294967294, %s5448_s28   ;;  %s5710_s18 = sadd.s32 1, %s5448_s28  }
  0xa5   : > { %s36_s30 = ssub.s32 %s5448_s28, %s5710_s18  ;;  %s39_s17 = sadd.s32 1, %s5444_s27 }
  0xa6   : > { %p37_p8 = scmp.eq.s32.totalorder %s36_s30, 0  ;;  %p46_p7 = scmp.ne.s32.totalorder %s5444_s27, %s5440_s26 }
  0xa7   : > { %p47_p9 = scmp.eq.s32.totalorder %s5448_s28, 0  ;;  %p52_p4 = scmp.ne.s32.totalorder %s5440_s26, %s5436_s25 }
  0xa8   : > { %s5721_s20 = scalar_select %p37_p8, %s5444_s27, %s39_s17  }
  0xa9   : > { %p5723_p1 = por %p47_p9, %p46_p7  ;;  %p6120_p3 = scmp.eq.s32.totalorder %s5562_s14, 0 }
  0xaa   : > { %p328_p10 = scmp.eq.s32.totalorder %s5562_s14, 1  ;;  %p334_p11 = scmp.eq.s32.totalorder %s4142_s16, 1 }
  0xab   : > { %p5729_p6 = por %p6120_p3, %p52_p4  ;;  %p4669_p12 = scmp.lt.s32.totalorder %s5448_s28, 2 }
  0xac   : > { %s446_s21 = sand.u32 1, %s5444_s27   ;;  %p5736_p13 = por %p328_p10, %p46_p7 }
  0xad   : > { %p5740_p0 = por %p334_p11, %p52_p4  ;;  %s4151_s8 = sshll.u32 %s446_s21, 5 }
  0xae   : > { %s6122_s3 = scalar_select %p5736_p13, 1, 0 }
  0xaf   : > { %s6123_s7 = scalar_select %p5740_p0, 1, 0 }
  0xb0   : > { %s4554_s1 = sshll.u32 %s5448_s28, 9  ;;  %s450_s29 = scalar_lea.vmem [#allocation5], %s4151_s8 }
  0xb1   : > { %s5748_s24 = scalar_lea.hbm %s6089_s0, %s4554_s1  ;;  %s457_s23 = sshll.u32 %s450_s29, 4  ;;  %s5750_s23 = int_to_ptr.vmem [resolvable:$true] %s457_s23 }
  0xb2   : > { %p5754_p2 = pnand %p4669_p12, %p5723_p1  ;;  %s5758_s16 = scalar_lea.sflag [#allocation6], %s446_s21 }
  0xb3   : > { %s5340_s30 = scalar_lea.hbm %s5748_s24, 512  ;;  %s5345_s12 = scalar_lea.hbm %s6089_s0, 1024 }
  0xb4   : > { %p5341_p5 = scmp.ne.s32.totalorder %s5748_s24, %s5340_s30  ;;  %p5342_p8 = pneg %p5754_p2 }
  0xb5   : > { %p5346_p4 = scmp.lt.u32.totalorder %s5748_s24, %s6089_s0  ;;  %p5347_p1 = scmp.lt.u32.totalorder %s5345_s12, %s5340_s30 }
  0xb6   : > { %p5343_p7 = pnand %p5342_p8, %p5341_p5  ;;  %p5349_p10 = scmp.lt.u32.totalorder %s5340_s30, %s5748_s24 }
  0xb7   : > { %p5348_p3 = por %p5347_p1, %p5346_p4 }
  0xb8   : > { %p5344_p9 = pneg %p5343_p7 }
  0xb9   : > { %p5350_p11 = por %p5349_p10, %p5348_p3 }
  0xbb   : > { %p5351_p12 = pnand %p5350_p11, %p5344_p9 }
  0xbd   : > { %5354 = shalt.err (!%p5351_p12)
}
  0xbe   : > { %s5355_s21 = scalar_lea.vmem %s5750_s23, 512  ;;  %s5462_s22 = smov [#allocation5]  }
  0xbf   : > { %p5356_p5 = scmp.ne.s32.totalorder %s5750_s23, %s5355_s21  ;;  %s5360_s29 = sshll.u32 %s5462_s22, 4  ;;  %s5361_s29 = int_to_ptr.vmem [resolvable:$false] %s5360_s29 }
  0xc0   : > { %s5362_s17 = scalar_lea.vmem %s5361_s29, 1024  ;;  %p5363_p13 = scmp.lt.s32.totalorder %s5750_s23, %s5361_s29 }
  0xc1   : > { %p5358_p7 = pnand %p5356_p5, %p5342_p8  ;;  %p5364_p4 = scmp.lt.s32.totalorder %s5362_s17, %s5355_s21 }
  0xc3   : > { %p5359_p0 = pneg %p5358_p7  ;;  %p5365_p1 = por %p5364_p4, %p5363_p13 }
  0xc5   : > { %p5366_p3 = pnand %p5365_p1, %p5359_p0 }
  0xc7   : > { %5369 = shalt.err (!%p5366_p3)
}
  0xc8   : > { %s5463_s30 = smov 256   ;;  %s5464_s8 = smov 16  }
  0xc9   : > { %4658 = dma.hbm_to_vmem [thread:$0]  (!%p5754_p2), %s5748_s24, 512, %s5750_s23, %s5758_s16, %s5463_s30, %s5463_s30, %s5464_s8  }
  0xca   : > { %p6125_p8 = scmp.ne.s32.totalorder %s6114_s15, 0 }
  0xcb   : > { %s5789_s12 = sand.u32 (!%p6125_p8), 1, %s5440_s26  }
  0xcc   : > { %469 = sbr.rel (%p6125_p8) target bundleno = 2383 (0x94f), region = 72  ;;  %s4155_s1 = sshll.u32 (!%p6125_p8), %s5789_s12, 5 }
  0xcd   : > { %s472_s10 = scalar_lea.sflag (!%p6125_p8), [#allocation6], %s5789_s12  ;;  %s5795_s21 = scalar_lea.vmem (!%p6125_p8), [#allocation5], %s4155_s1 }
  0xd3   : > { %5415 = dma.done.wait (%p5729_p6), %s472_s10, 512  }
  0xd4   : > { %5417 = vsyncadd (%p5729_p6), %s472_s10, 4294966784  ;;  %p6126_p13 = scmp.eq.s32.totalorder %s5562_s14, 0 }
  0xd6   : > { %5419 = dma.done.wait (%p6126_p13), [#allocation9], 64   ;;  %p6127_p0 = pmov %p6126_p13 }
  0xd8   : > { %5421 = vsyncadd (%p6127_p0), [#allocation9], 4294967232  ;;  %p6128_p2 = pmov %p6127_p0 }
  0xd9   : > { %p6129_p9 = pmov %p6127_p0 }
  0xda   : > { %5423 = dma.done.wait (%p6128_p2), [#allocation12], 16384  }
  0xdb   : > { %5425 = vsyncadd (%p6129_p9), [#allocation12], 4294950912  ;;  %p6130_p10 = pmov %p6127_p0 }
  0xdc   : > { %p6131_p11 = pmov %p6127_p0 }
  0xdd   : > { %5427 = dma.done.wait (%p6130_p10), [#allocation15], 32768  }
  0xde   : > { %5429 = vsyncadd (%p6131_p11), [#allocation15], 4294934528  ;;  %v5814_v0 = vld [vmem:[%s5795_s21] sm:$0xff]  ;;  %v5817_v1 = vld [vmem:[%s5795_s21 + $0x8] sm:$0xff]  ;;  %v588_v59 = vlaneseq  ;;  %vm5466_vm0 = vmmov 0   ;;  %vm1458_vm1 = vcmask 130048  }
  0xdf   : > { %v5820_v2 = vld [vmem:[%s5795_s21 + $0x10] sm:$0xff]  ;;  %v547_v3 = vadd.f32 %v5817_v1, %v5814_v0  ;;  %v556_v4 = vmul.f32 %v5814_v0, %v5814_v0  ;;  %v557_v5 = vmul.f32 %v5817_v1, %v5817_v1  ;;  %v5829_v6 = vld [vmem:[%s5795_s21 + $0x18] sm:$0xff]  ;;  %v4728_v9 = vld [vmem:[#allocation11 + $0x4] ss:$24 sps:$4 sm:$0xff]   ;;  %s6132_s22 = sld [smem:[#allocation25_spill]]  ;;  %s6133_s30 = sld [smem:[#allocation26_spill]] }
  0xe0   : > { %v558_v7 = vmul.f32 %v5820_v2, %v5820_v2  ;;  %v559_v8 = vmul.f32 %v5829_v6, %v5829_v6  ;;  %v4730_v10 = vld [vmem:[#allocation11] ss:$24 sps:$4 sm:$0xff]   ;;  %v550_v12 = vadd.f32 %v5829_v6, %v5820_v2  ;;  %v4731_v13 = vld [vmem:[#allocation11 + $0x34] ss:$24 sps:$4 sm:$0xff]   ;;  %1228 = vmatprep.subr.bf16.mxu1 %v4728_v9  ;;  %v4733_v15 = vld [vmem:[#allocation11 + $0x30] ss:$24 sps:$4 sm:$0xff]  }
  0xe1   : > { %548 = vadd.xlane.f32.xlu0 %v547_v3  ;;  %v560_v11 = vadd.f32 %v557_v5, %v556_v4  ;;  %1229 = vmatpush1.bf16.msra.mxu1 %v4730_v10  ;;  %v4734_v16 = vld [vmem:[#allocation11 + $0x64] ss:$24 sps:$4 sm:$0xff]   ;;  %v4736_v17 = vld [vmem:[#allocation11 + $0x60] ss:$24 sps:$4 sm:$0xff]   ;;  %v4737_v18 = vld [vmem:[#allocation11 + $0x94] ss:$24 sps:$4 sm:$0xff]  }
  0xe2   : > { %v563_v14 = vadd.f32 %v559_v8, %v558_v7  ;;  %1230 = vmatprep.subr.bf16.mxu1 %v4731_v13  ;;  %v4739_v19 = vld [vmem:[#allocation11 + $0x90] ss:$24 sps:$4 sm:$0xff]   ;;  %v4740_v20 = vld [vmem:[#allocation11 + $0xc4] ss:$24 sps:$4 sm:$0xff]   ;;  %v4742_v21 = vld [vmem:[#allocation11 + $0xc0] ss:$24 sps:$4 sm:$0xff]  }
  0xe3   : > { %561 = vadd.xlane.f32.xlu1 %v560_v11  ;;  %v4743_v22 = vld [vmem:[#allocation11 + $0xf4] ss:$24 sps:$4 sm:$0xff]   ;;  %v4745_v23 = vld [vmem:[#allocation11 + $0xf0] ss:$24 sps:$4 sm:$0xff]   ;;  %v4746_v24 = vld [vmem:[#allocation11 + $0x124] ss:$24 sps:$4 sm:$0xff]  }
  0xe4   : > { %v4748_v25 = vld [vmem:[#allocation11 + $0x120] ss:$24 sps:$4 sm:$0xff]   ;;  %v4749_v26 = vld [vmem:[#allocation11 + $0x154] ss:$24 sps:$4 sm:$0xff]   ;;  %v4751_v27 = vld [vmem:[#allocation11 + $0x150] ss:$24 sps:$4 sm:$0xff]  }
  0xe5   : > { %551 = vadd.xlane.f32.xlu0 %v550_v12  ;;  %1231 = vmatpush1.bf16.msra.mxu1 %v4733_v15  ;;  %v4752_v28 = vld [vmem:[#allocation11 + $0x184] ss:$24 sps:$4 sm:$0xff]   ;;  %v4754_v29 = vld [vmem:[#allocation11 + $0x180] ss:$24 sps:$4 sm:$0xff]   ;;  %v4755_v30 = vld [vmem:[#allocation11 + $0x1b4] ss:$24 sps:$4 sm:$0xff]  }
  0xe6   : > { %1232 = vmatprep.subr.bf16.mxu1 %v4734_v16  ;;  %v4757_v31 = vld [vmem:[#allocation11 + $0x1b0] ss:$24 sps:$4 sm:$0xff]   ;;  %v4758_v32 = vld [vmem:[#allocation11 + $0x1e4] ss:$24 sps:$4 sm:$0xff]   ;;  %v4760_v33 = vld [vmem:[#allocation11 + $0x1e0] ss:$24 sps:$4 sm:$0xff]  }
  0xe7   : > { %564 = vadd.xlane.f32.xlu1 %v563_v14  ;;  %v4761_v34 = vld [vmem:[#allocation11 + $0x214] ss:$24 sps:$4 sm:$0xff]   ;;  %v4763_v35 = vld [vmem:[#allocation11 + $0x210] ss:$24 sps:$4 sm:$0xff]   ;;  %v4764_v36 = vld [vmem:[#allocation11 + $0x244] ss:$24 sps:$4 sm:$0xff]  }
  0xe8   : > { %v4766_v37 = vld [vmem:[#allocation11 + $0x240] ss:$24 sps:$4 sm:$0xff]   ;;  %v4767_v38 = vld [vmem:[#allocation11 + $0x274] ss:$24 sps:$4 sm:$0xff]   ;;  %v4769_v39 = vld [vmem:[#allocation11 + $0x270] ss:$24 sps:$4 sm:$0xff]  }
  0xe9   : > { %1233 = vmatpush1.bf16.msra.mxu1 %v4736_v17  ;;  %v4770_v40 = vld [vmem:[#allocation11 + $0x2a4] ss:$24 sps:$4 sm:$0xff]   ;;  %v4772_v41 = vld [vmem:[#allocation11 + $0x2a0] ss:$24 sps:$4 sm:$0xff]   ;;  %v4773_v42 = vld [vmem:[#allocation11 + $0x2d4] ss:$24 sps:$4 sm:$0xff]  }
  0xea   : > { %1234 = vmatprep.subr.bf16.mxu1 %v4737_v18  ;;  %v4775_v43 = vld [vmem:[#allocation11 + $0x2d0] ss:$24 sps:$4 sm:$0xff]   ;;  %v4778_v44 = vld [vmem:[#allocation11 + $0xc] ss:$24 sps:$4 sm:$0xff]   ;;  %v5837_v62 = vshrl.u32 %v588_v59, 7  ;;  %s6135_s24 = sld [smem:[#allocation28_spill]] }
  0xeb   : > { %v586_v4 = vld [vmem:[#allocation8] sm:$0x3]  ;;  %v602_v11 = vld [vmem:[#allocation10] sm:$0x3]  ;;  %v4824_v59 = vld [vmem:[#allocation11 + $0x10] ss:$24 sps:$4 sm:$0xff]  }
  0xec   : > { %v5840_v63 = vsub.s32 1, %v5837_v62  ;;  %v5843_v3 = vsub.s32 0, %v5837_v62  ;;  %s541_s23 = scalar_lea.vmem [#allocation17], %s4155_s1  ;;  %s4555_s16 = sshll.u32 %s5562_s14, 9 }
  0xed   : > { %1235 = vmatpush1.bf16.msra.mxu1 %v4739_v19  ;;  %s4012_s19 = sshll.u32 %s541_s23, 4  ;;  %s6136_s29 = sld [smem:[#allocation29_spill]]  ;;  %s6037_s19 = int_to_ptr.vmem [resolvable:$true] %s4012_s19 }
  0xee   : > { %1236 = vmatprep.subr.bf16.mxu1 %v4740_v20  ;;  %v595_v10 = vrot.slane %v586_v4, %v5840_v63  ;;  %v591_v13 = vrot.slane %v586_v4, %v5843_v3  ;;  %v611_v17 = vrot.slane %v602_v11, %v5840_v63  ;;  %v607_v18 = vrot.slane %v602_v11, %v5843_v3  ;;  %v4832_v4 = vld [vmem:[#allocation11 + $0x74] ss:$24 sps:$4 sm:$0xff]   ;;  %v4841_v11 = vld [vmem:[#allocation11 + $0x104] ss:$24 sps:$4 sm:$0xff]   ;;  %s3999_s17 = scalar_lea.sflag [#allocation7], %s5789_s12  ;;  %p6137_p12 = scmp.ne.s32.totalorder %s6122_s3, 0 }
  0xef   : > { %s5468_s8 = smov [#allocation17]  }
  0xf0   : > { %s5374_s10 = sshll.u32 %s5468_s8, 4  ;;  %s5375_s10 = int_to_ptr.vmem [resolvable:$false] %s5374_s10 }
  0xf1   : > { %1237 = vmatpush1.bf16.msra.mxu1 %v4742_v21  ;;  %p5377_p4 = scmp.lt.s32.totalorder %s6037_s19, %s5375_s10 }
  0xf2   : > { %1238 = vmatprep.subr.bf16.mxu1 %v4743_v22 }
  0xf3   : > { %s6044_s14 = scalar_lea.hbm %s6136_s29, %s4555_s16 }
  0xf5   : > { %1239 = vmatpush1.bf16.msra.mxu1 %v4745_v23 }
  0xf6   : > { %1240 = vmatprep.subr.bf16.mxu1 %v4746_v24 }
  0xf9   : > { %1241 = vmatpush1.bf16.msra.mxu1 %v4748_v25 }
  0xfa   : > { %1242 = vmatprep.subr.bf16.mxu1 %v4749_v26 }
  0xfd   : > { %1243 = vmatpush1.bf16.msra.mxu1 %v4751_v27 }
  0xfe   : > { %1244 = vmatprep.subr.bf16.mxu1 %v4752_v28 }
 0x101   : > { %1245 = vmatpush1.bf16.msra.mxu1 %v4754_v29  ;;  %v4779_v29 = vld [vmem:[#allocation11 + $0x38] ss:$24 sps:$4 sm:$0xff]  }
 0x102   : > { %1246 = vmatprep.subr.bf16.mxu1 %v4755_v30  ;;  %v4784_v30 = vld [vmem:[#allocation11 + $0x6c] ss:$24 sps:$4 sm:$0xff]  }
 0x105   : > { %1247 = vmatpush1.bf16.msra.mxu1 %v4757_v31  ;;  %v4782_v31 = vld [vmem:[#allocation11 + $0x68] ss:$24 sps:$4 sm:$0xff]  }
 0x106   : > { %1248 = vmatprep.subr.bf16.mxu1 %v4758_v32  ;;  %v4787_v32 = vld [vmem:[#allocation11 + $0x9c] ss:$24 sps:$4 sm:$0xff]  }
 0x109   : > { %1249 = vmatpush1.bf16.msra.mxu1 %v4760_v33  ;;  %v4785_v33 = vld [vmem:[#allocation11 + $0x98] ss:$24 sps:$4 sm:$0xff]  }
 0x10a   : > { %1250 = vmatprep.subr.bf16.mxu1 %v4761_v34  ;;  %v4790_v34 = vld [vmem:[#allocation11 + $0xcc] ss:$24 sps:$4 sm:$0xff]  }
 0x10d   : > { %1251 = vmatpush1.bf16.msra.mxu1 %v4763_v35  ;;  %v4788_v35 = vld [vmem:[#allocation11 + $0xc8] ss:$24 sps:$4 sm:$0xff]  }
 0x10e   : > { %1252 = vmatprep.subr.bf16.mxu1 %v4764_v36  ;;  %v4793_v36 = vld [vmem:[#allocation11 + $0xfc] ss:$24 sps:$4 sm:$0xff]  }
 0x111   : > { %1253 = vmatpush1.bf16.msra.mxu1 %v4766_v37  ;;  %v4791_v37 = vld [vmem:[#allocation11 + $0xf8] ss:$24 sps:$4 sm:$0xff]  }
 0x112   : > { %1254 = vmatprep.subr.bf16.mxu1 %v4767_v38  ;;  %v4796_v38 = vld [vmem:[#allocation11 + $0x12c] ss:$24 sps:$4 sm:$0xff]  }
 0x115   : > { %1255 = vmatpush1.bf16.msra.mxu1 %v4769_v39  ;;  %v4794_v39 = vld [vmem:[#allocation11 + $0x128] ss:$24 sps:$4 sm:$0xff]  }
 0x116   : > { %1256 = vmatprep.subr.bf16.mxu1 %v4770_v40  ;;  %v4799_v40 = vld [vmem:[#allocation11 + $0x15c] ss:$24 sps:$4 sm:$0xff]  }
 0x119   : > { %1257 = vmatpush1.bf16.msra.mxu1 %v4772_v41  ;;  %v4797_v41 = vld [vmem:[#allocation11 + $0x158] ss:$24 sps:$4 sm:$0xff]  }
 0x11a   : > { %1258 = vmatprep.subr.bf16.mxu1 %v4773_v42  ;;  %v4802_v42 = vld [vmem:[#allocation11 + $0x18c] ss:$24 sps:$4 sm:$0xff]  }
 0x11d   : > { %1259 = vmatpush1.bf16.msra.mxu1 %v4775_v43  ;;  %v4800_v43 = vld [vmem:[#allocation11 + $0x188] ss:$24 sps:$4 sm:$0xff]  }
 0x11e   : > { %1271 = vmatprep.subr.bf16.mxu1 %v4778_v44  ;;  %v4805_v44 = vld [vmem:[#allocation11 + $0x1bc] ss:$24 sps:$4 sm:$0xff]  }
 0x16e   : > { %v549_v45 = vpop.xlane.xlu0 %548 }
 0x16f   : > { %v554_v46 = vmul.f32 0.00390625, %v549_v45  ;;  %v4803_v45 = vld [vmem:[#allocation11 + $0x1b8] ss:$24 sps:$4 sm:$0xff]  }
 0x170   : > { %v562_v47 = vpop.xlane.xlu1 %561 }
 0x171   : > { %v566_v48 = vmul.f32 0.00390625, %v562_v47  ;;  %v568_v49 = vmul.f32 %v554_v46, %v554_v46  ;;  %v574_v7 = vsub.f32 %v5814_v0, %v554_v46  ;;  %v575_v8 = vsub.f32 %v5817_v1, %v554_v46  ;;  %v4808_v46 = vld [vmem:[#allocation11 + $0x1ec] ss:$24 sps:$4 sm:$0xff]   ;;  %v4806_v47 = vld [vmem:[#allocation11 + $0x1e8] ss:$24 sps:$4 sm:$0xff]  }
 0x172   : > { %v552_v50 = vpop.xlane.xlu0 %551 }
 0x173   : > { %v570_v51 = vsub.f32 %v566_v48, %v568_v49  ;;  %v555_v52 = vmul.f32 0.00390625, %v552_v50  ;;  %v4811_v48 = vld [vmem:[#allocation11 + $0x21c] ss:$24 sps:$4 sm:$0xff]   ;;  %v4809_v49 = vld [vmem:[#allocation11 + $0x218] ss:$24 sps:$4 sm:$0xff]  }
 0x174   : > { %v565_v53 = vpop.xlane.xlu1 %564  ;;  %v4814_v50 = vld [vmem:[#allocation11 + $0x24c] ss:$24 sps:$4 sm:$0xff]  }
 0x175   : > { %v572_v54 = vmax.f32 %v570_v51, 0.0  ;;  %v567_v55 = vmul.f32 0.00390625, %v565_v53  ;;  %v569_v56 = vmul.f32 %v555_v52, %v555_v52  ;;  %v576_v14 = vsub.f32 %v5820_v2, %v555_v52  ;;  %v4776_v2 = vld [vmem:[#allocation11 + $0x8] ss:$24 sps:$4 sm:$0xff]   ;;  %v4815_v53 = vld [vmem:[#allocation11 + $0x278] ss:$24 sps:$4 sm:$0xff]  }
 0x176   : > { %v577_v15 = vsub.f32 %v5829_v6, %v555_v52  ;;  %v4781_v6 = vld [vmem:[#allocation11 + $0x3c] ss:$24 sps:$4 sm:$0xff]   ;;  %v4812_v51 = vld [vmem:[#allocation11 + $0x248] ss:$24 sps:$4 sm:$0xff]  }
 0x177   : > { %v578_v57 = vadd.f32 1e-06, %v572_v54  ;;  %v571_v58 = vsub.f32 %v567_v55, %v569_v56  ;;  %v4817_v52 = vld [vmem:[#allocation11 + $0x27c] ss:$24 sps:$4 sm:$0xff]   ;;  %v4820_v54 = vld [vmem:[#allocation11 + $0x2ac] ss:$24 sps:$4 sm:$0xff]  }
 0x178   : > { %v4818_v55 = vld [vmem:[#allocation11 + $0x2a8] ss:$24 sps:$4 sm:$0xff]   ;;  %v4823_v56 = vld [vmem:[#allocation11 + $0x2dc] ss:$24 sps:$4 sm:$0xff]  }
 0x179   : > { %5112 = vrsqrt.f32 %v578_v57  ;;  %v573_v60 = vmax.f32 %v571_v58, 0.0  ;;  %v4821_v57 = vld [vmem:[#allocation11 + $0x2d8] ss:$24 sps:$4 sm:$0xff]   ;;  %v4826_v58 = vld [vmem:[#allocation11 + $0x14] ss:$24 sps:$4 sm:$0xff]  }
 0x17b   : > { %v579_v61 = vadd.f32 1e-06, %v573_v60  ;;  %v4829_v60 = vld [vmem:[#allocation11 + $0x44] ss:$24 sps:$4 sm:$0xff]  }
 0x17d   : > { %5114 = vrsqrt.f32 %v579_v61  ;;  %v4827_v61 = vld [vmem:[#allocation11 + $0x40] ss:$24 sps:$4 sm:$0xff]  }
 0x183   : > { %v5113_v5 = vpop.eup %5112 }
 0x184   : > { %v583_v9 = vmul.f32 %v5113_v5, %v575_v8  ;;  %v582_v12 = vmul.f32 %v5113_v5, %v574_v7  ;;  %v4830_v5 = vld [vmem:[#allocation11 + $0x70] ss:$24 sps:$4 sm:$0xff]   ;;  %v4835_v7 = vld [vmem:[#allocation11 + $0xa4] ss:$24 sps:$4 sm:$0xff]   ;;  %v4833_v8 = vld [vmem:[#allocation11 + $0xa0] ss:$24 sps:$4 sm:$0xff]  }
 0x186   : > { %v599_v0 = vmul.f32 %v595_v10, %v583_v9  ;;  %v598_v1 = vmul.f32 %v591_v13, %v582_v12  ;;  %v4838_v9 = vld [vmem:[#allocation11 + $0xd4] ss:$24 sps:$4 sm:$0xff]   ;;  %v4839_v12 = vld [vmem:[#allocation11 + $0x100] ss:$24 sps:$4 sm:$0xff]  }
 0x187   : > { %v5115_v16 = vpop.eup %5114 }
 0x188   : > { %v585_v19 = vmul.f32 %v5115_v16, %v577_v15  ;;  %v584_v20 = vmul.f32 %v5115_v16, %v576_v14  ;;  %v615_v23 = vadd.f32 %v611_v17, %v599_v0  ;;  %v614_v25 = vadd.f32 %v607_v18, %v598_v1  ;;  %v4842_v14 = vld [vmem:[#allocation11 + $0x130] ss:$24 sps:$4 sm:$0xff]   ;;  %v4847_v15 = vld [vmem:[#allocation11 + $0x164] ss:$24 sps:$4 sm:$0xff]   ;;  %v4845_v16 = vld [vmem:[#allocation11 + $0x160] ss:$24 sps:$4 sm:$0xff]  }
 0x189   : > { %v4851_v0 = vld [vmem:[#allocation11 + $0x1c0] ss:$24 sps:$4 sm:$0xff]   ;;  %v4854_v1 = vld [vmem:[#allocation11 + $0x1f0] ss:$24 sps:$4 sm:$0xff]  }
 0x18a   : > { %v601_v21 = vmul.f32 %v595_v10, %v585_v19  ;;  %v600_v22 = vmul.f32 %v591_v13, %v584_v20  ;;  %v4836_v10 = vld [vmem:[#allocation11 + $0xd0] ss:$24 sps:$4 sm:$0xff]   ;;  %v4844_v13 = vld [vmem:[#allocation11 + $0x134] ss:$24 sps:$4 sm:$0xff]   ;;  %v4853_v19 = vld [vmem:[#allocation11 + $0x1c4] ss:$24 sps:$4 sm:$0xff]  }
 0x18b   : > { %v4856_v20 = vld [vmem:[#allocation11 + $0x1f4] ss:$24 sps:$4 sm:$0xff]  }
 0x18c   : > { %v617_v24 = vadd.f32 %v611_v17, %v601_v21  ;;  %v616_v26 = vadd.f32 %v607_v18, %v600_v22  ;;  %v4850_v17 = vld [vmem:[#allocation11 + $0x194] ss:$24 sps:$4 sm:$0xff]   ;;  %v4848_v18 = vld [vmem:[#allocation11 + $0x190] ss:$24 sps:$4 sm:$0xff]   ;;  %v4859_v21 = vld [vmem:[#allocation11 + $0x224] ss:$24 sps:$4 sm:$0xff]  }
 0x18d   : > { %v4857_v22 = vld [vmem:[#allocation11 + $0x220] ss:$24 sps:$4 sm:$0xff]  }
 0x18e   : > { %v5853_v27 = vpack.c.bf16 %v617_v24, %v615_v23  ;;  %v5855_v28 = vpack.c.bf16 %v616_v26, %v614_v25  ;;  %v4862_v23 = vld [vmem:[#allocation11 + $0x254] ss:$24 sps:$4 sm:$0xff]   ;;  %v4860_v24 = vld [vmem:[#allocation11 + $0x250] ss:$24 sps:$4 sm:$0xff]   ;;  %v4865_v25 = vld [vmem:[#allocation11 + $0x284] ss:$24 sps:$4 sm:$0xff]  }
 0x18f   : > { %v4863_v26 = vld [vmem:[#allocation11 + $0x280] ss:$24 sps:$4 sm:$0xff]  }
 0x190   : > { %1260 = vmatprep.mubr.bf16.mxu1 %v5853_v27 }
 0x191   : > { %1261 = vmatmul.mubr.bf16.vlgmr.msra.gmra.mrb[0].mxu1 %v5855_v28 }
 0x192   : > { %1272 = vmatpush1.bf16.msra.mxu1 %v4776_v2  ;;  %1303 = vmatprep.mubr.bf16.mxu1 %v5853_v27  ;;  %v4866_v2 = vld [vmem:[#allocation11 + $0x2b0] ss:$24 sps:$4 sm:$0xff]  }
 0x193   : > { %1273 = vmatprep.subr.bf16.mxu1 %v4781_v6  ;;  %v4871_v6 = vld [vmem:[#allocation11 + $0x2e4] ss:$24 sps:$4 sm:$0xff]  }
 0x196   : > { %1274 = vmatpush1.bf16.msra.mxu1 %v4779_v29  ;;  %v4869_v29 = vld [vmem:[#allocation11 + $0x2e0] ss:$24 sps:$4 sm:$0xff]  }
 0x197   : > { %1275 = vmatprep.subr.bf16.mxu1 %v4784_v30  ;;  %v5465_v30 = vmov 0.0  }
 0x198   : > { %4564 = vmatprep.subr.bf16.mxu0 %v5465_v30  ;;  %4566 = vmatprep.mubr.msk.bf16.mxu0 %vm5466_vm0, %v5465_v30 }
 0x19a   : > { %1276 = vmatpush1.bf16.msra.mxu1 %v4782_v31  ;;  %v716_v31 = vld [vmem:[%s6093_s4] sm:$0x3f] }
 0x19b   : > { %1277 = vmatprep.subr.bf16.mxu1 %v4787_v32  ;;  %v721_v32 = vrot.slane %v716_v31, %v5843_v3 }
 0x19e   : > { %1278 = vmatpush1.bf16.msra.mxu1 %v4785_v33 }
 0x19f   : > { %1279 = vmatprep.subr.bf16.mxu1 %v4790_v34 }
 0x1a2   : > { %1280 = vmatpush1.bf16.msra.mxu1 %v4788_v35 }
 0x1a3   : > { %1281 = vmatprep.subr.bf16.mxu1 %v4793_v36 }
 0x1a6   : > { %1282 = vmatpush1.bf16.msra.mxu1 %v4791_v37 }
 0x1a7   : > { %1283 = vmatprep.subr.bf16.mxu1 %v4796_v38 }
 0x1aa   : > { %1284 = vmatpush1.bf16.msra.mxu1 %v4794_v39 }
 0x1ab   : > { %1285 = vmatprep.subr.bf16.mxu1 %v4799_v40 }
 0x1ae   : > { %1286 = vmatpush1.bf16.msra.mxu1 %v4797_v41 }
 0x1af   : > { %1287 = vmatprep.subr.bf16.mxu1 %v4802_v42 }
 0x1b2   : > { %1288 = vmatpush1.bf16.msra.mxu1 %v4800_v43  ;;  %v728_v43 = vsub.s32 2, %v5837_v62 }
 0x1b3   : > { %1289 = vmatprep.subr.bf16.mxu1 %v4805_v44  ;;  %v732_v44 = vsub.s32 3, %v5837_v62 }
 0x1b6   : > { %1290 = vmatpush1.bf16.msra.mxu1 %v4803_v45  ;;  %v729_v45 = vrot.slane %v716_v31, %v728_v43 }
 0x1b7   : > { %1291 = vmatprep.subr.bf16.mxu1 %v4808_v46 }
 0x1ba   : > { %1292 = vmatpush1.bf16.msra.mxu1 %v4806_v47  ;;  %v733_v47 = vrot.slane %v716_v31, %v732_v44 }
 0x1bb   : > { %1293 = vmatprep.subr.bf16.mxu1 %v4811_v48 }
 0x1be   : > { %1294 = vmatpush1.bf16.msra.mxu1 %v4809_v49 }
 0x1bf   : > { %1295 = vmatprep.subr.bf16.mxu1 %v4814_v50 }
 0x1c2   : > { %1296 = vmatpush1.bf16.msra.mxu1 %v4812_v51 }
 0x1c3   : > { %1297 = vmatprep.subr.bf16.mxu1 %v4817_v52 }
 0x1c6   : > { %1298 = vmatpush1.bf16.msra.mxu1 %v4815_v53 }
 0x1c7   : > { %1299 = vmatprep.subr.bf16.mxu1 %v4820_v54 }
 0x1ca   : > { %1300 = vmatpush1.bf16.msra.mxu1 %v4818_v55 }
 0x1cb   : > { %1301 = vmatprep.subr.bf16.mxu1 %v4823_v56 }
 0x1ce   : > { %1302 = vmatpush1.bf16.msra.mxu1 %v4821_v57  ;;  %v736_v57 = vsub.s32 4, %v5837_v62 }
 0x1cf   : > { %1314 = vmatprep.subr.bf16.mxu1 %v4826_v58  ;;  %v740_v58 = vsub.s32 5, %v5837_v62 }
 0x1d1   : > { %1304 = vmatmul.mubr.bf16.vlgmr.msra.gmra.mrb[4].mxu1 %v5855_v28 }
 0x1d2   : > { %1315 = vmatpush1.bf16.msra.mxu1 %v4824_v59  ;;  %1346 = vmatprep.mubr.bf16.mxu1 %v5853_v27  ;;  %v4868_v27 = vld [vmem:[#allocation11 + $0x2b4] ss:$24 sps:$4 sm:$0xff]   ;;  %v737_v59 = vrot.slane %v716_v31, %v736_v57 }
 0x1d3   : > { %1316 = vmatprep.subr.bf16.mxu1 %v4829_v60 }
 0x1d6   : > { %1317 = vmatpush1.bf16.msra.mxu1 %v4827_v61  ;;  %v741_v61 = vrot.slane %v716_v31, %v740_v58 }
 0x1d7   : > { %1318 = vmatprep.subr.bf16.mxu1 %v4832_v4 }
 0x1da   : > { %1319 = vmatpush1.bf16.msra.mxu1 %v4830_v5 }
 0x1db   : > { %1320 = vmatprep.subr.bf16.mxu1 %v4835_v7 }
 0x1de   : > { %1321 = vmatpush1.bf16.msra.mxu1 %v4833_v8 }
 0x1df   : > { %1322 = vmatprep.subr.bf16.mxu1 %v4838_v9 }
 0x1e2   : > { %1323 = vmatpush1.bf16.msra.mxu1 %v4836_v10 }
 0x1e3   : > { %1324 = vmatprep.subr.bf16.mxu1 %v4841_v11 }
 0x1e6   : > { %1325 = vmatpush1.bf16.msra.mxu1 %v4839_v12 }
 0x1e7   : > { %1326 = vmatprep.subr.bf16.mxu1 %v4844_v13 }
 0x1ea   : > { %1327 = vmatpush1.bf16.msra.mxu1 %v4842_v14 }
 0x1eb   : > { %1328 = vmatprep.subr.bf16.mxu1 %v4847_v15 }
 0x1ee   : > { %1329 = vmatpush1.bf16.msra.mxu1 %v4845_v16 }
 0x1ef   : > { %1330 = vmatprep.subr.bf16.mxu1 %v4850_v17 }
 0x1f2   : > { %1331 = vmatpush1.bf16.msra.mxu1 %v4848_v18 }
 0x1f3   : > { %1332 = vmatprep.subr.bf16.mxu1 %v4853_v19 }
 0x1f6   : > { %1333 = vmatpush1.bf16.msra.mxu1 %v4851_v0 }
 0x1f7   : > { %1334 = vmatprep.subr.bf16.mxu1 %v4856_v20 }
 0x1fa   : > { %1335 = vmatpush1.bf16.msra.mxu1 %v4854_v1 }
 0x1fb   : > { %1336 = vmatprep.subr.bf16.mxu1 %v4859_v21 }
 0x1fe   : > { %1337 = vmatpush1.bf16.msra.mxu1 %v4857_v22 }
 0x1ff   : > { %1338 = vmatprep.subr.bf16.mxu1 %v4862_v23 }
 0x202   : > { %1339 = vmatpush1.bf16.msra.mxu1 %v4860_v24 }
 0x203   : > { %1340 = vmatprep.subr.bf16.mxu1 %v4865_v25 }
 0x206   : > { %1341 = vmatpush1.bf16.msra.mxu1 %v4863_v26 }
 0x207   : > { %1342 = vmatprep.subr.bf16.mxu1 %v4868_v27 }
 0x20a   : > { %1343 = vmatpush1.bf16.msra.mxu1 %v4866_v2 }
 0x20b   : > { %1344 = vmatprep.subr.bf16.mxu1 %v4871_v6 }
 0x20e   : > { %1345 = vmatpush1.bf16.msra.mxu1 %v4869_v29 }
 0x20f   : > { %4576 = vmatprep.subr.bf16.mxu1 %v5465_v30 }
 0x211   : > { %1347 = vmatmul.mubr.bf16.vlgmr.msra.gmra.mrb[8].mxu1 %v5855_v28  ;;  %v725_v28 = vrot.slane %v716_v31, %v5840_v63 }
 0x212   : > { %4578 = vmatprep.mubr.msk.bf16.mxu1 %vm5466_vm0, %v5465_v30 }
 0x264   : > { %v1262_v33 = vpop.f32.mrb[0].mxu1 }
 0x265   : > { %v1264_v34 = vpop.f32.mrb[1].mxu1  ;;  %v1263_v36 = vadd.f32 %v1262_v33, %v721_v32 }
 0x266   : > { %v1266_v35 = vpop.f32.mrb[2].mxu1  ;;  %v1265_v39 = vadd.f32 %v1264_v34, %v725_v28 }
 0x267   : > { %v1267_v37 = vadd.f32 %v1266_v35, %v721_v32  ;;  %v1268_v38 = vpop.f32.mrb[3].mxu1 }
 0x268   : > { %v1269_v40 = vadd.f32 %v1268_v38, %v725_v28 }
 0x269   : > { %v1357_v41 = vpack.c.bf16 %v1267_v37, %v1263_v36 }
 0x26a   : > { %v1358_v42 = vpack.c.bf16 %v1269_v40, %v1265_v39 }
 0x2a4   : > { %v1305_v46 = vpop.f32.mrb[4].mxu1 }
 0x2a5   : > { %v1307_v48 = vpop.f32.mrb[5].mxu1  ;;  %v1306_v50 = vadd.f32 %v1305_v46, %v729_v45 }
 0x2a6   : > { %v1309_v49 = vpop.f32.mrb[6].mxu1  ;;  %v1308_v53 = vadd.f32 %v1307_v48, %v733_v47  ;;  %v4874_v48 = vld [vmem:[#allocation13 + $0x84] ss:$8 sps:$4 sm:$0xff]  }
 0x2a7   : > { %v1310_v51 = vadd.f32 %v1309_v49, %v729_v45  ;;  %v1311_v52 = vpop.f32.mrb[7].mxu1  ;;  %v4875_v49 = vld [vmem:[#allocation13 + $0x90] ss:$8 sps:$4 sm:$0xff]  }
 0x2a8   : > { %v1312_v54 = vadd.f32 %v1311_v52, %v733_v47  ;;  %v4872_v47 = vld [vmem:[#allocation13 + $0x80] ss:$8 sps:$4 sm:$0xff]   ;;  %v4883_v52 = vld [vmem:[#allocation13 + $0xb4] ss:$8 sps:$4 sm:$0xff]  }
 0x2a9   : > { %v1359_v55 = vpack.c.bf16 %v1310_v51, %v1306_v50  ;;  %v4880_v50 = vld [vmem:[#allocation13 + $0xa4] ss:$8 sps:$4 sm:$0xff]   ;;  %v4878_v51 = vld [vmem:[#allocation13 + $0xa0] ss:$8 sps:$4 sm:$0xff]  }
 0x2aa   : > { %v1360_v56 = vpack.c.bf16 %v1312_v54, %v1308_v53  ;;  %v4881_v53 = vld [vmem:[#allocation13 + $0xb0] ss:$8 sps:$4 sm:$0xff]   ;;  %v4886_v54 = vld [vmem:[#allocation13 + $0xc4] ss:$8 sps:$4 sm:$0xff]  }
 0x2ab   : > { %4565 = vmatpush3.bf16.xpose.msra.mxu0 %v1359_v55  ;;  %v4884_v55 = vld [vmem:[#allocation13 + $0xc0] ss:$8 sps:$4 sm:$0xff]  }
 0x2ac   : > { %4570 = vmatprep.subr.bf16.mxu0 %v5465_v30 }
 0x2b2   : > { %4567 = vmatmul.mubr.bf16.vlgmr.msra.gmra.mrb[0].mxu0 %v1357_v41 }
 0x2b3   : > { %4571 = vmatpush3.bf16.xpose.msra.mxu0 %v1360_v56  ;;  %4572 = vmatprep.mubr.msk.bf16.mxu0 %vm5466_vm0, %v5465_v30  ;;  %v4889_v56 = vld [vmem:[#allocation13 + $0xd4] ss:$8 sps:$4 sm:$0xff]  }
 0x2ba   : > { %4573 = vmatmul.mubr.bf16.vlgmr.msra.gmra.mrb[4].mxu0 %v1358_v42 }
 0x2e4   : > { %v1348_v60 = vpop.f32.mrb[8].mxu1 }
 0x2e5   : > { %v1350_v4 = vpop.f32.mrb[9].mxu1  ;;  %v1349_v7 = vadd.f32 %v1348_v60, %v737_v59  ;;  %v4890_v60 = vld [vmem:[#allocation13 + $0xe0] ss:$8 sps:$4 sm:$0xff]  }
 0x2e6   : > { %v1352_v5 = vpop.f32.mrb[10].mxu1  ;;  %v1351_v10 = vadd.f32 %v1350_v4, %v741_v61  ;;  %v4895_v4 = vld [vmem:[#allocation13 + $0xf4] ss:$8 sps:$4 sm:$0xff]  }
 0x2e7   : > { %v1353_v8 = vadd.f32 %v1352_v5, %v737_v59  ;;  %v1354_v9 = vpop.f32.mrb[11].mxu1  ;;  %v4887_v59 = vld [vmem:[#allocation13 + $0xd0] ss:$8 sps:$4 sm:$0xff]  }
 0x2e8   : > { %v1355_v11 = vadd.f32 %v1354_v9, %v741_v61  ;;  %v4892_v61 = vld [vmem:[#allocation13 + $0xe4] ss:$8 sps:$4 sm:$0xff]   ;;  %v4893_v5 = vld [vmem:[#allocation13 + $0xf0] ss:$8 sps:$4 sm:$0xff]  }
 0x2e9   : > { %v1361_v12 = vpack.c.bf16 %v1353_v8, %v1349_v7  ;;  %v4898_v7 = vld [vmem:[#allocation13 + $0x4] ss:$8 sps:$4 sm:$0xff]   ;;  %v5467_v8 = vmov 0  }
 0x2ea   : > { %v1362_v13 = vpack.c.bf16 %v1355_v11, %v1351_v10 }
 0x2eb   : > { %4577 = vmatpush3.bf16.msra.mxu1 %v1361_v12 }
 0x2ec   : > { %4582 = vmatprep.subr.bf16.mxu1 %v5465_v30 }
 0x385   : > { %v1410_v14 = vpop.f32.mrb[0].mxu0 }
 0x386   : > { %v4568_v15 = vpop.f32.mrb[1].mxu0  ;;  %v1459_v16 = vsel %vm1458_vm1, %v1410_v14, -inf }
 0x387   : > { %1460 = vmax.xlane.f32.xlu0 %v1459_v16  ;;  %v1413_v17 = vpop.f32.mrb[2].mxu0 }
 0x388   : > { %v4569_v18 = vpop.f32.mrb[3].mxu0  ;;  %v1462_v19 = vsel %vm1458_vm1, %v1413_v17, -inf }
 0x389   : > { %1463 = vmax.xlane.f32.xlu1 %v1462_v19 }
 0x38d   : > { %v1451_v0 = vpop.f32.mrb[4].mxu0 }
 0x38e   : > { %v4574_v20 = vpop.f32.mrb[5].mxu0  ;;  %v1465_v1 = vsel %vm1458_vm1, %v1451_v0, -inf }
 0x38f   : > { %1466 = vmax.xlane.f32.xlu0 %v1465_v1  ;;  %v1454_v21 = vpop.f32.mrb[6].mxu0 }
 0x390   : > { %v4575_v22 = vpop.f32.mrb[7].mxu0  ;;  %v1468_v23 = vsel %vm1458_vm1, %v1454_v21, -inf }
 0x391   : > { %1469 = vmax.xlane.f32.xlu1 %v1468_v23 }
 0x414   : > { %v1461_v24 = vpop.xlane.xlu0 %1460 }
 0x415   : > { %v1471_v25 = vsub.f32 %v1410_v14, %v1461_v24 }
 0x416   : > { %v1464_v26 = vpop.xlane.xlu1 %1463 }
 0x417   : > { %v1475_v27 = vmul.f32 1.442695, %v1471_v25  ;;  %v1472_v2 = vsub.f32 %v1413_v17, %v1464_v26 }
 0x419   : > { %v1477_v6 = vmul.f32 1.442695, %v1472_v2  ;;  %5116 = vpow2.f32 %v1475_v27  ;;  %v4896_v2 = vld [vmem:[#allocation13] ss:$8 sps:$4 sm:$0xff]  }
 0x41b   : > { %5118 = vpow2.f32 %v1477_v6 }
 0x41c   : > { %v1467_v29 = vpop.xlane.xlu0 %1466 }
 0x41d   : > { %v1473_v31 = vsub.f32 %v1451_v0, %v1467_v29  ;;  %v4901_v29 = vld [vmem:[#allocation13 + $0x14] ss:$8 sps:$4 sm:$0xff]  }
 0x41e   : > { %v1470_v32 = vpop.xlane.xlu1 %1469 }
 0x41f   : > { %v1479_v33 = vmul.f32 1.442695, %v1473_v31  ;;  %v1474_v28 = vsub.f32 %v1454_v21, %v1470_v32  ;;  %v4899_v31 = vld [vmem:[#allocation13 + $0x10] ss:$8 sps:$4 sm:$0xff]   ;;  %v4904_v32 = vld [vmem:[#allocation13 + $0x24] ss:$8 sps:$4 sm:$0xff]  }
 0x421   : > { %5120 = vpow2.f32 %v1479_v33  ;;  %v1481_v34 = vmul.f32 1.442695, %v1474_v28  ;;  %v4902_v33 = vld [vmem:[#allocation13 + $0x20] ss:$8 sps:$4 sm:$0xff]   ;;  %v4907_v28 = vld [vmem:[#allocation13 + $0x34] ss:$8 sps:$4 sm:$0xff]  }
 0x423   : > { %5122 = vpow2.f32 %v1481_v34  ;;  %v5117_v35 = vpop.eup %5116  ;;  %v4905_v34 = vld [vmem:[#allocation13 + $0x30] ss:$8 sps:$4 sm:$0xff]  }
 0x424   : > { %v1483_v45 = vsel %vm1458_vm1, %v5117_v35, 0.0 }
 0x425   : > { %v5119_v36 = vpop.eup %5118 }
 0x426   : > { %v1495_v37 = vpack.c.bf16 %v5119_v36, %v5117_v35  ;;  %v1486_v46 = vsel %vm1458_vm1, %v5119_v36, 0.0  ;;  %v4910_v35 = vld [vmem:[#allocation13 + $0x44] ss:$8 sps:$4 sm:$0xff]   ;;  %v4908_v36 = vld [vmem:[#allocation13 + $0x40] ss:$8 sps:$4 sm:$0xff]  }
 0x428   : > { %4579 = vmatmul.mubr.msk.bf16.vlgmr.msra.gmra.mrb[12].mxu1 %vm1458_vm1, %v1495_v37  ;;  %v4913_v37 = vld [vmem:[#allocation13 + $0x54] ss:$8 sps:$4 sm:$0xff]  }
 0x429   : > { %4583 = vmatpush3.bf16.msra.mxu1 %v1362_v13  ;;  %4584 = vmatprep.mubr.msk.bf16.mxu1 %vm5466_vm0, %v5465_v30  ;;  %v4877_v30 = vld [vmem:[#allocation13 + $0x94] ss:$8 sps:$4 sm:$0xff]  }
 0x42a   : > { %1710 = vmatprep.subr.bf16.mxu1 %v4874_v48 }
 0x42b   : > { %v5121_v38 = vpop.eup %5120 }
 0x42c   : > { %v1489_v39 = vsel %vm1458_vm1, %v5121_v38, 0.0 }
 0x42d   : > { %v5123_v40 = vpop.eup %5122  ;;  %1490 = vadd.xlane.f32.xlu0 %v1489_v39  ;;  %v4916_v39 = vld [vmem:[#allocation13 + $0x64] ss:$8 sps:$4 sm:$0xff]  }
 0x42e   : > { %v1492_v41 = vsel %vm1458_vm1, %v5123_v40, 0.0  ;;  %v1496_v42 = vpack.c.bf16 %v5123_v40, %v5121_v38  ;;  %v4911_v38 = vld [vmem:[#allocation13 + $0x50] ss:$8 sps:$4 sm:$0xff]   ;;  %v4914_v40 = vld [vmem:[#allocation13 + $0x60] ss:$8 sps:$4 sm:$0xff]  }
 0x42f   : > { %1493 = vadd.xlane.f32.xlu1 %v1492_v41  ;;  %v4919_v41 = vld [vmem:[#allocation13 + $0x74] ss:$8 sps:$4 sm:$0xff]  }
 0x430   : > { %4585 = vmatmul.mubr.msk.bf16.vlgmr.msra.gmra.mrb[16].mxu1 %vm1458_vm1, %v1496_v42  ;;  %v4917_v42 = vld [vmem:[#allocation13 + $0x70] ss:$8 sps:$4 sm:$0xff]  }
 0x431   : > { %1484 = vadd.xlane.f32.xlu0 %v1483_v45  ;;  %1711 = vmatpush1.bf16.msra.mxu1 %v4872_v47  ;;  %v1968_v45 = vld [vmem:[#allocation14] sm:$0xff]  ;;  %v1969_v47 = vld [vmem:[#allocation14 + $0x8] sm:$0xff] }
 0x432   : > { %1712 = vmatprep.subr.bf16.mxu1 %v4877_v30  ;;  %1742 = vmatprep.mubr.bf16.mxu1 %v5467_v8 }
 0x433   : > { %1487 = vadd.xlane.f32.xlu1 %v1486_v46  ;;  %v1972_v46 = vld [vmem:[#allocation14 + $0x20] sm:$0xff] }
 0x434   : > { %v4293_v48 = vcombine.low %v1968_v45, %v1972_v46  ;;  %v4294_v30 = vcombine.high %v1968_v45, %v1972_v46  ;;  %v2029_v45 = vld [vmem:[#allocation14 + $0x1e8] sm:$0xff] }
 0x435   : > { %1713 = vmatpush1.bf16.msra.mxu1 %v4875_v49  ;;  %v1973_v49 = vld [vmem:[#allocation14 + $0x28] sm:$0xff] }
 0x436   : > { %1714 = vmatprep.subr.bf16.mxu1 %v4880_v50  ;;  %v1976_v50 = vld [vmem:[#allocation14 + $0x40] sm:$0xff]  ;;  %2778 = vmatprep.subr.bf16.mxu0 %v4294_v30 }
 0x437   : > { %2779 = vmatpush1.bf16.msra.mxu0 %v4293_v48 }
 0x439   : > { %1715 = vmatpush1.bf16.msra.mxu1 %v4878_v51  ;;  %v1980_v51 = vld [vmem:[#allocation14 + $0x60] sm:$0xff] }
 0x43a   : > { %1716 = vmatprep.subr.bf16.mxu1 %v4883_v52  ;;  %v4295_v52 = vcombine.low %v1969_v47, %v1973_v49 }
 0x43d   : > { %1717 = vmatpush1.bf16.msra.mxu1 %v4881_v53  ;;  %v4296_v53 = vcombine.high %v1969_v47, %v1973_v49 }
 0x43e   : > { %1718 = vmatprep.subr.bf16.mxu1 %v4886_v54  ;;  %v4302_v54 = vcombine.high %v1976_v50, %v1980_v51 }
 0x440   : > { %2780 = vmatprep.subr.bf16.mxu0 %v4302_v54 }
 0x441   : > { %1719 = vmatpush1.bf16.msra.mxu1 %v4884_v55  ;;  %v1977_v55 = vld [vmem:[#allocation14 + $0x48] sm:$0xff] }
 0x442   : > { %1720 = vmatprep.subr.bf16.mxu1 %v4889_v56  ;;  %v1981_v56 = vld [vmem:[#allocation14 + $0x68] sm:$0xff] }
 0x445   : > { %1721 = vmatpush1.bf16.msra.mxu1 %v4887_v59  ;;  %v1984_v59 = vld [vmem:[#allocation14 + $0x80] sm:$0xff] }
 0x446   : > { %1722 = vmatprep.subr.bf16.mxu1 %v4892_v61  ;;  %v1988_v61 = vld [vmem:[#allocation14 + $0xa0] sm:$0xff] }
 0x449   : > { %1723 = vmatpush1.bf16.msra.mxu1 %v4890_v60  ;;  %v4304_v60 = vcombine.high %v1977_v55, %v1981_v56 }
 0x44a   : > { %1724 = vmatprep.subr.bf16.mxu1 %v4895_v4  ;;  %v1985_v4 = vld [vmem:[#allocation14 + $0x88] sm:$0xff] }
 0x44d   : > { %1725 = vmatpush1.bf16.msra.mxu1 %v4893_v5  ;;  %v1989_v5 = vld [vmem:[#allocation14 + $0xa8] sm:$0xff] }
 0x44e   : > { %1833 = vmatprep.subr.bf16.mxu1 %v4898_v7  ;;  %v4301_v7 = vcombine.low %v1976_v50, %v1980_v51  ;;  %v1880_v51 = vld [vmem:[%s6095_s6] sm:$0x3] }
 0x44f   : > { %v1889_v54 = vrot.slane %v1880_v51, %v5840_v63 }
 0x450   : > { %2781 = vmatpush1.bf16.msra.mxu0 %v4301_v7  ;;  %v5170_v7 = vld [vmem:[%s5795_s21 + $0x10] sm:$0xff] }
 0x4ba   : > { %v1491_v9 = vpop.xlane.xlu0 %1490 }
 0x4bc   : > { %v1494_v10 = vpop.xlane.xlu1 %1493 }
 0x4be   : > { %v1485_v11 = vpop.xlane.xlu0 %1484 }
 0x4bf   : > { %5124 = vrcp.f32 %v1485_v11  ;;  %v1992_v11 = vld [vmem:[#allocation14 + $0xc0] sm:$0xff] }
 0x4c0   : > { %v1488_v12 = vpop.xlane.xlu1 %1487 }
 0x4c1   : > { %5126 = vrcp.f32 %v1488_v12  ;;  %v1996_v12 = vld [vmem:[#allocation14 + $0xe0] sm:$0xff] }
 0x4c2   : > { %5128 = vrcp.f32 %v1491_v9  ;;  %v4310_v9 = vcombine.high %v1984_v59, %v1988_v61 }
 0x4c3   : > { %5130 = vrcp.f32 %v1494_v10  ;;  %v4312_v10 = vcombine.high %v1985_v4, %v1989_v5 }
 0x4c4   : > { %2782 = vmatprep.subr.bf16.mxu0 %v4310_v9 }
 0x4c9   : > { %v5125_v14 = vpop.eup %5124 }
 0x4cb   : > { %v5127_v16 = vpop.eup %5126 }
 0x4cc   : > { %v5129_v21 = vpop.eup %5128 }
 0x4cd   : > { %v5131_v23 = vpop.eup %5130 }
 0x4fb   : > { %v1536_v13 = vpop.f32.mrb[12].mxu1 }
 0x4fc   : > { %v4580_v15 = vpop.f32.mrb[13].mxu1  ;;  %v1591_v18 = vmul.f32 %v5125_v14, %v1536_v13  ;;  %v1993_v13 = vld [vmem:[#allocation14 + $0xc8] sm:$0xff] }
 0x4fd   : > { %v1539_v17 = vpop.f32.mrb[14].mxu1  ;;  %v1997_v14 = vld [vmem:[#allocation14 + $0xe8] sm:$0xff]  ;;  %v4309_v15 = vcombine.low %v1984_v59, %v1988_v61 }
 0x4fe   : > { %v1592_v19 = vmul.f32 %v5127_v16, %v1539_v17  ;;  %v4581_v0 = vpop.f32.mrb[15].mxu1  ;;  %v4311_v16 = vcombine.low %v1985_v4, %v1989_v5  ;;  %v4318_v17 = vcombine.high %v1992_v11, %v1996_v12 }
 0x4ff   : > { %v2004_v0 = vld [vmem:[#allocation14 + $0x120] sm:$0xff]  ;;  %2783 = vmatpush1.bf16.msra.mxu0 %v4309_v15 }
 0x500   : > { %v1595_v20 = vpack.c.bf16 %v1592_v19, %v1591_v18  ;;  %v4320_v18 = vcombine.high %v1993_v13, %v1997_v14  ;;  %v2000_v19 = vld [vmem:[#allocation14 + $0x100] sm:$0xff]  ;;  %2784 = vmatprep.subr.bf16.mxu0 %v4318_v17 }
 0x503   : > { %v1580_v1 = vpop.f32.mrb[16].mxu1 }
 0x504   : > { %v4586_v22 = vpop.f32.mrb[17].mxu1  ;;  %v1593_v25 = vmul.f32 %v5129_v21, %v1580_v1  ;;  %v2005_v1 = vld [vmem:[#allocation14 + $0x128] sm:$0xff]  ;;  %v4317_v21 = vcombine.low %v1992_v11, %v1996_v12  ;;  %v5171_v11 = vld [vmem:[%s5795_s21 + $0x18] sm:$0xff] }
 0x505   : > { %v1583_v24 = vpop.f32.mrb[18].mxu1  ;;  %v4319_v22 = vcombine.low %v1993_v13, %v1997_v14 }
 0x506   : > { %v1594_v26 = vmul.f32 %v5131_v23, %v1583_v24  ;;  %v4587_v27 = vpop.f32.mrb[19].mxu1  ;;  %v4326_v23 = vcombine.high %v2000_v19, %v2004_v0  ;;  %2785 = vmatpush1.bf16.msra.mxu0 %v4317_v21  ;;  %v2032_v21 = vld [vmem:[#allocation14 + $0x200] sm:$0xff] }
 0x507   : > { %v2009_v27 = vld [vmem:[#allocation14 + $0x148] sm:$0xff] }
 0x508   : > { %v1596_v6 = vpack.c.bf16 %v1594_v26, %v1593_v25  ;;  %v2008_v25 = vld [vmem:[#allocation14 + $0x140] sm:$0xff]  ;;  %2786 = vmatprep.subr.bf16.mxu0 %v4326_v23  ;;  %v2033_v23 = vld [vmem:[#allocation14 + $0x208] sm:$0xff] }
 0x509   : > { %v2012_v26 = vld [vmem:[#allocation14 + $0x160] sm:$0xff] }
 0x50a   : > { %1743 = vmatmul.mubr.bf16.vlgmr.msra.gmra.mrb[20].mxu1 %v1596_v6  ;;  %v4325_v6 = vcombine.low %v2000_v19, %v2004_v0 }
 0x50b   : > { %1834 = vmatpush1.bf16.msra.mxu1 %v4896_v2  ;;  %1865 = vmatprep.mubr.bf16.mxu1 %v5467_v8  ;;  %v4303_v8 = vcombine.low %v1977_v55, %v1981_v56  ;;  %v2013_v2 = vld [vmem:[#allocation14 + $0x168] sm:$0xff]  ;;  %v5168_v55 = vld [vmem:[%s5795_s21] sm:$0xff] }
 0x50c   : > { %1835 = vmatprep.subr.bf16.mxu1 %v4901_v29  ;;  %2787 = vmatpush1.bf16.msra.mxu0 %v4325_v6  ;;  %v2040_v6 = vld [vmem:[#allocation14 + $0x240] sm:$0xff] }
 0x50f   : > { %1836 = vmatpush1.bf16.msra.mxu1 %v4899_v31  ;;  %v4334_v31 = vcombine.high %v2008_v25, %v2012_v26 }
 0x510   : > { %1837 = vmatprep.subr.bf16.mxu1 %v4904_v32  ;;  %v4336_v32 = vcombine.high %v2009_v27, %v2013_v2 }
 0x511   : > { %2788 = vmatprep.subr.bf16.mxu0 %v4334_v31  ;;  %v2041_v31 = vld [vmem:[#allocation14 + $0x248] sm:$0xff] }
 0x513   : > { %1838 = vmatpush1.bf16.msra.mxu1 %v4902_v33  ;;  %v2016_v33 = vld [vmem:[#allocation14 + $0x180] sm:$0xff] }
 0x514   : > { %1839 = vmatprep.subr.bf16.mxu1 %v4907_v28  ;;  %v2020_v28 = vld [vmem:[#allocation14 + $0x1a0] sm:$0xff] }
 0x515   : > { %v4341_v46 = vcombine.low %v2016_v33, %v2020_v28 }
 0x517   : > { %1840 = vmatpush1.bf16.msra.mxu1 %v4905_v34  ;;  %v2017_v34 = vld [vmem:[#allocation14 + $0x188] sm:$0xff] }
 0x518   : > { %1841 = vmatprep.subr.bf16.mxu1 %v4910_v35  ;;  %v2021_v35 = vld [vmem:[#allocation14 + $0x1a8] sm:$0xff] }
 0x519   : > { %v4343_v47 = vcombine.low %v2017_v34, %v2021_v35 }
 0x51b   : > { %1842 = vmatpush1.bf16.msra.mxu1 %v4908_v36  ;;  %v4333_v36 = vcombine.low %v2008_v25, %v2012_v26  ;;  %v2037_v25 = vld [vmem:[#allocation14 + $0x228] sm:$0xff] }
 0x51c   : > { %1843 = vmatprep.subr.bf16.mxu1 %v4913_v37  ;;  %v4335_v37 = vcombine.low %v2009_v27, %v2013_v2  ;;  %v4359_v27 = vcombine.low %v2033_v23, %v2037_v25  ;;  %v4360_v2 = vcombine.high %v2033_v23, %v2037_v25  ;;  %v2092_v23 = vld [vmem:[#allocation14 + $0x3e0] sm:$0xff]  ;;  %v2093_v25 = vld [vmem:[#allocation14 + $0x3e8] sm:$0xff] }
 0x51d   : > { %2789 = vmatpush1.bf16.msra.mxu0 %v4333_v36  ;;  %v2048_v36 = vld [vmem:[#allocation14 + $0x280] sm:$0xff] }
 0x51f   : > { %1844 = vmatpush1.bf16.msra.mxu1 %v4911_v38  ;;  %v4342_v38 = vcombine.high %v2016_v33, %v2020_v28  ;;  %v2045_v33 = vld [vmem:[#allocation14 + $0x268] sm:$0xff] }
 0x520   : > { %1845 = vmatprep.subr.bf16.mxu1 %v4916_v39  ;;  %v4344_v39 = vcombine.high %v2017_v34, %v2021_v35  ;;  %v4367_v34 = vcombine.low %v2041_v31, %v2045_v33  ;;  %v4368_v35 = vcombine.high %v2041_v31, %v2045_v33  ;;  %v5933_v33 = vld [vmem:[#allocation14 + $0x30] sm:$0xff] }
 0x521   : > { %2790 = vmatprep.subr.bf16.mxu0 %v4342_v38  ;;  %v2049_v38 = vld [vmem:[#allocation14 + $0x288] sm:$0xff] }
 0x522   : > { %2791 = vmatpush1.bf16.msra.mxu0 %v4341_v46  ;;  %v2056_v46 = vld [vmem:[#allocation14 + $0x2c0] sm:$0xff] }
 0x523   : > { %1846 = vmatpush1.bf16.msra.mxu1 %v4914_v40  ;;  %v2024_v40 = vld [vmem:[#allocation14 + $0x1c0] sm:$0xff] }
 0x524   : > { %1847 = vmatprep.subr.bf16.mxu1 %v4919_v41  ;;  %v2028_v41 = vld [vmem:[#allocation14 + $0x1e0] sm:$0xff] }
 0x525   : > { %v4350_v48 = vcombine.high %v2024_v40, %v2028_v41  ;;  %v4349_v49 = vcombine.low %v2024_v40, %v2028_v41  ;;  %v2053_v40 = vld [vmem:[#allocation14 + $0x2a8] sm:$0xff] }
 0x527   : > { %1848 = vmatpush1.bf16.msra.mxu1 %v4917_v42  ;;  %v2025_v42 = vld [vmem:[#allocation14 + $0x1c8] sm:$0xff]  ;;  %2792 = vmatprep.subr.bf16.mxu0 %v4350_v48 }
 0x528   : > { %2821 = vmatprep.subr.bf16.mxu1 %v4296_v53  ;;  %v4352_v30 = vcombine.high %v2025_v42, %v2029_v45  ;;  %v4351_v50 = vcombine.low %v2025_v42, %v2029_v45  ;;  %2793 = vmatpush1.bf16.msra.mxu0 %v4349_v49  ;;  %v4375_v42 = vcombine.low %v2049_v38, %v2053_v40  ;;  %v2057_v48 = vld [vmem:[#allocation14 + $0x2c8] sm:$0xff] }
 0x529   : > { %v4376_v45 = vcombine.high %v2049_v38, %v2053_v40  ;;  %v2061_v49 = vld [vmem:[#allocation14 + $0x2e8] sm:$0xff] }
 0x52a   : > { %1866 = vmatmul.mubr.bf16.vlgmr.msra.gmra.mrb[20].mxu1 %v1595_v20  ;;  %v2001_v20 = vld [vmem:[#allocation14 + $0x108] sm:$0xff] }
 0x52b   : > { %2822 = vmatpush1.bf16.msra.mxu1 %v4295_v52  ;;  %v4328_v24 = vcombine.high %v2001_v20, %v2005_v1  ;;  %v4327_v29 = vcombine.low %v2001_v20, %v2005_v1  ;;  %v1885_v52 = vrot.slane %v1880_v51, %v5843_v3  ;;  %v4383_v51 = vcombine.low %v2057_v48, %v2061_v49 }
 0x52c   : > { %2823 = vmatprep.subr.bf16.mxu1 %v4304_v60  ;;  %v5169_v60 = vld [vmem:[%s5795_s21 + $0x8] sm:$0xff]  ;;  %s6134_s21 = sld [smem:[#allocation27_spill]] }
 0x52f   : > { %2824 = vmatpush1.bf16.msra.mxu1 %v4303_v8 }
 0x530   : > { %2825 = vmatprep.subr.bf16.mxu1 %v4312_v10 }
 0x533   : > { %2826 = vmatpush1.bf16.msra.mxu1 %v4311_v16 }
 0x534   : > { %2827 = vmatprep.subr.bf16.mxu1 %v4320_v18 }
 0x537   : > { %2828 = vmatpush1.bf16.msra.mxu1 %v4319_v22  ;;  %v2036_v22 = vld [vmem:[#allocation14 + $0x220] sm:$0xff] }
 0x538   : > { %2829 = vmatprep.subr.bf16.mxu1 %v4328_v24  ;;  %v4358_v24 = vcombine.high %v2032_v21, %v2036_v22  ;;  %v4357_v26 = vcombine.low %v2032_v21, %v2036_v22  ;;  %v2088_v22 = vld [vmem:[#allocation14 + $0x3c0] sm:$0xff] }
 0x53a   : > { %2794 = vmatprep.subr.bf16.mxu0 %v4358_v24  ;;  %v2089_v24 = vld [vmem:[#allocation14 + $0x3c8] sm:$0xff] }
 0x53b   : > { %2830 = vmatpush1.bf16.msra.mxu1 %v4327_v29  ;;  %2795 = vmatpush1.bf16.msra.mxu0 %v4357_v26  ;;  %v2044_v29 = vld [vmem:[#allocation14 + $0x260] sm:$0xff]  ;;  %v4415_v31 = vcombine.low %v2089_v24, %v2093_v25 }
 0x53c   : > { %2831 = vmatprep.subr.bf16.mxu1 %v4336_v32  ;;  %v4366_v32 = vcombine.high %v2040_v6, %v2044_v29  ;;  %v4365_v28 = vcombine.low %v2040_v6, %v2044_v29  ;;  %v4416_v6 = vcombine.high %v2089_v24, %v2093_v25  ;;  %v4413_v29 = vcombine.low %v2088_v22, %v2092_v23 }
 0x53e   : > { %2796 = vmatprep.subr.bf16.mxu0 %v4366_v32  ;;  %v5931_v32 = vld [vmem:[#allocation14 + $0x10] sm:$0xff] }
 0x53f   : > { %2832 = vmatpush1.bf16.msra.mxu1 %v4335_v37  ;;  %2797 = vmatpush1.bf16.msra.mxu0 %v4365_v28  ;;  %v2052_v37 = vld [vmem:[#allocation14 + $0x2a0] sm:$0xff]  ;;  %v5935_v28 = vld [vmem:[#allocation14 + $0x18] sm:$0xff] }
 0x540   : > { %2833 = vmatprep.subr.bf16.mxu1 %v4344_v39  ;;  %v4374_v39 = vcombine.high %v2048_v36, %v2052_v37  ;;  %v4373_v41 = vcombine.low %v2048_v36, %v2052_v37  ;;  %v4297_v36 = vcombine.low %v5931_v32, %v5933_v33 }
 0x542   : > { %2798 = vmatprep.subr.bf16.mxu0 %v4374_v39 }
 0x543   : > { %2834 = vmatpush1.bf16.msra.mxu1 %v4343_v47  ;;  %2799 = vmatpush1.bf16.msra.mxu0 %v4373_v41  ;;  %v2060_v47 = vld [vmem:[#allocation14 + $0x2e0] sm:$0xff] }
 0x544   : > { %2835 = vmatprep.subr.bf16.mxu1 %v4352_v30  ;;  %v4382_v30 = vcombine.high %v2056_v46, %v2060_v47 }
 0x546   : > { %2800 = vmatprep.subr.bf16.mxu0 %v4382_v30 }
 0x547   : > { %2836 = vmatpush1.bf16.msra.mxu1 %v4351_v50  ;;  %v4381_v50 = vcombine.low %v2056_v46, %v2060_v47 }
 0x548   : > { %2837 = vmatprep.subr.bf16.mxu1 %v4360_v2  ;;  %v4414_v2 = vcombine.high %v2088_v22, %v2092_v23 }
 0x549   : > { %2801 = vmatpush1.bf16.msra.mxu0 %v4381_v50 }
 0x54b   : > { %2838 = vmatpush1.bf16.msra.mxu1 %v4359_v27 }
 0x54c   : > { %2839 = vmatprep.subr.bf16.mxu1 %v4368_v35  ;;  %v5939_v35 = vld [vmem:[#allocation14 + $0x38] sm:$0xff] }
 0x54d   : > { %v4299_v37 = vcombine.low %v5935_v28, %v5939_v35  ;;  %v4300_v38 = vcombine.high %v5935_v28, %v5939_v35  ;;  %v1990_v35 = vld [vmem:[#allocation14 + $0xb0] sm:$0xff] }
 0x54f   : > { %2840 = vmatpush1.bf16.msra.mxu1 %v4367_v34  ;;  %v4298_v34 = vcombine.high %v5931_v32, %v5933_v33  ;;  %v1986_v33 = vld [vmem:[#allocation14 + $0x90] sm:$0xff] }
 0x550   : > { %2841 = vmatprep.subr.bf16.mxu1 %v4376_v45 }
 0x553   : > { %2842 = vmatpush1.bf16.msra.mxu1 %v4375_v42 }
 0x5fd   : > { %v1867_v53 = vpop.f32.mrb[20].mxu1 }
 0x5fe   : > { %v1876_v56 = vadd.f32 %v5168_v55, %v1867_v53  ;;  %v1869_v59 = vpop.f32.mrb[21].mxu1  ;;  %v2064_v53 = vld [vmem:[#allocation14 + $0x300] sm:$0xff]  ;;  %v2065_v55 = vld [vmem:[#allocation14 + $0x308] sm:$0xff] }
 0x5ff   : > { %v1877_v61 = vadd.f32 %v5169_v60, %v1869_v59  ;;  %v1871_v4 = vpop.f32.mrb[22].mxu1  ;;  %v2069_v60 = vld [vmem:[#allocation14 + $0x328] sm:$0xff] }
 0x600   : > { %v5909_v5 = vadd.f32 %v1885_v52, %v1876_v56  ;;  %v1878_v8 = vadd.f32 %v5170_v7, %v1871_v4  ;;  %v1873_v9 = vpop.f32.mrb[23].mxu1  ;;  %v2076_v4 = vld [vmem:[#allocation14 + $0x360] sm:$0xff]  ;;  %v4391_v7 = vcombine.low %v2065_v55, %v2069_v60 }
 0x601   : > { %v5912_v10 = vadd.f32 %v1889_v54, %v1877_v61  ;;  %v1879_v12 = vadd.f32 %v5171_v11, %v1873_v9  ;;  %v2072_v61 = vld [vmem:[#allocation14 + $0x340] sm:$0xff]  ;;  %v2073_v11 = vld [vmem:[#allocation14 + $0x348] sm:$0xff] }
 0x602   : > { %v5915_v13 = vadd.f32 %v1885_v52, %v1878_v8  ;;  %v1904_v16 = vmul.f32 %v5909_v5, %v5909_v5  ;;  %v4384_v52 = vcombine.high %v2057_v48, %v2061_v49  ;;  %v4392_v8 = vcombine.high %v2065_v55, %v2069_v60 }
 0x603   : > { %v5917_v14 = vadd.f32 %v1889_v54, %v1879_v12  ;;  %v1896_v15 = vadd.f32 %v5912_v10, %v5909_v5  ;;  %v1905_v17 = vmul.f32 %v5912_v10, %v5912_v10  ;;  %v2068_v54 = vld [vmem:[#allocation14 + $0x320] sm:$0xff]  ;;  %v4398_v9 = vcombine.high %v2072_v61, %v2076_v4  ;;  %v2077_v12 = vld [vmem:[#allocation14 + $0x368] sm:$0xff] }
 0x604   : > { %v1906_v19 = vmul.f32 %v5915_v13, %v5915_v13  ;;  %2843 = vmatprep.subr.bf16.mxu1 %v4384_v52  ;;  %v4389_v56 = vcombine.low %v2064_v53, %v2068_v54  ;;  %v4390_v59 = vcombine.high %v2064_v53, %v2068_v54 }
 0x605   : > { %1897 = vadd.xlane.f32.xlu0 %v1896_v15  ;;  %v1899_v18 = vadd.f32 %v5917_v14, %v5915_v13  ;;  %v1907_v0 = vmul.f32 %v5917_v14, %v5917_v14  ;;  %v1908_v20 = vadd.f32 %v1905_v17, %v1904_v16  ;;  %2844 = vmatpush1.bf16.msra.mxu1 %v4383_v51  ;;  %v2080_v15 = vld [vmem:[#allocation14 + $0x380] sm:$0xff] }
 0x606   : > { %2802 = vmatprep.subr.bf16.mxu0 %v4390_v59  ;;  %v4400_v16 = vcombine.high %v2073_v11, %v2077_v12  ;;  %v2084_v17 = vld [vmem:[#allocation14 + $0x3a0] sm:$0xff]  ;;  %2845 = vmatprep.subr.bf16.mxu1 %v4392_v8 }
 0x607   : > { %1900 = vadd.xlane.f32.xlu1 %v1899_v18  ;;  %v1911_v1 = vadd.f32 %v1907_v0, %v1906_v19  ;;  %v2081_v18 = vld [vmem:[#allocation14 + $0x388] sm:$0xff]  ;;  %2803 = vmatpush1.bf16.msra.mxu0 %v4389_v56  ;;  %v4397_v0 = vcombine.low %v2072_v61, %v2076_v4  ;;  %v4405_v26 = vcombine.low %v2080_v15, %v2084_v17  ;;  %v1934_v56 = vld [vmem:[%s6132_s22] sm:$0x3] }
 0x608   : > { %v2085_v19 = vld [vmem:[#allocation14 + $0x3a8] sm:$0xff]  ;;  %2804 = vmatprep.subr.bf16.mxu0 %v4398_v9  ;;  %v1943_v61 = vrot.slane %v1934_v56, %v5840_v63  ;;  %v1950_v4 = vld [vmem:[%s6133_s30] sm:$0x3]  ;;  %s5370_s30 = scalar_lea.vmem %s6037_s19, 512 }
 0x609   : > { %1909 = vadd.xlane.f32.xlu0 %v1908_v20  ;;  %2846 = vmatpush1.bf16.msra.mxu1 %v4391_v7  ;;  %v4399_v20 = vcombine.low %v2073_v11, %v2077_v12  ;;  %v4408_v21 = vcombine.high %v2081_v18, %v2085_v19  ;;  %v4407_v27 = vcombine.low %v2081_v18, %v2085_v19  ;;  %p5371_p6 = scmp.ne.s32.totalorder %s6037_s19, %s5370_s30 }
 0x60a   : > { %2847 = vmatprep.subr.bf16.mxu1 %v4400_v16  ;;  %v1939_v7 = vrot.slane %v1934_v56, %v5843_v3  ;;  %v1955_v18 = vrot.slane %v1950_v4, %v5843_v3 }
 0x60b   : > { %1912 = vadd.xlane.f32.xlu1 %v1911_v1  ;;  %v4406_v1 = vcombine.high %v2080_v15, %v2084_v17  ;;  %2805 = vmatpush1.bf16.msra.mxu0 %v4397_v0  ;;  %v1959_v17 = vrot.slane %v1950_v4, %v5840_v63  ;;  %v2014_v4 = vld [vmem:[#allocation14 + $0x170] sm:$0xff]  ;;  %p5372_p5 = pnand %p5371_p6, %p6137_p12 }
 0x60d   : > { %2848 = vmatpush1.bf16.msra.mxu1 %v4399_v20  ;;  %2806 = vmatprep.subr.bf16.mxu0 %v4406_v1  ;;  %p5373_p7 = pneg %p5372_p5 }
 0x60e   : > { %2849 = vmatprep.subr.bf16.mxu1 %v4408_v21 }
 0x60f   : > { %2807 = vmatpush1.bf16.msra.mxu0 %v4405_v26 }
 0x610   : > { %2808 = vmatprep.subr.bf16.mxu0 %v4414_v2  ;;  %v1982_v2 = vld [vmem:[#allocation14 + $0x70] sm:$0xff] }
 0x611   : > { %2850 = vmatpush1.bf16.msra.mxu1 %v4407_v27  ;;  %v1978_v27 = vld [vmem:[#allocation14 + $0x50] sm:$0xff] }
 0x612   : > { %2851 = vmatprep.subr.bf16.mxu1 %v4416_v6  ;;  %v1979_v6 = vld [vmem:[#allocation14 + $0x58] sm:$0xff]  ;;  %v4306_v28 = vcombine.high %v1978_v27, %v1982_v2 }
 0x613   : > { %2809 = vmatpush1.bf16.msra.mxu0 %v4413_v29  ;;  %v1983_v29 = vld [vmem:[#allocation14 + $0x78] sm:$0xff] }
 0x614   : > { %2864 = vmatprep.subr.bf16.mxu0 %v4298_v34  ;;  %v4308_v34 = vcombine.high %v1979_v6, %v1983_v29 }
 0x615   : > { %2852 = vmatpush1.bf16.msra.mxu1 %v4415_v31 }
 0x616   : > { %2907 = vmatprep.subr.bf16.mxu1 %v4300_v38  ;;  %v1987_v38 = vld [vmem:[#allocation14 + $0x98] sm:$0xff] }
 0x692   : > { %v1898_v39 = vpop.xlane.xlu0 %1897 }
 0x693   : > { %v1902_v40 = vmul.f32 0.00390625, %v1898_v39  ;;  %v1991_v39 = vld [vmem:[#allocation14 + $0xb8] sm:$0xff] }
 0x694   : > { %v1901_v41 = vpop.xlane.xlu1 %1900 }
 0x695   : > { %v1903_v42 = vmul.f32 0.00390625, %v1901_v41  ;;  %v1916_v46 = vmul.f32 %v1902_v40, %v1902_v40  ;;  %v1922_v59 = vsub.f32 %v5909_v5, %v1902_v40  ;;  %v1923_v60 = vsub.f32 %v5912_v10, %v1902_v40 }
 0x696   : > { %v1910_v45 = vpop.xlane.xlu0 %1909  ;;  %v4305_v40 = vcombine.low %v1978_v27, %v1982_v2  ;;  %v4307_v41 = vcombine.low %v1979_v6, %v1983_v29  ;;  %v2034_v29 = vld [vmem:[#allocation14 + $0x210] sm:$0xff] }
 0x697   : > { %v1914_v47 = vmul.f32 0.00390625, %v1910_v45  ;;  %v1917_v49 = vmul.f32 %v1903_v42, %v1903_v42  ;;  %v1924_v9 = vsub.f32 %v5915_v13, %v1903_v42  ;;  %v1925_v11 = vsub.f32 %v5917_v14, %v1903_v42 }
 0x698   : > { %v1913_v48 = vpop.xlane.xlu1 %1912  ;;  %v4314_v42 = vcombine.high %v1986_v33, %v1990_v35  ;;  %v4316_v45 = vcombine.high %v1987_v38, %v1991_v39 }
 0x699   : > { %v1918_v30 = vsub.f32 %v1914_v47, %v1916_v46  ;;  %v1915_v50 = vmul.f32 0.00390625, %v1913_v48  ;;  %v1994_v46 = vld [vmem:[#allocation14 + $0xd0] sm:$0xff]  ;;  %v1995_v48 = vld [vmem:[#allocation14 + $0xd8] sm:$0xff] }
 0x69a   : > { %v1998_v47 = vld [vmem:[#allocation14 + $0xf0] sm:$0xff] }
 0x69b   : > { %v1920_v51 = vmax.f32 %v1918_v30, 0.0  ;;  %v1919_v52 = vsub.f32 %v1915_v50, %v1917_v49  ;;  %v1999_v30 = vld [vmem:[#allocation14 + $0xf8] sm:$0xff]  ;;  %v4313_v49 = vcombine.low %v1986_v33, %v1990_v35  ;;  %v4315_v50 = vcombine.low %v1987_v38, %v1991_v39 }
 0x69c   : > { %v4323_v56 = vcombine.low %v1995_v48, %v1999_v30  ;;  %v2035_v33 = vld [vmem:[#allocation14 + $0x218] sm:$0xff] }
 0x69d   : > { %v1926_v53 = vadd.f32 1e-06, %v1920_v51  ;;  %v1921_v54 = vmax.f32 %v1919_v52, 0.0  ;;  %v2002_v51 = vld [vmem:[#allocation14 + $0x110] sm:$0xff] }
 0x69e   : > { %v2006_v52 = vld [vmem:[#allocation14 + $0x130] sm:$0xff] }
 0x69f   : > { %5132 = vrsqrt.f32 %v1926_v53  ;;  %v1927_v55 = vadd.f32 1e-06, %v1921_v54  ;;  %v2003_v53 = vld [vmem:[#allocation14 + $0x118] sm:$0xff] }
 0x6a0   : > { %v2007_v54 = vld [vmem:[#allocation14 + $0x138] sm:$0xff] }
 0x6a1   : > { %5134 = vrsqrt.f32 %v1927_v55  ;;  %v4321_v55 = vcombine.low %v1994_v46, %v1998_v47 }
 0x6a9   : > { %v5133_v8 = vpop.eup %5132 }
 0x6aa   : > { %v1931_v12 = vmul.f32 %v5133_v8, %v1923_v60  ;;  %v1930_v15 = vmul.f32 %v5133_v8, %v1922_v59  ;;  %v4330_v59 = vcombine.high %v2002_v51, %v2006_v52  ;;  %v4332_v60 = vcombine.high %v2003_v53, %v2007_v54  ;;  %v2015_v8 = vld [vmem:[#allocation14 + $0x178] sm:$0xff] }
 0x6ab   : > { %v5135_v16 = vpop.eup %5134 }
 0x6ac   : > { %v1933_v19 = vmul.f32 %v5135_v16, %v1925_v11  ;;  %v1947_v0 = vmul.f32 %v1943_v61, %v1931_v12  ;;  %v1932_v20 = vmul.f32 %v5135_v16, %v1924_v9  ;;  %v1946_v1 = vmul.f32 %v1939_v7, %v1930_v15  ;;  %v2018_v16 = vld [vmem:[#allocation14 + $0x190] sm:$0xff] }
 0x6ad   : > { %v4329_v9 = vcombine.low %v2002_v51, %v2006_v52  ;;  %v4331_v11 = vcombine.low %v2003_v53, %v2007_v54 }
 0x6ae   : > { %v1949_v21 = vmul.f32 %v1943_v61, %v1933_v19  ;;  %v1948_v22 = vmul.f32 %v1939_v7, %v1932_v20  ;;  %v1963_v23 = vadd.f32 %v1959_v17, %v1947_v0  ;;  %v1962_v25 = vadd.f32 %v1955_v18, %v1946_v1  ;;  %v2010_v61 = vld [vmem:[#allocation14 + $0x150] sm:$0xff]  ;;  %v2011_v7 = vld [vmem:[#allocation14 + $0x158] sm:$0xff] }
 0x6af   : > { %v4338_v12 = vcombine.high %v2010_v61, %v2014_v4  ;;  %v4340_v15 = vcombine.high %v2011_v7, %v2015_v8  ;;  %v2023_v19 = vld [vmem:[#allocation14 + $0x1b8] sm:$0xff]  ;;  %v4337_v0 = vcombine.low %v2010_v61, %v2014_v4  ;;  %v4339_v20 = vcombine.low %v2011_v7, %v2015_v8 }
 0x6b0   : > { %v1965_v24 = vadd.f32 %v1959_v17, %v1949_v21  ;;  %v1964_v26 = vadd.f32 %v1955_v18, %v1948_v22  ;;  %v2022_v17 = vld [vmem:[#allocation14 + $0x1b0] sm:$0xff]  ;;  %v2019_v18 = vld [vmem:[#allocation14 + $0x198] sm:$0xff] }
 0x6b1   : > { %v4346_v1 = vcombine.high %v2018_v16, %v2022_v17  ;;  %v4348_v21 = vcombine.high %v2019_v18, %v2023_v19  ;;  %v2026_v22 = vld [vmem:[#allocation14 + $0x1d0] sm:$0xff]  ;;  %v4347_v27 = vcombine.low %v2019_v18, %v2023_v19 }
 0x6b2   : > { %v1967_v31 = vpack.c.bf16 %v1965_v24, %v1963_v23  ;;  %v5961_v32 = vpack.c.bf16 %v1964_v26, %v1962_v25  ;;  %v2030_v23 = vld [vmem:[#allocation14 + $0x1f0] sm:$0xff]  ;;  %v2027_v24 = vld [vmem:[#allocation14 + $0x1d8] sm:$0xff]  ;;  %v4345_v26 = vcombine.low %v2018_v16, %v2022_v17 }
 0x6b3   : > { %v2031_v25 = vld [vmem:[#allocation14 + $0x1f8] sm:$0xff]  ;;  %v4354_v2 = vcombine.high %v2026_v22, %v2030_v23 }
 0x6b4   : > { %2810 = vmatprep.mubr.bf16.mxu0 %v1967_v31  ;;  %2853 = vmatprep.mubr.bf16.mxu1 %v1967_v31  ;;  %v4356_v6 = vcombine.high %v2027_v24, %v2031_v25  ;;  %v4355_v35 = vcombine.low %v2027_v24, %v2031_v25 }
 0x6b5   : > { %2811 = vmatmul.mubr.bf16.vlgmr.msra.gmra.mrb[8].mxu0 %v5961_v32  ;;  %2854 = vmatmul.mubr.bf16.vlgmr.msra.gmra.mrb[24].mxu1 %v5961_v32 }
 0x6b6   : > { %2865 = vmatpush1.bf16.msra.mxu0 %v4297_v36  ;;  %2908 = vmatpush1.bf16.msra.mxu1 %v4299_v37  ;;  %v4322_v36 = vcombine.high %v1994_v46, %v1998_v47  ;;  %v4324_v37 = vcombine.high %v1995_v48, %v1999_v30 }
 0x6b7   : > { %2896 = vmatprep.mubr.bf16.mxu0 %v1967_v31  ;;  %2939 = vmatprep.mubr.bf16.mxu1 %v1967_v31  ;;  %v2038_v31 = vld [vmem:[#allocation14 + $0x230] sm:$0xff] }
 0x6b8   : > { %2866 = vmatprep.subr.bf16.mxu0 %v4306_v28  ;;  %2909 = vmatprep.subr.bf16.mxu1 %v4308_v34  ;;  %v2039_v28 = vld [vmem:[#allocation14 + $0x238] sm:$0xff]  ;;  %v4353_v34 = vcombine.low %v2026_v22, %v2030_v23  ;;  %v4362_v38 = vcombine.high %v2034_v29, %v2038_v31  ;;  %v4361_v46 = vcombine.low %v2034_v29, %v2038_v31 }
 0x6b9   : > { %v4364_v39 = vcombine.high %v2035_v33, %v2039_v28  ;;  %v4363_v47 = vcombine.low %v2035_v33, %v2039_v28 }
 0x6ba   : > { %2867 = vmatpush1.bf16.msra.mxu0 %v4305_v40  ;;  %2910 = vmatpush1.bf16.msra.mxu1 %v4307_v41  ;;  %v2042_v40 = vld [vmem:[#allocation14 + $0x250] sm:$0xff] }
 0x6bb   : > { %2868 = vmatprep.subr.bf16.mxu0 %v4314_v42  ;;  %2911 = vmatprep.subr.bf16.mxu1 %v4316_v45  ;;  %v2046_v41 = vld [vmem:[#allocation14 + $0x270] sm:$0xff]  ;;  %v2043_v42 = vld [vmem:[#allocation14 + $0x258] sm:$0xff] }
 0x6bc   : > { %v2047_v45 = vld [vmem:[#allocation14 + $0x278] sm:$0xff]  ;;  %v4370_v48 = vcombine.high %v2042_v40, %v2046_v41  ;;  %v4369_v51 = vcombine.low %v2042_v40, %v2046_v41 }
 0x6bd   : > { %v4372_v30 = vcombine.high %v2043_v42, %v2047_v45  ;;  %v4371_v52 = vcombine.low %v2043_v42, %v2047_v45 }
 0x6be   : > { %2869 = vmatpush1.bf16.msra.mxu0 %v4313_v49  ;;  %2912 = vmatpush1.bf16.msra.mxu1 %v4315_v50  ;;  %v2050_v49 = vld [vmem:[#allocation14 + $0x290] sm:$0xff] }
 0x6bf   : > { %2870 = vmatprep.subr.bf16.mxu0 %v4322_v36  ;;  %2913 = vmatprep.subr.bf16.mxu1 %v4324_v37  ;;  %v2054_v50 = vld [vmem:[#allocation14 + $0x2b0] sm:$0xff]  ;;  %v2051_v36 = vld [vmem:[#allocation14 + $0x298] sm:$0xff] }
 0x6c0   : > { %v2055_v37 = vld [vmem:[#allocation14 + $0x2b8] sm:$0xff]  ;;  %v4378_v53 = vcombine.high %v2050_v49, %v2054_v50  ;;  %v4377_v61 = vcombine.low %v2050_v49, %v2054_v50 }
 0x6c1   : > { %v4380_v54 = vcombine.high %v2051_v36, %v2055_v37  ;;  %v4379_v4 = vcombine.low %v2051_v36, %v2055_v37  ;;  %v4925_v49 = vld [vmem:[#allocation16 + $0x14] ss:$8 sps:$4 sm:$0xff]   ;;  %v4923_v50 = vld [vmem:[#allocation16 + $0x10] ss:$8 sps:$4 sm:$0xff]   ;;  %v4928_v36 = vld [vmem:[#allocation16 + $0x24] ss:$8 sps:$4 sm:$0xff]  }
 0x6c2   : > { %2871 = vmatpush1.bf16.msra.mxu0 %v4321_v55  ;;  %2914 = vmatpush1.bf16.msra.mxu1 %v4323_v56  ;;  %v2058_v55 = vld [vmem:[#allocation14 + $0x2d0] sm:$0xff]  ;;  %v4926_v37 = vld [vmem:[#allocation16 + $0x20] ss:$8 sps:$4 sm:$0xff]  }
 0x6c3   : > { %2872 = vmatprep.subr.bf16.mxu0 %v4330_v59  ;;  %2915 = vmatprep.subr.bf16.mxu1 %v4332_v60  ;;  %v2062_v56 = vld [vmem:[#allocation14 + $0x2f0] sm:$0xff]  ;;  %v2059_v59 = vld [vmem:[#allocation14 + $0x2d8] sm:$0xff] }
 0x6c4   : > { %v2063_v60 = vld [vmem:[#allocation14 + $0x2f8] sm:$0xff]  ;;  %v4386_v7 = vcombine.high %v2058_v55, %v2062_v56  ;;  %v4385_v16 = vcombine.low %v2058_v55, %v2062_v56 }
 0x6c5   : > { %v4388_v8 = vcombine.high %v2059_v59, %v2063_v60  ;;  %v4387_v17 = vcombine.low %v2059_v59, %v2063_v60  ;;  %v4937_v55 = vld [vmem:[#allocation16 + $0x54] ss:$8 sps:$4 sm:$0xff]   ;;  %v4935_v56 = vld [vmem:[#allocation16 + $0x50] ss:$8 sps:$4 sm:$0xff]   ;;  %v4938_v59 = vld [vmem:[#allocation16 + $0x60] ss:$8 sps:$4 sm:$0xff]  }
 0x6c6   : > { %2873 = vmatpush1.bf16.msra.mxu0 %v4329_v9  ;;  %2916 = vmatpush1.bf16.msra.mxu1 %v4331_v11  ;;  %v2066_v9 = vld [vmem:[#allocation14 + $0x310] sm:$0xff] }
 0x6c7   : > { %2874 = vmatprep.subr.bf16.mxu0 %v4338_v12  ;;  %2917 = vmatprep.subr.bf16.mxu1 %v4340_v15  ;;  %v2070_v11 = vld [vmem:[#allocation14 + $0x330] sm:$0xff]  ;;  %v2067_v12 = vld [vmem:[#allocation14 + $0x318] sm:$0xff] }
 0x6c8   : > { %v2071_v15 = vld [vmem:[#allocation14 + $0x338] sm:$0xff]  ;;  %v4394_v18 = vcombine.high %v2066_v9, %v2070_v11  ;;  %v4393_v22 = vcombine.low %v2066_v9, %v2070_v11  ;;  %v4952_v11 = vld [vmem:[#allocation16 + $0xa4] ss:$8 sps:$4 sm:$0xff]  }
 0x6c9   : > { %v4396_v19 = vcombine.high %v2067_v12, %v2071_v15  ;;  %v4395_v23 = vcombine.low %v2067_v12, %v2071_v15  ;;  %v4943_v60 = vld [vmem:[#allocation16 + $0x74] ss:$8 sps:$4 sm:$0xff]   ;;  %v4947_v9 = vld [vmem:[#allocation16 + $0x90] ss:$8 sps:$4 sm:$0xff]   ;;  %v4950_v12 = vld [vmem:[#allocation16 + $0xa0] ss:$8 sps:$4 sm:$0xff]  }
 0x6ca   : > { %2875 = vmatpush1.bf16.msra.mxu0 %v4337_v0  ;;  %2918 = vmatpush1.bf16.msra.mxu1 %v4339_v20  ;;  %v2074_v0 = vld [vmem:[#allocation14 + $0x350] sm:$0xff] }
 0x6cb   : > { %2876 = vmatprep.subr.bf16.mxu0 %v4346_v1  ;;  %2919 = vmatprep.subr.bf16.mxu1 %v4348_v21  ;;  %v2078_v20 = vld [vmem:[#allocation14 + $0x370] sm:$0xff]  ;;  %v2075_v1 = vld [vmem:[#allocation14 + $0x358] sm:$0xff] }
 0x6cc   : > { %v2079_v21 = vld [vmem:[#allocation14 + $0x378] sm:$0xff]  ;;  %v4402_v24 = vcombine.high %v2074_v0, %v2078_v20  ;;  %v4401_v29 = vcombine.low %v2074_v0, %v2078_v20  ;;  %v4964_v20 = vld [vmem:[#allocation16 + $0xe4] ss:$8 sps:$4 sm:$0xff]  }
 0x6cd   : > { %v4404_v25 = vcombine.high %v2075_v1, %v2079_v21  ;;  %v4403_v31 = vcombine.low %v2075_v1, %v2079_v21  ;;  %v4955_v15 = vld [vmem:[#allocation16 + $0xb4] ss:$8 sps:$4 sm:$0xff]   ;;  %v4959_v0 = vld [vmem:[#allocation16 + $0xd0] ss:$8 sps:$4 sm:$0xff]   ;;  %v4962_v1 = vld [vmem:[#allocation16 + $0xe0] ss:$8 sps:$4 sm:$0xff]  }
 0x6ce   : > { %2877 = vmatpush1.bf16.msra.mxu0 %v4345_v26  ;;  %2920 = vmatpush1.bf16.msra.mxu1 %v4347_v27  ;;  %v2082_v26 = vld [vmem:[#allocation14 + $0x390] sm:$0xff] }
 0x6cf   : > { %2878 = vmatprep.subr.bf16.mxu0 %v4354_v2  ;;  %2921 = vmatprep.subr.bf16.mxu1 %v4356_v6  ;;  %v2086_v27 = vld [vmem:[#allocation14 + $0x3b0] sm:$0xff]  ;;  %v2083_v2 = vld [vmem:[#allocation14 + $0x398] sm:$0xff] }
 0x6d0   : > { %v2087_v6 = vld [vmem:[#allocation14 + $0x3b8] sm:$0xff]  ;;  %v4410_v33 = vcombine.high %v2082_v26, %v2086_v27  ;;  %v4409_v40 = vcombine.low %v2082_v26, %v2086_v27 }
 0x6d1   : > { %v4412_v28 = vcombine.high %v2083_v2, %v2087_v6  ;;  %v4411_v41 = vcombine.low %v2083_v2, %v2087_v6  ;;  %v4967_v21 = vld [vmem:[#allocation16 + $0xf4] ss:$8 sps:$4 sm:$0xff]  }
 0x6d2   : > { %2879 = vmatpush1.bf16.msra.mxu0 %v4353_v34  ;;  %2922 = vmatpush1.bf16.msra.mxu1 %v4355_v35  ;;  %v2090_v34 = vld [vmem:[#allocation14 + $0x3d0] sm:$0xff] }
 0x6d3   : > { %2880 = vmatprep.subr.bf16.mxu0 %v4362_v38  ;;  %2923 = vmatprep.subr.bf16.mxu1 %v4364_v39  ;;  %v2094_v35 = vld [vmem:[#allocation14 + $0x3f0] sm:$0xff]  ;;  %v2091_v38 = vld [vmem:[#allocation14 + $0x3d8] sm:$0xff] }
 0x6d4   : > { %v2095_v39 = vld [vmem:[#allocation14 + $0x3f8] sm:$0xff]  ;;  %v4418_v42 = vcombine.high %v2090_v34, %v2094_v35 }
 0x6d5   : > { %v4420_v45 = vcombine.high %v2091_v38, %v2095_v39 }
 0x6d6   : > { %2881 = vmatpush1.bf16.msra.mxu0 %v4361_v46  ;;  %2924 = vmatpush1.bf16.msra.mxu1 %v4363_v47  ;;  %v4417_v46 = vcombine.low %v2090_v34, %v2094_v35  ;;  %v4419_v47 = vcombine.low %v2091_v38, %v2095_v39 }
 0x6d7   : > { %2882 = vmatprep.subr.bf16.mxu0 %v4370_v48  ;;  %2925 = vmatprep.subr.bf16.mxu1 %v4372_v30  ;;  %v4922_v48 = vld [vmem:[#allocation16 + $0x4] ss:$8 sps:$4 sm:$0xff]   ;;  %v4920_v30 = vld [vmem:[#allocation16] ss:$8 sps:$4 sm:$0xff]  }
 0x6da   : > { %2883 = vmatpush1.bf16.msra.mxu0 %v4369_v51  ;;  %2926 = vmatpush1.bf16.msra.mxu1 %v4371_v52  ;;  %v4931_v51 = vld [vmem:[#allocation16 + $0x34] ss:$8 sps:$4 sm:$0xff]   ;;  %v4929_v52 = vld [vmem:[#allocation16 + $0x30] ss:$8 sps:$4 sm:$0xff]  }
 0x6db   : > { %2884 = vmatprep.subr.bf16.mxu0 %v4378_v53  ;;  %2927 = vmatprep.subr.bf16.mxu1 %v4380_v54  ;;  %v4934_v53 = vld [vmem:[#allocation16 + $0x44] ss:$8 sps:$4 sm:$0xff]   ;;  %v4932_v54 = vld [vmem:[#allocation16 + $0x40] ss:$8 sps:$4 sm:$0xff]  }
 0x6de   : > { %2885 = vmatpush1.bf16.msra.mxu0 %v4377_v61  ;;  %2928 = vmatpush1.bf16.msra.mxu1 %v4379_v4  ;;  %v4941_v61 = vld [vmem:[#allocation16 + $0x70] ss:$8 sps:$4 sm:$0xff]   ;;  %v4946_v4 = vld [vmem:[#allocation16 + $0x84] ss:$8 sps:$4 sm:$0xff]  }
 0x6df   : > { %2886 = vmatprep.subr.bf16.mxu0 %v4386_v7  ;;  %2929 = vmatprep.subr.bf16.mxu1 %v4388_v8  ;;  %v4944_v7 = vld [vmem:[#allocation16 + $0x80] ss:$8 sps:$4 sm:$0xff]   ;;  %v4949_v8 = vld [vmem:[#allocation16 + $0x94] ss:$8 sps:$4 sm:$0xff]  }
 0x6e2   : > { %2887 = vmatpush1.bf16.msra.mxu0 %v4385_v16  ;;  %2930 = vmatpush1.bf16.msra.mxu1 %v4387_v17  ;;  %v4953_v16 = vld [vmem:[#allocation16 + $0xb0] ss:$8 sps:$4 sm:$0xff]   ;;  %v4958_v17 = vld [vmem:[#allocation16 + $0xc4] ss:$8 sps:$4 sm:$0xff]  }
 0x6e3   : > { %2888 = vmatprep.subr.bf16.mxu0 %v4394_v18  ;;  %2931 = vmatprep.subr.bf16.mxu1 %v4396_v19  ;;  %v4956_v18 = vld [vmem:[#allocation16 + $0xc0] ss:$8 sps:$4 sm:$0xff]   ;;  %v4961_v19 = vld [vmem:[#allocation16 + $0xd4] ss:$8 sps:$4 sm:$0xff]  }
 0x6e6   : > { %2889 = vmatpush1.bf16.msra.mxu0 %v4393_v22  ;;  %2932 = vmatpush1.bf16.msra.mxu1 %v4395_v23  ;;  %v4965_v22 = vld [vmem:[#allocation16 + $0xf0] ss:$8 sps:$4 sm:$0xff]   ;;  %v4970_v23 = vld [vmem:[#allocation16 + $0x104] ss:$8 sps:$4 sm:$0xff]  }
 0x6e7   : > { %2890 = vmatprep.subr.bf16.mxu0 %v4402_v24  ;;  %2933 = vmatprep.subr.bf16.mxu1 %v4404_v25  ;;  %v5970_v24 = vld [vmem:[%s6134_s21] sm:$0xff]  ;;  %s5376_s21 = scalar_lea.vmem %s5375_s10, 1024 }
 0x6e8   : > { %v2101_v25 = vrot.slane %v5970_v24, %v5843_v3  ;;  %v2109_v26 = vrot.slane %v5970_v24, %v728_v43  ;;  %v2105_v27 = vrot.slane %v5970_v24, %v5840_v63  ;;  %v2113_v2 = vrot.slane %v5970_v24, %v732_v44  ;;  %p5378_p1 = scmp.lt.s32.totalorder %s5376_s21, %s5370_s30 }
 0x6ea   : > { %2891 = vmatpush1.bf16.msra.mxu0 %v4401_v29  ;;  %2934 = vmatpush1.bf16.msra.mxu1 %v4403_v31  ;;  %p5379_p3 = por %p5378_p1, %p5377_p4 }
 0x6eb   : > { %2892 = vmatprep.subr.bf16.mxu0 %v4410_v33  ;;  %2935 = vmatprep.subr.bf16.mxu1 %v4412_v28 }
 0x6ec   : > { %p5380_p8 = pnand %p5379_p3, %p5373_p7 }
 0x6ee   : > { %2893 = vmatpush1.bf16.msra.mxu0 %v4409_v40  ;;  %2936 = vmatpush1.bf16.msra.mxu1 %v4411_v41 }
 0x6ef   : > { %2894 = vmatprep.subr.bf16.mxu0 %v4418_v42  ;;  %2937 = vmatprep.subr.bf16.mxu1 %v4420_v45 }
 0x6f2   : > { %2895 = vmatpush1.bf16.msra.mxu0 %v4417_v46  ;;  %2938 = vmatpush1.bf16.msra.mxu1 %v4419_v47 }
 0x6f3   : > { %3818 = vmatprep.subr.bf16.mxu0 %v4922_v48 }
 0x6f5   : > { %2897 = vmatmul.mubr.bf16.vlgmr.msra.gmra.mrb[12].mxu0 %v5961_v32  ;;  %2940 = vmatmul.mubr.bf16.vlgmr.msra.gmra.mrb[28].mxu1 %v5961_v32  ;;  %v4940_v32 = vld [vmem:[#allocation16 + $0x64] ss:$8 sps:$4 sm:$0xff]  }
 0x6f6   : > { %3819 = vmatpush1.bf16.msra.mxu0 %v4920_v30 }
 0x6f7   : > { %3820 = vmatprep.subr.bf16.mxu0 %v4925_v49 }
 0x6fa   : > { %3821 = vmatpush1.bf16.msra.mxu0 %v4923_v50 }
 0x6fb   : > { %3822 = vmatprep.subr.bf16.mxu0 %v4928_v36 }
 0x6fe   : > { %3823 = vmatpush1.bf16.msra.mxu0 %v4926_v37 }
 0x6ff   : > { %3824 = vmatprep.subr.bf16.mxu0 %v4931_v51 }
 0x702   : > { %3825 = vmatpush1.bf16.msra.mxu0 %v4929_v52 }
 0x703   : > { %3826 = vmatprep.subr.bf16.mxu0 %v4934_v53 }
 0x706   : > { %3827 = vmatpush1.bf16.msra.mxu0 %v4932_v54 }
 0x707   : > { %3828 = vmatprep.subr.bf16.mxu0 %v4937_v55 }
 0x70a   : > { %3829 = vmatpush1.bf16.msra.mxu0 %v4935_v56 }
 0x70b   : > { %3830 = vmatprep.subr.bf16.mxu0 %v4940_v32 }
 0x70e   : > { %3831 = vmatpush1.bf16.msra.mxu0 %v4938_v59 }
 0x70f   : > { %3832 = vmatprep.subr.bf16.mxu0 %v4943_v60 }
 0x712   : > { %3833 = vmatpush1.bf16.msra.mxu0 %v4941_v61 }
 0x713   : > { %3834 = vmatprep.subr.bf16.mxu0 %v4946_v4 }
 0x716   : > { %3835 = vmatpush1.bf16.msra.mxu0 %v4944_v7 }
 0x717   : > { %3836 = vmatprep.subr.bf16.mxu0 %v4949_v8 }
 0x71a   : > { %3837 = vmatpush1.bf16.msra.mxu0 %v4947_v9 }
 0x71b   : > { %3838 = vmatprep.subr.bf16.mxu0 %v4952_v11 }
 0x71e   : > { %3839 = vmatpush1.bf16.msra.mxu0 %v4950_v12 }
 0x71f   : > { %3840 = vmatprep.subr.bf16.mxu0 %v4955_v15 }
 0x722   : > { %3841 = vmatpush1.bf16.msra.mxu0 %v4953_v16 }
 0x723   : > { %3842 = vmatprep.subr.bf16.mxu0 %v4958_v17 }
 0x726   : > { %3843 = vmatpush1.bf16.msra.mxu0 %v4956_v18 }
 0x727   : > { %3844 = vmatprep.subr.bf16.mxu0 %v4961_v19 }
 0x72a   : > { %3845 = vmatpush1.bf16.msra.mxu0 %v4959_v0 }
 0x72b   : > { %3846 = vmatprep.subr.bf16.mxu0 %v4964_v20 }
 0x72e   : > { %3847 = vmatpush1.bf16.msra.mxu0 %v4962_v1 }
 0x72f   : > { %3848 = vmatprep.subr.bf16.mxu0 %v4967_v21 }
 0x732   : > { %3849 = vmatpush1.bf16.msra.mxu0 %v4965_v22 }
 0x733   : > { %3861 = vmatprep.subr.bf16.mxu0 %v4970_v23 }
 0x788   : > { %v2812_v6 = vpop.f32.mrb[8].mxu0  ;;  %v2855_v29 = vpop.f32.mrb[24].mxu1 }
 0x789   : > { %v2813_v31 = vadd.f32 %v2812_v6, %v2101_v25  ;;  %v2856_v33 = vadd.f32 %v2855_v29, %v2109_v26  ;;  %v2814_v28 = vpop.f32.mrb[9].mxu0  ;;  %v2857_v34 = vpop.f32.mrb[25].mxu1 }
 0x78a   : > { %v2815_v35 = vadd.f32 %v2814_v28, %v2105_v27  ;;  %v2858_v38 = vadd.f32 %v2857_v34, %v2113_v2  ;;  %v2816_v39 = vpop.f32.mrb[10].mxu0  ;;  %v2859_v40 = vpop.f32.mrb[26].mxu1  ;;  %v4968_v34 = vld [vmem:[#allocation16 + $0x100] ss:$8 sps:$4 sm:$0xff]  }
 0x78b   : > { %v2966_v41 = vmul.f32 0.70710677, %v2813_v31  ;;  %v2968_v42 = vmul.f32 0.70710677, %v2856_v33  ;;  %v2817_v46 = vadd.f32 %v2816_v39, %v2101_v25  ;;  %v2860_v47 = vadd.f32 %v2859_v40, %v2109_v26  ;;  %v2818_v48 = vpop.f32.mrb[11].mxu0  ;;  %v2861_v30 = vpop.f32.mrb[27].mxu1 }
 0x78c   : > { %v2967_v43 = vmul.f32 0.70710677, %v2815_v35  ;;  %v2969_v45 = vmul.f32 0.70710677, %v2858_v38  ;;  %v2819_v44 = vadd.f32 %v2818_v48, %v2105_v27  ;;  %v2862_v49 = vadd.f32 %v2861_v30, %v2113_v2  ;;  %v4971_v39 = vld [vmem:[#allocation16 + $0x110] ss:$8 sps:$4 sm:$0xff]  }
 0x78d   : > { %5136 = verf.f32 %v2966_v41  ;;  %v2974_v50 = vmul.f32 0.70710677, %v2817_v46  ;;  %v2976_v36 = vmul.f32 0.70710677, %v2860_v47  ;;  %v2950_v59 = vmul.f32 0.5, %v2813_v31 }
 0x78e   : > { %5138 = verf.f32 %v2968_v42  ;;  %v2975_v37 = vmul.f32 0.70710677, %v2819_v44  ;;  %v2977_v51 = vmul.f32 0.70710677, %v2862_v49  ;;  %v2952_v60 = vmul.f32 0.5, %v2856_v33 }
 0x78f   : > { %5140 = verf.f32 %v2967_v43  ;;  %v2951_v7 = vmul.f32 0.5, %v2815_v35  ;;  %v2958_v9 = vmul.f32 0.5, %v2817_v46  ;;  %v2953_v15 = vmul.f32 0.5, %v2858_v38  ;;  %v4973_v38 = vld [vmem:[#allocation16 + $0x114] ss:$8 sps:$4 sm:$0xff]  }
 0x790   : > { %5142 = verf.f32 %v2969_v45  ;;  %v2960_v17 = vmul.f32 0.5, %v2860_v47  ;;  %v2959_v1 = vmul.f32 0.5, %v2819_v44  ;;  %v2961_v25 = vmul.f32 0.5, %v2862_v49  ;;  %v4976_v40 = vld [vmem:[#allocation16 + $0x124] ss:$8 sps:$4 sm:$0xff]  }
 0x791   : > { %5144 = verf.f32 %v2974_v50  ;;  %v4974_v41 = vld [vmem:[#allocation16 + $0x120] ss:$8 sps:$4 sm:$0xff]   ;;  %v4979_v42 = vld [vmem:[#allocation16 + $0x134] ss:$8 sps:$4 sm:$0xff]   ;;  %v4977_v43 = vld [vmem:[#allocation16 + $0x130] ss:$8 sps:$4 sm:$0xff]  }
 0x792   : > { %5146 = verf.f32 %v2976_v36  ;;  %v4982_v45 = vld [vmem:[#allocation16 + $0x144] ss:$8 sps:$4 sm:$0xff]   ;;  %v4980_v46 = vld [vmem:[#allocation16 + $0x140] ss:$8 sps:$4 sm:$0xff]   ;;  %v4985_v47 = vld [vmem:[#allocation16 + $0x154] ss:$8 sps:$4 sm:$0xff]  }
 0x793   : > { %5148 = verf.f32 %v2975_v37  ;;  %v4983_v48 = vld [vmem:[#allocation16 + $0x150] ss:$8 sps:$4 sm:$0xff]   ;;  %v4988_v30 = vld [vmem:[#allocation16 + $0x164] ss:$8 sps:$4 sm:$0xff]   ;;  %v4986_v44 = vld [vmem:[#allocation16 + $0x160] ss:$8 sps:$4 sm:$0xff]  }
 0x794   : > { %5150 = verf.f32 %v2977_v51  ;;  %v4991_v49 = vld [vmem:[#allocation16 + $0x174] ss:$8 sps:$4 sm:$0xff]   ;;  %v4989_v50 = vld [vmem:[#allocation16 + $0x170] ss:$8 sps:$4 sm:$0xff]   ;;  %v4994_v36 = vld [vmem:[#allocation16 + $0x184] ss:$8 sps:$4 sm:$0xff]  }
 0x795   : > { %v2124_v37 = vsub.s32 6, %v5837_v62  ;;  %v4992_v51 = vld [vmem:[#allocation16 + $0x180] ss:$8 sps:$4 sm:$0xff]  }
 0x797   : > { %v5137_v52 = vpop.eup %5136 }
 0x798   : > { %v5139_v53 = vpop.eup %5138  ;;  %v2998_v56 = vadd.f32 1.0, %v5137_v52  ;;  %v2128_v52 = vsub.s32 7, %v5837_v62 }
 0x799   : > { %v5141_v54 = vpop.eup %5140  ;;  %v3000_v61 = vadd.f32 1.0, %v5139_v53  ;;  %v4997_v53 = vld [vmem:[#allocation16 + $0x194] ss:$8 sps:$4 sm:$0xff]  }
 0x79a   : > { %v5143_v55 = vpop.eup %5142  ;;  %v2999_v8 = vadd.f32 1.0, %v5141_v54  ;;  %v3014_v0 = vmul.f32 %v2998_v56, %v2950_v59  ;;  %v2117_v54 = vrot.slane %v5970_v24, %v736_v57  ;;  %v4995_v56 = vld [vmem:[#allocation16 + $0x190] ss:$8 sps:$4 sm:$0xff]   ;;  %v2129_v59 = vrot.slane %v5970_v24, %v2128_v52 }
 0x79b   : > { %v5145_v32 = vpop.eup %5144  ;;  %v3001_v16 = vadd.f32 1.0, %v5143_v55  ;;  %v5982_v22 = vmul.f32 %v3000_v61, %v2952_v60  ;;  %v2125_v55 = vrot.slane %v5970_v24, %v2124_v37  ;;  %v5000_v60 = vld [vmem:[#allocation16 + $0x1a4] ss:$8 sps:$4 sm:$0xff]  }
 0x79c   : > { %v5147_v4 = vpop.eup %5146  ;;  %v3006_v11 = vadd.f32 1.0, %v5145_v32  ;;  %v3015_v27 = vmul.f32 %v2999_v8, %v2951_v7  ;;  %v2121_v32 = vrot.slane %v5970_v24, %v740_v58  ;;  %v5003_v58 = vld [vmem:[#allocation16 + $0x1b4] ss:$8 sps:$4 sm:$0xff]  }
 0x79d   : > { %v5149_v12 = vpop.eup %5148  ;;  %v3008_v18 = vadd.f32 1.0, %v5147_v4  ;;  %v3017_v29 = vmul.f32 %v3001_v16, %v2953_v15 }
 0x79e   : > { %v5151_v19 = vpop.eup %5150  ;;  %v3022_v20 = vmul.f32 %v3006_v11, %v2958_v9  ;;  %v3007_v21 = vadd.f32 1.0, %v5149_v12 }
 0x79f   : > { %v5984_v23 = vmul.f32 %v3008_v18, %v2960_v17  ;;  %v3009_v26 = vadd.f32 1.0, %v5151_v19  ;;  %v4998_v17 = vld [vmem:[#allocation16 + $0x1a0] ss:$8 sps:$4 sm:$0xff]  }
 0x7a0   : > { %v3030_v2 = vpack.c.bf16 %v3022_v20, %v3014_v0  ;;  %v3023_v6 = vmul.f32 %v3007_v21, %v2959_v1 }
 0x7a1   : > { %v3032_v31 = vpack.c.bf16 %v5984_v23, %v5982_v22  ;;  %v3025_v33 = vmul.f32 %v3009_v26, %v2961_v25  ;;  %v5031_v22 = vld [vmem:[#allocation16 + $0x250] ss:$8 sps:$4 sm:$0xff]   ;;  %v5036_v23 = vld [vmem:[#allocation16 + $0x264] ss:$8 sps:$4 sm:$0xff]  }
 0x7a2   : > { %v3031_v28 = vpack.c.bf16 %v3023_v6, %v3015_v27  ;;  %v5001_v27 = vld [vmem:[#allocation16 + $0x1b0] ss:$8 sps:$4 sm:$0xff]   ;;  %v5006_v6 = vld [vmem:[#allocation16 + $0x1c4] ss:$8 sps:$4 sm:$0xff]  }
 0x7a3   : > { %v3033_v35 = vpack.c.bf16 %v3025_v33, %v3017_v29 }
 0x7a4   : > { %3850 = vmatprep.mubr.bf16.mxu0 %v3031_v28 }
 0x7a5   : > { %3851 = vmatmul.mubr.bf16.vlgmr.msra.gmra.mrb[16].mxu0 %v3030_v2 }
 0x7a6   : > { %3862 = vmatpush1.bf16.msra.mxu0 %v4968_v34  ;;  %3893 = vmatprep.mubr.bf16.mxu0 %v3033_v35  ;;  %v5004_v34 = vld [vmem:[#allocation16 + $0x1c0] ss:$8 sps:$4 sm:$0xff]   ;;  %v5009_v35 = vld [vmem:[#allocation16 + $0x1d4] ss:$8 sps:$4 sm:$0xff]  }
 0x7a7   : > { %3863 = vmatprep.subr.bf16.mxu0 %v4973_v38  ;;  %v5007_v38 = vld [vmem:[#allocation16 + $0x1d0] ss:$8 sps:$4 sm:$0xff]  }
 0x7aa   : > { %3864 = vmatpush1.bf16.msra.mxu0 %v4971_v39 }
 0x7ab   : > { %3865 = vmatprep.subr.bf16.mxu0 %v4976_v40  ;;  %v5012_v40 = vld [vmem:[#allocation16 + $0x1e4] ss:$8 sps:$4 sm:$0xff]  }
 0x7ae   : > { %3866 = vmatpush1.bf16.msra.mxu0 %v4974_v41 }
 0x7af   : > { %3867 = vmatprep.subr.bf16.mxu0 %v4979_v42 }
 0x7b2   : > { %3868 = vmatpush1.bf16.msra.mxu0 %v4977_v43 }
 0x7b3   : > { %3869 = vmatprep.subr.bf16.mxu0 %v4982_v45 }
 0x7b6   : > { %3870 = vmatpush1.bf16.msra.mxu0 %v4980_v46  ;;  %v5010_v46 = vld [vmem:[#allocation16 + $0x1e0] ss:$8 sps:$4 sm:$0xff]  }
 0x7b7   : > { %3871 = vmatprep.subr.bf16.mxu0 %v4985_v47 }
 0x7ba   : > { %3872 = vmatpush1.bf16.msra.mxu0 %v4983_v48 }
 0x7bb   : > { %3873 = vmatprep.subr.bf16.mxu0 %v4988_v30 }
 0x7be   : > { %3874 = vmatpush1.bf16.msra.mxu0 %v4986_v44 }
 0x7bf   : > { %3875 = vmatprep.subr.bf16.mxu0 %v4991_v49  ;;  %v5015_v49 = vld [vmem:[#allocation16 + $0x1f4] ss:$8 sps:$4 sm:$0xff]  }
 0x7c2   : > { %3876 = vmatpush1.bf16.msra.mxu0 %v4989_v50 }
 0x7c3   : > { %3877 = vmatprep.subr.bf16.mxu0 %v4994_v36 }
 0x7c6   : > { %3878 = vmatpush1.bf16.msra.mxu0 %v4992_v51 }
 0x7c7   : > { %3879 = vmatprep.subr.bf16.mxu0 %v4997_v53 }
 0x7c8   : > { %v2898_v61 = vpop.f32.mrb[12].mxu0  ;;  %v2941_v4 = vpop.f32.mrb[28].mxu1 }
 0x7c9   : > { %v2899_v7 = vadd.f32 %v2898_v61, %v2117_v54  ;;  %v2942_v8 = vadd.f32 %v2941_v4, %v2125_v55  ;;  %v2900_v9 = vpop.f32.mrb[13].mxu0  ;;  %v2943_v11 = vpop.f32.mrb[29].mxu1 }
 0x7ca   : > { %3880 = vmatpush1.bf16.msra.mxu0 %v4995_v56  ;;  %v2901_v57 = vadd.f32 %v2900_v9, %v2121_v32  ;;  %v2944_v12 = vadd.f32 %v2943_v11, %v2129_v59  ;;  %v2902_v15 = vpop.f32.mrb[14].mxu0  ;;  %v2945_v16 = vpop.f32.mrb[30].mxu1 }
 0x7cb   : > { %v2970_v18 = vmul.f32 0.70710677, %v2899_v7  ;;  %v2972_v62 = vmul.f32 0.70710677, %v2942_v8  ;;  %3881 = vmatprep.subr.bf16.mxu0 %v5000_v60  ;;  %v2903_v0 = vadd.f32 %v2902_v15, %v2117_v54  ;;  %v2946_v20 = vadd.f32 %v2945_v16, %v2125_v55  ;;  %v2904_v1 = vpop.f32.mrb[15].mxu0  ;;  %v2947_v21 = vpop.f32.mrb[31].mxu1 }
 0x7cc   : > { %v2971_v19 = vmul.f32 0.70710677, %v2901_v57  ;;  %v2973_v24 = vmul.f32 0.70710677, %v2944_v12  ;;  %v2905_v25 = vadd.f32 %v2904_v1, %v2121_v32  ;;  %v2948_v26 = vadd.f32 %v2947_v21, %v2129_v59  ;;  %v5019_v21 = vld [vmem:[#allocation16 + $0x210] ss:$8 sps:$4 sm:$0xff]  }
 0x7cd   : > { %5152 = verf.f32 %v2970_v18  ;;  %v2978_v2 = vmul.f32 0.70710677, %v2903_v0  ;;  %v2980_v29 = vmul.f32 0.70710677, %v2946_v20  ;;  %v2954_v48 = vmul.f32 0.5, %v2899_v7 }
 0x7ce   : > { %5154 = verf.f32 %v2972_v62  ;;  %3882 = vmatpush1.bf16.msra.mxu0 %v4998_v17  ;;  %v2979_v33 = vmul.f32 0.70710677, %v2905_v25  ;;  %v2981_v28 = vmul.f32 0.70710677, %v2948_v26  ;;  %v2956_v30 = vmul.f32 0.5, %v2942_v8 }
 0x7cf   : > { %5156 = verf.f32 %v2971_v19  ;;  %3883 = vmatprep.subr.bf16.mxu0 %v5003_v58  ;;  %v2955_v36 = vmul.f32 0.5, %v2901_v57  ;;  %v2962_v51 = vmul.f32 0.5, %v2903_v0  ;;  %v2957_v54 = vmul.f32 0.5, %v2944_v12  ;;  %v5013_v8 = vld [vmem:[#allocation16 + $0x1f0] ss:$8 sps:$4 sm:$0xff]  }
 0x7d0   : > { %5158 = verf.f32 %v2973_v24  ;;  %v2964_v56 = vmul.f32 0.5, %v2946_v20  ;;  %v2963_v4 = vmul.f32 0.5, %v2905_v25  ;;  %v2965_v57 = vmul.f32 0.5, %v2948_v26  ;;  %v5018_v12 = vld [vmem:[#allocation16 + $0x204] ss:$8 sps:$4 sm:$0xff]  }
 0x7d1   : > { %5160 = verf.f32 %v2978_v2  ;;  %v5016_v24 = vld [vmem:[#allocation16 + $0x200] ss:$8 sps:$4 sm:$0xff]   ;;  %v5021_v20 = vld [vmem:[#allocation16 + $0x214] ss:$8 sps:$4 sm:$0xff]   ;;  %v5024_v25 = vld [vmem:[#allocation16 + $0x224] ss:$8 sps:$4 sm:$0xff]  }
 0x7d2   : > { %5162 = verf.f32 %v2980_v29  ;;  %3884 = vmatpush1.bf16.msra.mxu0 %v5001_v27  ;;  %v5022_v26 = vld [vmem:[#allocation16 + $0x220] ss:$8 sps:$4 sm:$0xff]   ;;  %v5027_v27 = vld [vmem:[#allocation16 + $0x234] ss:$8 sps:$4 sm:$0xff]   ;;  %v5025_v2 = vld [vmem:[#allocation16 + $0x230] ss:$8 sps:$4 sm:$0xff]  }
 0x7d3   : > { %5164 = verf.f32 %v2979_v33  ;;  %3885 = vmatprep.subr.bf16.mxu0 %v5006_v6  ;;  %v5030_v6 = vld [vmem:[#allocation16 + $0x244] ss:$8 sps:$4 sm:$0xff]   ;;  %v5028_v29 = vld [vmem:[#allocation16 + $0x240] ss:$8 sps:$4 sm:$0xff]   ;;  %v5033_v33 = vld [vmem:[#allocation16 + $0x254] ss:$8 sps:$4 sm:$0xff]  }
 0x7d4   : > { %5166 = verf.f32 %v2981_v28  ;;  %v5039_v28 = vld [vmem:[#allocation16 + $0x274] ss:$8 sps:$4 sm:$0xff]  }
 0x7d6   : > { %3886 = vmatpush1.bf16.msra.mxu0 %v5004_v34  ;;  %v5037_v34 = vld [vmem:[#allocation16 + $0x270] ss:$8 sps:$4 sm:$0xff]  }
 0x7d7   : > { %v5153_v39 = vpop.eup %5152  ;;  %3887 = vmatprep.subr.bf16.mxu0 %v5009_v35  ;;  %v5042_v35 = vld [vmem:[#allocation16 + $0x284] ss:$8 sps:$4 sm:$0xff]  }
 0x7d8   : > { %v5155_v41 = vpop.eup %5154  ;;  %v3002_v45 = vadd.f32 1.0, %v5153_v39  ;;  %v5045_v39 = vld [vmem:[#allocation16 + $0x294] ss:$8 sps:$4 sm:$0xff]  }
 0x7d9   : > { %v5157_v42 = vpop.eup %5156  ;;  %v3004_v44 = vadd.f32 1.0, %v5155_v41  ;;  %v5048_v41 = vld [vmem:[#allocation16 + $0x2a4] ss:$8 sps:$4 sm:$0xff]  }
 0x7da   : > { %v5159_v43 = vpop.eup %5158  ;;  %3888 = vmatpush1.bf16.msra.mxu0 %v5007_v38  ;;  %v3003_v37 = vadd.f32 1.0, %v5157_v42  ;;  %v5998_v60 = vmul.f32 %v3002_v45, %v2954_v48  ;;  %v5040_v38 = vld [vmem:[#allocation16 + $0x280] ss:$8 sps:$4 sm:$0xff]   ;;  %v5049_v45 = vld [vmem:[#allocation16 + $0x2b0] ss:$8 sps:$4 sm:$0xff]  }
 0x7db   : > { %v5161_v47 = vpop.eup %5160  ;;  %3889 = vmatprep.subr.bf16.mxu0 %v5012_v40  ;;  %v3005_v55 = vadd.f32 1.0, %v5159_v43  ;;  %v6002_v9 = vmul.f32 %v3004_v44, %v2956_v30  ;;  %v5043_v40 = vld [vmem:[#allocation16 + $0x290] ss:$8 sps:$4 sm:$0xff]   ;;  %v5046_v42 = vld [vmem:[#allocation16 + $0x2a0] ss:$8 sps:$4 sm:$0xff]  }
 0x7dc   : > { %v5163_v50 = vpop.eup %5162  ;;  %v3010_v52 = vadd.f32 1.0, %v5161_v47  ;;  %v3019_v16 = vmul.f32 %v3003_v37, %v2955_v36  ;;  %v5051_v43 = vld [vmem:[#allocation16 + $0x2b4] ss:$8 sps:$4 sm:$0xff]   ;;  %v5052_v47 = vld [vmem:[#allocation16 + $0x2c0] ss:$8 sps:$4 sm:$0xff]  }
 0x7dd   : > { %v5165_v53 = vpop.eup %5164  ;;  %v3012_v32 = vadd.f32 1.0, %v5163_v50  ;;  %v6008_v62 = vmul.f32 %v3005_v55, %v2957_v54  ;;  %v5057_v48 = vld [vmem:[#allocation16 + $0x2d4] ss:$8 sps:$4 sm:$0xff]   ;;  %v5055_v30 = vld [vmem:[#allocation16 + $0x2d0] ss:$8 sps:$4 sm:$0xff]  }
 0x7de   : > { %v5167_v59 = vpop.eup %5166  ;;  %v6000_v61 = vmul.f32 %v3010_v52, %v2962_v51  ;;  %v3011_v7 = vadd.f32 1.0, %v5165_v53  ;;  %3890 = vmatpush1.bf16.msra.mxu0 %v5010_v46  ;;  %v5054_v46 = vld [vmem:[#allocation16 + $0x2c4] ss:$8 sps:$4 sm:$0xff]   ;;  %v5063_v50 = vld [vmem:[#allocation16 + $0x2f4] ss:$8 sps:$4 sm:$0xff]  }
 0x7df   : > { %v6004_v11 = vmul.f32 %v3012_v32, %v2964_v56  ;;  %v3013_v15 = vadd.f32 1.0, %v5167_v59  ;;  %3891 = vmatprep.subr.bf16.mxu0 %v5015_v49  ;;  %v5060_v44 = vld [vmem:[#allocation16 + $0x2e4] ss:$8 sps:$4 sm:$0xff]   ;;  %v5058_v49 = vld [vmem:[#allocation16 + $0x2e0] ss:$8 sps:$4 sm:$0xff]  }
 0x7e0   : > { %v3034_v17 = vpack.c.bf16 %v6000_v61, %v5998_v60  ;;  %v3027_v18 = vmul.f32 %v3011_v7, %v2963_v4  ;;  %v5061_v36 = vld [vmem:[#allocation16 + $0x2f0] ss:$8 sps:$4 sm:$0xff]   ;;  %v5066_v37 = vld [vmem:[#allocation16 + $0x304] ss:$8 sps:$4 sm:$0xff]   ;;  %v5064_v51 = vld [vmem:[#allocation16 + $0x300] ss:$8 sps:$4 sm:$0xff]  }
 0x7e1   : > { %v3036_v58 = vpack.c.bf16 %v6004_v11, %v6002_v9  ;;  %v6012_v19 = vmul.f32 %v3013_v15, %v2965_v57  ;;  %v5069_v52 = vld [vmem:[#allocation16 + $0x314] ss:$8 sps:$4 sm:$0xff]   ;;  %v5067_v53 = vld [vmem:[#allocation16 + $0x310] ss:$8 sps:$4 sm:$0xff]   ;;  %v5072_v54 = vld [vmem:[#allocation16 + $0x324] ss:$8 sps:$4 sm:$0xff]  }
 0x7e2   : > { %3892 = vmatpush1.bf16.msra.mxu0 %v5013_v8  ;;  %v3035_v0 = vpack.c.bf16 %v3027_v18, %v3019_v16  ;;  %v5070_v55 = vld [vmem:[#allocation16 + $0x320] ss:$8 sps:$4 sm:$0xff]   ;;  %v5075_v56 = vld [vmem:[#allocation16 + $0x334] ss:$8 sps:$4 sm:$0xff]   ;;  %v5073_v32 = vld [vmem:[#allocation16 + $0x330] ss:$8 sps:$4 sm:$0xff]  }
 0x7e3   : > { %3904 = vmatprep.subr.bf16.mxu0 %v5018_v12  ;;  %v3037_v1 = vpack.c.bf16 %v6012_v19, %v6008_v62  ;;  %v5078_v59 = vld [vmem:[#allocation16 + $0x344] ss:$8 sps:$4 sm:$0xff]   ;;  %v5076_v4 = vld [vmem:[#allocation16 + $0x340] ss:$8 sps:$4 sm:$0xff]   ;;  %v5081_v60 = vld [vmem:[#allocation16 + $0x354] ss:$8 sps:$4 sm:$0xff]  }
 0x7e4   : > { %v5079_v61 = vld [vmem:[#allocation16 + $0x350] ss:$8 sps:$4 sm:$0xff]   ;;  %v5084_v7 = vld [vmem:[#allocation16 + $0x364] ss:$8 sps:$4 sm:$0xff]   ;;  %v5082_v8 = vld [vmem:[#allocation16 + $0x360] ss:$8 sps:$4 sm:$0xff]  }
 0x7e5   : > { %3894 = vmatmul.mubr.bf16.vlgmr.msra.gmra.mrb[16].mxu0 %v3032_v31  ;;  %v5034_v31 = vld [vmem:[#allocation16 + $0x260] ss:$8 sps:$4 sm:$0xff]   ;;  %v5087_v57 = vld [vmem:[#allocation16 + $0x374] ss:$8 sps:$4 sm:$0xff]   ;;  %v5085_v15 = vld [vmem:[#allocation16 + $0x370] ss:$8 sps:$4 sm:$0xff]  }
 0x7e6   : > { %3905 = vmatpush1.bf16.msra.mxu0 %v5016_v24  ;;  %3936 = vmatprep.mubr.bf16.mxu0 %v3035_v0  ;;  %v5090_v12 = vld [vmem:[#allocation16 + $0x384] ss:$8 sps:$4 sm:$0xff]   ;;  %v5088_v16 = vld [vmem:[#allocation16 + $0x380] ss:$8 sps:$4 sm:$0xff]   ;;  %v5091_v18 = vld [vmem:[#allocation16 + $0x390] ss:$8 sps:$4 sm:$0xff]  }
 0x7e7   : > { %3906 = vmatprep.subr.bf16.mxu0 %v5021_v20  ;;  %v5096_v62 = vld [vmem:[#allocation16 + $0x3a4] ss:$8 sps:$4 sm:$0xff]   ;;  %v5094_v19 = vld [vmem:[#allocation16 + $0x3a0] ss:$8 sps:$4 sm:$0xff]   ;;  %v5099_v24 = vld [vmem:[#allocation16 + $0x3b4] ss:$8 sps:$4 sm:$0xff]  }
 0x7e8   : > { %v5097_v0 = vld [vmem:[#allocation16 + $0x3b0] ss:$8 sps:$4 sm:$0xff]   ;;  %v5102_v20 = vld [vmem:[#allocation16 + $0x3c4] ss:$8 sps:$4 sm:$0xff]  }
 0x7ea   : > { %3907 = vmatpush1.bf16.msra.mxu0 %v5019_v21  ;;  %v5105_v21 = vld [vmem:[#allocation16 + $0x3d4] ss:$8 sps:$4 sm:$0xff]  }
 0x7eb   : > { %3908 = vmatprep.subr.bf16.mxu0 %v5024_v25  ;;  %v5103_v25 = vld [vmem:[#allocation16 + $0x3d0] ss:$8 sps:$4 sm:$0xff]  }
 0x7ee   : > { %3909 = vmatpush1.bf16.msra.mxu0 %v5022_v26  ;;  %v5108_v26 = vld [vmem:[#allocation16 + $0x3e4] ss:$8 sps:$4 sm:$0xff]  }
 0x7ef   : > { %3910 = vmatprep.subr.bf16.mxu0 %v5027_v27  ;;  %v5106_v27 = vld [vmem:[#allocation16 + $0x3e0] ss:$8 sps:$4 sm:$0xff]  }
 0x7f2   : > { %3911 = vmatpush1.bf16.msra.mxu0 %v5025_v2  ;;  %v5111_v2 = vld [vmem:[#allocation16 + $0x3f4] ss:$8 sps:$4 sm:$0xff]  }
 0x7f3   : > { %3912 = vmatprep.subr.bf16.mxu0 %v5030_v6  ;;  %v5109_v6 = vld [vmem:[#allocation16 + $0x3f0] ss:$8 sps:$4 sm:$0xff]  }
 0x7f6   : > { %3913 = vmatpush1.bf16.msra.mxu0 %v5028_v29  ;;  %v3166_v29 = vld [vmem:[%s6135_s24] sm:$0x3] }
 0x7f7   : > { %3914 = vmatprep.subr.bf16.mxu0 %v5033_v33  ;;  %v3171_v33 = vrot.slane %v3166_v29, %v5843_v3 }
 0x7fa   : > { %3915 = vmatpush1.bf16.msra.mxu0 %v5031_v22  ;;  %v3175_v22 = vrot.slane %v3166_v29, %v5840_v63 }
 0x7fb   : > { %3916 = vmatprep.subr.bf16.mxu0 %v5036_v23 }
 0x7fe   : > { %3917 = vmatpush1.bf16.msra.mxu0 %v5034_v31 }
 0x7ff   : > { %3918 = vmatprep.subr.bf16.mxu0 %v5039_v28 }
 0x802   : > { %3919 = vmatpush1.bf16.msra.mxu0 %v5037_v34 }
 0x803   : > { %3920 = vmatprep.subr.bf16.mxu0 %v5042_v35 }
 0x806   : > { %3921 = vmatpush1.bf16.msra.mxu0 %v5040_v38 }
 0x807   : > { %3922 = vmatprep.subr.bf16.mxu0 %v5045_v39 }
 0x80a   : > { %3923 = vmatpush1.bf16.msra.mxu0 %v5043_v40 }
 0x80b   : > { %3924 = vmatprep.subr.bf16.mxu0 %v5048_v41 }
 0x80e   : > { %3925 = vmatpush1.bf16.msra.mxu0 %v5046_v42 }
 0x80f   : > { %3926 = vmatprep.subr.bf16.mxu0 %v5051_v43 }
 0x812   : > { %3927 = vmatpush1.bf16.msra.mxu0 %v5049_v45 }
 0x813   : > { %3928 = vmatprep.subr.bf16.mxu0 %v5054_v46 }
 0x816   : > { %3929 = vmatpush1.bf16.msra.mxu0 %v5052_v47 }
 0x817   : > { %3930 = vmatprep.subr.bf16.mxu0 %v5057_v48 }
 0x81a   : > { %3931 = vmatpush1.bf16.msra.mxu0 %v5055_v30 }
 0x81b   : > { %3932 = vmatprep.subr.bf16.mxu0 %v5060_v44 }
 0x81e   : > { %3933 = vmatpush1.bf16.msra.mxu0 %v5058_v49 }
 0x81f   : > { %3934 = vmatprep.subr.bf16.mxu0 %v5063_v50 }
 0x822   : > { %3935 = vmatpush1.bf16.msra.mxu0 %v5061_v36 }
 0x823   : > { %3947 = vmatprep.subr.bf16.mxu0 %v5066_v37 }
 0x825   : > { %3937 = vmatmul.mubr.bf16.vlgmr.msra.gmra.mrb[16].mxu0 %v3034_v17  ;;  %v5093_v17 = vld [vmem:[#allocation16 + $0x394] ss:$8 sps:$4 sm:$0xff]  }
 0x826   : > { %3948 = vmatpush1.bf16.msra.mxu0 %v5064_v51  ;;  %3979 = vmatprep.mubr.bf16.mxu0 %v3037_v1  ;;  %v5100_v1 = vld [vmem:[#allocation16 + $0x3c0] ss:$8 sps:$4 sm:$0xff]  }
 0x827   : > { %3949 = vmatprep.subr.bf16.mxu0 %v5069_v52 }
 0x82a   : > { %3950 = vmatpush1.bf16.msra.mxu0 %v5067_v53 }
 0x82b   : > { %3951 = vmatprep.subr.bf16.mxu0 %v5072_v54 }
 0x82e   : > { %3952 = vmatpush1.bf16.msra.mxu0 %v5070_v55 }
 0x82f   : > { %3953 = vmatprep.subr.bf16.mxu0 %v5075_v56 }
 0x832   : > { %3954 = vmatpush1.bf16.msra.mxu0 %v5073_v32 }
 0x833   : > { %3955 = vmatprep.subr.bf16.mxu0 %v5078_v59 }
 0x836   : > { %3956 = vmatpush1.bf16.msra.mxu0 %v5076_v4 }
 0x837   : > { %3957 = vmatprep.subr.bf16.mxu0 %v5081_v60 }
 0x83a   : > { %3958 = vmatpush1.bf16.msra.mxu0 %v5079_v61 }
 0x83b   : > { %3959 = vmatprep.subr.bf16.mxu0 %v5084_v7 }
 0x83e   : > { %3960 = vmatpush1.bf16.msra.mxu0 %v5082_v8 }
 0x83f   : > { %3961 = vmatprep.subr.bf16.mxu0 %v5087_v57 }
 0x842   : > { %3962 = vmatpush1.bf16.msra.mxu0 %v5085_v15 }
 0x843   : > { %3963 = vmatprep.subr.bf16.mxu0 %v5090_v12 }
 0x846   : > { %3964 = vmatpush1.bf16.msra.mxu0 %v5088_v16 }
 0x847   : > { %3965 = vmatprep.subr.bf16.mxu0 %v5093_v17 }
 0x84a   : > { %3966 = vmatpush1.bf16.msra.mxu0 %v5091_v18 }
 0x84b   : > { %3967 = vmatprep.subr.bf16.mxu0 %v5096_v62 }
 0x84e   : > { %3968 = vmatpush1.bf16.msra.mxu0 %v5094_v19 }
 0x84f   : > { %3969 = vmatprep.subr.bf16.mxu0 %v5099_v24 }
 0x852   : > { %3970 = vmatpush1.bf16.msra.mxu0 %v5097_v0 }
 0x853   : > { %3971 = vmatprep.subr.bf16.mxu0 %v5102_v20 }
 0x856   : > { %3972 = vmatpush1.bf16.msra.mxu0 %v5100_v1 }
 0x857   : > { %3973 = vmatprep.subr.bf16.mxu0 %v5105_v21 }
 0x85a   : > { %3974 = vmatpush1.bf16.msra.mxu0 %v5103_v25 }
 0x85b   : > { %3975 = vmatprep.subr.bf16.mxu0 %v5108_v26 }
 0x85e   : > { %3976 = vmatpush1.bf16.msra.mxu0 %v5106_v27 }
 0x85f   : > { %3977 = vmatprep.subr.bf16.mxu0 %v5111_v2 }
 0x862   : > { %3978 = vmatpush1.bf16.msra.mxu0 %v5109_v6 }
 0x865   : > { %3980 = vmatmul.mubr.bf16.vlgmr.msra.gmra.mrb[16].mxu0 %v3036_v58 }
 0x938   : > { %v3981_v23 = vpop.f32.mrb[16].mxu0 }
 0x939   : > { %v4588_v31 = vadd.f32 %v3981_v23, %v3171_v33  ;;  %v3983_v28 = vpop.f32.mrb[17].mxu0 }
 0x93a   : > { %v4589_v34 = vadd.f32 %v3983_v28, %v3175_v22  ;;  %v3985_v35 = vpop.f32.mrb[18].mxu0 }
 0x93b   : > { %v3990_v9 = vadd.f32 %v4588_v31, %v5909_v5  ;;  %v4590_v11 = vadd.f32 %v3985_v35, %v3171_v33  ;;  %v3987_v58 = vpop.f32.mrb[19].mxu0 }
 0x93c   : > { %v3991_v63 = vadd.f32 %v4589_v34, %v5912_v10  ;;  %v4591_v3 = vadd.f32 %v3987_v58, %v3175_v22 }
 0x93d   : > { %3994 = vst [vmem:[%s541_s23] sm:$0xff] %v3990_v9  ;;  %v3992_v38 = vadd.f32 %v4590_v11, %v5915_v13 }
 0x93e   : > { %3995 = vst [vmem:[%s541_s23 + $0x8] sm:$0xff] %v3991_v63  ;;  %v3993_v5 = vadd.f32 %v4591_v3, %v5917_v14 }
 0x93f   : > { %3996 = vst [vmem:[%s541_s23 + $0x10] sm:$0xff] %v3992_v38 }
 0x940   : > { %3997 = vst [vmem:[%s541_s23 + $0x18] sm:$0xff] %v3993_v5 }
 0x941   : > { %5383 = shalt.err (!%p5380_p8)
}
 0x942   : > { %s5384_s15 = scalar_lea.hbm %s6044_s14, 512  ;;  %s5388_s23 = scalar_lea.hbm %s6136_s29, 1024 }
 0x943   : > { %p5385_p13 = scmp.ne.s32.totalorder %s6044_s14, %s5384_s15  ;;  %p5389_p9 = scmp.lt.u32.totalorder %s6044_s14, %s6136_s29 }
 0x944   : > { %p5390_p10 = scmp.lt.u32.totalorder %s5388_s23, %s5384_s15  ;;  %p5392_p6 = scmp.lt.u32.totalorder %s5384_s15, %s6044_s14 }
 0x945   : > { %p5386_p0 = pnand %p5385_p13, %p6137_p12 }
 0x946   : > { %p5391_p11 = por %p5390_p10, %p5389_p9 }
 0x947   : > { %p5387_p2 = pneg %p5386_p0 }
 0x948   : > { %p5393_p5 = por %p5392_p6, %p5391_p11 }
 0x94a   : > { %p5394_p7 = pnand %p5393_p5, %p5387_p2 }
 0x94c   : > { %5397 = shalt.err (!%p5394_p7)
}
 0x94d   : > { %s5469_s22 = smov 256   ;;  %s5470_s30 = smov 16  }
 0x94e   : > { %4634 = dma.vmem_to_hbm [thread:$0]  (%p6137_p12), %s6037_s19, 512, %s6044_s14, %s3999_s17, %s5469_s22, %s5469_s22, %s5470_s30  }
 0x94f PF: > { %s4027_s8 = sand.u32 1, %s5436_s25   ;;  %p6138_p4 = scmp.ne.s32.totalorder %s6123_s7, 0 }
 0x950   : > { %p6139_p1 = scmp.ge.s32.totalorder %s5448_s28, 2  ;;  %s4028_s10 = scalar_lea.sflag [#allocation7], %s4027_s8 }
 0x952   : > { %p4660_p3 = pnand %p6139_p1, %p6138_p4 }
 0x954   : > { %5431 = dma.done.wait (!%p4660_p3), %s4028_s10, 512  }
 0x955   : > { %5433 = vsyncadd (!%p4660_p3), %s4028_s10, 4294966784  ;;  %p29_p8 = scmp.ge.s32.totalorder %s5710_s18, 4   ;;  %s6140_s25 = smov %s5440_s26 }
 0x956   : > { %s6141_s26 = smov %s5444_s27  ;;  %s6142_s27 = smov %s5721_s20 }
 0x957   : > { %s6143_s28 = smov %s5710_s18  ;;  %31 = sbr.rel (!%p29_p8) target bundleno = 16 (0x10), region = 145 }
 0x95e   :  { %4033 = vsyncpa [#allocation6], 1 }
 0x95f   :  { %4035 = vsyncpa [#allocation6 + $0x1], 1 }
 0x960   :  { %4036 = vsyncpa [#allocation9], 1 }
 0x961   :  { %4037 = vsyncpa [#allocation12], 1 }
 0x962   :  { %4038 = vsyncpa [#allocation15], 1 }
 0x963   :  { %4039 = vsyncpa [#allocation7], 1 }
 0x964   :  { %4041 = vsyncpa [#allocation7 + $0x1], 1 }

// kernel: tpu_custom_call.1
= control target key start
LH: loop header
LB: loop body
LE: loop exit
PB: predicated region body
PF: predicated region fallthrough
CT: control target
= control target key end

     0   :  { %s6089_s0 = inlined_call_operand.hbm [shape: f32[2,16,256], index: 0, kind: input, shape index: {}]   ;;  %s6090_s1 = inlined_call_operand.hbm [shape: f32[1,256], index: 1, kind: input, shape index: {}]   ;;  %s6091_s2 = inlined_call_operand.hbm [shape: f32[1,256], index: 2, kind: input, shape index: {}]   ;;  %s6092_s3 = inlined_call_operand.hbm [shape: bf16[256,768], index: 3, kind: input, shape index: {}]   ;;  %s6093_s4 = inlined_call_operand.vmem [shape: f32[1,768], index: 4, kind: input, shape index: {}]   ;;  %s6094_s5 = inlined_call_operand.hbm [shape: bf16[2,128,256], index: 5, kind: input, shape index: {}]   ;;  %s6095_s6 = inlined_call_operand.vmem [shape: f32[1,256], index: 6, kind: input, shape index: {}]   ;;  %s6096_s7 = inlined_call_operand.vmem [shape: f32[1,256], index: 7, kind: input, shape index: {}]   ;;  %s6097_s8 = inlined_call_operand.vmem [shape: f32[1,256], index: 8, kind: input, shape index: {}]   ;;  %s6098_s9 = inlined_call_operand.hbm [shape: bf16[256,1024], index: 9, kind: input, shape index: {}]   ;;  %s6099_s10 = inlined_call_operand.vmem [shape: f32[1,1024], index: 10, kind: input, shape index: {}]   ;;  %s6100_s11 = inlined_call_operand.hbm [shape: bf16[1024,256], index: 11, kind: input, shape index: {}]   ;;  %s6101_s12 = inlined_call_operand.vmem [shape: f32[1,256], index: 12, kind: input, shape index: {}]   ;;  %s6102_s13 = inlined_call_operand.hbm [shape: f32[2,16,256], index: 13, kind: output, shape index: {}]  }
   0x1   :  { %6107 = sst [smem:[#allocation23_spill]] %s6090_s1 }
   0x2   :  { %6108 = sst [smem:[#allocation24_spill]] %s6092_s3 }
   0x3   :  { %6109 = sst [smem:[#allocation25_spill]] %s6096_s7 }
   0x4   :  { %6110 = sst [smem:[#allocation26_spill]] %s6097_s8 }
   0x5   :  { %6111 = sst [smem:[#allocation27_spill]] %s6099_s10 }
   0x6   :  { %6112 = sst [smem:[#allocation28_spill]] %s6101_s12 }
   0x7   :  { %6113 = sst [smem:[#allocation29_spill]] %s6102_s13 }
   0x8   :  { %18 = vsyncpa [#allocation6], 0 }
   0x9   :  { %20 = vsyncpa [#allocation6 + $0x1], 0 }
   0xa   :  { %21 = vsyncpa [#allocation9], 0 }
   0xb   :  { %22 = vsyncpa [#allocation12], 0 }
   0xc   :  { %23 = vsyncpa [#allocation15], 0 }
   0xd   :  { %24 = vsyncpa [#allocation7], 0 }
   0xe   :  { %26 = vsyncpa [#allocation7 + $0x1], 0  ;;  %s5541_s25 = smov 0   ;;  %s5543_s26 = smov 0  }
   0xf   :  { %s5545_s27 = smov 0   ;;  %s5547_s28 = smov 0  }
  0x10 LB: > { %s5450_s29 = smov [#allocation8]   ;;  %s5562_s14 = sadd.s32 4294967295, %s5448_s28   ;;  %s5448_s28 = sphi %s5547_s28, %s6143_s28   ;;  %s5444_s27 = sphi %s5545_s27, %s6142_s27   ;;  %s5440_s26 = sphi %s5543_s26, %s6141_s26   ;;  %s5436_s25 = sphi %s5541_s25, %s6140_s25  }
  0x11   : > { %s354_s30 = sshll.u32 %s5450_s29, 4  ;;  %p4143_p0 = scmp.ge.s32.totalorder %s5448_s28, 1  ;;  %s355_s30 = int_to_ptr.vmem [resolvable:$true] %s354_s30 }
  0x12   : > { %p6104_p1 = scmp.eq.s32.totalorder %s5562_s14, 0  ;;  %p341_p2 = scmp.lt.s32.totalorder %s5448_s28, 3 }
  0x13   : > { %s5451_s16 = smov [#allocation11]   ;;  %s5452_s19 = smov [#allocation14]  }
  0x14   : > { %p5567_p3 = pnand %p4143_p0, %p341_p2  ;;  %s375_s17 = sshll.u32 %s5451_s16, 4  ;;  %s5574_s17 = int_to_ptr.vmem [resolvable:$true] %s375_s17 }
  0x15   : > { %s413_s20 = sshll.u32 %s5452_s19, 4  ;;  %s6116_s1 = sld [smem:[#allocation23_spill]]  ;;  %s5582_s20 = int_to_ptr.vmem [resolvable:$true] %s413_s20 }
  0x16   : > { %s6114_s15 = scalar_select %p5567_p3, 1, 0 }
  0x17   : > { %p4636_p5 = pneg %p5567_p3 }
  0x19   : > { %p5578_p6 = pnand %p4636_p5, %p6104_p1 }
  0x1b   : > { %s5172_s23 = scalar_lea.hbm %s6116_s1, 32  ;;  %p5592_p8 = pneg %p5578_p6 }
  0x1c   : > { %p5173_p7 = scmp.ne.s32.totalorder %s6116_s1, %s5172_s23  ;;  %p5179_p11 = scmp.lt.u32.totalorder %s5172_s23, %s6116_s1 }
  0x1e   : > { %p5175_p9 = pnand %p5592_p8, %p5173_p7 }
  0x20   : > { %p5176_p10 = pneg %p5175_p9 }
  0x22   : > { %p5181_p12 = pnand %p5179_p11, %p5176_p10 }
  0x24   : > { %5184 = shalt.err (!%p5181_p12)
}
  0x25   : > { %s5185_s21 = scalar_lea.vmem %s355_s30, 32  ;;  %p5193_p5 = scmp.lt.s32.totalorder %s355_s30, %s355_s30 }
  0x26   : > { %p5186_p13 = scmp.ne.s32.totalorder %s355_s30, %s5185_s21  ;;  %p5194_p4 = scmp.lt.s32.totalorder %s5185_s21, %s5185_s21 }
  0x28   : > { %p5188_p0 = pnand %p5186_p13, %p5592_p8  ;;  %p5195_p1 = por %p5194_p4, %p5193_p5 }
  0x2a   : > { %p5189_p2 = pneg %p5188_p0 }
  0x2c   : > { %p5196_p3 = pnand %p5195_p1, %p5189_p2 }
  0x2e   : > { %5199 = shalt.err (!%p5196_p3)
}
  0x2f   : > { %4639 = dma.hbm_to_vmem [thread:$0]  (!%p5578_p6), %s6116_s1, 32, %s355_s30, [#allocation9]  }
  0x30   : > { %s6118_s3 = sld [smem:[#allocation24_spill]] }
  0x36   : > { %s5200_s29 = scalar_lea.hbm %s6118_s3, 12288 }
  0x37   : > { %p5201_p7 = scmp.ne.s32.totalorder %s6118_s3, %s5200_s29  ;;  %p5207_p1 = scmp.lt.u32.totalorder %s5200_s29, %s6118_s3 }
  0x39   : > { %p5203_p9 = pnand %p5201_p7, %p5592_p8 }
  0x3b   : > { %p5204_p4 = pneg %p5203_p9 }
  0x3d   : > { %p5209_p3 = pnand %p5207_p1, %p5204_p4 }
  0x3f   : > { %5212 = shalt.err (!%p5209_p3)
}
  0x40   : > { %s5213_s30 = scalar_lea.vmem %s5574_s17, 12288  ;;  %p5221_p13 = scmp.lt.s32.totalorder %s5574_s17, %s5574_s17 }
  0x41   : > { %p5214_p10 = scmp.ne.s32.totalorder %s5574_s17, %s5213_s30  ;;  %p5222_p0 = scmp.lt.s32.totalorder %s5213_s30, %s5213_s30 }
  0x43   : > { %p5216_p11 = pnand %p5214_p10, %p5592_p8  ;;  %p5223_p2 = por %p5222_p0, %p5221_p13 }
  0x45   : > { %p5217_p12 = pneg %p5216_p11 }
  0x47   : > { %p5224_p5 = pnand %p5223_p2, %p5217_p12 }
  0x49   : > { %5227 = shalt.err (!%p5224_p5)
}
  0x4a   : > { %s5453_s12 = smov 384   ;;  %s5454_s10 = smov 24  }
  0x4b   : > { %4645 = dma.hbm_to_vmem [thread:$0]  (!%p5578_p6), %s6118_s3, 12288, %s5574_s17, [#allocation12], %s5453_s12, %s5453_s12, %s5454_s10  }
  0x4c   : > { %s5228_s29 = scalar_lea.hbm %s6098_s9, 16384 }
  0x4d   : > { %p5229_p7 = scmp.ne.s32.totalorder %s6098_s9, %s5228_s29  ;;  %p5235_p1 = scmp.lt.u32.totalorder %s5228_s29, %s6098_s9 }
  0x4f   : > { %p5231_p9 = pnand %p5229_p7, %p5592_p8 }
  0x51   : > { %p5232_p4 = pneg %p5231_p9 }
  0x53   : > { %p5237_p3 = pnand %p5235_p1, %p5232_p4 }
  0x55   : > { %5240 = shalt.err (!%p5237_p3)
}
  0x56   : > { %s5241_s17 = scalar_lea.vmem %s5582_s20, 16384  ;;  %p5249_p13 = scmp.lt.s32.totalorder %s5582_s20, %s5582_s20 }
  0x57   : > { %p5242_p10 = scmp.ne.s32.totalorder %s5582_s20, %s5241_s17  ;;  %p5250_p0 = scmp.lt.s32.totalorder %s5241_s17, %s5241_s17 }
  0x59   : > { %p5244_p11 = pnand %p5242_p10, %p5592_p8  ;;  %p5251_p2 = por %p5250_p0, %p5249_p13 }
  0x5b   : > { %p5245_p12 = pneg %p5244_p11 }
  0x5d   : > { %p5252_p5 = pnand %p5251_p2, %p5245_p12 }
  0x5f   : > { %5255 = shalt.err (!%p5252_p5)
}
  0x60   : > { %s5455_s12 = smov 512   ;;  %s5456_s1 = smov 32  }
  0x61   : > { %4651 = dma.hbm_to_vmem [thread:$0]  (!%p5578_p6), %s6098_s9, 16384, %s5582_s20, [#allocation15], %s5455_s12, %s5455_s12, %s5456_s1  }
  0x62   : > { %s5457_s24 = smov [#allocation10]   ;;  %s5458_s23 = smov [#allocation13]  }
  0x63   : > { %s365_s13 = sshll.u32 %s5457_s24, 4  ;;  %s391_s29 = sshll.u32 %s5458_s23, 4  ;;  %s366_s13 = int_to_ptr.vmem [resolvable:$true] %s365_s13  ;;  %s392_s29 = int_to_ptr.vmem [resolvable:$true] %s391_s29 }
  0x64   : > { %s5256_s30 = scalar_lea.hbm %s6091_s2, 32 }
  0x65   : > { %p5257_p7 = scmp.ne.s32.totalorder %s6091_s2, %s5256_s30  ;;  %p5263_p1 = scmp.lt.u32.totalorder %s5256_s30, %s6091_s2 }
  0x67   : > { %p5259_p9 = pnand %p5257_p7, %p5592_p8 }
  0x69   : > { %p5260_p4 = pneg %p5259_p9 }
  0x6b   : > { %p5265_p3 = pnand %p5263_p1, %p5260_p4 }
  0x6d   : > { %5268 = shalt.err (!%p5265_p3)
}
  0x6e   : > { %s5269_s20 = scalar_lea.vmem %s366_s13, 32  ;;  %p5277_p13 = scmp.lt.s32.totalorder %s366_s13, %s366_s13 }
  0x6f   : > { %p5270_p10 = scmp.ne.s32.totalorder %s366_s13, %s5269_s20  ;;  %p5278_p0 = scmp.lt.s32.totalorder %s5269_s20, %s5269_s20 }
  0x71   : > { %p5272_p11 = pnand %p5270_p10, %p5592_p8  ;;  %p5279_p2 = por %p5278_p0, %p5277_p13 }
  0x73   : > { %p5273_p12 = pneg %p5272_p11 }
  0x75   : > { %p5280_p5 = pnand %p5279_p2, %p5273_p12 }
  0x77   : > { %5283 = shalt.err (!%p5280_p5)
}
  0x78   : > { %4642 = dma.hbm_to_vmem [thread:$0]  (!%p5578_p6), %s6091_s2, 32, %s366_s13, [#allocation9]  }
  0x79   : > { %s5284_s1 = scalar_lea.hbm %s6094_s5, 4096 }
  0x7a   : > { %p5285_p7 = scmp.ne.s32.totalorder %s6094_s5, %s5284_s1  ;;  %p5291_p1 = scmp.lt.u32.totalorder %s5284_s1, %s6094_s5 }
  0x7c   : > { %p5287_p9 = pnand %p5285_p7, %p5592_p8 }
  0x7e   : > { %p5288_p4 = pneg %p5287_p9 }
  0x80   : > { %p5293_p3 = pnand %p5291_p1, %p5288_p4 }
  0x82   : > { %5296 = shalt.err (!%p5293_p3)
}
  0x83   : > { %s5297_s19 = scalar_lea.vmem %s392_s29, 4096  ;;  %p5305_p13 = scmp.lt.s32.totalorder %s392_s29, %s392_s29 }
  0x84   : > { %p5298_p10 = scmp.ne.s32.totalorder %s392_s29, %s5297_s19  ;;  %p5306_p0 = scmp.lt.s32.totalorder %s5297_s19, %s5297_s19 }
  0x86   : > { %p5300_p11 = pnand %p5298_p10, %p5592_p8  ;;  %p5307_p2 = por %p5306_p0, %p5305_p13 }
  0x88   : > { %p5301_p12 = pneg %p5300_p11 }
  0x8a   : > { %p5308_p5 = pnand %p5307_p2, %p5301_p12 }
  0x8c   : > { %5311 = shalt.err (!%p5308_p5)
}
  0x8d   : > { %s5459_s13 = smov 128   ;;  %s5460_s21 = smov 8  }
  0x8e   : > { %4648 = dma.hbm_to_vmem [thread:$0]  (!%p5578_p6), %s6094_s5, 4096, %s392_s29, [#allocation12], %s5459_s13, %s5459_s13, %s5460_s21  }
  0x8f   : > { %s5461_s20 = smov [#allocation16]   ;;  %s5312_s8 = scalar_lea.hbm %s6100_s11, 16384 }
  0x90   : > { %s429_s3 = sshll.u32 %s5461_s20, 4  ;;  %p5313_p7 = scmp.ne.s32.totalorder %s6100_s11, %s5312_s8  ;;  %s430_s3 = int_to_ptr.vmem [resolvable:$true] %s429_s3 }
  0x91   : > { %p5319_p1 = scmp.lt.u32.totalorder %s5312_s8, %s6100_s11 }
  0x92   : > { %p5315_p9 = pnand %p5313_p7, %p5592_p8 }
  0x94   : > { %p5316_p4 = pneg %p5315_p9 }
  0x96   : > { %p5321_p3 = pnand %p5319_p1, %p5316_p4 }
  0x98   : > { %5324 = shalt.err (!%p5321_p3)
}
  0x99   : > { %s5325_s29 = scalar_lea.vmem %s430_s3, 16384  ;;  %p5333_p13 = scmp.lt.s32.totalorder %s430_s3, %s430_s3 }
  0x9a   : > { %p5326_p10 = scmp.ne.s32.totalorder %s430_s3, %s5325_s29  ;;  %p5334_p0 = scmp.lt.s32.totalorder %s5325_s29, %s5325_s29 }
  0x9c   : > { %p5328_p11 = pnand %p5326_p10, %p5592_p8  ;;  %p5335_p2 = por %p5334_p0, %p5333_p13 }
  0x9e   : > { %p5329_p12 = pneg %p5328_p11 }
  0xa0   : > { %p5336_p5 = pnand %p5335_p2, %p5329_p12 }
  0xa2   : > { %5339 = shalt.err (!%p5336_p5)
}
  0xa3   : > { %4654 = dma.hbm_to_vmem [thread:$0]  (!%p5578_p6), %s6100_s11, 16384, %s430_s3, [#allocation15], %s5459_s13, %s5459_s13, %s5460_s21  }
  0xa4   : > { %s4142_s16 = sadd.s32 4294967294, %s5448_s28   ;;  %s5710_s18 = sadd.s32 1, %s5448_s28  }
  0xa5   : > { %s36_s30 = ssub.s32 %s5448_s28, %s5710_s18  ;;  %s39_s17 = sadd.s32 1, %s5444_s27 }
  0xa6   : > { %p37_p8 = scmp.eq.s32.totalorder %s36_s30, 0  ;;  %p46_p7 = scmp.ne.s32.totalorder %s5444_s27, %s5440_s26 }
  0xa7   : > { %p47_p9 = scmp.eq.s32.totalorder %s5448_s28, 0  ;;  %p52_p4 = scmp.ne.s32.totalorder %s5440_s26, %s5436_s25 }
  0xa8   : > { %s5721_s20 = scalar_select %p37_p8, %s5444_s27, %s39_s17  }
  0xa9   : > { %p5723_p1 = por %p47_p9, %p46_p7  ;;  %p6120_p3 = scmp.eq.s32.totalorder %s5562_s14, 0 }
  0xaa   : > { %p328_p10 = scmp.eq.s32.totalorder %s5562_s14, 1  ;;  %p334_p11 = scmp.eq.s32.totalorder %s4142_s16, 1 }
  0xab   : > { %p5729_p6 = por %p6120_p3, %p52_p4  ;;  %p4669_p12 = scmp.lt.s32.totalorder %s5448_s28, 2 }
  0xac   : > { %s446_s21 = sand.u32 1, %s5444_s27   ;;  %p5736_p13 = por %p328_p10, %p46_p7 }
  0xad   : > { %p5740_p0 = por %p334_p11, %p52_p4  ;;  %s4151_s8 = sshll.u32 %s446_s21, 5 }
  0xae   : > { %s6122_s3 = scalar_select %p5736_p13, 1, 0 }
  0xaf   : > { %s6123_s7 = scalar_select %p5740_p0, 1, 0 }
  0xb0   : > { %s4554_s1 = sshll.u32 %s5448_s28, 9  ;;  %s450_s29 = scalar_lea.vmem [#allocation5], %s4151_s8 }
  0xb1   : > { %s5748_s24 = scalar_lea.hbm %s6089_s0, %s4554_s1  ;;  %s457_s23 = sshll.u32 %s450_s29, 4  ;;  %s5750_s23 = int_to_ptr.vmem [resolvable:$true] %s457_s23 }
  0xb2   : > { %p5754_p2 = pnand %p4669_p12, %p5723_p1  ;;  %s5758_s16 = scalar_lea.sflag [#allocation6], %s446_s21 }
  0xb3   : > { %s5340_s30 = scalar_lea.hbm %s5748_s24, 512  ;;  %s5345_s12 = scalar_lea.hbm %s6089_s0, 1024 }
  0xb4   : > { %p5341_p5 = scmp.ne.s32.totalorder %s5748_s24, %s5340_s30  ;;  %p5342_p8 = pneg %p5754_p2 }
  0xb5   : > { %p5346_p4 = scmp.lt.u32.totalorder %s5748_s24, %s6089_s0  ;;  %p5347_p1 = scmp.lt.u32.totalorder %s5345_s12, %s5340_s30 }
  0xb6   : > { %p5343_p7 = pnand %p5342_p8, %p5341_p5  ;;  %p5349_p10 = scmp.lt.u32.totalorder %s5340_s30, %s5748_s24 }
  0xb7   : > { %p5348_p3 = por %p5347_p1, %p5346_p4 }
  0xb8   : > { %p5344_p9 = pneg %p5343_p7 }
  0xb9   : > { %p5350_p11 = por %p5349_p10, %p5348_p3 }
  0xbb   : > { %p5351_p12 = pnand %p5350_p11, %p5344_p9 }
  0xbd   : > { %5354 = shalt.err (!%p5351_p12)
}
  0xbe   : > { %s5355_s21 = scalar_lea.vmem %s5750_s23, 512  ;;  %s5462_s22 = smov [#allocation5]  }
  0xbf   : > { %p5356_p5 = scmp.ne.s32.totalorder %s5750_s23, %s5355_s21  ;;  %s5360_s29 = sshll.u32 %s5462_s22, 4  ;;  %s5361_s29 = int_to_ptr.vmem [resolvable:$false] %s5360_s29 }
  0xc0   : > { %s5362_s17 = scalar_lea.vmem %s5361_s29, 1024  ;;  %p5363_p13 = scmp.lt.s32.totalorder %s5750_s23, %s5361_s29 }
  0xc1   : > { %p5358_p7 = pnand %p5356_p5, %p5342_p8  ;;  %p5364_p4 = scmp.lt.s32.totalorder %s5362_s17, %s5355_s21 }
  0xc3   : > { %p5359_p0 = pneg %p5358_p7  ;;  %p5365_p1 = por %p5364_p4, %p5363_p13 }
  0xc5   : > { %p5366_p3 = pnand %p5365_p1, %p5359_p0 }
  0xc7   : > { %5369 = shalt.err (!%p5366_p3)
}
  0xc8   : > { %s5463_s30 = smov 256   ;;  %s5464_s8 = smov 16  }
  0xc9   : > { %4658 = dma.hbm_to_vmem [thread:$0]  (!%p5754_p2), %s5748_s24, 512, %s5750_s23, %s5758_s16, %s5463_s30, %s5463_s30, %s5464_s8  }
  0xca   : > { %p6125_p8 = scmp.ne.s32.totalorder %s6114_s15, 0 }
  0xcb   : > { %s5789_s12 = sand.u32 (!%p6125_p8), 1, %s5440_s26  }
  0xcc   : > { %469 = sbr.rel (%p6125_p8) target bundleno = 2383 (0x94f), region = 72  ;;  %s4155_s1 = sshll.u32 (!%p6125_p8), %s5789_s12, 5 }
  0xcd   : > { %s472_s10 = scalar_lea.sflag (!%p6125_p8), [#allocation6], %s5789_s12  ;;  %s5795_s21 = scalar_lea.vmem (!%p6125_p8), [#allocation5], %s4155_s1 }
  0xd3   : > { %5415 = dma.done.wait (%p5729_p6), %s472_s10, 512  }
  0xd4   : > { %5417 = vsyncadd (%p5729_p6), %s472_s10, 4294966784  ;;  %p6126_p13 = scmp.eq.s32.totalorder %s5562_s14, 0 }
  0xd6   : > { %5419 = dma.done.wait (%p6126_p13), [#allocation9], 64   ;;  %p6127_p0 = pmov %p6126_p13 }
  0xd8   : > { %5421 = vsyncadd (%p6127_p0), [#allocation9], 4294967232  ;;  %p6128_p2 = pmov %p6127_p0 }
  0xd9   : > { %p6129_p9 = pmov %p6127_p0 }
  0xda   : > { %5423 = dma.done.wait (%p6128_p2), [#allocation12], 16384  }
  0xdb   : > { %5425 = vsyncadd (%p6129_p9), [#allocation12], 4294950912  ;;  %p6130_p10 = pmov %p6127_p0 }
  0xdc   : > { %p6131_p11 = pmov %p6127_p0 }
  0xdd   : > { %5427 = dma.done.wait (%p6130_p10), [#allocation15], 32768  }
  0xde   : > { %5429 = vsyncadd (%p6131_p11), [#allocation15], 4294934528  ;;  %v5814_v0 = vld [vmem:[%s5795_s21] sm:$0xff]  ;;  %v5817_v1 = vld [vmem:[%s5795_s21 + $0x8] sm:$0xff]  ;;  %v588_v59 = vlaneseq  ;;  %vm5466_vm0 = vmmov 0   ;;  %vm1458_vm1 = vcmask 130048  }
  0xdf   : > { %v5820_v2 = vld [vmem:[%s5795_s21 + $0x10] sm:$0xff]  ;;  %v547_v3 = vadd.f32 %v5817_v1, %v5814_v0  ;;  %v556_v4 = vmul.f32 %v5814_v0, %v5814_v0  ;;  %v557_v5 = vmul.f32 %v5817_v1, %v5817_v1  ;;  %v5829_v6 = vld [vmem:[%s5795_s21 + $0x18] sm:$0xff]  ;;  %v4728_v9 = vld [vmem:[#allocation11 + $0x4] ss:$24 sps:$4 sm:$0xff]   ;;  %s6132_s22 = sld [smem:[#allocation25_spill]]  ;;  %s6133_s30 = sld [smem:[#allocation26_spill]] }
  0xe0   : > { %v558_v7 = vmul.f32 %v5820_v2, %v5820_v2  ;;  %v559_v8 = vmul.f32 %v5829_v6, %v5829_v6  ;;  %v4730_v10 = vld [vmem:[#allocation11] ss:$24 sps:$4 sm:$0xff]   ;;  %v550_v12 = vadd.f32 %v5829_v6, %v5820_v2  ;;  %v4731_v13 = vld [vmem:[#allocation11 + $0x34] ss:$24 sps:$4 sm:$0xff]   ;;  %1228 = vmatprep.subr.bf16.mxu1 %v4728_v9  ;;  %v4733_v15 = vld [vmem:[#allocation11 + $0x30] ss:$24 sps:$4 sm:$0xff]  }
  0xe1   : > { %548 = vadd.xlane.f32.xlu0 %v547_v3  ;;  %v560_v11 = vadd.f32 %v557_v5, %v556_v4  ;;  %1229 = vmatpush1.bf16.msra.mxu1 %v4730_v10  ;;  %v4734_v16 = vld [vmem:[#allocation11 + $0x64] ss:$24 sps:$4 sm:$0xff]   ;;  %v4736_v17 = vld [vmem:[#allocation11 + $0x60] ss:$24 sps:$4 sm:$0xff]   ;;  %v4737_v18 = vld [vmem:[#allocation11 + $0x94] ss:$24 sps:$4 sm:$0xff]  }
  0xe2   : > { %v563_v14 = vadd.f32 %v559_v8, %v558_v7  ;;  %1230 = vmatprep.subr.bf16.mxu1 %v4731_v13  ;;  %v4739_v19 = vld [vmem:[#allocation11 + $0x90] ss:$24 sps:$4 sm:$0xff]   ;;  %v4740_v20 = vld [vmem:[#allocation11 + $0xc4] ss:$24 sps:$4 sm:$0xff]   ;;  %v4742_v21 = vld [vmem:[#allocation11 + $0xc0] ss:$24 sps:$4 sm:$0xff]  }
  0xe3   : > { %561 = vadd.xlane.f32.xlu1 %v560_v11  ;;  %v4743_v22 = vld [vmem:[#allocation11 + $0xf4] ss:$24 sps:$4 sm:$0xff]   ;;  %v4745_v23 = vld [vmem:[#allocation11 + $0xf0] ss:$24 sps:$4 sm:$0xff]   ;;  %v4746_v24 = vld [vmem:[#allocation11 + $0x124] ss:$24 sps:$4 sm:$0xff]  }
  0xe4   : > { %v4748_v25 = vld [vmem:[#allocation11 + $0x120] ss:$24 sps:$4 sm:$0xff]   ;;  %v4749_v26 = vld [vmem:[#allocation11 + $0x154] ss:$24 sps:$4 sm:$0xff]   ;;  %v4751_v27 = vld [vmem:[#allocation11 + $0x150] ss:$24 sps:$4 sm:$0xff]  }
  0xe5   : > { %551 = vadd.xlane.f32.xlu0 %v550_v12  ;;  %1231 = vmatpush1.bf16.msra.mxu1 %v4733_v15  ;;  %v4752_v28 = vld [vmem:[#allocation11 + $0x184] ss:$24 sps:$4 sm:$0xff]   ;;  %v4754_v29 = vld [vmem:[#allocation11 + $0x180] ss:$24 sps:$4 sm:$0xff]   ;;  %v4755_v30 = vld [vmem:[#allocation11 + $0x1b4] ss:$24 sps:$4 sm:$0xff]  }
  0xe6   : > { %1232 = vmatprep.subr.bf16.mxu1 %v4734_v16  ;;  %v4757_v31 = vld [vmem:[#allocation11 + $0x1b0] ss:$24 sps:$4 sm:$0xff]   ;;  %v4758_v32 = vld [vmem:[#allocation11 + $0x1e4] ss:$24 sps:$4 sm:$0xff]   ;;  %v4760_v33 = vld [vmem:[#allocation11 + $0x1e0] ss:$24 sps:$4 sm:$0xff]  }
  0xe7   : > { %564 = vadd.xlane.f32.xlu1 %v563_v14  ;;  %v4761_v34 = vld [vmem:[#allocation11 + $0x214] ss:$24 sps:$4 sm:$0xff]   ;;  %v4763_v35 = vld [vmem:[#allocation11 + $0x210] ss:$24 sps:$4 sm:$0xff]   ;;  %v4764_v36 = vld [vmem:[#allocation11 + $0x244] ss:$24 sps:$4 sm:$0xff]  }
  0xe8   : > { %v4766_v37 = vld [vmem:[#allocation11 + $0x240] ss:$24 sps:$4 sm:$0xff]   ;;  %v4767_v38 = vld [vmem:[#allocation11 + $0x274] ss:$24 sps:$4 sm:$0xff]   ;;  %v4769_v39 = vld [vmem:[#allocation11 + $0x270] ss:$24 sps:$4 sm:$0xff]  }
  0xe9   : > { %1233 = vmatpush1.bf16.msra.mxu1 %v4736_v17  ;;  %v4770_v40 = vld [vmem:[#allocation11 + $0x2a4] ss:$24 sps:$4 sm:$0xff]   ;;  %v4772_v41 = vld [vmem:[#allocation11 + $0x2a0] ss:$24 sps:$4 sm:$0xff]   ;;  %v4773_v42 = vld [vmem:[#allocation11 + $0x2d4] ss:$24 sps:$4 sm:$0xff]  }
  0xea   : > { %1234 = vmatprep.subr.bf16.mxu1 %v4737_v18  ;;  %v4775_v43 = vld [vmem:[#allocation11 + $0x2d0] ss:$24 sps:$4 sm:$0xff]   ;;  %v4778_v44 = vld [vmem:[#allocation11 + $0xc] ss:$24 sps:$4 sm:$0xff]   ;;  %v5837_v62 = vshrl.u32 %v588_v59, 7  ;;  %s6135_s24 = sld [smem:[#allocation28_spill]] }
  0xeb   : > { %v586_v4 = vld [vmem:[#allocation8] sm:$0x3]  ;;  %v602_v11 = vld [vmem:[#allocation10] sm:$0x3]  ;;  %v4824_v59 = vld [vmem:[#allocation11 + $0x10] ss:$24 sps:$4 sm:$0xff]  }
  0xec   : > { %v5840_v63 = vsub.s32 1, %v5837_v62  ;;  %v5843_v3 = vsub.s32 0, %v5837_v62  ;;  %s541_s23 = scalar_lea.vmem [#allocation17], %s4155_s1  ;;  %s4555_s16 = sshll.u32 %s5562_s14, 9 }
  0xed   : > { %1235 = vmatpush1.bf16.msra.mxu1 %v4739_v19  ;;  %s4012_s19 = sshll.u32 %s541_s23, 4  ;;  %s6136_s29 = sld [smem:[#allocation29_spill]]  ;;  %s6037_s19 = int_to_ptr.vmem [resolvable:$true] %s4012_s19 }
  0xee   : > { %1236 = vmatprep.subr.bf16.mxu1 %v4740_v20  ;;  %v595_v10 = vrot.slane %v586_v4, %v5840_v63  ;;  %v591_v13 = vrot.slane %v586_v4, %v5843_v3  ;;  %v611_v17 = vrot.slane %v602_v11, %v5840_v63  ;;  %v607_v18 = vrot.slane %v602_v11, %v5843_v3  ;;  %v4832_v4 = vld [vmem:[#allocation11 + $0x74] ss:$24 sps:$4 sm:$0xff]   ;;  %v4841_v11 = vld [vmem:[#allocation11 + $0x104] ss:$24 sps:$4 sm:$0xff]   ;;  %s3999_s17 = scalar_lea.sflag [#allocation7], %s5789_s12  ;;  %p6137_p12 = scmp.ne.s32.totalorder %s6122_s3, 0 }
  0xef   : > { %s5468_s8 = smov [#allocation17]  }
  0xf0   : > { %s5374_s10 = sshll.u32 %s5468_s8, 4  ;;  %s5375_s10 = int_to_ptr.vmem [resolvable:$false] %s5374_s10 }
  0xf1   : > { %1237 = vmatpush1.bf16.msra.mxu1 %v4742_v21  ;;  %p5377_p4 = scmp.lt.s32.totalorder %s6037_s19, %s5375_s10 }
  0xf2   : > { %1238 = vmatprep.subr.bf16.mxu1 %v4743_v22 }
  0xf3   : > { %s6044_s14 = scalar_lea.hbm %s6136_s29, %s4555_s16 }
  0xf5   : > { %1239 = vmatpush1.bf16.msra.mxu1 %v4745_v23 }
  0xf6   : > { %1240 = vmatprep.subr.bf16.mxu1 %v4746_v24 }
  0xf9   : > { %1241 = vmatpush1.bf16.msra.mxu1 %v4748_v25 }
  0xfa   : > { %1242 = vmatprep.subr.bf16.mxu1 %v4749_v26 }
  0xfd   : > { %1243 = vmatpush1.bf16.msra.mxu1 %v4751_v27 }
  0xfe   : > { %1244 = vmatprep.subr.bf16.mxu1 %v4752_v28 }
 0x101   : > { %1245 = vmatpush1.bf16.msra.mxu1 %v4754_v29  ;;  %v4779_v29 = vld [vmem:[#allocation11 + $0x38] ss:$24 sps:$4 sm:$0xff]  }
 0x102   : > { %1246 = vmatprep.subr.bf16.mxu1 %v4755_v30  ;;  %v4784_v30 = vld [vmem:[#allocation11 + $0x6c] ss:$24 sps:$4 sm:$0xff]  }
 0x105   : > { %1247 = vmatpush1.bf16.msra.mxu1 %v4757_v31  ;;  %v4782_v31 = vld [vmem:[#allocation11 + $0x68] ss:$24 sps:$4 sm:$0xff]  }
 0x106   : > { %1248 = vmatprep.subr.bf16.mxu1 %v4758_v32  ;;  %v4787_v32 = vld [vmem:[#allocation11 + $0x9c] ss:$24 sps:$4 sm:$0xff]  }
 0x109   : > { %1249 = vmatpush1.bf16.msra.mxu1 %v4760_v33  ;;  %v4785_v33 = vld [vmem:[#allocation11 + $0x98] ss:$24 sps:$4 sm:$0xff]  }
 0x10a   : > { %1250 = vmatprep.subr.bf16.mxu1 %v4761_v34  ;;  %v4790_v34 = vld [vmem:[#allocation11 + $0xcc] ss:$24 sps:$4 sm:$0xff]  }
 0x10d   : > { %1251 = vmatpush1.bf16.msra.mxu1 %v4763_v35  ;;  %v4788_v35 = vld [vmem:[#allocation11 + $0xc8] ss:$24 sps:$4 sm:$0xff]  }
 0x10e   : > { %1252 = vmatprep.subr.bf16.mxu1 %v4764_v36  ;;  %v4793_v36 = vld [vmem:[#allocation11 + $0xfc] ss:$24 sps:$4 sm:$0xff]  }
 0x111   : > { %1253 = vmatpush1.bf16.msra.mxu1 %v4766_v37  ;;  %v4791_v37 = vld [vmem:[#allocation11 + $0xf8] ss:$24 sps:$4 sm:$0xff]  }
 0x112   : > { %1254 = vmatprep.subr.bf16.mxu1 %v4767_v38  ;;  %v4796_v38 = vld [vmem:[#allocation11 + $0x12c] ss:$24 sps:$4 sm:$0xff]  }
 0x115   : > { %1255 = vmatpush1.bf16.msra.mxu1 %v4769_v39  ;;  %v4794_v39 = vld [vmem:[#allocation11 + $0x128] ss:$24 sps:$4 sm:$0xff]  }
 0x116   : > { %1256 = vmatprep.subr.bf16.mxu1 %v4770_v40  ;;  %v4799_v40 = vld [vmem:[#allocation11 + $0x15c] ss:$24 sps:$4 sm:$0xff]  }
 0x119   : > { %1257 = vmatpush1.bf16.msra.mxu1 %v4772_v41  ;;  %v4797_v41 = vld [vmem:[#allocation11 + $0x158] ss:$24 sps:$4 sm:$0xff]  }
 0x11a   : > { %1258 = vmatprep.subr.bf16.mxu1 %v4773_v42  ;;  %v4802_v42 = vld [vmem:[#allocation11 + $0x18c] ss:$24 sps:$4 sm:$0xff]  }
 0x11d   : > { %1259 = vmatpush1.bf16.msra.mxu1 %v4775_v43  ;;  %v4800_v43 = vld [vmem:[#allocation11 + $0x188] ss:$24 sps:$4 sm:$0xff]  }
 0x11e   : > { %1271 = vmatprep.subr.bf16.mxu1 %v4778_v44  ;;  %v4805_v44 = vld [vmem:[#allocation11 + $0x1bc] ss:$24 sps:$4 sm:$0xff]  }
 0x16e   : > { %v549_v45 = vpop.xlane.xlu0 %548 }
 0x16f   : > { %v554_v46 = vmul.f32 0.00390625, %v549_v45  ;;  %v4803_v45 = vld [vmem:[#allocation11 + $0x1b8] ss:$24 sps:$4 sm:$0xff]  }
 0x170   : > { %v562_v47 = vpop.xlane.xlu1 %561 }
 0x171   : > { %v566_v48 = vmul.f32 0.00390625, %v562_v47  ;;  %v568_v49 = vmul.f32 %v554_v46, %v554_v46  ;;  %v574_v7 = vsub.f32 %v5814_v0, %v554_v46  ;;  %v575_v8 = vsub.f32 %v5817_v1, %v554_v46  ;;  %v4808_v46 = vld [vmem:[#allocation11 + $0x1ec] ss:$24 sps:$4 sm:$0xff]   ;;  %v4806_v47 = vld [vmem:[#allocation11 + $0x1e8] ss:$24 sps:$4 sm:$0xff]  }
 0x172   : > { %v552_v50 = vpop.xlane.xlu0 %551 }
 0x173   : > { %v570_v51 = vsub.f32 %v566_v48, %v568_v49  ;;  %v555_v52 = vmul.f32 0.00390625, %v552_v50  ;;  %v4811_v48 = vld [vmem:[#allocation11 + $0x21c] ss:$24 sps:$4 sm:$0xff]   ;;  %v4809_v49 = vld [vmem:[#allocation11 + $0x218] ss:$24 sps:$4 sm:$0xff]  }
 0x174   : > { %v565_v53 = vpop.xlane.xlu1 %564  ;;  %v4814_v50 = vld [vmem:[#allocation11 + $0x24c] ss:$24 sps:$4 sm:$0xff]  }
 0x175   : > { %v572_v54 = vmax.f32 %v570_v51, 0.0  ;;  %v567_v55 = vmul.f32 0.00390625, %v565_v53  ;;  %v569_v56 = vmul.f32 %v555_v52, %v555_v52  ;;  %v576_v14 = vsub.f32 %v5820_v2, %v555_v52  ;;  %v4776_v2 = vld [vmem:[#allocation11 + $0x8] ss:$24 sps:$4 sm:$0xff]   ;;  %v4815_v53 = vld [vmem:[#allocation11 + $0x278] ss:$24 sps:$4 sm:$0xff]  }
 0x176   : > { %v577_v15 = vsub.f32 %v5829_v6, %v555_v52  ;;  %v4781_v6 = vld [vmem:[#allocation11 + $0x3c] ss:$24 sps:$4 sm:$0xff]   ;;  %v4812_v51 = vld [vmem:[#allocation11 + $0x248] ss:$24 sps:$4 sm:$0xff]  }
 0x177   : > { %v578_v57 = vadd.f32 1e-06, %v572_v54  ;;  %v571_v58 = vsub.f32 %v567_v55, %v569_v56  ;;  %v4817_v52 = vld [vmem:[#allocation11 + $0x27c] ss:$24 sps:$4 sm:$0xff]   ;;  %v4820_v54 = vld [vmem:[#allocation11 + $0x2ac] ss:$24 sps:$4 sm:$0xff]  }
 0x178   : > { %v4818_v55 = vld [vmem:[#allocation11 + $0x2a8] ss:$24 sps:$4 sm:$0xff]   ;;  %v4823_v56 = vld [vmem:[#allocation11 + $0x2dc] ss:$24 sps:$4 sm:$0xff]  }
 0x179   : > { %5112 = vrsqrt.f32 %v578_v57  ;;  %v573_v60 = vmax.f32 %v571_v58, 0.0  ;;  %v4821_v57 = vld [vmem:[#allocation11 + $0x2d8] ss:$24 sps:$4 sm:$0xff]   ;;  %v4826_v58 = vld [vmem:[#allocation11 + $0x14] ss:$24 sps:$4 sm:$0xff]  }
 0x17b   : > { %v579_v61 = vadd.f32 1e-06, %v573_v60  ;;  %v4829_v60 = vld [vmem:[#allocation11 + $0x44] ss:$24 sps:$4 sm:$0xff]  }
 0x17d   : > { %5114 = vrsqrt.f32 %v579_v61  ;;  %v4827_v61 = vld [vmem:[#allocation11 + $0x40] ss:$24 sps:$4 sm:$0xff]  }
 0x183   : > { %v5113_v5 = vpop.eup %5112 }
 0x184   : > { %v583_v9 = vmul.f32 %v5113_v5, %v575_v8  ;;  %v582_v12 = vmul.f32 %v5113_v5, %v574_v7  ;;  %v4830_v5 = vld [vmem:[#allocation11 + $0x70] ss:$24 sps:$4 sm:$0xff]   ;;  %v4835_v7 = vld [vmem:[#allocation11 + $0xa4] ss:$24 sps:$4 sm:$0xff]   ;;  %v4833_v8 = vld [vmem:[#allocation11 + $0xa0] ss:$24 sps:$4 sm:$0xff]  }
 0x186   : > { %v599_v0 = vmul.f32 %v595_v10, %v583_v9  ;;  %v598_v1 = vmul.f32 %v591_v13, %v582_v12  ;;  %v4838_v9 = vld [vmem:[#allocation11 + $0xd4] ss:$24 sps:$4 sm:$0xff]   ;;  %v4839_v12 = vld [vmem:[#allocation11 + $0x100] ss:$24 sps:$4 sm:$0xff]  }
 0x187   : > { %v5115_v16 = vpop.eup %5114 }
 0x188   : > { %v585_v19 = vmul.f32 %v5115_v16, %v577_v15  ;;  %v584_v20 = vmul.f32 %v5115_v16, %v576_v14  ;;  %v615_v23 = vadd.f32 %v611_v17, %v599_v0  ;;  %v614_v25 = vadd.f32 %v607_v18, %v598_v1  ;;  %v4842_v14 = vld [vmem:[#allocation11 + $0x130] ss:$24 sps:$4 sm:$0xff]   ;;  %v4847_v15 = vld [vmem:[#allocation11 + $0x164] ss:$24 sps:$4 sm:$0xff]   ;;  %v4845_v16 = vld [vmem:[#allocation11 + $0x160] ss:$24 sps:$4 sm:$0xff]  }
 0x189   : > { %v4851_v0 = vld [vmem:[#allocation11 + $0x1c0] ss:$24 sps:$4 sm:$0xff]   ;;  %v4854_v1 = vld [vmem:[#allocation11 + $0x1f0] ss:$24 sps:$4 sm:$0xff]  }
 0x18a   : > { %v601_v21 = vmul.f32 %v595_v10, %v585_v19  ;;  %v600_v22 = vmul.f32 %v591_v13, %v584_v20  ;;  %v4836_v10 = vld [vmem:[#allocation11 + $0xd0] ss:$24 sps:$4 sm:$0xff]   ;;  %v4844_v13 = vld [vmem:[#allocation11 + $0x134] ss:$24 sps:$4 sm:$0xff]   ;;  %v4853_v19 = vld [vmem:[#allocation11 + $0x1c4] ss:$24 sps:$4 sm:$0xff]  }
 0x18b   : > { %v4856_v20 = vld [vmem:[#allocation11 + $0x1f4] ss:$24 sps:$4 sm:$0xff]  }
 0x18c   : > { %v617_v24 = vadd.f32 %v611_v17, %v601_v21  ;;  %v616_v26 = vadd.f32 %v607_v18, %v600_v22  ;;  %v4850_v17 = vld [vmem:[#allocation11 + $0x194] ss:$24 sps:$4 sm:$0xff]   ;;  %v4848_v18 = vld [vmem:[#allocation11 + $0x190] ss:$24 sps:$4 sm:$0xff]   ;;  %v4859_v21 = vld [vmem:[#allocation11 + $0x224] ss:$24 sps:$4 sm:$0xff]  }
 0x18d   : > { %v4857_v22 = vld [vmem:[#allocation11 + $0x220] ss:$24 sps:$4 sm:$0xff]  }
 0x18e   : > { %v5853_v27 = vpack.c.bf16 %v617_v24, %v615_v23  ;;  %v5855_v28 = vpack.c.bf16 %v616_v26, %v614_v25  ;;  %v4862_v23 = vld [vmem:[#allocation11 + $0x254] ss:$24 sps:$4 sm:$0xff]   ;;  %v4860_v24 = vld [vmem:[#allocation11 + $0x250] ss:$24 sps:$4 sm:$0xff]   ;;  %v4865_v25 = vld [vmem:[#allocation11 + $0x284] ss:$24 sps:$4 sm:$0xff]  }
 0x18f   : > { %v4863_v26 = vld [vmem:[#allocation11 + $0x280] ss:$24 sps:$4 sm:$0xff]  }
 0x190   : > { %1260 = vmatprep.mubr.bf16.mxu1 %v5853_v27 }
 0x191   : > { %1261 = vmatmul.mubr.bf16.vlgmr.msra.gmra.mrb[0].mxu1 %v5855_v28 }
 0x192   : > { %1272 = vmatpush1.bf16.msra.mxu1 %v4776_v2  ;;  %1303 = vmatprep.mubr.bf16.mxu1 %v5853_v27  ;;  %v4866_v2 = vld [vmem:[#allocation11 + $0x2b0] ss:$24 sps:$4 sm:$0xff]  }
 0x193   : > { %1273 = vmatprep.subr.bf16.mxu1 %v4781_v6  ;;  %v4871_v6 = vld [vmem:[#allocation11 + $0x2e4] ss:$24 sps:$4 sm:$0xff]  }
 0x196   : > { %1274 = vmatpush1.bf16.msra.mxu1 %v4779_v29  ;;  %v4869_v29 = vld [vmem:[#allocation11 + $0x2e0] ss:$24 sps:$4 sm:$0xff]  }
 0x197   : > { %1275 = vmatprep.subr.bf16.mxu1 %v4784_v30  ;;  %v5465_v30 = vmov 0.0  }
 0x198   : > { %4564 = vmatprep.subr.bf16.mxu0 %v5465_v30  ;;  %4566 = vmatprep.mubr.msk.bf16.mxu0 %vm5466_vm0, %v5465_v30 }
 0x19a   : > { %1276 = vmatpush1.bf16.msra.mxu1 %v4782_v31  ;;  %v716_v31 = vld [vmem:[%s6093_s4] sm:$0x3f] }
 0x19b   : > { %1277 = vmatprep.subr.bf16.mxu1 %v4787_v32  ;;  %v721_v32 = vrot.slane %v716_v31, %v5843_v3 }
 0x19e   : > { %1278 = vmatpush1.bf16.msra.mxu1 %v4785_v33 }
 0x19f   : > { %1279 = vmatprep.subr.bf16.mxu1 %v4790_v34 }
 0x1a2   : > { %1280 = vmatpush1.bf16.msra.mxu1 %v4788_v35 }
 0x1a3   : > { %1281 = vmatprep.subr.bf16.mxu1 %v4793_v36 }
 0x1a6   : > { %1282 = vmatpush1.bf16.msra.mxu1 %v4791_v37 }
 0x1a7   : > { %1283 = vmatprep.subr.bf16.mxu1 %v4796_v38 }
 0x1aa   : > { %1284 = vmatpush1.bf16.msra.mxu1 %v4794_v39 }
 0x1ab   : > { %1285 = vmatprep.subr.bf16.mxu1 %v4799_v40 }
 0x1ae   : > { %1286 = vmatpush1.bf16.msra.mxu1 %v4797_v41 }
 0x1af   : > { %1287 = vmatprep.subr.bf16.mxu1 %v4802_v42 }
 0x1b2   : > { %1288 = vmatpush1.bf16.msra.mxu1 %v4800_v43  ;;  %v728_v43 = vsub.s32 2, %v5837_v62 }
 0x1b3   : > { %1289 = vmatprep.subr.bf16.mxu1 %v4805_v44  ;;  %v732_v44 = vsub.s32 3, %v5837_v62 }
 0x1b6   : > { %1290 = vmatpush1.bf16.msra.mxu1 %v4803_v45  ;;  %v729_v45 = vrot.slane %v716_v31, %v728_v43 }
 0x1b7   : > { %1291 = vmatprep.subr.bf16.mxu1 %v4808_v46 }
 0x1ba   : > { %1292 = vmatpush1.bf16.msra.mxu1 %v4806_v47  ;;  %v733_v47 = vrot.slane %v716_v31, %v732_v44 }
 0x1bb   : > { %1293 = vmatprep.subr.bf16.mxu1 %v4811_v48 }
 0x1be   : > { %1294 = vmatpush1.bf16.msra.mxu1 %v4809_v49 }
 0x1bf   : > { %1295 = vmatprep.subr.bf16.mxu1 %v4814_v50 }
 0x1c2   : > { %1296 = vmatpush1.bf16.msra.mxu1 %v4812_v51 }
 0x1c3   : > { %1297 = vmatprep.subr.bf16.mxu1 %v4817_v52 }
 0x1c6   : > { %1298 = vmatpush1.bf16.msra.mxu1 %v4815_v53 }
 0x1c7   : > { %1299 = vmatprep.subr.bf16.mxu1 %v4820_v54 }
 0x1ca   : > { %1300 = vmatpush1.bf16.msra.mxu1 %v4818_v55 }
 0x1cb   : > { %1301 = vmatprep.subr.bf16.mxu1 %v4823_v56 }
 0x1ce   : > { %1302 = vmatpush1.bf16.msra.mxu1 %v4821_v57  ;;  %v736_v57 = vsub.s32 4, %v5837_v62 }
 0x1cf   : > { %1314 = vmatprep.subr.bf16.mxu1 %v4826_v58  ;;  %v740_v58 = vsub.s32 5, %v5837_v62 }
 0x1d1   : > { %1304 = vmatmul.mubr.bf16.vlgmr.msra.gmra.mrb[4].mxu1 %v5855_v28 }
 0x1d2   : > { %1315 = vmatpush1.bf16.msra.mxu1 %v4824_v59  ;;  %1346 = vmatprep.mubr.bf16.mxu1 %v5853_v27  ;;  %v4868_v27 = vld [vmem:[#allocation11 + $0x2b4] ss:$24 sps:$4 sm:$0xff]   ;;  %v737_v59 = vrot.slane %v716_v31, %v736_v57 }
 0x1d3   : > { %1316 = vmatprep.subr.bf16.mxu1 %v4829_v60 }
 0x1d6   : > { %1317 = vmatpush1.bf16.msra.mxu1 %v4827_v61  ;;  %v741_v61 = vrot.slane %v716_v31, %v740_v58 }
 0x1d7   : > { %1318 = vmatprep.subr.bf16.mxu1 %v4832_v4 }
 0x1da   : > { %1319 = vmatpush1.bf16.msra.mxu1 %v4830_v5 }
 0x1db   : > { %1320 = vmatprep.subr.bf16.mxu1 %v4835_v7 }
 0x1de   : > { %1321 = vmatpush1.bf16.msra.mxu1 %v4833_v8 }
 0x1df   : > { %1322 = vmatprep.subr.bf16.mxu1 %v4838_v9 }
 0x1e2   : > { %1323 = vmatpush1.bf16.msra.mxu1 %v4836_v10 }
 0x1e3   : > { %1324 = vmatprep.subr.bf16.mxu1 %v4841_v11 }
 0x1e6   : > { %1325 = vmatpush1.bf16.msra.mxu1 %v4839_v12 }
 0x1e7   : > { %1326 = vmatprep.subr.bf16.mxu1 %v4844_v13 }
 0x1ea   : > { %1327 = vmatpush1.bf16.msra.mxu1 %v4842_v14 }
 0x1eb   : > { %1328 = vmatprep.subr.bf16.mxu1 %v4847_v15 }
 0x1ee   : > { %1329 = vmatpush1.bf16.msra.mxu1 %v4845_v16 }
 0x1ef   : > { %1330 = vmatprep.subr.bf16.mxu1 %v4850_v17 }
 0x1f2   : > { %1331 = vmatpush1.bf16.msra.mxu1 %v4848_v18 }
 0x1f3   : > { %1332 = vmatprep.subr.bf16.mxu1 %v4853_v19 }
 0x1f6   : > { %1333 = vmatpush1.bf16.msra.mxu1 %v4851_v0 }
 0x1f7   : > { %1334 = vmatprep.subr.bf16.mxu1 %v4856_v20 }
 0x1fa   : > { %1335 = vmatpush1.bf16.msra.mxu1 %v4854_v1 }
 0x1fb   : > { %1336 = vmatprep.subr.bf16.mxu1 %v4859_v21 }
 0x1fe   : > { %1337 = vmatpush1.bf16.msra.mxu1 %v4857_v22 }
 0x1ff   : > { %1338 = vmatprep.subr.bf16.mxu1 %v4862_v23 }
 0x202   : > { %1339 = vmatpush1.bf16.msra.mxu1 %v4860_v24 }
 0x203   : > { %1340 = vmatprep.subr.bf16.mxu1 %v4865_v25 }
 0x206   : > { %1341 = vmatpush1.bf16.msra.mxu1 %v4863_v26 }
 0x207   : > { %1342 = vmatprep.subr.bf16.mxu1 %v4868_v27 }
 0x20a   : > { %1343 = vmatpush1.bf16.msra.mxu1 %v4866_v2 }
 0x20b   : > { %1344 = vmatprep.subr.bf16.mxu1 %v4871_v6 }
 0x20e   : > { %1345 = vmatpush1.bf16.msra.mxu1 %v4869_v29 }
 0x20f   : > { %4576 = vmatprep.subr.bf16.mxu1 %v5465_v30 }
 0x211   : > { %1347 = vmatmul.mubr.bf16.vlgmr.msra.gmra.mrb[8].mxu1 %v5855_v28  ;;  %v725_v28 = vrot.slane %v716_v31, %v5840_v63 }
 0x212   : > { %4578 = vmatprep.mubr.msk.bf16.mxu1 %vm5466_vm0, %v5465_v30 }
 0x264   : > { %v1262_v33 = vpop.f32.mrb[0].mxu1 }
 0x265   : > { %v1264_v34 = vpop.f32.mrb[1].mxu1  ;;  %v1263_v36 = vadd.f32 %v1262_v33, %v721_v32 }
 0x266   : > { %v1266_v35 = vpop.f32.mrb[2].mxu1  ;;  %v1265_v39 = vadd.f32 %v1264_v34, %v725_v28 }
 0x267   : > { %v1267_v37 = vadd.f32 %v1266_v35, %v721_v32  ;;  %v1268_v38 = vpop.f32.mrb[3].mxu1 }
 0x268   : > { %v1269_v40 = vadd.f32 %v1268_v38, %v725_v28 }
 0x269   : > { %v1357_v41 = vpack.c.bf16 %v1267_v37, %v1263_v36 }
 0x26a   : > { %v1358_v42 = vpack.c.bf16 %v1269_v40, %v1265_v39 }
 0x2a4   : > { %v1305_v46 = vpop.f32.mrb[4].mxu1 }
 0x2a5   : > { %v1307_v48 = vpop.f32.mrb[5].mxu1  ;;  %v1306_v50 = vadd.f32 %v1305_v46, %v729_v45 }
 0x2a6   : > { %v1309_v49 = vpop.f32.mrb[6].mxu1  ;;  %v1308_v53 = vadd.f32 %v1307_v48, %v733_v47  ;;  %v4874_v48 = vld [vmem:[#allocation13 + $0x84] ss:$8 sps:$4 sm:$0xff]  }
 0x2a7   : > { %v1310_v51 = vadd.f32 %v1309_v49, %v729_v45  ;;  %v1311_v52 = vpop.f32.mrb[7].mxu1  ;;  %v4875_v49 = vld [vmem:[#allocation13 + $0x90] ss:$8 sps:$4 sm:$0xff]  }
 0x2a8   : > { %v1312_v54 = vadd.f32 %v1311_v52, %v733_v47  ;;  %v4872_v47 = vld [vmem:[#allocation13 + $0x80] ss:$8 sps:$4 sm:$0xff]   ;;  %v4883_v52 = vld [vmem:[#allocation13 + $0xb4] ss:$8 sps:$4 sm:$0xff]  }
 0x2a9   : > { %v1359_v55 = vpack.c.bf16 %v1310_v51, %v1306_v50  ;;  %v4880_v50 = vld [vmem:[#allocation13 + $0xa4] ss:$8 sps:$4 sm:$0xff]   ;;  %v4878_v51 = vld [vmem:[#allocation13 + $0xa0] ss:$8 sps:$4 sm:$0xff]  }
 0x2aa   : > { %v1360_v56 = vpack.c.bf16 %v1312_v54, %v1308_v53  ;;  %v4881_v53 = vld [vmem:[#allocation13 + $0xb0] ss:$8 sps:$4 sm:$0xff]   ;;  %v4886_v54 = vld [vmem:[#allocation13 + $0xc4] ss:$8 sps:$4 sm:$0xff]  }
 0x2ab   : > { %4565 = vmatpush3.bf16.xpose.msra.mxu0 %v1359_v55  ;;  %v4884_v55 = vld [vmem:[#allocation13 + $0xc0] ss:$8 sps:$4 sm:$0xff]  }
 0x2ac   : > { %4570 = vmatprep.subr.bf16.mxu0 %v5465_v30 }
 0x2b2   : > { %4567 = vmatmul.mubr.bf16.vlgmr.msra.gmra.mrb[0].mxu0 %v1357_v41 }
 0x2b3   : > { %4571 = vmatpush3.bf16.xpose.msra.mxu0 %v1360_v56  ;;  %4572 = vmatprep.mubr.msk.bf16.mxu0 %vm5466_vm0, %v5465_v30  ;;  %v4889_v56 = vld [vmem:[#allocation13 + $0xd4] ss:$8 sps:$4 sm:$0xff]  }
 0x2ba   : > { %4573 = vmatmul.mubr.bf16.vlgmr.msra.gmra.mrb[4].mxu0 %v1358_v42 }
 0x2e4   : > { %v1348_v60 = vpop.f32.mrb[8].mxu1 }
 0x2e5   : > { %v1350_v4 = vpop.f32.mrb[9].mxu1  ;;  %v1349_v7 = vadd.f32 %v1348_v60, %v737_v59  ;;  %v4890_v60 = vld [vmem:[#allocation13 + $0xe0] ss:$8 sps:$4 sm:$0xff]  }
 0x2e6   : > { %v1352_v5 = vpop.f32.mrb[10].mxu1  ;;  %v1351_v10 = vadd.f32 %v1350_v4, %v741_v61  ;;  %v4895_v4 = vld [vmem:[#allocation13 + $0xf4] ss:$8 sps:$4 sm:$0xff]  }
 0x2e7   : > { %v1353_v8 = vadd.f32 %v1352_v5, %v737_v59  ;;  %v1354_v9 = vpop.f32.mrb[11].mxu1  ;;  %v4887_v59 = vld [vmem:[#allocation13 + $0xd0] ss:$8 sps:$4 sm:$0xff]  }
 0x2e8   : > { %v1355_v11 = vadd.f32 %v1354_v9, %v741_v61  ;;  %v4892_v61 = vld [vmem:[#allocation13 + $0xe4] ss:$8 sps:$4 sm:$0xff]   ;;  %v4893_v5 = vld [vmem:[#allocation13 + $0xf0] ss:$8 sps:$4 sm:$0xff]  }
 0x2e9   : > { %v1361_v12 = vpack.c.bf16 %v1353_v8, %v1349_v7  ;;  %v4898_v7 = vld [vmem:[#allocation13 + $0x4] ss:$8 sps:$4 sm:$0xff]   ;;  %v5467_v8 = vmov 0  }
 0x2ea   : > { %v1362_v13 = vpack.c.bf16 %v1355_v11, %v1351_v10 }
 0x2eb   : > { %4577 = vmatpush3.bf16.msra.mxu1 %v1361_v12 }
 0x2ec   : > { %4582 = vmatprep.subr.bf16.mxu1 %v5465_v30 }
 0x385   : > { %v1410_v14 = vpop.f32.mrb[0].mxu0 }
 0x386   : > { %v4568_v15 = vpop.f32.mrb[1].mxu0  ;;  %v1459_v16 = vsel %vm1458_vm1, %v1410_v14, -inf }
 0x387   : > { %1460 = vmax.xlane.f32.xlu0 %v1459_v16  ;;  %v1413_v17 = vpop.f32.mrb[2].mxu0 }
 0x388   : > { %v4569_v18 = vpop.f32.mrb[3].mxu0  ;;  %v1462_v19 = vsel %vm1458_vm1, %v1413_v17, -inf }
 0x389   : > { %1463 = vmax.xlane.f32.xlu1 %v1462_v19 }
 0x38d   : > { %v1451_v0 = vpop.f32.mrb[4].mxu0 }
 0x38e   : > { %v4574_v20 = vpop.f32.mrb[5].mxu0  ;;  %v1465_v1 = vsel %vm1458_vm1, %v1451_v0, -inf }
 0x38f   : > { %1466 = vmax.xlane.f32.xlu0 %v1465_v1  ;;  %v1454_v21 = vpop.f32.mrb[6].mxu0 }
 0x390   : > { %v4575_v22 = vpop.f32.mrb[7].mxu0  ;;  %v1468_v23 = vsel %vm1458_vm1, %v1454_v21, -inf }
 0x391   : > { %1469 = vmax.xlane.f32.xlu1 %v1468_v23 }
 0x414   : > { %v1461_v24 = vpop.xlane.xlu0 %1460 }
 0x415   : > { %v1471_v25 = vsub.f32 %v1410_v14, %v1461_v24 }
 0x416   : > { %v1464_v26 = vpop.xlane.xlu1 %1463 }
 0x417   : > { %v1475_v27 = vmul.f32 1.442695, %v1471_v25  ;;  %v1472_v2 = vsub.f32 %v1413_v17, %v1464_v26 }
 0x419   : > { %v1477_v6 = vmul.f32 1.442695, %v1472_v2  ;;  %5116 = vpow2.f32 %v1475_v27  ;;  %v4896_v2 = vld [vmem:[#allocation13] ss:$8 sps:$4 sm:$0xff]  }
 0x41b   : > { %5118 = vpow2.f32 %v1477_v6 }
 0x41c   : > { %v1467_v29 = vpop.xlane.xlu0 %1466 }
 0x41d   : > { %v1473_v31 = vsub.f32 %v1451_v0, %v1467_v29  ;;  %v4901_v29 = vld [vmem:[#allocation13 + $0x14] ss:$8 sps:$4 sm:$0xff]  }
 0x41e   : > { %v1470_v32 = vpop.xlane.xlu1 %1469 }
 0x41f   : > { %v1479_v33 = vmul.f32 1.442695, %v1473_v31  ;;  %v1474_v28 = vsub.f32 %v1454_v21, %v1470_v32  ;;  %v4899_v31 = vld [vmem:[#allocation13 + $0x10] ss:$8 sps:$4 sm:$0xff]   ;;  %v4904_v32 = vld [vmem:[#allocation13 + $0x24] ss:$8 sps:$4 sm:$0xff]  }
 0x421   : > { %5120 = vpow2.f32 %v1479_v33  ;;  %v1481_v34 = vmul.f32 1.442695, %v1474_v28  ;;  %v4902_v33 = vld [vmem:[#allocation13 + $0x20] ss:$8 sps:$4 sm:$0xff]   ;;  %v4907_v28 = vld [vmem:[#allocation13 + $0x34] ss:$8 sps:$4 sm:$0xff]  }
 0x423   : > { %5122 = vpow2.f32 %v1481_v34  ;;  %v5117_v35 = vpop.eup %5116  ;;  %v4905_v34 = vld [vmem:[#allocation13 + $0x30] ss:$8 sps:$4 sm:$0xff]  }
 0x424   : > { %v1483_v45 = vsel %vm1458_vm1, %v5117_v35, 0.0 }
 0x425   : > { %v5119_v36 = vpop.eup %5118 }
 0x426   : > { %v1495_v37 = vpack.c.bf16 %v5119_v36, %v5117_v35  ;;  %v1486_v46 = vsel %vm1458_vm1, %v5119_v36, 0.0  ;;  %v4910_v35 = vld [vmem:[#allocation13 + $0x44] ss:$8 sps:$4 sm:$0xff]   ;;  %v4908_v36 = vld [vmem:[#allocation13 + $0x40] ss:$8 sps:$4 sm:$0xff]  }
 0x428   : > { %4579 = vmatmul.mubr.msk.bf16.vlgmr.msra.gmra.mrb[12].mxu1 %vm1458_vm1, %v1495_v37  ;;  %v4913_v37 = vld [vmem:[#allocation13 + $0x54] ss:$8 sps:$4 sm:$0xff]  }
 0x429   : > { %4583 = vmatpush3.bf16.msra.mxu1 %v1362_v13  ;;  %4584 = vmatprep.mubr.msk.bf16.mxu1 %vm5466_vm0, %v5465_v30  ;;  %v4877_v30 = vld [vmem:[#allocation13 + $0x94] ss:$8 sps:$4 sm:$0xff]  }
 0x42a   : > { %1710 = vmatprep.subr.bf16.mxu1 %v4874_v48 }
 0x42b   : > { %v5121_v38 = vpop.eup %5120 }
 0x42c   : > { %v1489_v39 = vsel %vm1458_vm1, %v5121_v38, 0.0 }
 0x42d   : > { %v5123_v40 = vpop.eup %5122  ;;  %1490 = vadd.xlane.f32.xlu0 %v1489_v39  ;;  %v4916_v39 = vld [vmem:[#allocation13 + $0x64] ss:$8 sps:$4 sm:$0xff]  }
 0x42e   : > { %v1492_v41 = vsel %vm1458_vm1, %v5123_v40, 0.0  ;;  %v1496_v42 = vpack.c.bf16 %v5123_v40, %v5121_v38  ;;  %v4911_v38 = vld [vmem:[#allocation13 + $0x50] ss:$8 sps:$4 sm:$0xff]   ;;  %v4914_v40 = vld [vmem:[#allocation13 + $0x60] ss:$8 sps:$4 sm:$0xff]  }
 0x42f   : > { %1493 = vadd.xlane.f32.xlu1 %v1492_v41  ;;  %v4919_v41 = vld [vmem:[#allocation13 + $0x74] ss:$8 sps:$4 sm:$0xff]  }
 0x430   : > { %4585 = vmatmul.mubr.msk.bf16.vlgmr.msra.gmra.mrb[16].mxu1 %vm1458_vm1, %v1496_v42  ;;  %v4917_v42 = vld [vmem:[#allocation13 + $0x70] ss:$8 sps:$4 sm:$0xff]  }
 0x431   : > { %1484 = vadd.xlane.f32.xlu0 %v1483_v45  ;;  %1711 = vmatpush1.bf16.msra.mxu1 %v4872_v47  ;;  %v1968_v45 = vld [vmem:[#allocation14] sm:$0xff]  ;;  %v1969_v47 = vld [vmem:[#allocation14 + $0x8] sm:$0xff] }
 0x432   : > { %1712 = vmatprep.subr.bf16.mxu1 %v4877_v30  ;;  %1742 = vmatprep.mubr.bf16.mxu1 %v5467_v8 }
 0x433   : > { %1487 = vadd.xlane.f32.xlu1 %v1486_v46  ;;  %v1972_v46 = vld [vmem:[#allocation14 + $0x20] sm:$0xff] }
 0x434   : > { %v4293_v48 = vcombine.low %v1968_v45, %v1972_v46  ;;  %v4294_v30 = vcombine.high %v1968_v45, %v1972_v46  ;;  %v2029_v45 = vld [vmem:[#allocation14 + $0x1e8] sm:$0xff] }
 0x435   : > { %1713 = vmatpush1.bf16.msra.mxu1 %v4875_v49  ;;  %v1973_v49 = vld [vmem:[#allocation14 + $0x28] sm:$0xff] }
 0x436   : > { %1714 = vmatprep.subr.bf16.mxu1 %v4880_v50  ;;  %v1976_v50 = vld [vmem:[#allocation14 + $0x40] sm:$0xff]  ;;  %2778 = vmatprep.subr.bf16.mxu0 %v4294_v30 }
 0x437   : > { %2779 = vmatpush1.bf16.msra.mxu0 %v4293_v48 }
 0x439   : > { %1715 = vmatpush1.bf16.msra.mxu1 %v4878_v51  ;;  %v1980_v51 = vld [vmem:[#allocation14 + $0x60] sm:$0xff] }
 0x43a   : > { %1716 = vmatprep.subr.bf16.mxu1 %v4883_v52  ;;  %v4295_v52 = vcombine.low %v1969_v47, %v1973_v49 }
 0x43d   : > { %1717 = vmatpush1.bf16.msra.mxu1 %v4881_v53  ;;  %v4296_v53 = vcombine.high %v1969_v47, %v1973_v49 }
 0x43e   : > { %1718 = vmatprep.subr.bf16.mxu1 %v4886_v54  ;;  %v4302_v54 = vcombine.high %v1976_v50, %v1980_v51 }
 0x440   : > { %2780 = vmatprep.subr.bf16.mxu0 %v4302_v54 }
 0x441   : > { %1719 = vmatpush1.bf16.msra.mxu1 %v4884_v55  ;;  %v1977_v55 = vld [vmem:[#allocation14 + $0x48] sm:$0xff] }
 0x442   : > { %1720 = vmatprep.subr.bf16.mxu1 %v4889_v56  ;;  %v1981_v56 = vld [vmem:[#allocation14 + $0x68] sm:$0xff] }
 0x445   : > { %1721 = vmatpush1.bf16.msra.mxu1 %v4887_v59  ;;  %v1984_v59 = vld [vmem:[#allocation14 + $0x80] sm:$0xff] }
 0x446   : > { %1722 = vmatprep.subr.bf16.mxu1 %v4892_v61  ;;  %v1988_v61 = vld [vmem:[#allocation14 + $0xa0] sm:$0xff] }
 0x449   : > { %1723 = vmatpush1.bf16.msra.mxu1 %v4890_v60  ;;  %v4304_v60 = vcombine.high %v1977_v55, %v1981_v56 }
 0x44a   : > { %1724 = vmatprep.subr.bf16.mxu1 %v4895_v4  ;;  %v1985_v4 = vld [vmem:[#allocation14 + $0x88] sm:$0xff] }
 0x44d   : > { %1725 = vmatpush1.bf16.msra.mxu1 %v4893_v5  ;;  %v1989_v5 = vld [vmem:[#allocation14 + $0xa8] sm:$0xff] }
 0x44e   : > { %1833 = vmatprep.subr.bf16.mxu1 %v4898_v7  ;;  %v4301_v7 = vcombine.low %v1976_v50, %v1980_v51  ;;  %v1880_v51 = vld [vmem:[%s6095_s6] sm:$0x3] }
 0x44f   : > { %v1889_v54 = vrot.slane %v1880_v51, %v5840_v63 }
 0x450   : > { %2781 = vmatpush1.bf16.msra.mxu0 %v4301_v7  ;;  %v5170_v7 = vld [vmem:[%s5795_s21 + $0x10] sm:$0xff] }
 0x4ba   : > { %v1491_v9 = vpop.xlane.xlu0 %1490 }
 0x4bc   : > { %v1494_v10 = vpop.xlane.xlu1 %1493 }
 0x4be   : > { %v1485_v11 = vpop.xlane.xlu0 %1484 }
 0x4bf   : > { %5124 = vrcp.f32 %v1485_v11  ;;  %v1992_v11 = vld [vmem:[#allocation14 + $0xc0] sm:$0xff] }
 0x4c0   : > { %v1488_v12 = vpop.xlane.xlu1 %1487 }
 0x4c1   : > { %5126 = vrcp.f32 %v1488_v12  ;;  %v1996_v12 = vld [vmem:[#allocation14 + $0xe0] sm:$0xff] }
 0x4c2   : > { %5128 = vrcp.f32 %v1491_v9  ;;  %v4310_v9 = vcombine.high %v1984_v59, %v1988_v61 }
 0x4c3   : > { %5130 = vrcp.f32 %v1494_v10  ;;  %v4312_v10 = vcombine.high %v1985_v4, %v1989_v5 }
 0x4c4   : > { %2782 = vmatprep.subr.bf16.mxu0 %v4310_v9 }
 0x4c9   : > { %v5125_v14 = vpop.eup %5124 }
 0x4cb   : > { %v5127_v16 = vpop.eup %5126 }
 0x4cc   : > { %v5129_v21 = vpop.eup %5128 }
 0x4cd   : > { %v5131_v23 = vpop.eup %5130 }
 0x4fb   : > { %v1536_v13 = vpop.f32.mrb[12].mxu1 }
 0x4fc   : > { %v4580_v15 = vpop.f32.mrb[13].mxu1  ;;  %v1591_v18 = vmul.f32 %v5125_v14, %v1536_v13  ;;  %v1993_v13 = vld [vmem:[#allocation14 + $0xc8] sm:$0xff] }
 0x4fd   : > { %v1539_v17 = vpop.f32.mrb[14].mxu1  ;;  %v1997_v14 = vld [vmem:[#allocation14 + $0xe8] sm:$0xff]  ;;  %v4309_v15 = vcombine.low %v1984_v59, %v1988_v61 }
 0x4fe   : > { %v1592_v19 = vmul.f32 %v5127_v16, %v1539_v17  ;;  %v4581_v0 = vpop.f32.mrb[15].mxu1  ;;  %v4311_v16 = vcombine.low %v1985_v4, %v1989_v5  ;;  %v4318_v17 = vcombine.high %v1992_v11, %v1996_v12 }
 0x4ff   : > { %v2004_v0 = vld [vmem:[#allocation14 + $0x120] sm:$0xff]  ;;  %2783 = vmatpush1.bf16.msra.mxu0 %v4309_v15 }
 0x500   : > { %v1595_v20 = vpack.c.bf16 %v1592_v19, %v1591_v18  ;;  %v4320_v18 = vcombine.high %v1993_v13, %v1997_v14  ;;  %v2000_v19 = vld [vmem:[#allocation14 + $0x100] sm:$0xff]  ;;  %2784 = vmatprep.subr.bf16.mxu0 %v4318_v17 }
 0x503   : > { %v1580_v1 = vpop.f32.mrb[16].mxu1 }
 0x504   : > { %v4586_v22 = vpop.f32.mrb[17].mxu1  ;;  %v1593_v25 = vmul.f32 %v5129_v21, %v1580_v1  ;;  %v2005_v1 = vld [vmem:[#allocation14 + $0x128] sm:$0xff]  ;;  %v4317_v21 = vcombine.low %v1992_v11, %v1996_v12  ;;  %v5171_v11 = vld [vmem:[%s5795_s21 + $0x18] sm:$0xff] }
 0x505   : > { %v1583_v24 = vpop.f32.mrb[18].mxu1  ;;  %v4319_v22 = vcombine.low %v1993_v13, %v1997_v14 }
 0x506   : > { %v1594_v26 = vmul.f32 %v5131_v23, %v1583_v24  ;;  %v4587_v27 = vpop.f32.mrb[19].mxu1  ;;  %v4326_v23 = vcombine.high %v2000_v19, %v2004_v0  ;;  %2785 = vmatpush1.bf16.msra.mxu0 %v4317_v21  ;;  %v2032_v21 = vld [vmem:[#allocation14 + $0x200] sm:$0xff] }
 0x507   : > { %v2009_v27 = vld [vmem:[#allocation14 + $0x148] sm:$0xff] }
 0x508   : > { %v1596_v6 = vpack.c.bf16 %v1594_v26, %v1593_v25  ;;  %v2008_v25 = vld [vmem:[#allocation14 + $0x140] sm:$0xff]  ;;  %2786 = vmatprep.subr.bf16.mxu0 %v4326_v23  ;;  %v2033_v23 = vld [vmem:[#allocation14 + $0x208] sm:$0xff] }
 0x509   : > { %v2012_v26 = vld [vmem:[#allocation14 + $0x160] sm:$0xff] }
 0x50a   : > { %1743 = vmatmul.mubr.bf16.vlgmr.msra.gmra.mrb[20].mxu1 %v1596_v6  ;;  %v4325_v6 = vcombine.low %v2000_v19, %v2004_v0 }
 0x50b   : > { %1834 = vmatpush1.bf16.msra.mxu1 %v4896_v2  ;;  %1865 = vmatprep.mubr.bf16.mxu1 %v5467_v8  ;;  %v4303_v8 = vcombine.low %v1977_v55, %v1981_v56  ;;  %v2013_v2 = vld [vmem:[#allocation14 + $0x168] sm:$0xff]  ;;  %v5168_v55 = vld [vmem:[%s5795_s21] sm:$0xff] }
 0x50c   : > { %1835 = vmatprep.subr.bf16.mxu1 %v4901_v29  ;;  %2787 = vmatpush1.bf16.msra.mxu0 %v4325_v6  ;;  %v2040_v6 = vld [vmem:[#allocation14 + $0x240] sm:$0xff] }
 0x50f   : > { %1836 = vmatpush1.bf16.msra.mxu1 %v4899_v31  ;;  %v4334_v31 = vcombine.high %v2008_v25, %v2012_v26 }
 0x510   : > { %1837 = vmatprep.subr.bf16.mxu1 %v4904_v32  ;;  %v4336_v32 = vcombine.high %v2009_v27, %v2013_v2 }
 0x511   : > { %2788 = vmatprep.subr.bf16.mxu0 %v4334_v31  ;;  %v2041_v31 = vld [vmem:[#allocation14 + $0x248] sm:$0xff] }
 0x513   : > { %1838 = vmatpush1.bf16.msra.mxu1 %v4902_v33  ;;  %v2016_v33 = vld [vmem:[#allocation14 + $0x180] sm:$0xff] }
 0x514   : > { %1839 = vmatprep.subr.bf16.mxu1 %v4907_v28  ;;  %v2020_v28 = vld [vmem:[#allocation14 + $0x1a0] sm:$0xff] }
 0x515   : > { %v4341_v46 = vcombine.low %v2016_v33, %v2020_v28 }
 0x517   : > { %1840 = vmatpush1.bf16.msra.mxu1 %v4905_v34  ;;  %v2017_v34 = vld [vmem:[#allocation14 + $0x188] sm:$0xff] }
 0x518   : > { %1841 = vmatprep.subr.bf16.mxu1 %v4910_v35  ;;  %v2021_v35 = vld [vmem:[#allocation14 + $0x1a8] sm:$0xff] }
 0x519   : > { %v4343_v47 = vcombine.low %v2017_v34, %v2021_v35 }
 0x51b   : > { %1842 = vmatpush1.bf16.msra.mxu1 %v4908_v36  ;;  %v4333_v36 = vcombine.low %v2008_v25, %v2012_v26  ;;  %v2037_v25 = vld [vmem:[#allocation14 + $0x228] sm:$0xff] }
 0x51c   : > { %1843 = vmatprep.subr.bf16.mxu1 %v4913_v37  ;;  %v4335_v37 = vcombine.low %v2009_v27, %v2013_v2  ;;  %v4359_v27 = vcombine.low %v2033_v23, %v2037_v25  ;;  %v4360_v2 = vcombine.high %v2033_v23, %v2037_v25  ;;  %v2092_v23 = vld [vmem:[#allocation14 + $0x3e0] sm:$0xff]  ;;  %v2093_v25 = vld [vmem:[#allocation14 + $0x3e8] sm:$0xff] }
 0x51d   : > { %2789 = vmatpush1.bf16.msra.mxu0 %v4333_v36  ;;  %v2048_v36 = vld [vmem:[#allocation14 + $0x280] sm:$0xff] }
 0x51f   : > { %1844 = vmatpush1.bf16.msra.mxu1 %v4911_v38  ;;  %v4342_v38 = vcombine.high %v2016_v33, %v2020_v28  ;;  %v2045_v33 = vld [vmem:[#allocation14 + $0x268] sm:$0xff] }
 0x520   : > { %1845 = vmatprep.subr.bf16.mxu1 %v4916_v39  ;;  %v4344_v39 = vcombine.high %v2017_v34, %v2021_v35  ;;  %v4367_v34 = vcombine.low %v2041_v31, %v2045_v33  ;;  %v4368_v35 = vcombine.high %v2041_v31, %v2045_v33  ;;  %v5933_v33 = vld [vmem:[#allocation14 + $0x30] sm:$0xff] }
 0x521   : > { %2790 = vmatprep.subr.bf16.mxu0 %v4342_v38  ;;  %v2049_v38 = vld [vmem:[#allocation14 + $0x288] sm:$0xff] }
 0x522   : > { %2791 = vmatpush1.bf16.msra.mxu0 %v4341_v46  ;;  %v2056_v46 = vld [vmem:[#allocation14 + $0x2c0] sm:$0xff] }
 0x523   : > { %1846 = vmatpush1.bf16.msra.mxu1 %v4914_v40  ;;  %v2024_v40 = vld [vmem:[#allocation14 + $0x1c0] sm:$0xff] }
 0x524   : > { %1847 = vmatprep.subr.bf16.mxu1 %v4919_v41  ;;  %v2028_v41 = vld [vmem:[#allocation14 + $0x1e0] sm:$0xff] }
 0x525   : > { %v4350_v48 = vcombine.high %v2024_v40, %v2028_v41  ;;  %v4349_v49 = vcombine.low %v2024_v40, %v2028_v41  ;;  %v2053_v40 = vld [vmem:[#allocation14 + $0x2a8] sm:$0xff] }
 0x527   : > { %1848 = vmatpush1.bf16.msra.mxu1 %v4917_v42  ;;  %v2025_v42 = vld [vmem:[#allocation14 + $0x1c8] sm:$0xff]  ;;  %2792 = vmatprep.subr.bf16.mxu0 %v4350_v48 }
 0x528   : > { %2821 = vmatprep.subr.bf16.mxu1 %v4296_v53  ;;  %v4352_v30 = vcombine.high %v2025_v42, %v2029_v45  ;;  %v4351_v50 = vcombine.low %v2025_v42, %v2029_v45  ;;  %2793 = vmatpush1.bf16.msra.mxu0 %v4349_v49  ;;  %v4375_v42 = vcombine.low %v2049_v38, %v2053_v40  ;;  %v2057_v48 = vld [vmem:[#allocation14 + $0x2c8] sm:$0xff] }
 0x529   : > { %v4376_v45 = vcombine.high %v2049_v38, %v2053_v40  ;;  %v2061_v49 = vld [vmem:[#allocation14 + $0x2e8] sm:$0xff] }
 0x52a   : > { %1866 = vmatmul.mubr.bf16.vlgmr.msra.gmra.mrb[20].mxu1 %v1595_v20  ;;  %v2001_v20 = vld [vmem:[#allocation14 + $0x108] sm:$0xff] }
 0x52b   : > { %2822 = vmatpush1.bf16.msra.mxu1 %v4295_v52  ;;  %v4328_v24 = vcombine.high %v2001_v20, %v2005_v1  ;;  %v4327_v29 = vcombine.low %v2001_v20, %v2005_v1  ;;  %v1885_v52 = vrot.slane %v1880_v51, %v5843_v3  ;;  %v4383_v51 = vcombine.low %v2057_v48, %v2061_v49 }
 0x52c   : > { %2823 = vmatprep.subr.bf16.mxu1 %v4304_v60  ;;  %v5169_v60 = vld [vmem:[%s5795_s21 + $0x8] sm:$0xff]  ;;  %s6134_s21 = sld [smem:[#allocation27_spill]] }
 0x52f   : > { %2824 = vmatpush1.bf16.msra.mxu1 %v4303_v8 }
 0x530   : > { %2825 = vmatprep.subr.bf16.mxu1 %v4312_v10 }
 0x533   : > { %2826 = vmatpush1.bf16.msra.mxu1 %v4311_v16 }
 0x534   : > { %2827 = vmatprep.subr.bf16.mxu1 %v4320_v18 }
 0x537   : > { %2828 = vmatpush1.bf16.msra.mxu1 %v4319_v22  ;;  %v2036_v22 = vld [vmem:[#allocation14 + $0x220] sm:$0xff] }
 0x538   : > { %2829 = vmatprep.subr.bf16.mxu1 %v4328_v24  ;;  %v4358_v24 = vcombine.high %v2032_v21, %v2036_v22  ;;  %v4357_v26 = vcombine.low %v2032_v21, %v2036_v22  ;;  %v2088_v22 = vld [vmem:[#allocation14 + $0x3c0] sm:$0xff] }
 0x53a   : > { %2794 = vmatprep.subr.bf16.mxu0 %v4358_v24  ;;  %v2089_v24 = vld [vmem:[#allocation14 + $0x3c8] sm:$0xff] }
 0x53b   : > { %2830 = vmatpush1.bf16.msra.mxu1 %v4327_v29  ;;  %2795 = vmatpush1.bf16.msra.mxu0 %v4357_v26  ;;  %v2044_v29 = vld [vmem:[#allocation14 + $0x260] sm:$0xff]  ;;  %v4415_v31 = vcombine.low %v2089_v24, %v2093_v25 }
 0x53c   : > { %2831 = vmatprep.subr.bf16.mxu1 %v4336_v32  ;;  %v4366_v32 = vcombine.high %v2040_v6, %v2044_v29  ;;  %v4365_v28 = vcombine.low %v2040_v6, %v2044_v29  ;;  %v4416_v6 = vcombine.high %v2089_v24, %v2093_v25  ;;  %v4413_v29 = vcombine.low %v2088_v22, %v2092_v23 }
 0x53e   : > { %2796 = vmatprep.subr.bf16.mxu0 %v4366_v32  ;;  %v5931_v32 = vld [vmem:[#allocation14 + $0x10] sm:$0xff] }
 0x53f   : > { %2832 = vmatpush1.bf16.msra.mxu1 %v4335_v37  ;;  %2797 = vmatpush1.bf16.msra.mxu0 %v4365_v28  ;;  %v2052_v37 = vld [vmem:[#allocation14 + $0x2a0] sm:$0xff]  ;;  %v5935_v28 = vld [vmem:[#allocation14 + $0x18] sm:$0xff] }
 0x540   : > { %2833 = vmatprep.subr.bf16.mxu1 %v4344_v39  ;;  %v4374_v39 = vcombine.high %v2048_v36, %v2052_v37  ;;  %v4373_v41 = vcombine.low %v2048_v36, %v2052_v37  ;;  %v4297_v36 = vcombine.low %v5931_v32, %v5933_v33 }
 0x542   : > { %2798 = vmatprep.subr.bf16.mxu0 %v4374_v39 }
 0x543   : > { %2834 = vmatpush1.bf16.msra.mxu1 %v4343_v47  ;;  %2799 = vmatpush1.bf16.msra.mxu0 %v4373_v41  ;;  %v2060_v47 = vld [vmem:[#allocation14 + $0x2e0] sm:$0xff] }
 0x544   : > { %2835 = vmatprep.subr.bf16.mxu1 %v4352_v30  ;;  %v4382_v30 = vcombine.high %v2056_v46, %v2060_v47 }
 0x546   : > { %2800 = vmatprep.subr.bf16.mxu0 %v4382_v30 }
 0x547   : > { %2836 = vmatpush1.bf16.msra.mxu1 %v4351_v50  ;;  %v4381_v50 = vcombine.low %v2056_v46, %v2060_v47 }
 0x548   : > { %2837 = vmatprep.subr.bf16.mxu1 %v4360_v2  ;;  %v4414_v2 = vcombine.high %v2088_v22, %v2092_v23 }
 0x549   : > { %2801 = vmatpush1.bf16.msra.mxu0 %v4381_v50 }
 0x54b   : > { %2838 = vmatpush1.bf16.msra.mxu1 %v4359_v27 }
 0x54c   : > { %2839 = vmatprep.subr.bf16.mxu1 %v4368_v35  ;;  %v5939_v35 = vld [vmem:[#allocation14 + $0x38] sm:$0xff] }
 0x54d   : > { %v4299_v37 = vcombine.low %v5935_v28, %v5939_v35  ;;  %v4300_v38 = vcombine.high %v5935_v28, %v5939_v35  ;;  %v1990_v35 = vld [vmem:[#allocation14 + $0xb0] sm:$0xff] }
 0x54f   : > { %2840 = vmatpush1.bf16.msra.mxu1 %v4367_v34  ;;  %v4298_v34 = vcombine.high %v5931_v32, %v5933_v33  ;;  %v1986_v33 = vld [vmem:[#allocation14 + $0x90] sm:$0xff] }
 0x550   : > { %2841 = vmatprep.subr.bf16.mxu1 %v4376_v45 }
 0x553   : > { %2842 = vmatpush1.bf16.msra.mxu1 %v4375_v42 }
 0x5fd   : > { %v1867_v53 = vpop.f32.mrb[20].mxu1 }
 0x5fe   : > { %v1876_v56 = vadd.f32 %v5168_v55, %v1867_v53  ;;  %v1869_v59 = vpop.f32.mrb[21].mxu1  ;;  %v2064_v53 = vld [vmem:[#allocation14 + $0x300] sm:$0xff]  ;;  %v2065_v55 = vld [vmem:[#allocation14 + $0x308] sm:$0xff] }
 0x5ff   : > { %v1877_v61 = vadd.f32 %v5169_v60, %v1869_v59  ;;  %v1871_v4 = vpop.f32.mrb[22].mxu1  ;;  %v2069_v60 = vld [vmem:[#allocation14 + $0x328] sm:$0xff] }
 0x600   : > { %v5909_v5 = vadd.f32 %v1885_v52, %v1876_v56  ;;  %v1878_v8 = vadd.f32 %v5170_v7, %v1871_v4  ;;  %v1873_v9 = vpop.f32.mrb[23].mxu1  ;;  %v2076_v4 = vld [vmem:[#allocation14 + $0x360] sm:$0xff]  ;;  %v4391_v7 = vcombine.low %v2065_v55, %v2069_v60 }
 0x601   : > { %v5912_v10 = vadd.f32 %v1889_v54, %v1877_v61  ;;  %v1879_v12 = vadd.f32 %v5171_v11, %v1873_v9  ;;  %v2072_v61 = vld [vmem:[#allocation14 + $0x340] sm:$0xff]  ;;  %v2073_v11 = vld [vmem:[#allocation14 + $0x348] sm:$0xff] }
 0x602   : > { %v5915_v13 = vadd.f32 %v1885_v52, %v1878_v8  ;;  %v1904_v16 = vmul.f32 %v5909_v5, %v5909_v5  ;;  %v4384_v52 = vcombine.high %v2057_v48, %v2061_v49  ;;  %v4392_v8 = vcombine.high %v2065_v55, %v2069_v60 }
 0x603   : > { %v5917_v14 = vadd.f32 %v1889_v54, %v1879_v12  ;;  %v1896_v15 = vadd.f32 %v5912_v10, %v5909_v5  ;;  %v1905_v17 = vmul.f32 %v5912_v10, %v5912_v10  ;;  %v2068_v54 = vld [vmem:[#allocation14 + $0x320] sm:$0xff]  ;;  %v4398_v9 = vcombine.high %v2072_v61, %v2076_v4  ;;  %v2077_v12 = vld [vmem:[#allocation14 + $0x368] sm:$0xff] }
 0x604   : > { %v1906_v19 = vmul.f32 %v5915_v13, %v5915_v13  ;;  %2843 = vmatprep.subr.bf16.mxu1 %v4384_v52  ;;  %v4389_v56 = vcombine.low %v2064_v53, %v2068_v54  ;;  %v4390_v59 = vcombine.high %v2064_v53, %v2068_v54 }
 0x605   : > { %1897 = vadd.xlane.f32.xlu0 %v1896_v15  ;;  %v1899_v18 = vadd.f32 %v5917_v14, %v5915_v13  ;;  %v1907_v0 = vmul.f32 %v5917_v14, %v5917_v14  ;;  %v1908_v20 = vadd.f32 %v1905_v17, %v1904_v16  ;;  %2844 = vmatpush1.bf16.msra.mxu1 %v4383_v51  ;;  %v2080_v15 = vld [vmem:[#allocation14 + $0x380] sm:$0xff] }
 0x606   : > { %2802 = vmatprep.subr.bf16.mxu0 %v4390_v59  ;;  %v4400_v16 = vcombine.high %v2073_v11, %v2077_v12  ;;  %v2084_v17 = vld [vmem:[#allocation14 + $0x3a0] sm:$0xff]  ;;  %2845 = vmatprep.subr.bf16.mxu1 %v4392_v8 }
 0x607   : > { %1900 = vadd.xlane.f32.xlu1 %v1899_v18  ;;  %v1911_v1 = vadd.f32 %v1907_v0, %v1906_v19  ;;  %v2081_v18 = vld [vmem:[#allocation14 + $0x388] sm:$0xff]  ;;  %2803 = vmatpush1.bf16.msra.mxu0 %v4389_v56  ;;  %v4397_v0 = vcombine.low %v2072_v61, %v2076_v4  ;;  %v4405_v26 = vcombine.low %v2080_v15, %v2084_v17  ;;  %v1934_v56 = vld [vmem:[%s6132_s22] sm:$0x3] }
 0x608   : > { %v2085_v19 = vld [vmem:[#allocation14 + $0x3a8] sm:$0xff]  ;;  %2804 = vmatprep.subr.bf16.mxu0 %v4398_v9  ;;  %v1943_v61 = vrot.slane %v1934_v56, %v5840_v63  ;;  %v1950_v4 = vld [vmem:[%s6133_s30] sm:$0x3]  ;;  %s5370_s30 = scalar_lea.vmem %s6037_s19, 512 }
 0x609   : > { %1909 = vadd.xlane.f32.xlu0 %v1908_v20  ;;  %2846 = vmatpush1.bf16.msra.mxu1 %v4391_v7  ;;  %v4399_v20 = vcombine.low %v2073_v11, %v2077_v12  ;;  %v4408_v21 = vcombine.high %v2081_v18, %v2085_v19  ;;  %v4407_v27 = vcombine.low %v2081_v18, %v2085_v19  ;;  %p5371_p6 = scmp.ne.s32.totalorder %s6037_s19, %s5370_s30 }
 0x60a   : > { %2847 = vmatprep.subr.bf16.mxu1 %v4400_v16  ;;  %v1939_v7 = vrot.slane %v1934_v56, %v5843_v3  ;;  %v1955_v18 = vrot.slane %v1950_v4, %v5843_v3 }
 0x60b   : > { %1912 = vadd.xlane.f32.xlu1 %v1911_v1  ;;  %v4406_v1 = vcombine.high %v2080_v15, %v2084_v17  ;;  %2805 = vmatpush1.bf16.msra.mxu0 %v4397_v0  ;;  %v1959_v17 = vrot.slane %v1950_v4, %v5840_v63  ;;  %v2014_v4 = vld [vmem:[#allocation14 + $0x170] sm:$0xff]  ;;  %p5372_p5 = pnand %p5371_p6, %p6137_p12 }
 0x60d   : > { %2848 = vmatpush1.bf16.msra.mxu1 %v4399_v20  ;;  %2806 = vmatprep.subr.bf16.mxu0 %v4406_v1  ;;  %p5373_p7 = pneg %p5372_p5 }
 0x60e   : > { %2849 = vmatprep.subr.bf16.mxu1 %v4408_v21 }
 0x60f   : > { %2807 = vmatpush1.bf16.msra.mxu0 %v4405_v26 }
 0x610   : > { %2808 = vmatprep.subr.bf16.mxu0 %v4414_v2  ;;  %v1982_v2 = vld [vmem:[#allocation14 + $0x70] sm:$0xff] }
 0x611   : > { %2850 = vmatpush1.bf16.msra.mxu1 %v4407_v27  ;;  %v1978_v27 = vld [vmem:[#allocation14 + $0x50] sm:$0xff] }
 0x612   : > { %2851 = vmatprep.subr.bf16.mxu1 %v4416_v6  ;;  %v1979_v6 = vld [vmem:[#allocation14 + $0x58] sm:$0xff]  ;;  %v4306_v28 = vcombine.high %v1978_v27, %v1982_v2 }
 0x613   : > { %2809 = vmatpush1.bf16.msra.mxu0 %v4413_v29  ;;  %v1983_v29 = vld [vmem:[#allocation14 + $0x78] sm:$0xff] }
 0x614   : > { %2864 = vmatprep.subr.bf16.mxu0 %v4298_v34  ;;  %v4308_v34 = vcombine.high %v1979_v6, %v1983_v29 }
 0x615   : > { %2852 = vmatpush1.bf16.msra.mxu1 %v4415_v31 }
 0x616   : > { %2907 = vmatprep.subr.bf16.mxu1 %v4300_v38  ;;  %v1987_v38 = vld [vmem:[#allocation14 + $0x98] sm:$0xff] }
 0x692   : > { %v1898_v39 = vpop.xlane.xlu0 %1897 }
 0x693   : > { %v1902_v40 = vmul.f32 0.00390625, %v1898_v39  ;;  %v1991_v39 = vld [vmem:[#allocation14 + $0xb8] sm:$0xff] }
 0x694   : > { %v1901_v41 = vpop.xlane.xlu1 %1900 }
 0x695   : > { %v1903_v42 = vmul.f32 0.00390625, %v1901_v41  ;;  %v1916_v46 = vmul.f32 %v1902_v40, %v1902_v40  ;;  %v1922_v59 = vsub.f32 %v5909_v5, %v1902_v40  ;;  %v1923_v60 = vsub.f32 %v5912_v10, %v1902_v40 }
 0x696   : > { %v1910_v45 = vpop.xlane.xlu0 %1909  ;;  %v4305_v40 = vcombine.low %v1978_v27, %v1982_v2  ;;  %v4307_v41 = vcombine.low %v1979_v6, %v1983_v29  ;;  %v2034_v29 = vld [vmem:[#allocation14 + $0x210] sm:$0xff] }
 0x697   : > { %v1914_v47 = vmul.f32 0.00390625, %v1910_v45  ;;  %v1917_v49 = vmul.f32 %v1903_v42, %v1903_v42  ;;  %v1924_v9 = vsub.f32 %v5915_v13, %v1903_v42  ;;  %v1925_v11 = vsub.f32 %v5917_v14, %v1903_v42 }
 0x698   : > { %v1913_v48 = vpop.xlane.xlu1 %1912  ;;  %v4314_v42 = vcombine.high %v1986_v33, %v1990_v35  ;;  %v4316_v45 = vcombine.high %v1987_v38, %v1991_v39 }
 0x699   : > { %v1918_v30 = vsub.f32 %v1914_v47, %v1916_v46  ;;  %v1915_v50 = vmul.f32 0.00390625, %v1913_v48  ;;  %v1994_v46 = vld [vmem:[#allocation14 + $0xd0] sm:$0xff]  ;;  %v1995_v48 = vld [vmem:[#allocation14 + $0xd8] sm:$0xff] }
 0x69a   : > { %v1998_v47 = vld [vmem:[#allocation14 + $0xf0] sm:$0xff] }
 0x69b   : > { %v1920_v51 = vmax.f32 %v1918_v30, 0.0  ;;  %v1919_v52 = vsub.f32 %v1915_v50, %v1917_v49  ;;  %v1999_v30 = vld [vmem:[#allocation14 + $0xf8] sm:$0xff]  ;;  %v4313_v49 = vcombine.low %v1986_v33, %v1990_v35  ;;  %v4315_v50 = vcombine.low %v1987_v38, %v1991_v39 }
 0x69c   : > { %v4323_v56 = vcombine.low %v1995_v48, %v1999_v30  ;;  %v2035_v33 = vld [vmem:[#allocation14 + $0x218] sm:$0xff] }
 0x69d   : > { %v1926_v53 = vadd.f32 1e-06, %v1920_v51  ;;  %v1921_v54 = vmax.f32 %v1919_v52, 0.0  ;;  %v2002_v51 = vld [vmem:[#allocation14 + $0x110] sm:$0xff] }
 0x69e   : > { %v2006_v52 = vld [vmem:[#allocation14 + $0x130] sm:$0xff] }
 0x69f   : > { %5132 = vrsqrt.f32 %v1926_v53  ;;  %v1927_v55 = vadd.f32 1e-06, %v1921_v54  ;;  %v2003_v53 = vld [vmem:[#allocation14 + $0x118] sm:$0xff] }
 0x6a0   : > { %v2007_v54 = vld [vmem:[#allocation14 + $0x138] sm:$0xff] }
 0x6a1   : > { %5134 = vrsqrt.f32 %v1927_v55  ;;  %v4321_v55 = vcombine.low %v1994_v46, %v1998_v47 }
 0x6a9   : > { %v5133_v8 = vpop.eup %5132 }
 0x6aa   : > { %v1931_v12 = vmul.f32 %v5133_v8, %v1923_v60  ;;  %v1930_v15 = vmul.f32 %v5133_v8, %v1922_v59  ;;  %v4330_v59 = vcombine.high %v2002_v51, %v2006_v52  ;;  %v4332_v60 = vcombine.high %v2003_v53, %v2007_v54  ;;  %v2015_v8 = vld [vmem:[#allocation14 + $0x178] sm:$0xff] }
 0x6ab   : > { %v5135_v16 = vpop.eup %5134 }
 0x6ac   : > { %v1933_v19 = vmul.f32 %v5135_v16, %v1925_v11  ;;  %v1947_v0 = vmul.f32 %v1943_v61, %v1931_v12  ;;  %v1932_v20 = vmul.f32 %v5135_v16, %v1924_v9  ;;  %v1946_v1 = vmul.f32 %v1939_v7, %v1930_v15  ;;  %v2018_v16 = vld [vmem:[#allocation14 + $0x190] sm:$0xff] }
 0x6ad   : > { %v4329_v9 = vcombine.low %v2002_v51, %v2006_v52  ;;  %v4331_v11 = vcombine.low %v2003_v53, %v2007_v54 }
 0x6ae   : > { %v1949_v21 = vmul.f32 %v1943_v61, %v1933_v19  ;;  %v1948_v22 = vmul.f32 %v1939_v7, %v1932_v20  ;;  %v1963_v23 = vadd.f32 %v1959_v17, %v1947_v0  ;;  %v1962_v25 = vadd.f32 %v1955_v18, %v1946_v1  ;;  %v2010_v61 = vld [vmem:[#allocation14 + $0x150] sm:$0xff]  ;;  %v2011_v7 = vld [vmem:[#allocation14 + $0x158] sm:$0xff] }
 0x6af   : > { %v4338_v12 = vcombine.high %v2010_v61, %v2014_v4  ;;  %v4340_v15 = vcombine.high %v2011_v7, %v2015_v8  ;;  %v2023_v19 = vld [vmem:[#allocation14 + $0x1b8] sm:$0xff]  ;;  %v4337_v0 = vcombine.low %v2010_v61, %v2014_v4  ;;  %v4339_v20 = vcombine.low %v2011_v7, %v2015_v8 }
 0x6b0   : > { %v1965_v24 = vadd.f32 %v1959_v17, %v1949_v21  ;;  %v1964_v26 = vadd.f32 %v1955_v18, %v1948_v22  ;;  %v2022_v17 = vld [vmem:[#allocation14 + $0x1b0] sm:$0xff]  ;;  %v2019_v18 = vld [vmem:[#allocation14 + $0x198] sm:$0xff] }
 0x6b1   : > { %v4346_v1 = vcombine.high %v2018_v16, %v2022_v17  ;;  %v4348_v21 = vcombine.high %v2019_v18, %v2023_v19  ;;  %v2026_v22 = vld [vmem:[#allocation14 + $0x1d0] sm:$0xff]  ;;  %v4347_v27 = vcombine.low %v2019_v18, %v2023_v19 }
 0x6b2   : > { %v1967_v31 = vpack.c.bf16 %v1965_v24, %v1963_v23  ;;  %v5961_v32 = vpack.c.bf16 %v1964_v26, %v1962_v25  ;;  %v2030_v23 = vld [vmem:[#allocation14 + $0x1f0] sm:$0xff]  ;;  %v2027_v24 = vld [vmem:[#allocation14 + $0x1d8] sm:$0xff]  ;;  %v4345_v26 = vcombine.low %v2018_v16, %v2022_v17 }
 0x6b3   : > { %v2031_v25 = vld [vmem:[#allocation14 + $0x1f8] sm:$0xff]  ;;  %v4354_v2 = vcombine.high %v2026_v22, %v2030_v23 }
 0x6b4   : > { %2810 = vmatprep.mubr.bf16.mxu0 %v1967_v31  ;;  %2853 = vmatprep.mubr.bf16.mxu1 %v1967_v31  ;;  %v4356_v6 = vcombine.high %v2027_v24, %v2031_v25  ;;  %v4355_v35 = vcombine.low %v2027_v24, %v2031_v25 }
 0x6b5   : > { %2811 = vmatmul.mubr.bf16.vlgmr.msra.gmra.mrb[8].mxu0 %v5961_v32  ;;  %2854 = vmatmul.mubr.bf16.vlgmr.msra.gmra.mrb[24].mxu1 %v5961_v32 }
 0x6b6   : > { %2865 = vmatpush1.bf16.msra.mxu0 %v4297_v36  ;;  %2908 = vmatpush1.bf16.msra.mxu1 %v4299_v37  ;;  %v4322_v36 = vcombine.high %v1994_v46, %v1998_v47  ;;  %v4324_v37 = vcombine.high %v1995_v48, %v1999_v30 }
 0x6b7   : > { %2896 = vmatprep.mubr.bf16.mxu0 %v1967_v31  ;;  %2939 = vmatprep.mubr.bf16.mxu1 %v1967_v31  ;;  %v2038_v31 = vld [vmem:[#allocation14 + $0x230] sm:$0xff] }
 0x6b8   : > { %2866 = vmatprep.subr.bf16.mxu0 %v4306_v28  ;;  %2909 = vmatprep.subr.bf16.mxu1 %v4308_v34  ;;  %v2039_v28 = vld [vmem:[#allocation14 + $0x238] sm:$0xff]  ;;  %v4353_v34 = vcombine.low %v2026_v22, %v2030_v23  ;;  %v4362_v38 = vcombine.high %v2034_v29, %v2038_v31  ;;  %v4361_v46 = vcombine.low %v2034_v29, %v2038_v31 }
 0x6b9   : > { %v4364_v39 = vcombine.high %v2035_v33, %v2039_v28  ;;  %v4363_v47 = vcombine.low %v2035_v33, %v2039_v28 }
 0x6ba   : > { %2867 = vmatpush1.bf16.msra.mxu0 %v4305_v40  ;;  %2910 = vmatpush1.bf16.msra.mxu1 %v4307_v41  ;;  %v2042_v40 = vld [vmem:[#allocation14 + $0x250] sm:$0xff] }
 0x6bb   : > { %2868 = vmatprep.subr.bf16.mxu0 %v4314_v42  ;;  %2911 = vmatprep.subr.bf16.mxu1 %v4316_v45  ;;  %v2046_v41 = vld [vmem:[#allocation14 + $0x270] sm:$0xff]  ;;  %v2043_v42 = vld [vmem:[#allocation14 + $0x258] sm:$0xff] }
 0x6bc   : > { %v2047_v45 = vld [vmem:[#allocation14 + $0x278] sm:$0xff]  ;;  %v4370_v48 = vcombine.high %v2042_v40, %v2046_v41  ;;  %v4369_v51 = vcombine.low %v2042_v40, %v2046_v41 }
 0x6bd   : > { %v4372_v30 = vcombine.high %v2043_v42, %v2047_v45  ;;  %v4371_v52 = vcombine.low %v2043_v42, %v2047_v45 }
 0x6be   : > { %2869 = vmatpush1.bf16.msra.mxu0 %v4313_v49  ;;  %2912 = vmatpush1.bf16.msra.mxu1 %v4315_v50  ;;  %v2050_v49 = vld [vmem:[#allocation14 + $0x290] sm:$0xff] }
 0x6bf   : > { %2870 = vmatprep.subr.bf16.mxu0 %v4322_v36  ;;  %2913 = vmatprep.subr.bf16.mxu1 %v4324_v37  ;;  %v2054_v50 = vld [vmem:[#allocation14 + $0x2b0] sm:$0xff]  ;;  %v2051_v36 = vld [vmem:[#allocation14 + $0x298] sm:$0xff] }
 0x6c0   : > { %v2055_v37 = vld [vmem:[#allocation14 + $0x2b8] sm:$0xff]  ;;  %v4378_v53 = vcombine.high %v2050_v49, %v2054_v50  ;;  %v4377_v61 = vcombine.low %v2050_v49, %v2054_v50 }
 0x6c1   : > { %v4380_v54 = vcombine.high %v2051_v36, %v2055_v37  ;;  %v4379_v4 = vcombine.low %v2051_v36, %v2055_v37  ;;  %v4925_v49 = vld [vmem:[#allocation16 + $0x14] ss:$8 sps:$4 sm:$0xff]   ;;  %v4923_v50 = vld [vmem:[#allocation16 + $0x10] ss:$8 sps:$4 sm:$0xff]   ;;  %v4928_v36 = vld [vmem:[#allocation16 + $0x24] ss:$8 sps:$4 sm:$0xff]  }
 0x6c2   : > { %2871 = vmatpush1.bf16.msra.mxu0 %v4321_v55  ;;  %2914 = vmatpush1.bf16.msra.mxu1 %v4323_v56  ;;  %v2058_v55 = vld [vmem:[#allocation14 + $0x2d0] sm:$0xff]  ;;  %v4926_v37 = vld [vmem:[#allocation16 + $0x20] ss:$8 sps:$4 sm:$0xff]  }
 0x6c3   : > { %2872 = vmatprep.subr.bf16.mxu0 %v4330_v59  ;;  %2915 = vmatprep.subr.bf16.mxu1 %v4332_v60  ;;  %v2062_v56 = vld [vmem:[#allocation14 + $0x2f0] sm:$0xff]  ;;  %v2059_v59 = vld [vmem:[#allocation14 + $0x2d8] sm:$0xff] }
 0x6c4   : > { %v2063_v60 = vld [vmem:[#allocation14 + $0x2f8] sm:$0xff]  ;;  %v4386_v7 = vcombine.high %v2058_v55, %v2062_v56  ;;  %v4385_v16 = vcombine.low %v2058_v55, %v2062_v56 }
 0x6c5   : > { %v4388_v8 = vcombine.high %v2059_v59, %v2063_v60  ;;  %v4387_v17 = vcombine.low %v2059_v59, %v2063_v60  ;;  %v4937_v55 = vld [vmem:[#allocation16 + $0x54] ss:$8 sps:$4 sm:$0xff]   ;;  %v4935_v56 = vld [vmem:[#allocation16 + $0x50] ss:$8 sps:$4 sm:$0xff]   ;;  %v4938_v59 = vld [vmem:[#allocation16 + $0x60] ss:$8 sps:$4 sm:$0xff]  }
 0x6c6   : > { %2873 = vmatpush1.bf16.msra.mxu0 %v4329_v9  ;;  %2916 = vmatpush1.bf16.msra.mxu1 %v4331_v11  ;;  %v2066_v9 = vld [vmem:[#allocation14 + $0x310] sm:$0xff] }
 0x6c7   : > { %2874 = vmatprep.subr.bf16.mxu0 %v4338_v12  ;;  %2917 = vmatprep.subr.bf16.mxu1 %v4340_v15  ;;  %v2070_v11 = vld [vmem:[#allocation14 + $0x330] sm:$0xff]  ;;  %v2067_v12 = vld [vmem:[#allocation14 + $0x318] sm:$0xff] }
 0x6c8   : > { %v2071_v15 = vld [vmem:[#allocation14 + $0x338] sm:$0xff]  ;;  %v4394_v18 = vcombine.high %v2066_v9, %v2070_v11  ;;  %v4393_v22 = vcombine.low %v2066_v9, %v2070_v11  ;;  %v4952_v11 = vld [vmem:[#allocation16 + $0xa4] ss:$8 sps:$4 sm:$0xff]  }
 0x6c9   : > { %v4396_v19 = vcombine.high %v2067_v12, %v2071_v15  ;;  %v4395_v23 = vcombine.low %v2067_v12, %v2071_v15  ;;  %v4943_v60 = vld [vmem:[#allocation16 + $0x74] ss:$8 sps:$4 sm:$0xff]   ;;  %v4947_v9 = vld [vmem:[#allocation16 + $0x90] ss:$8 sps:$4 sm:$0xff]   ;;  %v4950_v12 = vld [vmem:[#allocation16 + $0xa0] ss:$8 sps:$4 sm:$0xff]  }
 0x6ca   : > { %2875 = vmatpush1.bf16.msra.mxu0 %v4337_v0  ;;  %2918 = vmatpush1.bf16.msra.mxu1 %v4339_v20  ;;  %v2074_v0 = vld [vmem:[#allocation14 + $0x350] sm:$0xff] }
 0x6cb   : > { %2876 = vmatprep.subr.bf16.mxu0 %v4346_v1  ;;  %2919 = vmatprep.subr.bf16.mxu1 %v4348_v21  ;;  %v2078_v20 = vld [vmem:[#allocation14 + $0x370] sm:$0xff]  ;;  %v2075_v1 = vld [vmem:[#allocation14 + $0x358] sm:$0xff] }
 0x6cc   : > { %v2079_v21 = vld [vmem:[#allocation14 + $0x378] sm:$0xff]  ;;  %v4402_v24 = vcombine.high %v2074_v0, %v2078_v20  ;;  %v4401_v29 = vcombine.low %v2074_v0, %v2078_v20  ;;  %v4964_v20 = vld [vmem:[#allocation16 + $0xe4] ss:$8 sps:$4 sm:$0xff]  }
 0x6cd   : > { %v4404_v25 = vcombine.high %v2075_v1, %v2079_v21  ;;  %v4403_v31 = vcombine.low %v2075_v1, %v2079_v21  ;;  %v4955_v15 = vld [vmem:[#allocation16 + $0xb4] ss:$8 sps:$4 sm:$0xff]   ;;  %v4959_v0 = vld [vmem:[#allocation16 + $0xd0] ss:$8 sps:$4 sm:$0xff]   ;;  %v4962_v1 = vld [vmem:[#allocation16 + $0xe0] ss:$8 sps:$4 sm:$0xff]  }
 0x6ce   : > { %2877 = vmatpush1.bf16.msra.mxu0 %v4345_v26  ;;  %2920 = vmatpush1.bf16.msra.mxu1 %v4347_v27  ;;  %v2082_v26 = vld [vmem:[#allocation14 + $0x390] sm:$0xff] }
 0x6cf   : > { %2878 = vmatprep.subr.bf16.mxu0 %v4354_v2  ;;  %2921 = vmatprep.subr.bf16.mxu1 %v4356_v6  ;;  %v2086_v27 = vld [vmem:[#allocation14 + $0x3b0] sm:$0xff]  ;;  %v2083_v2 = vld [vmem:[#allocation14 + $0x398] sm:$0xff] }
 0x6d0   : > { %v2087_v6 = vld [vmem:[#allocation14 + $0x3b8] sm:$0xff]  ;;  %v4410_v33 = vcombine.high %v2082_v26, %v2086_v27  ;;  %v4409_v40 = vcombine.low %v2082_v26, %v2086_v27 }
 0x6d1   : > { %v4412_v28 = vcombine.high %v2083_v2, %v2087_v6  ;;  %v4411_v41 = vcombine.low %v2083_v2, %v2087_v6  ;;  %v4967_v21 = vld [vmem:[#allocation16 + $0xf4] ss:$8 sps:$4 sm:$0xff]  }
 0x6d2   : > { %2879 = vmatpush1.bf16.msra.mxu0 %v4353_v34  ;;  %2922 = vmatpush1.bf16.msra.mxu1 %v4355_v35  ;;  %v2090_v34 = vld [vmem:[#allocation14 + $0x3d0] sm:$0xff] }
 0x6d3   : > { %2880 = vmatprep.subr.bf16.mxu0 %v4362_v38  ;;  %2923 = vmatprep.subr.bf16.mxu1 %v4364_v39  ;;  %v2094_v35 = vld [vmem:[#allocation14 + $0x3f0] sm:$0xff]  ;;  %v2091_v38 = vld [vmem:[#allocation14 + $0x3d8] sm:$0xff] }
 0x6d4   : > { %v2095_v39 = vld [vmem:[#allocation14 + $0x3f8] sm:$0xff]  ;;  %v4418_v42 = vcombine.high %v2090_v34, %v2094_v35 }
 0x6d5   : > { %v4420_v45 = vcombine.high %v2091_v38, %v2095_v39 }
 0x6d6   : > { %2881 = vmatpush1.bf16.msra.mxu0 %v4361_v46  ;;  %2924 = vmatpush1.bf16.msra.mxu1 %v4363_v47  ;;  %v4417_v46 = vcombine.low %v2090_v34, %v2094_v35  ;;  %v4419_v47 = vcombine.low %v2091_v38, %v2095_v39 }
 0x6d7   : > { %2882 = vmatprep.subr.bf16.mxu0 %v4370_v48  ;;  %2925 = vmatprep.subr.bf16.mxu1 %v4372_v30  ;;  %v4922_v48 = vld [vmem:[#allocation16 + $0x4] ss:$8 sps:$4 sm:$0xff]   ;;  %v4920_v30 = vld [vmem:[#allocation16] ss:$8 sps:$4 sm:$0xff]  }
 0x6da   : > { %2883 = vmatpush1.bf16.msra.mxu0 %v4369_v51  ;;  %2926 = vmatpush1.bf16.msra.mxu1 %v4371_v52  ;;  %v4931_v51 = vld [vmem:[#allocation16 + $0x34] ss:$8 sps:$4 sm:$0xff]   ;;  %v4929_v52 = vld [vmem:[#allocation16 + $0x30] ss:$8 sps:$4 sm:$0xff]  }
 0x6db   : > { %2884 = vmatprep.subr.bf16.mxu0 %v4378_v53  ;;  %2927 = vmatprep.subr.bf16.mxu1 %v4380_v54  ;;  %v4934_v53 = vld [vmem:[#allocation16 + $0x44] ss:$8 sps:$4 sm:$0xff]   ;;  %v4932_v54 = vld [vmem:[#allocation16 + $0x40] ss:$8 sps:$4 sm:$0xff]  }
 0x6de   : > { %2885 = vmatpush1.bf16.msra.mxu0 %v4377_v61  ;;  %2928 = vmatpush1.bf16.msra.mxu1 %v4379_v4  ;;  %v4941_v61 = vld [vmem:[#allocation16 + $0x70] ss:$8 sps:$4 sm:$0xff]   ;;  %v4946_v4 = vld [vmem:[#allocation16 + $0x84] ss:$8 sps:$4 sm:$0xff]  }
 0x6df   : > { %2886 = vmatprep.subr.bf16.mxu0 %v4386_v7  ;;  %2929 = vmatprep.subr.bf16.mxu1 %v4388_v8  ;;  %v4944_v7 = vld [vmem:[#allocation16 + $0x80] ss:$8 sps:$4 sm:$0xff]   ;;  %v4949_v8 = vld [vmem:[#allocation16 + $0x94] ss:$8 sps:$4 sm:$0xff]  }
 0x6e2   : > { %2887 = vmatpush1.bf16.msra.mxu0 %v4385_v16  ;;  %2930 = vmatpush1.bf16.msra.mxu1 %v4387_v17  ;;  %v4953_v16 = vld [vmem:[#allocation16 + $0xb0] ss:$8 sps:$4 sm:$0xff]   ;;  %v4958_v17 = vld [vmem:[#allocation16 + $0xc4] ss:$8 sps:$4 sm:$0xff]  }
 0x6e3   : > { %2888 = vmatprep.subr.bf16.mxu0 %v4394_v18  ;;  %2931 = vmatprep.subr.bf16.mxu1 %v4396_v19  ;;  %v4956_v18 = vld [vmem:[#allocation16 + $0xc0] ss:$8 sps:$4 sm:$0xff]   ;;  %v4961_v19 = vld [vmem:[#allocation16 + $0xd4] ss:$8 sps:$4 sm:$0xff]  }
 0x6e6   : > { %2889 = vmatpush1.bf16.msra.mxu0 %v4393_v22  ;;  %2932 = vmatpush1.bf16.msra.mxu1 %v4395_v23  ;;  %v4965_v22 = vld [vmem:[#allocation16 + $0xf0] ss:$8 sps:$4 sm:$0xff]   ;;  %v4970_v23 = vld [vmem:[#allocation16 + $0x104] ss:$8 sps:$4 sm:$0xff]  }
 0x6e7   : > { %2890 = vmatprep.subr.bf16.mxu0 %v4402_v24  ;;  %2933 = vmatprep.subr.bf16.mxu1 %v4404_v25  ;;  %v5970_v24 = vld [vmem:[%s6134_s21] sm:$0xff]  ;;  %s5376_s21 = scalar_lea.vmem %s5375_s10, 1024 }
 0x6e8   : > { %v2101_v25 = vrot.slane %v5970_v24, %v5843_v3  ;;  %v2109_v26 = vrot.slane %v5970_v24, %v728_v43  ;;  %v2105_v27 = vrot.slane %v5970_v24, %v5840_v63  ;;  %v2113_v2 = vrot.slane %v5970_v24, %v732_v44  ;;  %p5378_p1 = scmp.lt.s32.totalorder %s5376_s21, %s5370_s30 }
 0x6ea   : > { %2891 = vmatpush1.bf16.msra.mxu0 %v4401_v29  ;;  %2934 = vmatpush1.bf16.msra.mxu1 %v4403_v31  ;;  %p5379_p3 = por %p5378_p1, %p5377_p4 }
 0x6eb   : > { %2892 = vmatprep.subr.bf16.mxu0 %v4410_v33  ;;  %2935 = vmatprep.subr.bf16.mxu1 %v4412_v28 }
 0x6ec   : > { %p5380_p8 = pnand %p5379_p3, %p5373_p7 }
 0x6ee   : > { %2893 = vmatpush1.bf16.msra.mxu0 %v4409_v40  ;;  %2936 = vmatpush1.bf16.msra.mxu1 %v4411_v41 }
 0x6ef   : > { %2894 = vmatprep.subr.bf16.mxu0 %v4418_v42  ;;  %2937 = vmatprep.subr.bf16.mxu1 %v4420_v45 }
 0x6f2   : > { %2895 = vmatpush1.bf16.msra.mxu0 %v4417_v46  ;;  %2938 = vmatpush1.bf16.msra.mxu1 %v4419_v47 }
 0x6f3   : > { %3818 = vmatprep.subr.bf16.mxu0 %v4922_v48 }
 0x6f5   : > { %2897 = vmatmul.mubr.bf16.vlgmr.msra.gmra.mrb[12].mxu0 %v5961_v32  ;;  %2940 = vmatmul.mubr.bf16.vlgmr.msra.gmra.mrb[28].mxu1 %v5961_v32  ;;  %v4940_v32 = vld [vmem:[#allocation16 + $0x64] ss:$8 sps:$4 sm:$0xff]  }
 0x6f6   : > { %3819 = vmatpush1.bf16.msra.mxu0 %v4920_v30 }
 0x6f7   : > { %3820 = vmatprep.subr.bf16.mxu0 %v4925_v49 }
 0x6fa   : > { %3821 = vmatpush1.bf16.msra.mxu0 %v4923_v50 }
 0x6fb   : > { %3822 = vmatprep.subr.bf16.mxu0 %v4928_v36 }
 0x6fe   : > { %3823 = vmatpush1.bf16.msra.mxu0 %v4926_v37 }
 0x6ff   : > { %3824 = vmatprep.subr.bf16.mxu0 %v4931_v51 }
 0x702   : > { %3825 = vmatpush1.bf16.msra.mxu0 %v4929_v52 }
 0x703   : > { %3826 = vmatprep.subr.bf16.mxu0 %v4934_v53 }
 0x706   : > { %3827 = vmatpush1.bf16.msra.mxu0 %v4932_v54 }
 0x707   : > { %3828 = vmatprep.subr.bf16.mxu0 %v4937_v55 }
 0x70a   : > { %3829 = vmatpush1.bf16.msra.mxu0 %v4935_v56 }
 0x70b   : > { %3830 = vmatprep.subr.bf16.mxu0 %v4940_v32 }
 0x70e   : > { %3831 = vmatpush1.bf16.msra.mxu0 %v4938_v59 }
 0x70f   : > { %3832 = vmatprep.subr.bf16.mxu0 %v4943_v60 }
 0x712   : > { %3833 = vmatpush1.bf16.msra.mxu0 %v4941_v61 }
 0x713   : > { %3834 = vmatprep.subr.bf16.mxu0 %v4946_v4 }
 0x716   : > { %3835 = vmatpush1.bf16.msra.mxu0 %v4944_v7 }
 0x717   : > { %3836 = vmatprep.subr.bf16.mxu0 %v4949_v8 }
 0x71a   : > { %3837 = vmatpush1.bf16.msra.mxu0 %v4947_v9 }
 0x71b   : > { %3838 = vmatprep.subr.bf16.mxu0 %v4952_v11 }
 0x71e   : > { %3839 = vmatpush1.bf16.msra.mxu0 %v4950_v12 }
 0x71f   : > { %3840 = vmatprep.subr.bf16.mxu0 %v4955_v15 }
 0x722   : > { %3841 = vmatpush1.bf16.msra.mxu0 %v4953_v16 }
 0x723   : > { %3842 = vmatprep.subr.bf16.mxu0 %v4958_v17 }
 0x726   : > { %3843 = vmatpush1.bf16.msra.mxu0 %v4956_v18 }
 0x727   : > { %3844 = vmatprep.subr.bf16.mxu0 %v4961_v19 }
 0x72a   : > { %3845 = vmatpush1.bf16.msra.mxu0 %v4959_v0 }
 0x72b   : > { %3846 = vmatprep.subr.bf16.mxu0 %v4964_v20 }
 0x72e   : > { %3847 = vmatpush1.bf16.msra.mxu0 %v4962_v1 }
 0x72f   : > { %3848 = vmatprep.subr.bf16.mxu0 %v4967_v21 }
 0x732   : > { %3849 = vmatpush1.bf16.msra.mxu0 %v4965_v22 }
 0x733   : > { %3861 = vmatprep.subr.bf16.mxu0 %v4970_v23 }
 0x788   : > { %v2812_v6 = vpop.f32.mrb[8].mxu0  ;;  %v2855_v29 = vpop.f32.mrb[24].mxu1 }
 0x789   : > { %v2813_v31 = vadd.f32 %v2812_v6, %v2101_v25  ;;  %v2856_v33 = vadd.f32 %v2855_v29, %v2109_v26  ;;  %v2814_v28 = vpop.f32.mrb[9].mxu0  ;;  %v2857_v34 = vpop.f32.mrb[25].mxu1 }
 0x78a   : > { %v2815_v35 = vadd.f32 %v2814_v28, %v2105_v27  ;;  %v2858_v38 = vadd.f32 %v2857_v34, %v2113_v2  ;;  %v2816_v39 = vpop.f32.mrb[10].mxu0  ;;  %v2859_v40 = vpop.f32.mrb[26].mxu1  ;;  %v4968_v34 = vld [vmem:[#allocation16 + $0x100] ss:$8 sps:$4 sm:$0xff]  }
 0x78b   : > { %v2966_v41 = vmul.f32 0.70710677, %v2813_v31  ;;  %v2968_v42 = vmul.f32 0.70710677, %v2856_v33  ;;  %v2817_v46 = vadd.f32 %v2816_v39, %v2101_v25  ;;  %v2860_v47 = vadd.f32 %v2859_v40, %v2109_v26  ;;  %v2818_v48 = vpop.f32.mrb[11].mxu0  ;;  %v2861_v30 = vpop.f32.mrb[27].mxu1 }
 0x78c   : > { %v2967_v43 = vmul.f32 0.70710677, %v2815_v35  ;;  %v2969_v45 = vmul.f32 0.70710677, %v2858_v38  ;;  %v2819_v44 = vadd.f32 %v2818_v48, %v2105_v27  ;;  %v2862_v49 = vadd.f32 %v2861_v30, %v2113_v2  ;;  %v4971_v39 = vld [vmem:[#allocation16 + $0x110] ss:$8 sps:$4 sm:$0xff]  }
 0x78d   : > { %5136 = verf.f32 %v2966_v41  ;;  %v2974_v50 = vmul.f32 0.70710677, %v2817_v46  ;;  %v2976_v36 = vmul.f32 0.70710677, %v2860_v47  ;;  %v2950_v59 = vmul.f32 0.5, %v2813_v31 }
 0x78e   : > { %5138 = verf.f32 %v2968_v42  ;;  %v2975_v37 = vmul.f32 0.70710677, %v2819_v44  ;;  %v2977_v51 = vmul.f32 0.70710677, %v2862_v49  ;;  %v2952_v60 = vmul.f32 0.5, %v2856_v33 }
 0x78f   : > { %5140 = verf.f32 %v2967_v43  ;;  %v2951_v7 = vmul.f32 0.5, %v2815_v35  ;;  %v2958_v9 = vmul.f32 0.5, %v2817_v46  ;;  %v2953_v15 = vmul.f32 0.5, %v2858_v38  ;;  %v4973_v38 = vld [vmem:[#allocation16 + $0x114] ss:$8 sps:$4 sm:$0xff]  }
 0x790   : > { %5142 = verf.f32 %v2969_v45  ;;  %v2960_v17 = vmul.f32 0.5, %v2860_v47  ;;  %v2959_v1 = vmul.f32 0.5, %v2819_v44  ;;  %v2961_v25 = vmul.f32 0.5, %v2862_v49  ;;  %v4976_v40 = vld [vmem:[#allocation16 + $0x124] ss:$8 sps:$4 sm:$0xff]  }
 0x791   : > { %5144 = verf.f32 %v2974_v50  ;;  %v4974_v41 = vld [vmem:[#allocation16 + $0x120] ss:$8 sps:$4 sm:$0xff]   ;;  %v4979_v42 = vld [vmem:[#allocation16 + $0x134] ss:$8 sps:$4 sm:$0xff]   ;;  %v4977_v43 = vld [vmem:[#allocation16 + $0x130] ss:$8 sps:$4 sm:$0xff]  }
 0x792   : > { %5146 = verf.f32 %v2976_v36  ;;  %v4982_v45 = vld [vmem:[#allocation16 + $0x144] ss:$8 sps:$4 sm:$0xff]   ;;  %v4980_v46 = vld [vmem:[#allocation16 + $0x140] ss:$8 sps:$4 sm:$0xff]   ;;  %v4985_v47 = vld [vmem:[#allocation16 + $0x154] ss:$8 sps:$4 sm:$0xff]  }
 0x793   : > { %5148 = verf.f32 %v2975_v37  ;;  %v4983_v48 = vld [vmem:[#allocation16 + $0x150] ss:$8 sps:$4 sm:$0xff]   ;;  %v4988_v30 = vld [vmem:[#allocation16 + $0x164] ss:$8 sps:$4 sm:$0xff]   ;;  %v4986_v44 = vld [vmem:[#allocation16 + $0x160] ss:$8 sps:$4 sm:$0xff]  }
 0x794   : > { %5150 = verf.f32 %v2977_v51  ;;  %v4991_v49 = vld [vmem:[#allocation16 + $0x174] ss:$8 sps:$4 sm:$0xff]   ;;  %v4989_v50 = vld [vmem:[#allocation16 + $0x170] ss:$8 sps:$4 sm:$0xff]   ;;  %v4994_v36 = vld [vmem:[#allocation16 + $0x184] ss:$8 sps:$4 sm:$0xff]  }
 0x795   : > { %v2124_v37 = vsub.s32 6, %v5837_v62  ;;  %v4992_v51 = vld [vmem:[#allocation16 + $0x180] ss:$8 sps:$4 sm:$0xff]  }
 0x797   : > { %v5137_v52 = vpop.eup %5136 }
 0x798   : > { %v5139_v53 = vpop.eup %5138  ;;  %v2998_v56 = vadd.f32 1.0, %v5137_v52  ;;  %v2128_v52 = vsub.s32 7, %v5837_v62 }
 0x799   : > { %v5141_v54 = vpop.eup %5140  ;;  %v3000_v61 = vadd.f32 1.0, %v5139_v53  ;;  %v4997_v53 = vld [vmem:[#allocation16 + $0x194] ss:$8 sps:$4 sm:$0xff]  }
 0x79a   : > { %v5143_v55 = vpop.eup %5142  ;;  %v2999_v8 = vadd.f32 1.0, %v5141_v54  ;;  %v3014_v0 = vmul.f32 %v2998_v56, %v2950_v59  ;;  %v2117_v54 = vrot.slane %v5970_v24, %v736_v57  ;;  %v4995_v56 = vld [vmem:[#allocation16 + $0x190] ss:$8 sps:$4 sm:$0xff]   ;;  %v2129_v59 = vrot.slane %v5970_v24, %v2128_v52 }
 0x79b   : > { %v5145_v32 = vpop.eup %5144  ;;  %v3001_v16 = vadd.f32 1.0, %v5143_v55  ;;  %v5982_v22 = vmul.f32 %v3000_v61, %v2952_v60  ;;  %v2125_v55 = vrot.slane %v5970_v24, %v2124_v37  ;;  %v5000_v60 = vld [vmem:[#allocation16 + $0x1a4] ss:$8 sps:$4 sm:$0xff]  }
 0x79c   : > { %v5147_v4 = vpop.eup %5146  ;;  %v3006_v11 = vadd.f32 1.0, %v5145_v32  ;;  %v3015_v27 = vmul.f32 %v2999_v8, %v2951_v7  ;;  %v2121_v32 = vrot.slane %v5970_v24, %v740_v58  ;;  %v5003_v58 = vld [vmem:[#allocation16 + $0x1b4] ss:$8 sps:$4 sm:$0xff]  }
 0x79d   : > { %v5149_v12 = vpop.eup %5148  ;;  %v3008_v18 = vadd.f32 1.0, %v5147_v4  ;;  %v3017_v29 = vmul.f32 %v3001_v16, %v2953_v15 }
 0x79e   : > { %v5151_v19 = vpop.eup %5150  ;;  %v3022_v20 = vmul.f32 %v3006_v11, %v2958_v9  ;;  %v3007_v21 = vadd.f32 1.0, %v5149_v12 }
 0x79f   : > { %v5984_v23 = vmul.f32 %v3008_v18, %v2960_v17  ;;  %v3009_v26 = vadd.f32 1.0, %v5151_v19  ;;  %v4998_v17 = vld [vmem:[#allocation16 + $0x1a0] ss:$8 sps:$4 sm:$0xff]  }
 0x7a0   : > { %v3030_v2 = vpack.c.bf16 %v3022_v20, %v3014_v0  ;;  %v3023_v6 = vmul.f32 %v3007_v21, %v2959_v1 }
 0x7a1   : > { %v3032_v31 = vpack.c.bf16 %v5984_v23, %v5982_v22  ;;  %v3025_v33 = vmul.f32 %v3009_v26, %v2961_v25  ;;  %v5031_v22 = vld [vmem:[#allocation16 + $0x250] ss:$8 sps:$4 sm:$0xff]   ;;  %v5036_v23 = vld [vmem:[#allocation16 + $0x264] ss:$8 sps:$4 sm:$0xff]  }
 0x7a2   : > { %v3031_v28 = vpack.c.bf16 %v3023_v6, %v3015_v27  ;;  %v5001_v27 = vld [vmem:[#allocation16 + $0x1b0] ss:$8 sps:$4 sm:$0xff]   ;;  %v5006_v6 = vld [vmem:[#allocation16 + $0x1c4] ss:$8 sps:$4 sm:$0xff]  }
 0x7a3   : > { %v3033_v35 = vpack.c.bf16 %v3025_v33, %v3017_v29 }
 0x7a4   : > { %3850 = vmatprep.mubr.bf16.mxu0 %v3031_v28 }
 0x7a5   : > { %3851 = vmatmul.mubr.bf16.vlgmr.msra.gmra.mrb[16].mxu0 %v3030_v2 }
 0x7a6   : > { %3862 = vmatpush1.bf16.msra.mxu0 %v4968_v34  ;;  %3893 = vmatprep.mubr.bf16.mxu0 %v3033_v35  ;;  %v5004_v34 = vld [vmem:[#allocation16 + $0x1c0] ss:$8 sps:$4 sm:$0xff]   ;;  %v5009_v35 = vld [vmem:[#allocation16 + $0x1d4] ss:$8 sps:$4 sm:$0xff]  }
 0x7a7   : > { %3863 = vmatprep.subr.bf16.mxu0 %v4973_v38  ;;  %v5007_v38 = vld [vmem:[#allocation16 + $0x1d0] ss:$8 sps:$4 sm:$0xff]  }
 0x7aa   : > { %3864 = vmatpush1.bf16.msra.mxu0 %v4971_v39 }
 0x7ab   : > { %3865 = vmatprep.subr.bf16.mxu0 %v4976_v40  ;;  %v5012_v40 = vld [vmem:[#allocation16 + $0x1e4] ss:$8 sps:$4 sm:$0xff]  }
 0x7ae   : > { %3866 = vmatpush1.bf16.msra.mxu0 %v4974_v41 }
 0x7af   : > { %3867 = vmatprep.subr.bf16.mxu0 %v4979_v42 }
 0x7b2   : > { %3868 = vmatpush1.bf16.msra.mxu0 %v4977_v43 }
 0x7b3   : > { %3869 = vmatprep.subr.bf16.mxu0 %v4982_v45 }
 0x7b6   : > { %3870 = vmatpush1.bf16.msra.mxu0 %v4980_v46  ;;  %v5010_v46 = vld [vmem:[#allocation16 + $0x1e0] ss:$8 sps:$4 sm:$0xff]  }
 0x7b7   : > { %3871 = vmatprep.subr.bf16.mxu0 %v4985_v47 }
 0x7ba   : > { %3872 = vmatpush1.bf16.msra.mxu0 %v4983_v48 }
 0x7bb   : > { %3873 = vmatprep.subr.bf16.mxu0 %v4988_v30 }
 0x7be   : > { %3874 = vmatpush1.bf16.msra.mxu0 %v4986_v44 }
 0x7bf   : > { %3875 = vmatprep.subr.bf16.mxu0 %v4991_v49  ;;  %v5015_v49 = vld [vmem:[#allocation16 + $0x1f4] ss:$8 sps:$4 sm:$0xff]  }
 0x7c2   : > { %3876 = vmatpush1.bf16.msra.mxu0 %v4989_v50 }
 0x7c3   : > { %3877 = vmatprep.subr.bf16.mxu0 %v4994_v36 }
 0x7c6   : > { %3878 = vmatpush1.bf16.msra.mxu0 %v4992_v51 }
 0x7c7   : > { %3879 = vmatprep.subr.bf16.mxu0 %v4997_v53 }
 0x7c8   : > { %v2898_v61 = vpop.f32.mrb[12].mxu0  ;;  %v2941_v4 = vpop.f32.mrb[28].mxu1 }
 0x7c9   : > { %v2899_v7 = vadd.f32 %v2898_v61, %v2117_v54  ;;  %v2942_v8 = vadd.f32 %v2941_v4, %v2125_v55  ;;  %v2900_v9 = vpop.f32.mrb[13].mxu0  ;;  %v2943_v11 = vpop.f32.mrb[29].mxu1 }
 0x7ca   : > { %3880 = vmatpush1.bf16.msra.mxu0 %v4995_v56  ;;  %v2901_v57 = vadd.f32 %v2900_v9, %v2121_v32  ;;  %v2944_v12 = vadd.f32 %v2943_v11, %v2129_v59  ;;  %v2902_v15 = vpop.f32.mrb[14].mxu0  ;;  %v2945_v16 = vpop.f32.mrb[30].mxu1 }
 0x7cb   : > { %v2970_v18 = vmul.f32 0.70710677, %v2899_v7  ;;  %v2972_v62 = vmul.f32 0.70710677, %v2942_v8  ;;  %3881 = vmatprep.subr.bf16.mxu0 %v5000_v60  ;;  %v2903_v0 = vadd.f32 %v2902_v15, %v2117_v54  ;;  %v2946_v20 = vadd.f32 %v2945_v16, %v2125_v55  ;;  %v2904_v1 = vpop.f32.mrb[15].mxu0  ;;  %v2947_v21 = vpop.f32.mrb[31].mxu1 }
 0x7cc   : > { %v2971_v19 = vmul.f32 0.70710677, %v2901_v57  ;;  %v2973_v24 = vmul.f32 0.70710677, %v2944_v12  ;;  %v2905_v25 = vadd.f32 %v2904_v1, %v2121_v32  ;;  %v2948_v26 = vadd.f32 %v2947_v21, %v2129_v59  ;;  %v5019_v21 = vld [vmem:[#allocation16 + $0x210] ss:$8 sps:$4 sm:$0xff]  }
 0x7cd   : > { %5152 = verf.f32 %v2970_v18  ;;  %v2978_v2 = vmul.f32 0.70710677, %v2903_v0  ;;  %v2980_v29 = vmul.f32 0.70710677, %v2946_v20  ;;  %v2954_v48 = vmul.f32 0.5, %v2899_v7 }
 0x7ce   : > { %5154 = verf.f32 %v2972_v62  ;;  %3882 = vmatpush1.bf16.msra.mxu0 %v4998_v17  ;;  %v2979_v33 = vmul.f32 0.70710677, %v2905_v25  ;;  %v2981_v28 = vmul.f32 0.70710677, %v2948_v26  ;;  %v2956_v30 = vmul.f32 0.5, %v2942_v8 }
 0x7cf   : > { %5156 = verf.f32 %v2971_v19  ;;  %3883 = vmatprep.subr.bf16.mxu0 %v5003_v58  ;;  %v2955_v36 = vmul.f32 0.5, %v2901_v57  ;;  %v2962_v51 = vmul.f32 0.5, %v2903_v0  ;;  %v2957_v54 = vmul.f32 0.5, %v2944_v12  ;;  %v5013_v8 = vld [vmem:[#allocation16 + $0x1f0] ss:$8 sps:$4 sm:$0xff]  }
 0x7d0   : > { %5158 = verf.f32 %v2973_v24  ;;  %v2964_v56 = vmul.f32 0.5, %v2946_v20  ;;  %v2963_v4 = vmul.f32 0.5, %v2905_v25  ;;  %v2965_v57 = vmul.f32 0.5, %v2948_v26  ;;  %v5018_v12 = vld [vmem:[#allocation16 + $0x204] ss:$8 sps:$4 sm:$0xff]  }
 0x7d1   : > { %5160 = verf.f32 %v2978_v2  ;;  %v5016_v24 = vld [vmem:[#allocation16 + $0x200] ss:$8 sps:$4 sm:$0xff]   ;;  %v5021_v20 = vld [vmem:[#allocation16 + $0x214] ss:$8 sps:$4 sm:$0xff]   ;;  %v5024_v25 = vld [vmem:[#allocation16 + $0x224] ss:$8 sps:$4 sm:$0xff]  }
 0x7d2   : > { %5162 = verf.f32 %v2980_v29  ;;  %3884 = vmatpush1.bf16.msra.mxu0 %v5001_v27  ;;  %v5022_v26 = vld [vmem:[#allocation16 + $0x220] ss:$8 sps:$4 sm:$0xff]   ;;  %v5027_v27 = vld [vmem:[#allocation16 + $0x234] ss:$8 sps:$4 sm:$0xff]   ;;  %v5025_v2 = vld [vmem:[#allocation16 + $0x230] ss:$8 sps:$4 sm:$0xff]  }
 0x7d3   : > { %5164 = verf.f32 %v2979_v33  ;;  %3885 = vmatprep.subr.bf16.mxu0 %v5006_v6  ;;  %v5030_v6 = vld [vmem:[#allocation16 + $0x244] ss:$8 sps:$4 sm:$0xff]   ;;  %v5028_v29 = vld [vmem:[#allocation16 + $0x240] ss:$8 sps:$4 sm:$0xff]   ;;  %v5033_v33 = vld [vmem:[#allocation16 + $0x254] ss:$8 sps:$4 sm:$0xff]  }
 0x7d4   : > { %5166 = verf.f32 %v2981_v28  ;;  %v5039_v28 = vld [vmem:[#allocation16 + $0x274] ss:$8 sps:$4 sm:$0xff]  }
 0x7d6   : > { %3886 = vmatpush1.bf16.msra.mxu0 %v5004_v34  ;;  %v5037_v34 = vld [vmem:[#allocation16 + $0x270] ss:$8 sps:$4 sm:$0xff]  }
 0x7d7   : > { %v5153_v39 = vpop.eup %5152  ;;  %3887 = vmatprep.subr.bf16.mxu0 %v5009_v35  ;;  %v5042_v35 = vld [vmem:[#allocation16 + $0x284] ss:$8 sps:$4 sm:$0xff]  }
 0x7d8   : > { %v5155_v41 = vpop.eup %5154  ;;  %v3002_v45 = vadd.f32 1.0, %v5153_v39  ;;  %v5045_v39 = vld [vmem:[#allocation16 + $0x294] ss:$8 sps:$4 sm:$0xff]  }
 0x7d9   : > { %v5157_v42 = vpop.eup %5156  ;;  %v3004_v44 = vadd.f32 1.0, %v5155_v41  ;;  %v5048_v41 = vld [vmem:[#allocation16 + $0x2a4] ss:$8 sps:$4 sm:$0xff]  }
 0x7da   : > { %v5159_v43 = vpop.eup %5158  ;;  %3888 = vmatpush1.bf16.msra.mxu0 %v5007_v38  ;;  %v3003_v37 = vadd.f32 1.0, %v5157_v42  ;;  %v5998_v60 = vmul.f32 %v3002_v45, %v2954_v48  ;;  %v5040_v38 = vld [vmem:[#allocation16 + $0x280] ss:$8 sps:$4 sm:$0xff]   ;;  %v5049_v45 = vld [vmem:[#allocation16 + $0x2b0] ss:$8 sps:$4 sm:$0xff]  }
 0x7db   : > { %v5161_v47 = vpop.eup %5160  ;;  %3889 = vmatprep.subr.bf16.mxu0 %v5012_v40  ;;  %v3005_v55 = vadd.f32 1.0, %v5159_v43  ;;  %v6002_v9 = vmul.f32 %v3004_v44, %v2956_v30  ;;  %v5043_v40 = vld [vmem:[#allocation16 + $0x290] ss:$8 sps:$4 sm:$0xff]   ;;  %v5046_v42 = vld [vmem:[#allocation16 + $0x2a0] ss:$8 sps:$4 sm:$0xff]  }
 0x7dc   : > { %v5163_v50 = vpop.eup %5162  ;;  %v3010_v52 = vadd.f32 1.0, %v5161_v47  ;;  %v3019_v16 = vmul.f32 %v3003_v37, %v2955_v36  ;;  %v5051_v43 = vld [vmem:[#allocation16 + $0x2b4] ss:$8 sps:$4 sm:$0xff]   ;;  %v5052_v47 = vld [vmem:[#allocation16 + $0x2c0] ss:$8 sps:$4 sm:$0xff]  }
 0x7dd   : > { %v5165_v53 = vpop.eup %5164  ;;  %v3012_v32 = vadd.f32 1.0, %v5163_v50  ;;  %v6008_v62 = vmul.f32 %v3005_v55, %v2957_v54  ;;  %v5057_v48 = vld [vmem:[#allocation16 + $0x2d4] ss:$8 sps:$4 sm:$0xff]   ;;  %v5055_v30 = vld [vmem:[#allocation16 + $0x2d0] ss:$8 sps:$4 sm:$0xff]  }
 0x7de   : > { %v5167_v59 = vpop.eup %5166  ;;  %v6000_v61 = vmul.f32 %v3010_v52, %v2962_v51  ;;  %v3011_v7 = vadd.f32 1.0, %v5165_v53  ;;  %3890 = vmatpush1.bf16.msra.mxu0 %v5010_v46  ;;  %v5054_v46 = vld [vmem:[#allocation16 + $0x2c4] ss:$8 sps:$4 sm:$0xff]   ;;  %v5063_v50 = vld [vmem:[#allocation16 + $0x2f4] ss:$8 sps:$4 sm:$0xff]  }
 0x7df   : > { %v6004_v11 = vmul.f32 %v3012_v32, %v2964_v56  ;;  %v3013_v15 = vadd.f32 1.0, %v5167_v59  ;;  %3891 = vmatprep.subr.bf16.mxu0 %v5015_v49  ;;  %v5060_v44 = vld [vmem:[#allocation16 + $0x2e4] ss:$8 sps:$4 sm:$0xff]   ;;  %v5058_v49 = vld [vmem:[#allocation16 + $0x2e0] ss:$8 sps:$4 sm:$0xff]  }
 0x7e0   : > { %v3034_v17 = vpack.c.bf16 %v6000_v61, %v5998_v60  ;;  %v3027_v18 = vmul.f32 %v3011_v7, %v2963_v4  ;;  %v5061_v36 = vld [vmem:[#allocation16 + $0x2f0] ss:$8 sps:$4 sm:$0xff]   ;;  %v5066_v37 = vld [vmem:[#allocation16 + $0x304] ss:$8 sps:$4 sm:$0xff]   ;;  %v5064_v51 = vld [vmem:[#allocation16 + $0x300] ss:$8 sps:$4 sm:$0xff]  }
 0x7e1   : > { %v3036_v58 = vpack.c.bf16 %v6004_v11, %v6002_v9  ;;  %v6012_v19 = vmul.f32 %v3013_v15, %v2965_v57  ;;  %v5069_v52 = vld [vmem:[#allocation16 + $0x314] ss:$8 sps:$4 sm:$0xff]   ;;  %v5067_v53 = vld [vmem:[#allocation16 + $0x310] ss:$8 sps:$4 sm:$0xff]   ;;  %v5072_v54 = vld [vmem:[#allocation16 + $0x324] ss:$8 sps:$4 sm:$0xff]  }
 0x7e2   : > { %3892 = vmatpush1.bf16.msra.mxu0 %v5013_v8  ;;  %v3035_v0 = vpack.c.bf16 %v3027_v18, %v3019_v16  ;;  %v5070_v55 = vld [vmem:[#allocation16 + $0x320] ss:$8 sps:$4 sm:$0xff]   ;;  %v5075_v56 = vld [vmem:[#allocation16 + $0x334] ss:$8 sps:$4 sm:$0xff]   ;;  %v5073_v32 = vld [vmem:[#allocation16 + $0x330] ss:$8 sps:$4 sm:$0xff]  }
 0x7e3   : > { %3904 = vmatprep.subr.bf16.mxu0 %v5018_v12  ;;  %v3037_v1 = vpack.c.bf16 %v6012_v19, %v6008_v62  ;;  %v5078_v59 = vld [vmem:[#allocation16 + $0x344] ss:$8 sps:$4 sm:$0xff]   ;;  %v5076_v4 = vld [vmem:[#allocation16 + $0x340] ss:$8 sps:$4 sm:$0xff]   ;;  %v5081_v60 = vld [vmem:[#allocation16 + $0x354] ss:$8 sps:$4 sm:$0xff]  }
 0x7e4   : > { %v5079_v61 = vld [vmem:[#allocation16 + $0x350] ss:$8 sps:$4 sm:$0xff]   ;;  %v5084_v7 = vld [vmem:[#allocation16 + $0x364] ss:$8 sps:$4 sm:$0xff]   ;;  %v5082_v8 = vld [vmem:[#allocation16 + $0x360] ss:$8 sps:$4 sm:$0xff]  }
 0x7e5   : > { %3894 = vmatmul.mubr.bf16.vlgmr.msra.gmra.mrb[16].mxu0 %v3032_v31  ;;  %v5034_v31 = vld [vmem:[#allocation16 + $0x260] ss:$8 sps:$4 sm:$0xff]   ;;  %v5087_v57 = vld [vmem:[#allocation16 + $0x374] ss:$8 sps:$4 sm:$0xff]   ;;  %v5085_v15 = vld [vmem:[#allocation16 + $0x370] ss:$8 sps:$4 sm:$0xff]  }
 0x7e6   : > { %3905 = vmatpush1.bf16.msra.mxu0 %v5016_v24  ;;  %3936 = vmatprep.mubr.bf16.mxu0 %v3035_v0  ;;  %v5090_v12 = vld [vmem:[#allocation16 + $0x384] ss:$8 sps:$4 sm:$0xff]   ;;  %v5088_v16 = vld [vmem:[#allocation16 + $0x380] ss:$8 sps:$4 sm:$0xff]   ;;  %v5091_v18 = vld [vmem:[#allocation16 + $0x390] ss:$8 sps:$4 sm:$0xff]  }
 0x7e7   : > { %3906 = vmatprep.subr.bf16.mxu0 %v5021_v20  ;;  %v5096_v62 = vld [vmem:[#allocation16 + $0x3a4] ss:$8 sps:$4 sm:$0xff]   ;;  %v5094_v19 = vld [vmem:[#allocation16 + $0x3a0] ss:$8 sps:$4 sm:$0xff]   ;;  %v5099_v24 = vld [vmem:[#allocation16 + $0x3b4] ss:$8 sps:$4 sm:$0xff]  }
 0x7e8   : > { %v5097_v0 = vld [vmem:[#allocation16 + $0x3b0] ss:$8 sps:$4 sm:$0xff]   ;;  %v5102_v20 = vld [vmem:[#allocation16 + $0x3c4] ss:$8 sps:$4 sm:$0xff]  }
 0x7ea   : > { %3907 = vmatpush1.bf16.msra.mxu0 %v5019_v21  ;;  %v5105_v21 = vld [vmem:[#allocation16 + $0x3d4] ss:$8 sps:$4 sm:$0xff]  }
 0x7eb   : > { %3908 = vmatprep.subr.bf16.mxu0 %v5024_v25  ;;  %v5103_v25 = vld [vmem:[#allocation16 + $0x3d0] ss:$8 sps:$4 sm:$0xff]  }
 0x7ee   : > { %3909 = vmatpush1.bf16.msra.mxu0 %v5022_v26  ;;  %v5108_v26 = vld [vmem:[#allocation16 + $0x3e4] ss:$8 sps:$4 sm:$0xff]  }
 0x7ef   : > { %3910 = vmatprep.subr.bf16.mxu0 %v5027_v27  ;;  %v5106_v27 = vld [vmem:[#allocation16 + $0x3e0] ss:$8 sps:$4 sm:$0xff]  }
 0x7f2   : > { %3911 = vmatpush1.bf16.msra.mxu0 %v5025_v2  ;;  %v5111_v2 = vld [vmem:[#allocation16 + $0x3f4] ss:$8 sps:$4 sm:$0xff]  }
 0x7f3   : > { %3912 = vmatprep.subr.bf16.mxu0 %v5030_v6  ;;  %v5109_v6 = vld [vmem:[#allocation16 + $0x3f0] ss:$8 sps:$4 sm:$0xff]  }
 0x7f6   : > { %3913 = vmatpush1.bf16.msra.mxu0 %v5028_v29  ;;  %v3166_v29 = vld [vmem:[%s6135_s24] sm:$0x3] }
 0x7f7   : > { %3914 = vmatprep.subr.bf16.mxu0 %v5033_v33  ;;  %v3171_v33 = vrot.slane %v3166_v29, %v5843_v3 }
 0x7fa   : > { %3915 = vmatpush1.bf16.msra.mxu0 %v5031_v22  ;;  %v3175_v22 = vrot.slane %v3166_v29, %v5840_v63 }
 0x7fb   : > { %3916 = vmatprep.subr.bf16.mxu0 %v5036_v23 }
 0x7fe   : > { %3917 = vmatpush1.bf16.msra.mxu0 %v5034_v31 }
 0x7ff   : > { %3918 = vmatprep.subr.bf16.mxu0 %v5039_v28 }
 0x802   : > { %3919 = vmatpush1.bf16.msra.mxu0 %v5037_v34 }
 0x803   : > { %3920 = vmatprep.subr.bf16.mxu0 %v5042_v35 }
 0x806   : > { %3921 = vmatpush1.bf16.msra.mxu0 %v5040_v38 }
 0x807   : > { %3922 = vmatprep.subr.bf16.mxu0 %v5045_v39 }
 0x80a   : > { %3923 = vmatpush1.bf16.msra.mxu0 %v5043_v40 }
 0x80b   : > { %3924 = vmatprep.subr.bf16.mxu0 %v5048_v41 }
 0x80e   : > { %3925 = vmatpush1.bf16.msra.mxu0 %v5046_v42 }
 0x80f   : > { %3926 = vmatprep.subr.bf16.mxu0 %v5051_v43 }
 0x812   : > { %3927 = vmatpush1.bf16.msra.mxu0 %v5049_v45 }
 0x813   : > { %3928 = vmatprep.subr.bf16.mxu0 %v5054_v46 }
 0x816   : > { %3929 = vmatpush1.bf16.msra.mxu0 %v5052_v47 }
 0x817   : > { %3930 = vmatprep.subr.bf16.mxu0 %v5057_v48 }
 0x81a   : > { %3931 = vmatpush1.bf16.msra.mxu0 %v5055_v30 }
 0x81b   : > { %3932 = vmatprep.subr.bf16.mxu0 %v5060_v44 }
 0x81e   : > { %3933 = vmatpush1.bf16.msra.mxu0 %v5058_v49 }
 0x81f   : > { %3934 = vmatprep.subr.bf16.mxu0 %v5063_v50 }
 0x822   : > { %3935 = vmatpush1.bf16.msra.mxu0 %v5061_v36 }
 0x823   : > { %3947 = vmatprep.subr.bf16.mxu0 %v5066_v37 }
 0x825   : > { %3937 = vmatmul.mubr.bf16.vlgmr.msra.gmra.mrb[16].mxu0 %v3034_v17  ;;  %v5093_v17 = vld [vmem:[#allocation16 + $0x394] ss:$8 sps:$4 sm:$0xff]  }
 0x826   : > { %3948 = vmatpush1.bf16.msra.mxu0 %v5064_v51  ;;  %3979 = vmatprep.mubr.bf16.mxu0 %v3037_v1  ;;  %v5100_v1 = vld [vmem:[#allocation16 + $0x3c0] ss:$8 sps:$4 sm:$0xff]  }
 0x827   : > { %3949 = vmatprep.subr.bf16.mxu0 %v5069_v52 }
 0x82a   : > { %3950 = vmatpush1.bf16.msra.mxu0 %v5067_v53 }
 0x82b   : > { %3951 = vmatprep.subr.bf16.mxu0 %v5072_v54 }
 0x82e   : > { %3952 = vmatpush1.bf16.msra.mxu0 %v5070_v55 }
 0x82f   : > { %3953 = vmatprep.subr.bf16.mxu0 %v5075_v56 }
 0x832   : > { %3954 = vmatpush1.bf16.msra.mxu0 %v5073_v32 }
 0x833   : > { %3955 = vmatprep.subr.bf16.mxu0 %v5078_v59 }
 0x836   : > { %3956 = vmatpush1.bf16.msra.mxu0 %v5076_v4 }
 0x837   : > { %3957 = vmatprep.subr.bf16.mxu0 %v5081_v60 }
 0x83a   : > { %3958 = vmatpush1.bf16.msra.mxu0 %v5079_v61 }
 0x83b   : > { %3959 = vmatprep.subr.bf16.mxu0 %v5084_v7 }
 0x83e   : > { %3960 = vmatpush1.bf16.msra.mxu0 %v5082_v8 }
 0x83f   : > { %3961 = vmatprep.subr.bf16.mxu0 %v5087_v57 }
 0x842   : > { %3962 = vmatpush1.bf16.msra.mxu0 %v5085_v15 }
 0x843   : > { %3963 = vmatprep.subr.bf16.mxu0 %v5090_v12 }
 0x846   : > { %3964 = vmatpush1.bf16.msra.mxu0 %v5088_v16 }
 0x847   : > { %3965 = vmatprep.subr.bf16.mxu0 %v5093_v17 }
 0x84a   : > { %3966 = vmatpush1.bf16.msra.mxu0 %v5091_v18 }
 0x84b   : > { %3967 = vmatprep.subr.bf16.mxu0 %v5096_v62 }
 0x84e   : > { %3968 = vmatpush1.bf16.msra.mxu0 %v5094_v19 }
 0x84f   : > { %3969 = vmatprep.subr.bf16.mxu0 %v5099_v24 }
 0x852   : > { %3970 = vmatpush1.bf16.msra.mxu0 %v5097_v0 }
 0x853   : > { %3971 = vmatprep.subr.bf16.mxu0 %v5102_v20 }
 0x856   : > { %3972 = vmatpush1.bf16.msra.mxu0 %v5100_v1 }
 0x857   : > { %3973 = vmatprep.subr.bf16.mxu0 %v5105_v21 }
 0x85a   : > { %3974 = vmatpush1.bf16.msra.mxu0 %v5103_v25 }
 0x85b   : > { %3975 = vmatprep.subr.bf16.mxu0 %v5108_v26 }
 0x85e   : > { %3976 = vmatpush1.bf16.msra.mxu0 %v5106_v27 }
 0x85f   : > { %3977 = vmatprep.subr.bf16.mxu0 %v5111_v2 }
 0x862   : > { %3978 = vmatpush1.bf16.msra.mxu0 %v5109_v6 }
 0x865   : > { %3980 = vmatmul.mubr.bf16.vlgmr.msra.gmra.mrb[16].mxu0 %v3036_v58 }
 0x938   : > { %v3981_v23 = vpop.f32.mrb[16].mxu0 }
 0x939   : > { %v4588_v31 = vadd.f32 %v3981_v23, %v3171_v33  ;;  %v3983_v28 = vpop.f32.mrb[17].mxu0 }
 0x93a   : > { %v4589_v34 = vadd.f32 %v3983_v28, %v3175_v22  ;;  %v3985_v35 = vpop.f32.mrb[18].mxu0 }
 0x93b   : > { %v3990_v9 = vadd.f32 %v4588_v31, %v5909_v5  ;;  %v4590_v11 = vadd.f32 %v3985_v35, %v3171_v33  ;;  %v3987_v58 = vpop.f32.mrb[19].mxu0 }
 0x93c   : > { %v3991_v63 = vadd.f32 %v4589_v34, %v5912_v10  ;;  %v4591_v3 = vadd.f32 %v3987_v58, %v3175_v22 }
 0x93d   : > { %3994 = vst [vmem:[%s541_s23] sm:$0xff] %v3990_v9  ;;  %v3992_v38 = vadd.f32 %v4590_v11, %v5915_v13 }
 0x93e   : > { %3995 = vst [vmem:[%s541_s23 + $0x8] sm:$0xff] %v3991_v63  ;;  %v3993_v5 = vadd.f32 %v4591_v3, %v5917_v14 }
 0x93f   : > { %3996 = vst [vmem:[%s541_s23 + $0x10] sm:$0xff] %v3992_v38 }
 0x940   : > { %3997 = vst [vmem:[%s541_s23 + $0x18] sm:$0xff] %v3993_v5 }
 0x941   : > { %5383 = shalt.err (!%p5380_p8)
}
 0x942   : > { %s5384_s15 = scalar_lea.hbm %s6044_s14, 512  ;;  %s5388_s23 = scalar_lea.hbm %s6136_s29, 1024 }
 0x943   : > { %p5385_p13 = scmp.ne.s32.totalorder %s6044_s14, %s5384_s15  ;;  %p5389_p9 = scmp.lt.u32.totalorder %s6044_s14, %s6136_s29 }
 0x944   : > { %p5390_p10 = scmp.lt.u32.totalorder %s5388_s23, %s5384_s15  ;;  %p5392_p6 = scmp.lt.u32.totalorder %s5384_s15, %s6044_s14 }
 0x945   : > { %p5386_p0 = pnand %p5385_p13, %p6137_p12 }
 0x946   : > { %p5391_p11 = por %p5390_p10, %p5389_p9 }
 0x947   : > { %p5387_p2 = pneg %p5386_p0 }
 0x948   : > { %p5393_p5 = por %p5392_p6, %p5391_p11 }
 0x94a   : > { %p5394_p7 = pnand %p5393_p5, %p5387_p2 }
 0x94c   : > { %5397 = shalt.err (!%p5394_p7)
}
 0x94d   : > { %s5469_s22 = smov 256   ;;  %s5470_s30 = smov 16  }
 0x94e   : > { %4634 = dma.vmem_to_hbm [thread:$0]  (%p6137_p12), %s6037_s19, 512, %s6044_s14, %s3999_s17, %s5469_s22, %s5469_s22, %s5470_s30  }
 0x94f PF: > { %s4027_s8 = sand.u32 1, %s5436_s25   ;;  %p6138_p4 = scmp.ne.s32.totalorder %s6123_s7, 0 }
 0x950   : > { %p6139_p1 = scmp.ge.s32.totalorder %s5448_s28, 2  ;;  %s4028_s10 = scalar_lea.sflag [#allocation7], %s4027_s8 }
 0x952   : > { %p4660_p3 = pnand %p6139_p1, %p6138_p4 }
 0x954   : > { %5431 = dma.done.wait (!%p4660_p3), %s4028_s10, 512  }
 0x955   : > { %5433 = vsyncadd (!%p4660_p3), %s4028_s10, 4294966784  ;;  %p29_p8 = scmp.ge.s32.totalorder %s5710_s18, 4   ;;  %s6140_s25 = smov %s5440_s26 }
 0x956   : > { %s6141_s26 = smov %s5444_s27  ;;  %s6142_s27 = smov %s5721_s20 }
 0x957   : > { %s6143_s28 = smov %s5710_s18  ;;  %31 = sbr.rel (!%p29_p8) target bundleno = 16 (0x10), region = 145 }
 0x95e   :  { %4033 = vsyncpa [#allocation6], 1 }
 0x95f   :  { %4035 = vsyncpa [#allocation6 + $0x1], 1 }
 0x960   :  { %4036 = vsyncpa [#allocation9], 1 }
 0x961   :  { %4037 = vsyncpa [#allocation12], 1 }
 0x962   :  { %4038 = vsyncpa [#allocation15], 1 }
 0x963   :  { %4039 = vsyncpa [#allocation7], 1 }
 0x964   :  { %4041 = vsyncpa [#allocation7 + $0x1], 1 }

</bundles_post_ra>
